<compile_context>
chip_gen: v6e
topology: v6e:2x2x1
jax: 0.10.0
libtpu: 0.0.40
codegen_flags: <defaults>
</compile_context>

<pallas_src>
import jax
import jax.numpy as jnp
import numpy as np
from jax.experimental import pallas as pl
from jax.experimental.pallas import tpu as pltpu


# ----------------------------------------------------------------------------
# Kernel
# ----------------------------------------------------------------------------
def bigru_kernel(x_ref, h0_ref, wih_ref, whh_ref, bgi_ref, bhn_ref,
                 hout_ref, gi_ref):
    """Fused bidirectional GRU; only final hidden states are emitted.

    x_ref   : (S*Bp, E)      embedded inputs, time-major, batch padded to Bp
    h0_ref  : (Bp, 2*Hp)     [h0_fwd | h0_bwd], hidden padded to Hp=128
    wih_ref : (E, 6*Hp)      [r_f z_f n_f r_b z_b n_b] input->gate weights
    whh_ref : (2*Hp, 6*Hp)   block-diagonal hidden->gate weights (both dirs)
    bgi_ref : (1, 6*Hp)      b_ih (+ b_hh for r,z gates), folded into GI
    bhn_ref : (1, 2*Hp)      b_hh of the n gate per direction [n_f | n_b]
    hout_ref: (Bp, 2*Hp)     final hidden states [h_f | h_b]
    gi_ref  : (S*Bp, 6*Hp)   VMEM scratch holding the hoisted input projection
    """
    SB, _ = x_ref.shape
    Bp, Hp2 = h0_ref.shape
    Hp = Hp2 // 2
    S = SB // Bp

    # --- Hoisted input projection: one big MXU matmul for all steps/dirs. ---
    gi_ref[...] = (
        jnp.dot(x_ref[...], wih_ref[...], preferred_element_type=jnp.float32)
        + bgi_ref[...]
    )

    whh = whh_ref[...]
    # Hoist the n-gate recurrent-bias broadcasts out of the unrolled loop.
    bhn_f = jnp.broadcast_to(bhn_ref[:, 0:Hp], (Bp, Hp))
    bhn_b = jnp.broadcast_to(bhn_ref[:, Hp:2 * Hp], (Bp, Hp))

    h_f = h0_ref[:, 0:Hp]
    h_b = h0_ref[:, Hp:2 * Hp]

    # --- Fully unrolled fused recurrence (S is small and static). ---
    for t in range(S):
        h_cat = jnp.concatenate([h_f, h_b], axis=1)          # (Bp, 2*Hp)
        gh = jnp.dot(h_cat, whh, preferred_element_type=jnp.float32)  # (Bp,6Hp)

        # Forward direction consumes x[t]; backward consumes x[S-1-t].
        gi_f = gi_ref[t * Bp:(t + 1) * Bp, 0:3 * Hp]
        gi_b = gi_ref[(S - 1 - t) * Bp:(S - t) * Bp, 3 * Hp:6 * Hp]

        # forward gates (r, z, n) — all slices 128-lane aligned
        r_f = jax.nn.sigmoid(gi_f[:, 0:Hp] + gh[:, 0:Hp])
        z_f = jax.nn.sigmoid(gi_f[:, Hp:2 * Hp] + gh[:, Hp:2 * Hp])
        n_f = jnp.tanh(gi_f[:, 2 * Hp:3 * Hp]
                       + r_f * (gh[:, 2 * Hp:3 * Hp] + bhn_f))
        h_f = (1.0 - z_f) * n_f + z_f * h_f

        # backward gates
        r_b = jax.nn.sigmoid(gi_b[:, 0:Hp] + gh[:, 3 * Hp:4 * Hp])
        z_b = jax.nn.sigmoid(gi_b[:, Hp:2 * Hp] + gh[:, 4 * Hp:5 * Hp])
        n_b = jnp.tanh(gi_b[:, 2 * Hp:3 * Hp]
                       + r_b * (gh[:, 5 * Hp:6 * Hp] + bhn_b))
        h_b = (1.0 - z_b) * n_b + z_b * h_b

    hout_ref[:, 0:Hp] = h_f
    hout_ref[:, Hp:2 * Hp] = h_b


# ----------------------------------------------------------------------------
# Parameter packing (PyTorch nn.GRU layout -> lane-aligned fused layout)
# ----------------------------------------------------------------------------
def _round_up(x, m):
    return ((x + m - 1) // m) * m


def _pack_gru_params(params, H, Hp, E):
    """Build lane-aligned fused weight/bias slabs.

    Column layout (each gate block is Hp wide): [r_f z_f n_f r_b z_b n_b].
    """
    f32 = jnp.float32

    def place_cols(dst, w, col_off):
        wT = w.T.astype(f32)                      # (in, 3H), gates [r|z|n]
        for g in range(3):
            dst = dst.at[:, col_off + g * Hp: col_off + g * Hp + H].set(
                wT[:, g * H:(g + 1) * H])
        return dst

    wih = jnp.zeros((E, 6 * Hp), f32)
    wih = place_cols(wih, params["w_ih_f"], 0)
    wih = place_cols(wih, params["w_ih_b"], 3 * Hp)

    whh = jnp.zeros((2 * Hp, 6 * Hp), f32)
    whh_f_T = params["w_hh_f"].T.astype(f32)      # (H, 3H)
    whh_b_T = params["w_hh_b"].T.astype(f32)
    for g in range(3):
        whh = whh.at[0:H, g * Hp: g * Hp + H].set(
            whh_f_T[:, g * H:(g + 1) * H])
        whh = whh.at[Hp:Hp + H, 3 * Hp + g * Hp: 3 * Hp + g * Hp + H].set(
            whh_b_T[:, g * H:(g + 1) * H])

    def place_bias(dst, b_ih, b_hh, col_off):
        b_ih = b_ih.astype(f32); b_hh = b_hh.astype(f32)
        dst = dst.at[0, col_off + 0 * Hp: col_off + 0 * Hp + H].set(
            b_ih[0:H] + b_hh[0:H])                          # r: fold both
        dst = dst.at[0, col_off + 1 * Hp: col_off + 1 * Hp + H].set(
            b_ih[H:2 * H] + b_hh[H:2 * H])                  # z: fold both
        dst = dst.at[0, col_off + 2 * Hp: col_off + 2 * Hp + H].set(
            b_ih[2 * H:3 * H])                              # n: only b_ih
        return dst

    bgi = jnp.zeros((1, 6 * Hp), f32)
    bgi = place_bias(bgi, params["b_ih_f"], params["b_hh_f"], 0)
    bgi = place_bias(bgi, params["b_ih_b"], params["b_hh_b"], 3 * Hp)

    bhn = jnp.zeros((1, 2 * Hp), f32)
    bhn = bhn.at[0, 0:H].set(params["b_hh_f"][2 * H:3 * H].astype(f32))
    bhn = bhn.at[0, Hp:Hp + H].set(params["b_hh_b"][2 * H:3 * H].astype(f32))
    return wih, whh, bgi, bhn


# ----------------------------------------------------------------------------
# Forward wrapper (mirrors WordAttNet.forward)
# ----------------------------------------------------------------------------
def word_att_net_forward(params, input_ids, hidden_state):
    """input_ids: (S, B) int32 ; hidden_state: (2, B, H) float32.

    Returns (hidden[1, B, 2H], h_output[2, B, H]) like the PyTorch module.
    """
    # Embedding lookup (data-dependent gather) — glue in plain JAX.
    emb = params["embedding"][input_ids].astype(jnp.float32)     # (S, B, E)
    S, B, E = emb.shape
    H = hidden_state.shape[-1]
    Hp = _round_up(max(H, 1), 128)       # lane-aligned gate width
    Bp = _round_up(max(B, 1), 8)         # f32 sublane count

    wih, whh, bgi, bhn = _pack_gru_params(params, H, Hp, E)

    # Pad batch, flatten time into sublanes: (S*Bp, E).
    x = jnp.zeros((S, Bp, E), jnp.float32).at[:, :B, :].set(emb)
    x = x.reshape(S * Bp, E)

    h0 = jnp.zeros((Bp, 2 * Hp), jnp.float32)
    h0 = h0.at[:B, 0:H].set(hidden_state[0].astype(jnp.float32))
    h0 = h0.at[:B, Hp:Hp + H].set(hidden_state[1].astype(jnp.float32))

    vmem = pltpu.MemorySpace.VMEM
    hout = pl.pallas_call(
        bigru_kernel,
        out_shape=jax.ShapeDtypeStruct((Bp, 2 * Hp), jnp.float32),
        in_specs=[pl.BlockSpec(memory_space=vmem)] * 6,
        out_specs=pl.BlockSpec(memory_space=vmem),
        scratch_shapes=[pltpu.VMEM((S * Bp, 6 * Hp), jnp.float32)],
    )(x, h0, wih, whh, bgi, bhn)

    h_f = hout[:B, 0:H]
    h_b = hout[:B, Hp:Hp + H]
    h_output = jnp.stack([h_f, h_b], axis=0)                     # (2, B, H)
    hidden = jnp.concatenate([h_f, h_b], axis=1)[None, :, :]     # (1, B, 2H)
    return hidden, h_output


# ----------------------------------------------------------------------------
# Synthetic parameters + pure-JAX reference (for self-check)
# ----------------------------------------------------------------------------
def init_params(key, hidden_size, word_dict_len, embed_size):
    ks = jax.random.split(key, 9)
    bound = 1.0 / jnp.sqrt(jnp.float32(hidden_size))

    def u(k, shape):
        return jax.random.uniform(k, shape, jnp.float32, -bound, bound)

    return {
        "embedding": jax.random.normal(ks[0], (word_dict_len, embed_size),
                                       jnp.float32),
        "w_ih_f": u(ks[1], (3 * hidden_size, embed_size)),
        "w_hh_f": u(ks[2], (3 * hidden_size, hidden_size)),
        "b_ih_f": u(ks[3], (3 * hidden_size,)),
        "b_hh_f": u(ks[4], (3 * hidden_size,)),
        "w_ih_b": u(ks[5], (3 * hidden_size, embed_size)),
        "w_hh_b": u(ks[6], (3 * hidden_size, hidden_size)),
        "b_ih_b": u(ks[7], (3 * hidden_size,)),
        "b_hh_b": u(ks[8], (3 * hidden_size,)),
    }


def _gru_cell_ref(x_t, h, w_ih, w_hh, b_ih, b_hh, H):
    hp = jax.lax.Precision.HIGHEST
    gi = jnp.dot(x_t, w_ih.T, precision=hp) + b_ih
    gh = jnp.dot(h, w_hh.T, precision=hp) + b_hh
    r = jax.nn.sigmoid(gi[:, 0:H] + gh[:, 0:H])
    z = jax.nn.sigmoid(gi[:, H:2 * H] + gh[:, H:2 * H])
    n = jnp.tanh(gi[:, 2 * H:3 * H] + r * gh[:, 2 * H:3 * H])
    return (1.0 - z) * n + z * h


def _bigru_final_ref(params, input_ids, hidden_state):
    emb = params["embedding"][input_ids].astype(jnp.float32)
    S = emb.shape[0]
    H = hidden_state.shape[-1]
    h_f = hidden_state[0].astype(jnp.float32)
    h_b = hidden_state[1].astype(jnp.float32)
    for t in range(S):
        h_f = _gru_cell_ref(emb[t], h_f, params["w_ih_f"], params["w_hh_f"],
                            params["b_ih_f"], params["b_hh_f"], H)
    for t in range(S - 1, -1, -1):
        h_b = _gru_cell_ref(emb[t], h_b, params["w_ih_b"], params["w_hh_b"],
                            params["b_ih_b"], params["b_hh_b"], H)
    return jnp.stack([h_f, h_b], axis=0)


# ----------------------------------------------------------------------------
if __name__ == "__main__":
    hidden_size = 32
    word_dict_len = 50
    embed_size = 16
    seq_len = 8
    batch = 2

    key = jax.random.PRNGKey(0)
    k_param, k_ids, k_h0 = jax.random.split(key, 3)

    params = init_params(k_param, hidden_size, word_dict_len, embed_size)
    input_ids = jax.random.randint(k_ids, (seq_len, batch), 0, word_dict_len,
                                   dtype=jnp.int32)
    hidden_state = jax.random.normal(k_h0, (2, batch, hidden_size),
                                     jnp.float32)

    hidden, h_output = jax.jit(word_att_net_forward)(params, input_ids,
                                                     hidden_state)
    jax.block_until_ready((hidden, h_output))

    assert hidden.shape == (1, batch, 2 * hidden_size)
    assert h_output.shape == (2, batch, hidden_size)

    # Self-check against a pure-JAX bidirectional GRU reference.
    h_ref = _bigru_final_ref(params, input_ids, hidden_state)
    np.testing.assert_allclose(np.asarray(h_output), np.asarray(h_ref),
                               rtol=2e-3, atol=2e-3)
    np.testing.assert_allclose(
        np.asarray(hidden[0]),
        np.concatenate([np.asarray(h_ref[0]), np.asarray(h_ref[1])], axis=1),
        rtol=2e-3, atol=2e-3)

    print("KERNEL_OK")
</pallas_src>

<mosaic_0001>
module attributes {stable_mosaic.version = 11 : i64} {
  func.func @bigru_kernel(%arg0: memref<64x16xf32, #tpu.memory_space<vmem>>, %arg1: memref<8x256xf32, #tpu.memory_space<vmem>>, %arg2: memref<16x768xf32, #tpu.memory_space<vmem>>, %arg3: memref<256x768xf32, #tpu.memory_space<vmem>>, %arg4: memref<1x768xf32, #tpu.memory_space<vmem>>, %arg5: memref<1x256xf32, #tpu.memory_space<vmem>>, %arg6: memref<8x256xf32, #tpu.memory_space<vmem>>, %arg7: memref<64x768xf32, #tpu.memory_space<vmem>>) attributes {dimension_semantics = [], scalar_prefetch = 0 : i64, scratch_operands = 1 : i64, tpu.core_type = #tpu.core_type<tc>} {
    %c0 = arith.constant 0 : index
    %c0_0 = arith.constant 0 : index
    %0 = vector.load %arg0[%c0, %c0_0] : memref<64x16xf32, #tpu.memory_space<vmem>>, vector<64x16xf32>
    %c0_1 = arith.constant 0 : index
    %c0_2 = arith.constant 0 : index
    %1 = vector.load %arg2[%c0_1, %c0_2] : memref<16x768xf32, #tpu.memory_space<vmem>>, vector<16x768xf32>
    %cst = arith.constant dense<0.000000e+00> : vector<64x768xf32>
    %2 = tpu.matmul %0, %1, %cst {dimension_numbers = #tpu.dot_dimension_numbers<[1], [0], [0], [1], [0, 0, 1, 1], [], []>} : vector<64x16xf32>, vector<16x768xf32>, vector<64x768xf32> -> vector<64x768xf32>
    %c0_3 = arith.constant 0 : index
    %c0_4 = arith.constant 0 : index
    %3 = vector.load %arg4[%c0_3, %c0_4] : memref<1x768xf32, #tpu.memory_space<vmem>>, vector<1x768xf32>
    %4 = vector.broadcast %3 : vector<1x768xf32> to vector<64x768xf32>
    %5 = arith.addf %2, %4 : vector<64x768xf32>
    %c0_5 = arith.constant 0 : index
    %c0_6 = arith.constant 0 : index
    %6 = vector.load %arg7[%c0_5, %c0_6] : memref<64x768xf32, #tpu.memory_space<vmem>>, vector<64x768xf32>
    tpu.vector_store %arg7[%c0_5, %c0_6], %5 {strides = array<i32>} : memref<64x768xf32, #tpu.memory_space<vmem>>, vector<64x768xf32>,
    %c0_7 = arith.constant 0 : index
    %c0_8 = arith.constant 0 : index
    %7 = vector.load %arg3[%c0_7, %c0_8] : memref<256x768xf32, #tpu.memory_space<vmem>>, vector<256x768xf32>
    %c0_9 = arith.constant 0 : index
    %c0_10 = arith.constant 0 : index
    %8 = vector.load %arg5[%c0_9, %c0_10] : memref<1x256xf32, #tpu.memory_space<vmem>>, vector<1x128xf32>
    %9 = vector.shape_cast %8 : vector<1x128xf32> to vector<1x128xf32>
    %10 = vector.broadcast %9 : vector<1x128xf32> to vector<8x128xf32>
    %c0_11 = arith.constant 0 : index
    %c128 = arith.constant 128 : index
    %11 = vector.load %arg5[%c0_11, %c128] : memref<1x256xf32, #tpu.memory_space<vmem>>, vector<1x128xf32>
    %12 = vector.shape_cast %11 : vector<1x128xf32> to vector<1x128xf32>
    %13 = vector.broadcast %12 : vector<1x128xf32> to vector<8x128xf32>
    %c0_12 = arith.constant 0 : index
    %c0_13 = arith.constant 0 : index
    %14 = vector.load %arg1[%c0_12, %c0_13] : memref<8x256xf32, #tpu.memory_space<vmem>>, vector<8x128xf32>
    %c0_14 = arith.constant 0 : index
    %c128_15 = arith.constant 128 : index
    %15 = vector.load %arg1[%c0_14, %c128_15] : memref<8x256xf32, #tpu.memory_space<vmem>>, vector<8x128xf32>
    %16 = tpu.concatenate %14, %15 in 1 : vector<8x128xf32>, vector<8x128xf32> -> vector<8x256xf32>
    %cst_16 = arith.constant dense<0.000000e+00> : vector<8x768xf32>
    %17 = tpu.matmul %16, %7, %cst_16 {dimension_numbers = #tpu.dot_dimension_numbers<[1], [0], [0], [1], [0, 0, 1, 1], [], []>} : vector<8x256xf32>, vector<256x768xf32>, vector<8x768xf32> -> vector<8x768xf32>
    %c0_17 = arith.constant 0 : index
    %c0_18 = arith.constant 0 : index
    %18 = vector.load %arg7[%c0_17, %c0_18] : memref<64x768xf32, #tpu.memory_space<vmem>>, vector<8x384xf32>
    %c56 = arith.constant 56 : index
    %c384 = arith.constant 384 : index
    %19 = vector.load %arg7[%c56, %c384] : memref<64x768xf32, #tpu.memory_space<vmem>>, vector<8x384xf32>
    %20 = vector.extract_strided_slice %18 {offsets = [0, 0], sizes = [8, 128], strides = [1, 1]} : vector<8x384xf32> to vector<8x128xf32>
    %21 = vector.extract_strided_slice %17 {offsets = [0, 0], sizes = [8, 128], strides = [1, 1]} : vector<8x768xf32> to vector<8x128xf32>
    %22 = arith.addf %20, %21 : vector<8x128xf32>
    %23 = arith.negf %22 : vector<8x128xf32>
    %24 = math.exp %23 : vector<8x128xf32>
    %cst_19 = arith.constant 1.000000e+00 : f32
    %25 = vector.broadcast %cst_19 : f32 to vector<8x128xf32>
    %26 = arith.addf %25, %24 : vector<8x128xf32>
    %27 = arith.divf %25, %26 : vector<8x128xf32>
    %28 = vector.extract_strided_slice %18 {offsets = [0, 128], sizes = [8, 128], strides = [1, 1]} : vector<8x384xf32> to vector<8x128xf32>
    %29 = vector.extract_strided_slice %17 {offsets = [0, 128], sizes = [8, 128], strides = [1, 1]} : vector<8x768xf32> to vector<8x128xf32>
    %30 = arith.addf %28, %29 : vector<8x128xf32>
    %31 = arith.negf %30 : vector<8x128xf32>
    %32 = math.exp %31 : vector<8x128xf32>
    %cst_20 = arith.constant 1.000000e+00 : f32
    %33 = vector.broadcast %cst_20 : f32 to vector<8x128xf32>
    %34 = arith.addf %33, %32 : vector<8x128xf32>
    %35 = arith.divf %33, %34 : vector<8x128xf32>
    %36 = vector.extract_strided_slice %18 {offsets = [0, 256], sizes = [8, 128], strides = [1, 1]} : vector<8x384xf32> to vector<8x128xf32>
    %37 = vector.extract_strided_slice %17 {offsets = [0, 256], sizes = [8, 128], strides = [1, 1]} : vector<8x768xf32> to vector<8x128xf32>
    %38 = arith.addf %37, %10 : vector<8x128xf32>
    %39 = arith.mulf %27, %38 : vector<8x128xf32>
    %40 = arith.addf %36, %39 : vector<8x128xf32>
    %41 = math.tanh %40 : vector<8x128xf32>
    %cst_21 = arith.constant 1.000000e+00 : f32
    %42 = vector.broadcast %cst_21 : f32 to vector<8x128xf32>
    %43 = arith.subf %42, %35 : vector<8x128xf32>
    %44 = arith.mulf %43, %41 : vector<8x128xf32>
    %45 = arith.mulf %35, %14 : vector<8x128xf32>
    %46 = arith.addf %44, %45 : vector<8x128xf32>
    %47 = vector.extract_strided_slice %19 {offsets = [0, 0], sizes = [8, 128], strides = [1, 1]} : vector<8x384xf32> to vector<8x128xf32>
    %48 = vector.extract_strided_slice %17 {offsets = [0, 384], sizes = [8, 128], strides = [1, 1]} : vector<8x768xf32> to vector<8x128xf32>
    %49 = arith.addf %47, %48 : vector<8x128xf32>
    %50 = arith.negf %49 : vector<8x128xf32>
    %51 = math.exp %50 : vector<8x128xf32>
    %cst_22 = arith.constant 1.000000e+00 : f32
    %52 = vector.broadcast %cst_22 : f32 to vector<8x128xf32>
    %53 = arith.addf %52, %51 : vector<8x128xf32>
    %54 = arith.divf %52, %53 : vector<8x128xf32>
    %55 = vector.extract_strided_slice %19 {offsets = [0, 128], sizes = [8, 128], strides = [1, 1]} : vector<8x384xf32> to vector<8x128xf32>
    %56 = vector.extract_strided_slice %17 {offsets = [0, 512], sizes = [8, 128], strides = [1, 1]} : vector<8x768xf32> to vector<8x128xf32>
    %57 = arith.addf %55, %56 : vector<8x128xf32>
    %58 = arith.negf %57 : vector<8x128xf32>
    %59 = math.exp %58 : vector<8x128xf32>
    %cst_23 = arith.constant 1.000000e+00 : f32
    %60 = vector.broadcast %cst_23 : f32 to vector<8x128xf32>
    %61 = arith.addf %60, %59 : vector<8x128xf32>
    %62 = arith.divf %60, %61 : vector<8x128xf32>
    %63 = vector.extract_strided_slice %19 {offsets = [0, 256], sizes = [8, 128], strides = [1, 1]} : vector<8x384xf32> to vector<8x128xf32>
    %64 = vector.extract_strided_slice %17 {offsets = [0, 640], sizes = [8, 128], strides = [1, 1]} : vector<8x768xf32> to vector<8x128xf32>
    %65 = arith.addf %64, %13 : vector<8x128xf32>
    %66 = arith.mulf %54, %65 : vector<8x128xf32>
    %67 = arith.addf %63, %66 : vector<8x128xf32>
    %68 = math.tanh %67 : vector<8x128xf32>
    %cst_24 = arith.constant 1.000000e+00 : f32
    %69 = vector.broadcast %cst_24 : f32 to vector<8x128xf32>
    %70 = arith.subf %69, %62 : vector<8x128xf32>
    %71 = arith.mulf %70, %68 : vector<8x128xf32>
    %72 = arith.mulf %62, %15 : vector<8x128xf32>
    %73 = arith.addf %71, %72 : vector<8x128xf32>
    %74 = tpu.concatenate %46, %73 in 1 : vector<8x128xf32>, vector<8x128xf32> -> vector<8x256xf32>
    %cst_25 = arith.constant dense<0.000000e+00> : vector<8x768xf32>
    %75 = tpu.matmul %74, %7, %cst_25 {dimension_numbers = #tpu.dot_dimension_numbers<[1], [0], [0], [1], [0, 0, 1, 1], [], []>} : vector<8x256xf32>, vector<256x768xf32>, vector<8x768xf32> -> vector<8x768xf32>
    %c8 = arith.constant 8 : index
    %c0_26 = arith.constant 0 : index
    %76 = vector.load %arg7[%c8, %c0_26] : memref<64x768xf32, #tpu.memory_space<vmem>>, vector<8x384xf32>
    %c48 = arith.constant 48 : index
    %c384_27 = arith.constant 384 : index
    %77 = vector.load %arg7[%c48, %c384_27] : memref<64x768xf32, #tpu.memory_space<vmem>>, vector<8x384xf32>
    %78 = vector.extract_strided_slice %76 {offsets = [0, 0], sizes = [8, 128], strides = [1, 1]} : vector<8x384xf32> to vector<8x128xf32>
    %79 = vector.extract_strided_slice %75 {offsets = [0, 0], sizes = [8, 128], strides = [1, 1]} : vector<8x768xf32> to vector<8x128xf32>
    %80 = arith.addf %78, %79 : vector<8x128xf32>
    %81 = arith.negf %80 : vector<8x128xf32>
    %82 = math.exp %81 : vector<8x128xf32>
    %cst_28 = arith.constant 1.000000e+00 : f32
    %83 = vector.broadcast %cst_28 : f32 to vector<8x128xf32>
    %84 = arith.addf %83, %82 : vector<8x128xf32>
    %85 = arith.divf %83, %84 : vector<8x128xf32>
    %86 = vector.extract_strided_slice %76 {offsets = [0, 128], sizes = [8, 128], strides = [1, 1]} : vector<8x384xf32> to vector<8x128xf32>
    %87 = vector.extract_strided_slice %75 {offsets = [0, 128], sizes = [8, 128], strides = [1, 1]} : vector<8x768xf32> to vector<8x128xf32>
    %88 = arith.addf %86, %87 : vector<8x128xf32>
    %89 = arith.negf %88 : vector<8x128xf32>
    %90 = math.exp %89 : vector<8x128xf32>
    %cst_29 = arith.constant 1.000000e+00 : f32
    %91 = vector.broadcast %cst_29 : f32 to vector<8x128xf32>
    %92 = arith.addf %91, %90 : vector<8x128xf32>
    %93 = arith.divf %91, %92 : vector<8x128xf32>
    %94 = vector.extract_strided_slice %76 {offsets = [0, 256], sizes = [8, 128], strides = [1, 1]} : vector<8x384xf32> to vector<8x128xf32>
    %95 = vector.extract_strided_slice %75 {offsets = [0, 256], sizes = [8, 128], strides = [1, 1]} : vector<8x768xf32> to vector<8x128xf32>
    %96 = arith.addf %95, %10 : vector<8x128xf32>
    %97 = arith.mulf %85, %96 : vector<8x128xf32>
    %98 = arith.addf %94, %97 : vector<8x128xf32>
    %99 = math.tanh %98 : vector<8x128xf32>
    %cst_30 = arith.constant 1.000000e+00 : f32
    %100 = vector.broadcast %cst_30 : f32 to vector<8x128xf32>
    %101 = arith.subf %100, %93 : vector<8x128xf32>
    %102 = arith.mulf %101, %99 : vector<8x128xf32>
    %103 = arith.mulf %93, %46 : vector<8x128xf32>
    %104 = arith.addf %102, %103 : vector<8x128xf32>
    %105 = vector.extract_strided_slice %77 {offsets = [0, 0], sizes = [8, 128], strides = [1, 1]} : vector<8x384xf32> to vector<8x128xf32>
    %106 = vector.extract_strided_slice %75 {offsets = [0, 384], sizes = [8, 128], strides = [1, 1]} : vector<8x768xf32> to vector<8x128xf32>
    %107 = arith.addf %105, %106 : vector<8x128xf32>
    %108 = arith.negf %107 : vector<8x128xf32>
    %109 = math.exp %108 : vector<8x128xf32>
    %cst_31 = arith.constant 1.000000e+00 : f32
    %110 = vector.broadcast %cst_31 : f32 to vector<8x128xf32>
    %111 = arith.addf %110, %109 : vector<8x128xf32>
    %112 = arith.divf %110, %111 : vector<8x128xf32>
    %113 = vector.extract_strided_slice %77 {offsets = [0, 128], sizes = [8, 128], strides = [1, 1]} : vector<8x384xf32> to vector<8x128xf32>
    %114 = vector.extract_strided_slice %75 {offsets = [0, 512], sizes = [8, 128], strides = [1, 1]} : vector<8x768xf32> to vector<8x128xf32>
    %115 = arith.addf %113, %114 : vector<8x128xf32>
    %116 = arith.negf %115 : vector<8x128xf32>
    %117 = math.exp %116 : vector<8x128xf32>
    %cst_32 = arith.constant 1.000000e+00 : f32
    %118 = vector.broadcast %cst_32 : f32 to vector<8x128xf32>
    %119 = arith.addf %118, %117 : vector<8x128xf32>
    %120 = arith.divf %118, %119 : vector<8x128xf32>
    %121 = vector.extract_strided_slice %77 {offsets = [0, 256], sizes = [8, 128], strides = [1, 1]} : vector<8x384xf32> to vector<8x128xf32>
    %122 = vector.extract_strided_slice %75 {offsets = [0, 640], sizes = [8, 128], strides = [1, 1]} : vector<8x768xf32> to vector<8x128xf32>
    %123 = arith.addf %122, %13 : vector<8x128xf32>
    %124 = arith.mulf %112, %123 : vector<8x128xf32>
    %125 = arith.addf %121, %124 : vector<8x128xf32>
    %126 = math.tanh %125 : vector<8x128xf32>
    %cst_33 = arith.constant 1.000000e+00 : f32
    %127 = vector.broadcast %cst_33 : f32 to vector<8x128xf32>
    %128 = arith.subf %127, %120 : vector<8x128xf32>
    %129 = arith.mulf %128, %126 : vector<8x128xf32>
    %130 = arith.mulf %120, %73 : vector<8x128xf32>
    %131 = arith.addf %129, %130 : vector<8x128xf32>
    %132 = tpu.concatenate %104, %131 in 1 : vector<8x128xf32>, vector<8x128xf32> -> vector<8x256xf32>
    %cst_34 = arith.constant dense<0.000000e+00> : vector<8x768xf32>
    %133 = tpu.matmul %132, %7, %cst_34 {dimension_numbers = #tpu.dot_dimension_numbers<[1], [0], [0], [1], [0, 0, 1, 1], [], []>} : vector<8x256xf32>, vector<256x768xf32>, vector<8x768xf32> -> vector<8x768xf32>
    %c16 = arith.constant 16 : index
    %c0_35 = arith.constant 0 : index
    %134 = vector.load %arg7[%c16, %c0_35] : memref<64x768xf32, #tpu.memory_space<vmem>>, vector<8x384xf32>
    %c40 = arith.constant 40 : index
    %c384_36 = arith.constant 384 : index
    %135 = vector.load %arg7[%c40, %c384_36] : memref<64x768xf32, #tpu.memory_space<vmem>>, vector<8x384xf32>
    %136 = vector.extract_strided_slice %134 {offsets = [0, 0], sizes = [8, 128], strides = [1, 1]} : vector<8x384xf32> to vector<8x128xf32>
    %137 = vector.extract_strided_slice %133 {offsets = [0, 0], sizes = [8, 128], strides = [1, 1]} : vector<8x768xf32> to vector<8x128xf32>
    %138 = arith.addf %136, %137 : vector<8x128xf32>
    %139 = arith.negf %138 : vector<8x128xf32>
    %140 = math.exp %139 : vector<8x128xf32>
    %cst_37 = arith.constant 1.000000e+00 : f32
    %141 = vector.broadcast %cst_37 : f32 to vector<8x128xf32>
    %142 = arith.addf %141, %140 : vector<8x128xf32>
    %143 = arith.divf %141, %142 : vector<8x128xf32>
    %144 = vector.extract_strided_slice %134 {offsets = [0, 128], sizes = [8, 128], strides = [1, 1]} : vector<8x384xf32> to vector<8x128xf32>
    %145 = vector.extract_strided_slice %133 {offsets = [0, 128], sizes = [8, 128], strides = [1, 1]} : vector<8x768xf32> to vector<8x128xf32>
    %146 = arith.addf %144, %145 : vector<8x128xf32>
    %147 = arith.negf %146 : vector<8x128xf32>
    %148 = math.exp %147 : vector<8x128xf32>
    %cst_38 = arith.constant 1.000000e+00 : f32
    %149 = vector.broadcast %cst_38 : f32 to vector<8x128xf32>
    %150 = arith.addf %149, %148 : vector<8x128xf32>
    %151 = arith.divf %149, %150 : vector<8x128xf32>
    %152 = vector.extract_strided_slice %134 {offsets = [0, 256], sizes = [8, 128], strides = [1, 1]} : vector<8x384xf32> to vector<8x128xf32>
    %153 = vector.extract_strided_slice %133 {offsets = [0, 256], sizes = [8, 128], strides = [1, 1]} : vector<8x768xf32> to vector<8x128xf32>
    %154 = arith.addf %153, %10 : vector<8x128xf32>
    %155 = arith.mulf %143, %154 : vector<8x128xf32>
    %156 = arith.addf %152, %155 : vector<8x128xf32>
    %157 = math.tanh %156 : vector<8x128xf32>
    %cst_39 = arith.constant 1.000000e+00 : f32
    %158 = vector.broadcast %cst_39 : f32 to vector<8x128xf32>
    %159 = arith.subf %158, %151 : vector<8x128xf32>
    %160 = arith.mulf %159, %157 : vector<8x128xf32>
    %161 = arith.mulf %151, %104 : vector<8x128xf32>
    %162 = arith.addf %160, %161 : vector<8x128xf32>
    %163 = vector.extract_strided_slice %135 {offsets = [0, 0], sizes = [8, 128], strides = [1, 1]} : vector<8x384xf32> to vector<8x128xf32>
    %164 = vector.extract_strided_slice %133 {offsets = [0, 384], sizes = [8, 128], strides = [1, 1]} : vector<8x768xf32> to vector<8x128xf32>
    %165 = arith.addf %163, %164 : vector<8x128xf32>
    %166 = arith.negf %165 : vector<8x128xf32>
    %167 = math.exp %166 : vector<8x128xf32>
    %cst_40 = arith.constant 1.000000e+00 : f32
    %168 = vector.broadcast %cst_40 : f32 to vector<8x128xf32>
    %169 = arith.addf %168, %167 : vector<8x128xf32>
    %170 = arith.divf %168, %169 : vector<8x128xf32>
    %171 = vector.extract_strided_slice %135 {offsets = [0, 128], sizes = [8, 128], strides = [1, 1]} : vector<8x384xf32> to vector<8x128xf32>
    %172 = vector.extract_strided_slice %133 {offsets = [0, 512], sizes = [8, 128], strides = [1, 1]} : vector<8x768xf32> to vector<8x128xf32>
    %173 = arith.addf %171, %172 : vector<8x128xf32>
    %174 = arith.negf %173 : vector<8x128xf32>
    %175 = math.exp %174 : vector<8x128xf32>
    %cst_41 = arith.constant 1.000000e+00 : f32
    %176 = vector.broadcast %cst_41 : f32 to vector<8x128xf32>
    %177 = arith.addf %176, %175 : vector<8x128xf32>
    %178 = arith.divf %176, %177 : vector<8x128xf32>
    %179 = vector.extract_strided_slice %135 {offsets = [0, 256], sizes = [8, 128], strides = [1, 1]} : vector<8x384xf32> to vector<8x128xf32>
    %180 = vector.extract_strided_slice %133 {offsets = [0, 640], sizes = [8, 128], strides = [1, 1]} : vector<8x768xf32> to vector<8x128xf32>
    %181 = arith.addf %180, %13 : vector<8x128xf32>
    %182 = arith.mulf %170, %181 : vector<8x128xf32>
    %183 = arith.addf %179, %182 : vector<8x128xf32>
    %184 = math.tanh %183 : vector<8x128xf32>
    %cst_42 = arith.constant 1.000000e+00 : f32
    %185 = vector.broadcast %cst_42 : f32 to vector<8x128xf32>
    %186 = arith.subf %185, %178 : vector<8x128xf32>
    %187 = arith.mulf %186, %184 : vector<8x128xf32>
    %188 = arith.mulf %178, %131 : vector<8x128xf32>
    %189 = arith.addf %187, %188 : vector<8x128xf32>
    %190 = tpu.concatenate %162, %189 in 1 : vector<8x128xf32>, vector<8x128xf32> -> vector<8x256xf32>
    %cst_43 = arith.constant dense<0.000000e+00> : vector<8x768xf32>
    %191 = tpu.matmul %190, %7, %cst_43 {dimension_numbers = #tpu.dot_dimension_numbers<[1], [0], [0], [1], [0, 0, 1, 1], [], []>} : vector<8x256xf32>, vector<256x768xf32>, vector<8x768xf32> -> vector<8x768xf32>
    %c24 = arith.constant 24 : index
    %c0_44 = arith.constant 0 : index
    %192 = vector.load %arg7[%c24, %c0_44] : memref<64x768xf32, #tpu.memory_space<vmem>>, vector<8x384xf32>
    %c32 = arith.constant 32 : index
    %c384_45 = arith.constant 384 : index
    %193 = vector.load %arg7[%c32, %c384_45] : memref<64x768xf32, #tpu.memory_space<vmem>>, vector<8x384xf32>
    %194 = vector.extract_strided_slice %192 {offsets = [0, 0], sizes = [8, 128], strides = [1, 1]} : vector<8x384xf32> to vector<8x128xf32>
    %195 = vector.extract_strided_slice %191 {offsets = [0, 0], sizes = [8, 128], strides = [1, 1]} : vector<8x768xf32> to vector<8x128xf32>
    %196 = arith.addf %194, %195 : vector<8x128xf32>
    %197 = arith.negf %196 : vector<8x128xf32>
    %198 = math.exp %197 : vector<8x128xf32>
    %cst_46 = arith.constant 1.000000e+00 : f32
    %199 = vector.broadcast %cst_46 : f32 to vector<8x128xf32>
    %200 = arith.addf %199, %198 : vector<8x128xf32>
    %201 = arith.divf %199, %200 : vector<8x128xf32>
    %202 = vector.extract_strided_slice %192 {offsets = [0, 128], sizes = [8, 128], strides = [1, 1]} : vector<8x384xf32> to vector<8x128xf32>
    %203 = vector.extract_strided_slice %191 {offsets = [0, 128], sizes = [8, 128], strides = [1, 1]} : vector<8x768xf32> to vector<8x128xf32>
    %204 = arith.addf %202, %203 : vector<8x128xf32>
    %205 = arith.negf %204 : vector<8x128xf32>
    %206 = math.exp %205 : vector<8x128xf32>
    %cst_47 = arith.constant 1.000000e+00 : f32
    %207 = vector.broadcast %cst_47 : f32 to vector<8x128xf32>
    %208 = arith.addf %207, %206 : vector<8x128xf32>
    %209 = arith.divf %207, %208 : vector<8x128xf32>
    %210 = vector.extract_strided_slice %192 {offsets = [0, 256], sizes = [8, 128], strides = [1, 1]} : vector<8x384xf32> to vector<8x128xf32>
    %211 = vector.extract_strided_slice %191 {offsets = [0, 256], sizes = [8, 128], strides = [1, 1]} : vector<8x768xf32> to vector<8x128xf32>
    %212 = arith.addf %211, %10 : vector<8x128xf32>
    %213 = arith.mulf %201, %212 : vector<8x128xf32>
    %214 = arith.addf %210, %213 : vector<8x128xf32>
    %215 = math.tanh %214 : vector<8x128xf32>
    %cst_48 = arith.constant 1.000000e+00 : f32
    %216 = vector.broadcast %cst_48 : f32 to vector<8x128xf32>
    %217 = arith.subf %216, %209 : vector<8x128xf32>
    %218 = arith.mulf %217, %215 : vector<8x128xf32>
    %219 = arith.mulf %209, %162 : vector<8x128xf32>
    %220 = arith.addf %218, %219 : vector<8x128xf32>
    %221 = vector.extract_strided_slice %193 {offsets = [0, 0], sizes = [8, 128], strides = [1, 1]} : vector<8x384xf32> to vector<8x128xf32>
    %222 = vector.extract_strided_slice %191 {offsets = [0, 384], sizes = [8, 128], strides = [1, 1]} : vector<8x768xf32> to vector<8x128xf32>
    %223 = arith.addf %221, %222 : vector<8x128xf32>
    %224 = arith.negf %223 : vector<8x128xf32>
    %225 = math.exp %224 : vector<8x128xf32>
    %cst_49 = arith.constant 1.000000e+00 : f32
    %226 = vector.broadcast %cst_49 : f32 to vector<8x128xf32>
    %227 = arith.addf %226, %225 : vector<8x128xf32>
    %228 = arith.divf %226, %227 : vector<8x128xf32>
    %229 = vector.extract_strided_slice %193 {offsets = [0, 128], sizes = [8, 128], strides = [1, 1]} : vector<8x384xf32> to vector<8x128xf32>
    %230 = vector.extract_strided_slice %191 {offsets = [0, 512], sizes = [8, 128], strides = [1, 1]} : vector<8x768xf32> to vector<8x128xf32>
    %231 = arith.addf %229, %230 : vector<8x128xf32>
    %232 = arith.negf %231 : vector<8x128xf32>
    %233 = math.exp %232 : vector<8x128xf32>
    %cst_50 = arith.constant 1.000000e+00 : f32
    %234 = vector.broadcast %cst_50 : f32 to vector<8x128xf32>
    %235 = arith.addf %234, %233 : vector<8x128xf32>
    %236 = arith.divf %234, %235 : vector<8x128xf32>
    %237 = vector.extract_strided_slice %193 {offsets = [0, 256], sizes = [8, 128], strides = [1, 1]} : vector<8x384xf32> to vector<8x128xf32>
    %238 = vector.extract_strided_slice %191 {offsets = [0, 640], sizes = [8, 128], strides = [1, 1]} : vector<8x768xf32> to vector<8x128xf32>
    %239 = arith.addf %238, %13 : vector<8x128xf32>
    %240 = arith.mulf %228, %239 : vector<8x128xf32>
    %241 = arith.addf %237, %240 : vector<8x128xf32>
    %242 = math.tanh %241 : vector<8x128xf32>
    %cst_51 = arith.constant 1.000000e+00 : f32
    %243 = vector.broadcast %cst_51 : f32 to vector<8x128xf32>
    %244 = arith.subf %243, %236 : vector<8x128xf32>
    %245 = arith.mulf %244, %242 : vector<8x128xf32>
    %246 = arith.mulf %236, %189 : vector<8x128xf32>
    %247 = arith.addf %245, %246 : vector<8x128xf32>
    %248 = tpu.concatenate %220, %247 in 1 : vector<8x128xf32>, vector<8x128xf32> -> vector<8x256xf32>
    %cst_52 = arith.constant dense<0.000000e+00> : vector<8x768xf32>
    %249 = tpu.matmul %248, %7, %cst_52 {dimension_numbers = #tpu.dot_dimension_numbers<[1], [0], [0], [1], [0, 0, 1, 1], [], []>} : vector<8x256xf32>, vector<256x768xf32>, vector<8x768xf32> -> vector<8x768xf32>
    %c32_53 = arith.constant 32 : index
    %c0_54 = arith.constant 0 : index
    %250 = vector.load %arg7[%c32_53, %c0_54] : memref<64x768xf32, #tpu.memory_space<vmem>>, vector<8x384xf32>
    %c24_55 = arith.constant 24 : index
    %c384_56 = arith.constant 384 : index
    %251 = vector.load %arg7[%c24_55, %c384_56] : memref<64x768xf32, #tpu.memory_space<vmem>>, vector<8x384xf32>
    %252 = vector.extract_strided_slice %250 {offsets = [0, 0], sizes = [8, 128], strides = [1, 1]} : vector<8x384xf32> to vector<8x128xf32>
    %253 = vector.extract_strided_slice %249 {offsets = [0, 0], sizes = [8, 128], strides = [1, 1]} : vector<8x768xf32> to vector<8x128xf32>
    %254 = arith.addf %252, %253 : vector<8x128xf32>
    %255 = arith.negf %254 : vector<8x128xf32>
    %256 = math.exp %255 : vector<8x128xf32>
    %cst_57 = arith.constant 1.000000e+00 : f32
    %257 = vector.broadcast %cst_57 : f32 to vector<8x128xf32>
    %258 = arith.addf %257, %256 : vector<8x128xf32>
    %259 = arith.divf %257, %258 : vector<8x128xf32>
    %260 = vector.extract_strided_slice %250 {offsets = [0, 128], sizes = [8, 128], strides = [1, 1]} : vector<8x384xf32> to vector<8x128xf32>
    %261 = vector.extract_strided_slice %249 {offsets = [0, 128], sizes = [8, 128], strides = [1, 1]} : vector<8x768xf32> to vector<8x128xf32>
    %262 = arith.addf %260, %261 : vector<8x128xf32>
    %263 = arith.negf %262 : vector<8x128xf32>
    %264 = math.exp %263 : vector<8x128xf32>
    %cst_58 = arith.constant 1.000000e+00 : f32
    %265 = vector.broadcast %cst_58 : f32 to vector<8x128xf32>
    %266 = arith.addf %265, %264 : vector<8x128xf32>
    %267 = arith.divf %265, %266 : vector<8x128xf32>
    %268 = vector.extract_strided_slice %250 {offsets = [0, 256], sizes = [8, 128], strides = [1, 1]} : vector<8x384xf32> to vector<8x128xf32>
    %269 = vector.extract_strided_slice %249 {offsets = [0, 256], sizes = [8, 128], strides = [1, 1]} : vector<8x768xf32> to vector<8x128xf32>
    %270 = arith.addf %269, %10 : vector<8x128xf32>
    %271 = arith.mulf %259, %270 : vector<8x128xf32>
    %272 = arith.addf %268, %271 : vector<8x128xf32>
    %273 = math.tanh %272 : vector<8x128xf32>
    %cst_59 = arith.constant 1.000000e+00 : f32
    %274 = vector.broadcast %cst_59 : f32 to vector<8x128xf32>
    %275 = arith.subf %274, %267 : vector<8x128xf32>
    %276 = arith.mulf %275, %273 : vector<8x128xf32>
    %277 = arith.mulf %267, %220 : vector<8x128xf32>
    %278 = arith.addf %276, %277 : vector<8x128xf32>
    %279 = vector.extract_strided_slice %251 {offsets = [0, 0], sizes = [8, 128], strides = [1, 1]} : vector<8x384xf32> to vector<8x128xf32>
    %280 = vector.extract_strided_slice %249 {offsets = [0, 384], sizes = [8, 128], strides = [1, 1]} : vector<8x768xf32> to vector<8x128xf32>
    %281 = arith.addf %279, %280 : vector<8x128xf32>
    %282 = arith.negf %281 : vector<8x128xf32>
    %283 = math.exp %282 : vector<8x128xf32>
    %cst_60 = arith.constant 1.000000e+00 : f32
    %284 = vector.broadcast %cst_60 : f32 to vector<8x128xf32>
    %285 = arith.addf %284, %283 : vector<8x128xf32>
    %286 = arith.divf %284, %285 : vector<8x128xf32>
    %287 = vector.extract_strided_slice %251 {offsets = [0, 128], sizes = [8, 128], strides = [1, 1]} : vector<8x384xf32> to vector<8x128xf32>
    %288 = vector.extract_strided_slice %249 {offsets = [0, 512], sizes = [8, 128], strides = [1, 1]} : vector<8x768xf32> to vector<8x128xf32>
    %289 = arith.addf %287, %288 : vector<8x128xf32>
    %290 = arith.negf %289 : vector<8x128xf32>
    %291 = math.exp %290 : vector<8x128xf32>
    %cst_61 = arith.constant 1.000000e+00 : f32
    %292 = vector.broadcast %cst_61 : f32 to vector<8x128xf32>
    %293 = arith.addf %292, %291 : vector<8x128xf32>
    %294 = arith.divf %292, %293 : vector<8x128xf32>
    %295 = vector.extract_strided_slice %251 {offsets = [0, 256], sizes = [8, 128], strides = [1, 1]} : vector<8x384xf32> to vector<8x128xf32>
    %296 = vector.extract_strided_slice %249 {offsets = [0, 640], sizes = [8, 128], strides = [1, 1]} : vector<8x768xf32> to vector<8x128xf32>
    %297 = arith.addf %296, %13 : vector<8x128xf32>
    %298 = arith.mulf %286, %297 : vector<8x128xf32>
    %299 = arith.addf %295, %298 : vector<8x128xf32>
    %300 = math.tanh %299 : vector<8x128xf32>
    %cst_62 = arith.constant 1.000000e+00 : f32
    %301 = vector.broadcast %cst_62 : f32 to vector<8x128xf32>
    %302 = arith.subf %301, %294 : vector<8x128xf32>
    %303 = arith.mulf %302, %300 : vector<8x128xf32>
    %304 = arith.mulf %294, %247 : vector<8x128xf32>
    %305 = arith.addf %303, %304 : vector<8x128xf32>
    %306 = tpu.concatenate %278, %305 in 1 : vector<8x128xf32>, vector<8x128xf32> -> vector<8x256xf32>
    %cst_63 = arith.constant dense<0.000000e+00> : vector<8x768xf32>
    %307 = tpu.matmul %306, %7, %cst_63 {dimension_numbers = #tpu.dot_dimension_numbers<[1], [0], [0], [1], [0, 0, 1, 1], [], []>} : vector<8x256xf32>, vector<256x768xf32>, vector<8x768xf32> -> vector<8x768xf32>
    %c40_64 = arith.constant 40 : index
    %c0_65 = arith.constant 0 : index
    %308 = vector.load %arg7[%c40_64, %c0_65] : memref<64x768xf32, #tpu.memory_space<vmem>>, vector<8x384xf32>
    %c16_66 = arith.constant 16 : index
    %c384_67 = arith.constant 384 : index
    %309 = vector.load %arg7[%c16_66, %c384_67] : memref<64x768xf32, #tpu.memory_space<vmem>>, vector<8x384xf32>
    %310 = vector.extract_strided_slice %308 {offsets = [0, 0], sizes = [8, 128], strides = [1, 1]} : vector<8x384xf32> to vector<8x128xf32>
    %311 = vector.extract_strided_slice %307 {offsets = [0, 0], sizes = [8, 128], strides = [1, 1]} : vector<8x768xf32> to vector<8x128xf32>
    %312 = arith.addf %310, %311 : vector<8x128xf32>
    %313 = arith.negf %312 : vector<8x128xf32>
    %314 = math.exp %313 : vector<8x128xf32>
    %cst_68 = arith.constant 1.000000e+00 : f32
    %315 = vector.broadcast %cst_68 : f32 to vector<8x128xf32>
    %316 = arith.addf %315, %314 : vector<8x128xf32>
    %317 = arith.divf %315, %316 : vector<8x128xf32>
    %318 = vector.extract_strided_slice %308 {offsets = [0, 128], sizes = [8, 128], strides = [1, 1]} : vector<8x384xf32> to vector<8x128xf32>
    %319 = vector.extract_strided_slice %307 {offsets = [0, 128], sizes = [8, 128], strides = [1, 1]} : vector<8x768xf32> to vector<8x128xf32>
    %320 = arith.addf %318, %319 : vector<8x128xf32>
    %321 = arith.negf %320 : vector<8x128xf32>
    %322 = math.exp %321 : vector<8x128xf32>
    %cst_69 = arith.constant 1.000000e+00 : f32
    %323 = vector.broadcast %cst_69 : f32 to vector<8x128xf32>
    %324 = arith.addf %323, %322 : vector<8x128xf32>
    %325 = arith.divf %323, %324 : vector<8x128xf32>
    %326 = vector.extract_strided_slice %308 {offsets = [0, 256], sizes = [8, 128], strides = [1, 1]} : vector<8x384xf32> to vector<8x128xf32>
    %327 = vector.extract_strided_slice %307 {offsets = [0, 256], sizes = [8, 128], strides = [1, 1]} : vector<8x768xf32> to vector<8x128xf32>
    %328 = arith.addf %327, %10 : vector<8x128xf32>
    %329 = arith.mulf %317, %328 : vector<8x128xf32>
    %330 = arith.addf %326, %329 : vector<8x128xf32>
    %331 = math.tanh %330 : vector<8x128xf32>
    %cst_70 = arith.constant 1.000000e+00 : f32
    %332 = vector.broadcast %cst_70 : f32 to vector<8x128xf32>
    %333 = arith.subf %332, %325 : vector<8x128xf32>
    %334 = arith.mulf %333, %331 : vector<8x128xf32>
    %335 = arith.mulf %325, %278 : vector<8x128xf32>
    %336 = arith.addf %334, %335 : vector<8x128xf32>
    %337 = vector.extract_strided_slice %309 {offsets = [0, 0], sizes = [8, 128], strides = [1, 1]} : vector<8x384xf32> to vector<8x128xf32>
    %338 = vector.extract_strided_slice %307 {offsets = [0, 384], sizes = [8, 128], strides = [1, 1]} : vector<8x768xf32> to vector<8x128xf32>
    %339 = arith.addf %337, %338 : vector<8x128xf32>
    %340 = arith.negf %339 : vector<8x128xf32>
    %341 = math.exp %340 : vector<8x128xf32>
    %cst_71 = arith.constant 1.000000e+00 : f32
    %342 = vector.broadcast %cst_71 : f32 to vector<8x128xf32>
    %343 = arith.addf %342, %341 : vector<8x128xf32>
    %344 = arith.divf %342, %343 : vector<8x128xf32>
    %345 = vector.extract_strided_slice %309 {offsets = [0, 128], sizes = [8, 128], strides = [1, 1]} : vector<8x384xf32> to vector<8x128xf32>
    %346 = vector.extract_strided_slice %307 {offsets = [0, 512], sizes = [8, 128], strides = [1, 1]} : vector<8x768xf32> to vector<8x128xf32>
    %347 = arith.addf %345, %346 : vector<8x128xf32>
    %348 = arith.negf %347 : vector<8x128xf32>
    %349 = math.exp %348 : vector<8x128xf32>
    %cst_72 = arith.constant 1.000000e+00 : f32
    %350 = vector.broadcast %cst_72 : f32 to vector<8x128xf32>
    %351 = arith.addf %350, %349 : vector<8x128xf32>
    %352 = arith.divf %350, %351 : vector<8x128xf32>
    %353 = vector.extract_strided_slice %309 {offsets = [0, 256], sizes = [8, 128], strides = [1, 1]} : vector<8x384xf32> to vector<8x128xf32>
    %354 = vector.extract_strided_slice %307 {offsets = [0, 640], sizes = [8, 128], strides = [1, 1]} : vector<8x768xf32> to vector<8x128xf32>
    %355 = arith.addf %354, %13 : vector<8x128xf32>
    %356 = arith.mulf %344, %355 : vector<8x128xf32>
    %357 = arith.addf %353, %356 : vector<8x128xf32>
    %358 = math.tanh %357 : vector<8x128xf32>
    %cst_73 = arith.constant 1.000000e+00 : f32
    %359 = vector.broadcast %cst_73 : f32 to vector<8x128xf32>
    %360 = arith.subf %359, %352 : vector<8x128xf32>
    %361 = arith.mulf %360, %358 : vector<8x128xf32>
    %362 = arith.mulf %352, %305 : vector<8x128xf32>
    %363 = arith.addf %361, %362 : vector<8x128xf32>
    %364 = tpu.concatenate %336, %363 in 1 : vector<8x128xf32>, vector<8x128xf32> -> vector<8x256xf32>
    %cst_74 = arith.constant dense<0.000000e+00> : vector<8x768xf32>
    %365 = tpu.matmul %364, %7, %cst_74 {dimension_numbers = #tpu.dot_dimension_numbers<[1], [0], [0], [1], [0, 0, 1, 1], [], []>} : vector<8x256xf32>, vector<256x768xf32>, vector<8x768xf32> -> vector<8x768xf32>
    %c48_75 = arith.constant 48 : index
    %c0_76 = arith.constant 0 : index
    %366 = vector.load %arg7[%c48_75, %c0_76] : memref<64x768xf32, #tpu.memory_space<vmem>>, vector<8x384xf32>
    %c8_77 = arith.constant 8 : index
    %c384_78 = arith.constant 384 : index
    %367 = vector.load %arg7[%c8_77, %c384_78] : memref<64x768xf32, #tpu.memory_space<vmem>>, vector<8x384xf32>
    %368 = vector.extract_strided_slice %366 {offsets = [0, 0], sizes = [8, 128], strides = [1, 1]} : vector<8x384xf32> to vector<8x128xf32>
    %369 = vector.extract_strided_slice %365 {offsets = [0, 0], sizes = [8, 128], strides = [1, 1]} : vector<8x768xf32> to vector<8x128xf32>
    %370 = arith.addf %368, %369 : vector<8x128xf32>
    %371 = arith.negf %370 : vector<8x128xf32>
    %372 = math.exp %371 : vector<8x128xf32>
    %cst_79 = arith.constant 1.000000e+00 : f32
    %373 = vector.broadcast %cst_79 : f32 to vector<8x128xf32>
    %374 = arith.addf %373, %372 : vector<8x128xf32>
    %375 = arith.divf %373, %374 : vector<8x128xf32>
    %376 = vector.extract_strided_slice %366 {offsets = [0, 128], sizes = [8, 128], strides = [1, 1]} : vector<8x384xf32> to vector<8x128xf32>
    %377 = vector.extract_strided_slice %365 {offsets = [0, 128], sizes = [8, 128], strides = [1, 1]} : vector<8x768xf32> to vector<8x128xf32>
    %378 = arith.addf %376, %377 : vector<8x128xf32>
    %379 = arith.negf %378 : vector<8x128xf32>
    %380 = math.exp %379 : vector<8x128xf32>
    %cst_80 = arith.constant 1.000000e+00 : f32
    %381 = vector.broadcast %cst_80 : f32 to vector<8x128xf32>
    %382 = arith.addf %381, %380 : vector<8x128xf32>
    %383 = arith.divf %381, %382 : vector<8x128xf32>
    %384 = vector.extract_strided_slice %366 {offsets = [0, 256], sizes = [8, 128], strides = [1, 1]} : vector<8x384xf32> to vector<8x128xf32>
    %385 = vector.extract_strided_slice %365 {offsets = [0, 256], sizes = [8, 128], strides = [1, 1]} : vector<8x768xf32> to vector<8x128xf32>
    %386 = arith.addf %385, %10 : vector<8x128xf32>
    %387 = arith.mulf %375, %386 : vector<8x128xf32>
    %388 = arith.addf %384, %387 : vector<8x128xf32>
    %389 = math.tanh %388 : vector<8x128xf32>
    %cst_81 = arith.constant 1.000000e+00 : f32
    %390 = vector.broadcast %cst_81 : f32 to vector<8x128xf32>
    %391 = arith.subf %390, %383 : vector<8x128xf32>
    %392 = arith.mulf %391, %389 : vector<8x128xf32>
    %393 = arith.mulf %383, %336 : vector<8x128xf32>
    %394 = arith.addf %392, %393 : vector<8x128xf32>
    %395 = vector.extract_strided_slice %367 {offsets = [0, 0], sizes = [8, 128], strides = [1, 1]} : vector<8x384xf32> to vector<8x128xf32>
    %396 = vector.extract_strided_slice %365 {offsets = [0, 384], sizes = [8, 128], strides = [1, 1]} : vector<8x768xf32> to vector<8x128xf32>
    %397 = arith.addf %395, %396 : vector<8x128xf32>
    %398 = arith.negf %397 : vector<8x128xf32>
    %399 = math.exp %398 : vector<8x128xf32>
    %cst_82 = arith.constant 1.000000e+00 : f32
    %400 = vector.broadcast %cst_82 : f32 to vector<8x128xf32>
    %401 = arith.addf %400, %399 : vector<8x128xf32>
    %402 = arith.divf %400, %401 : vector<8x128xf32>
    %403 = vector.extract_strided_slice %367 {offsets = [0, 128], sizes = [8, 128], strides = [1, 1]} : vector<8x384xf32> to vector<8x128xf32>
    %404 = vector.extract_strided_slice %365 {offsets = [0, 512], sizes = [8, 128], strides = [1, 1]} : vector<8x768xf32> to vector<8x128xf32>
    %405 = arith.addf %403, %404 : vector<8x128xf32>
    %406 = arith.negf %405 : vector<8x128xf32>
    %407 = math.exp %406 : vector<8x128xf32>
    %cst_83 = arith.constant 1.000000e+00 : f32
    %408 = vector.broadcast %cst_83 : f32 to vector<8x128xf32>
    %409 = arith.addf %408, %407 : vector<8x128xf32>
    %410 = arith.divf %408, %409 : vector<8x128xf32>
    %411 = vector.extract_strided_slice %367 {offsets = [0, 256], sizes = [8, 128], strides = [1, 1]} : vector<8x384xf32> to vector<8x128xf32>
    %412 = vector.extract_strided_slice %365 {offsets = [0, 640], sizes = [8, 128], strides = [1, 1]} : vector<8x768xf32> to vector<8x128xf32>
    %413 = arith.addf %412, %13 : vector<8x128xf32>
    %414 = arith.mulf %402, %413 : vector<8x128xf32>
    %415 = arith.addf %411, %414 : vector<8x128xf32>
    %416 = math.tanh %415 : vector<8x128xf32>
    %cst_84 = arith.constant 1.000000e+00 : f32
    %417 = vector.broadcast %cst_84 : f32 to vector<8x128xf32>
    %418 = arith.subf %417, %410 : vector<8x128xf32>
    %419 = arith.mulf %418, %416 : vector<8x128xf32>
    %420 = arith.mulf %410, %363 : vector<8x128xf32>
    %421 = arith.addf %419, %420 : vector<8x128xf32>
    %422 = tpu.concatenate %394, %421 in 1 : vector<8x128xf32>, vector<8x128xf32> -> vector<8x256xf32>
    %cst_85 = arith.constant dense<0.000000e+00> : vector<8x768xf32>
    %423 = tpu.matmul %422, %7, %cst_85 {dimension_numbers = #tpu.dot_dimension_numbers<[1], [0], [0], [1], [0, 0, 1, 1], [], []>} : vector<8x256xf32>, vector<256x768xf32>, vector<8x768xf32> -> vector<8x768xf32>
    %c56_86 = arith.constant 56 : index
    %c0_87 = arith.constant 0 : index
    %424 = vector.load %arg7[%c56_86, %c0_87] : memref<64x768xf32, #tpu.memory_space<vmem>>, vector<8x384xf32>
    %c0_88 = arith.constant 0 : index
    %c384_89 = arith.constant 384 : index
    %425 = vector.load %arg7[%c0_88, %c384_89] : memref<64x768xf32, #tpu.memory_space<vmem>>, vector<8x384xf32>
    %426 = vector.extract_strided_slice %424 {offsets = [0, 0], sizes = [8, 128], strides = [1, 1]} : vector<8x384xf32> to vector<8x128xf32>
    %427 = vector.extract_strided_slice %423 {offsets = [0, 0], sizes = [8, 128], strides = [1, 1]} : vector<8x768xf32> to vector<8x128xf32>
    %428 = arith.addf %426, %427 : vector<8x128xf32>
    %429 = arith.negf %428 : vector<8x128xf32>
    %430 = math.exp %429 : vector<8x128xf32>
    %cst_90 = arith.constant 1.000000e+00 : f32
    %431 = vector.broadcast %cst_90 : f32 to vector<8x128xf32>
    %432 = arith.addf %431, %430 : vector<8x128xf32>
    %433 = arith.divf %431, %432 : vector<8x128xf32>
    %434 = vector.extract_strided_slice %424 {offsets = [0, 128], sizes = [8, 128], strides = [1, 1]} : vector<8x384xf32> to vector<8x128xf32>
    %435 = vector.extract_strided_slice %423 {offsets = [0, 128], sizes = [8, 128], strides = [1, 1]} : vector<8x768xf32> to vector<8x128xf32>
    %436 = arith.addf %434, %435 : vector<8x128xf32>
    %437 = arith.negf %436 : vector<8x128xf32>
    %438 = math.exp %437 : vector<8x128xf32>
    %cst_91 = arith.constant 1.000000e+00 : f32
    %439 = vector.broadcast %cst_91 : f32 to vector<8x128xf32>
    %440 = arith.addf %439, %438 : vector<8x128xf32>
    %441 = arith.divf %439, %440 : vector<8x128xf32>
    %442 = vector.extract_strided_slice %424 {offsets = [0, 256], sizes = [8, 128], strides = [1, 1]} : vector<8x384xf32> to vector<8x128xf32>
    %443 = vector.extract_strided_slice %423 {offsets = [0, 256], sizes = [8, 128], strides = [1, 1]} : vector<8x768xf32> to vector<8x128xf32>
    %444 = arith.addf %443, %10 : vector<8x128xf32>
    %445 = arith.mulf %433, %444 : vector<8x128xf32>
    %446 = arith.addf %442, %445 : vector<8x128xf32>
    %447 = math.tanh %446 : vector<8x128xf32>
    %cst_92 = arith.constant 1.000000e+00 : f32
    %448 = vector.broadcast %cst_92 : f32 to vector<8x128xf32>
    %449 = arith.subf %448, %441 : vector<8x128xf32>
    %450 = arith.mulf %449, %447 : vector<8x128xf32>
    %451 = arith.mulf %441, %394 : vector<8x128xf32>
    %452 = arith.addf %450, %451 : vector<8x128xf32>
    %453 = vector.extract_strided_slice %425 {offsets = [0, 0], sizes = [8, 128], strides = [1, 1]} : vector<8x384xf32> to vector<8x128xf32>
    %454 = vector.extract_strided_slice %423 {offsets = [0, 384], sizes = [8, 128], strides = [1, 1]} : vector<8x768xf32> to vector<8x128xf32>
    %455 = arith.addf %453, %454 : vector<8x128xf32>
    %456 = arith.negf %455 : vector<8x128xf32>
    %457 = math.exp %456 : vector<8x128xf32>
    %cst_93 = arith.constant 1.000000e+00 : f32
    %458 = vector.broadcast %cst_93 : f32 to vector<8x128xf32>
    %459 = arith.addf %458, %457 : vector<8x128xf32>
    %460 = arith.divf %458, %459 : vector<8x128xf32>
    %461 = vector.extract_strided_slice %425 {offsets = [0, 128], sizes = [8, 128], strides = [1, 1]} : vector<8x384xf32> to vector<8x128xf32>
    %462 = vector.extract_strided_slice %423 {offsets = [0, 512], sizes = [8, 128], strides = [1, 1]} : vector<8x768xf32> to vector<8x128xf32>
    %463 = arith.addf %461, %462 : vector<8x128xf32>
    %464 = arith.negf %463 : vector<8x128xf32>
    %465 = math.exp %464 : vector<8x128xf32>
    %cst_94 = arith.constant 1.000000e+00 : f32
    %466 = vector.broadcast %cst_94 : f32 to vector<8x128xf32>
    %467 = arith.addf %466, %465 : vector<8x128xf32>
    %468 = arith.divf %466, %467 : vector<8x128xf32>
    %469 = vector.extract_strided_slice %425 {offsets = [0, 256], sizes = [8, 128], strides = [1, 1]} : vector<8x384xf32> to vector<8x128xf32>
    %470 = vector.extract_strided_slice %423 {offsets = [0, 640], sizes = [8, 128], strides = [1, 1]} : vector<8x768xf32> to vector<8x128xf32>
    %471 = arith.addf %470, %13 : vector<8x128xf32>
    %472 = arith.mulf %460, %471 : vector<8x128xf32>
    %473 = arith.addf %469, %472 : vector<8x128xf32>
    %474 = math.tanh %473 : vector<8x128xf32>
    %cst_95 = arith.constant 1.000000e+00 : f32
    %475 = vector.broadcast %cst_95 : f32 to vector<8x128xf32>
    %476 = arith.subf %475, %468 : vector<8x128xf32>
    %477 = arith.mulf %476, %474 : vector<8x128xf32>
    %478 = arith.mulf %468, %421 : vector<8x128xf32>
    %479 = arith.addf %477, %478 : vector<8x128xf32>
    %c0_96 = arith.constant 0 : index
    %c0_97 = arith.constant 0 : index
    %480 = vector.load %arg6[%c0_96, %c0_97] : memref<8x256xf32, #tpu.memory_space<vmem>>, vector<8x128xf32>
    tpu.vector_store %arg6[%c0_96, %c0_97], %452 {strides = array<i32>} : memref<8x256xf32, #tpu.memory_space<vmem>>, vector<8x128xf32>,
    %c0_98 = arith.constant 0 : index
    %c128_99 = arith.constant 128 : index
    %481 = vector.load %arg6[%c0_98, %c128_99] : memref<8x256xf32, #tpu.memory_space<vmem>>, vector<8x128xf32>
    tpu.vector_store %arg6[%c0_98, %c128_99], %479 {strides = array<i32>} : memref<8x256xf32, #tpu.memory_space<vmem>>, vector<8x128xf32>,
    return
  }
}

</mosaic_0001>

<bundles_post_ra>
// kernel: word_att_net_forward.1
= control target key start
LH: loop header
LB: loop body
LE: loop exit
PB: predicated region body
PF: predicated region fallthrough
CT: control target
= control target key end

     0   :  { %v8389_v3 = vmov 0.0   ;;  %vm75_vm0 = vcmask 130048   ;;  %s8382_s2 = inlined_call_operand.vmem [shape: f32[16,768], index: 2, kind: input, shape index: {}]   ;;  %s8383_s0 = inlined_call_operand.vmem [shape: f32[64,16], index: 0, kind: input, shape index: {}]   ;;  %s8384_s3 = inlined_call_operand.vmem [shape: f32[256,768], index: 3, kind: input, shape index: {}]   ;;  %s8385_s1 = inlined_call_operand.vmem [shape: f32[8,256], index: 1, kind: input, shape index: {}]   ;;  %s8386_s4 = inlined_call_operand.vmem [shape: f32[1,768], index: 4, kind: input, shape index: {}]   ;;  %s8387_s5 = inlined_call_operand.vmem [shape: f32[1,256], index: 5, kind: input, shape index: {}]   ;;  %s8388_s6 = inlined_call_operand.vmem [shape: f32[8,256], index: 6, kind: output, shape index: {}]  }
   0x1   :  { %v38_v0 = vld [vmem:[%s8382_s2 + $0x38] sm:$0xff]  ;;  %v37_v1 = vld [vmem:[%s8382_s2 + $0x30] sm:$0xff]  ;;  %v32_v2 = vld [vmem:[%s8382_s2 + $0x8] sm:$0xff]  ;;  %164 = vmatprep.mubr.f32.mxu0 %v8389_v3  ;;  %188 = vmatprep.mubr.f32.mxu1 %v8389_v3 }
   0x2   :  { %128 = vmatprep.subr.mxu0 %v38_v0  ;;  %2863 = vmatprep.subr.mxu1 %v38_v0  ;;  %v31_v4 = vld [vmem:[%s8382_s2] sm:$0xff]  ;;  %v40_v7 = vld [vmem:[%s8382_s2 + $0x48] sm:$0xff]  ;;  %v34_v9 = vld [vmem:[%s8382_s2 + $0x18] sm:$0xff] }
   0x3   :  { %129 = vmatpush1.msra.mxu0 %v37_v1  ;;  %2865 = vmatpush1.msra.mxu1 %v37_v1  ;;  %v23_v5 = vld [vmem:[%s8383_s0] sm:$0xff]  ;;  %v42_v10 = vld [vmem:[%s8382_s2 + $0x58] sm:$0xff]  ;;  %v3494_v11 = vld [vmem:[%s8383_s0 + $0x8] sm:$0xff] }
   0x4   :  { %v3473_v6 = vld [vmem:[%s8383_s0 + $0x20] sm:$0xff]  ;;  %130 = vmatprep.subr.mxu0 %v32_v2  ;;  %2864 = vmatprep.subr.mxu1 %v32_v2  ;;  %v3499_v12 = vld [vmem:[%s8383_s0 + $0x28] sm:$0xff]  ;;  %v33_v13 = vld [vmem:[%s8382_s2 + $0x10] sm:$0xff] }
   0x5   :  { %131 = vmatpush1.msra.mxu0 %v31_v4  ;;  %2866 = vmatpush1.msra.mxu1 %v31_v4  ;;  %v39_v8 = vld [vmem:[%s8382_s2 + $0x40] sm:$0xff]  ;;  %v41_v14 = vld [vmem:[%s8382_s2 + $0x50] sm:$0xff]  ;;  %v36_v15 = vld [vmem:[%s8382_s2 + $0x28] sm:$0xff] }
   0x6   :  { %2805 = vmatmul.mubr.msk.f32.vlgmr.msra.gmra.mxu0 %vm75_vm0, %v23_v5  ;;  %2809 = vmatmul.mubr.msk.f32.vlgmr.msra.gmra.mxu1 %vm75_vm0, %v3473_v6  ;;  %v3518_v16 = vld [vmem:[%s8384_s3 + $0x2d8] sm:$0xff]  ;;  %v3525_v17 = vld [vmem:[%s8383_s0 + $0x10] sm:$0xff]  ;;  %v35_v19 = vld [vmem:[%s8382_s2 + $0x20] sm:$0xff] }
   0x7   :  { %241 = vmatprep.subr.mxu1 %v40_v7  ;;  %170 = vmatprep.mubr.f32.mxu0 %v8389_v3  ;;  %v3530_v18 = vld [vmem:[%s8383_s0 + $0x30] sm:$0xff]  ;;  %v3543_v20 = vld [vmem:[%s8384_s3 + $0x2e8] sm:$0xff]  ;;  %v3550_v21 = vld [vmem:[%s8383_s0 + $0x18] sm:$0xff] }
   0x8   :  { %242 = vmatpush1.msra.mxu1 %v39_v8  ;;  %194 = vmatprep.mubr.f32.mxu1 %v8389_v3  ;;  %9059 = vst [vmem:[#allocation3_spill] sm:$0xff] %v3543_v20  ;;  %v3555_v22 = vld [vmem:[%s8383_s0 + $0x38] sm:$0xff]  ;;  %v3567_v23 = vld [vmem:[%s8384_s3 + $0x2d0] sm:$0xff]  ;;  %v3572_v24 = vld [vmem:[%s8384_s3 + $0x2e0] sm:$0xff] }
   0x9   :  { %243 = vmatprep.subr.mxu1 %v34_v9  ;;  %354 = vmatprep.subr.mxu0 %v42_v10  ;;  %9060 = vst [vmem:[#allocation4_spill] sm:$0xff] %v3572_v24  ;;  %v3577_v25 = vld [vmem:[%s8384_s3 + $0x2a8] sm:$0xff]  ;;  %v3582_v26 = vld [vmem:[%s8384_s3 + $0x2b8] sm:$0xff]  ;;  %v3589_v27 = vld [vmem:[%s8384_s3 + $0x2a0] sm:$0xff] }
   0xa   :  { %2806 = vmatmul.mubr.msk.f32.gmra.mxu0 %vm75_vm0, %v3494_v11  ;;  %2810 = vmatmul.mubr.msk.f32.gmra.mxu1 %vm75_vm0, %v3499_v12  ;;  %9061 = vst [vmem:[#allocation5_spill] sm:$0xff] %v3582_v26  ;;  %v3594_v28 = vld [vmem:[%s8384_s3 + $0x2b0] sm:$0xff]  ;;  %v3601_v29 = vld [vmem:[%s8384_s3 + $0x278] sm:$0xff]  ;;  %v3606_v30 = vld [vmem:[%s8384_s3 + $0x288] sm:$0xff] }
   0xb   :  { %176 = vmatprep.mubr.f32.mxu0 %v8389_v3  ;;  %200 = vmatprep.mubr.f32.mxu1 %v8389_v3  ;;  %9062 = vst [vmem:[#allocation6_spill] sm:$0xff] %v3594_v28  ;;  %9063 = vst [vmem:[#allocation7_spill] sm:$0xff] %v3606_v30  ;;  %v3613_v31 = vld [vmem:[%s8384_s3 + $0x270] sm:$0xff]  ;;  %v3618_v32 = vld [vmem:[%s8384_s3 + $0x280] sm:$0xff] }
   0xc   :  { %244 = vmatpush1.msra.mxu1 %v33_v13  ;;  %355 = vmatpush1.msra.mxu0 %v41_v14  ;;  %9064 = vst [vmem:[#allocation8_spill] sm:$0xff] %v3618_v32  ;;  %v3625_v33 = vld [vmem:[%s8384_s3 + $0x248] sm:$0xff]  ;;  %v3630_v34 = vld [vmem:[%s8384_s3 + $0x258] sm:$0xff]  ;;  %v3637_v35 = vld [vmem:[%s8384_s3 + $0x240] sm:$0xff] }
   0xd   :  { %356 = vmatprep.subr.mxu0 %v36_v15  ;;  %695 = vmatprep.subr.mxu1 %v3518_v16  ;;  %9065 = vst [vmem:[#allocation9_spill] sm:$0xff] %v3630_v34  ;;  %v3642_v36 = vld [vmem:[%s8384_s3 + $0x250] sm:$0xff]  ;;  %v3649_v37 = vld [vmem:[%s8384_s3 + $0x218] sm:$0xff]  ;;  %v3654_v38 = vld [vmem:[%s8384_s3 + $0x228] sm:$0xff] }
   0xe   :  { %2807 = vmatmul.mubr.msk.f32.gmra.mxu0 %vm75_vm0, %v3525_v17  ;;  %2811 = vmatmul.mubr.msk.f32.gmra.mxu1 %vm75_vm0, %v3530_v18  ;;  %9066 = vst [vmem:[#allocation10_spill] sm:$0xff] %v3642_v36  ;;  %9067 = vst [vmem:[#allocation11_spill] sm:$0xff] %v3654_v38  ;;  %v3661_v39 = vld [vmem:[%s8384_s3 + $0x210] sm:$0xff]  ;;  %v3666_v40 = vld [vmem:[%s8384_s3 + $0x220] sm:$0xff] }
   0xf   :  { %182 = vmatprep.mubr.f32.mxu0 %v8389_v3  ;;  %206 = vmatprep.mubr.f32.mxu1 %v8389_v3  ;;  %9068 = vst [vmem:[#allocation12_spill] sm:$0xff] %v3666_v40  ;;  %v3673_v41 = vld [vmem:[%s8384_s3 + $0x1e8] sm:$0xff]  ;;  %v3678_v42 = vld [vmem:[%s8384_s3 + $0x1f8] sm:$0xff]  ;;  %v3685_v43 = vld [vmem:[%s8384_s3 + $0x1e0] sm:$0xff] }
  0x10   :  { %357 = vmatpush1.msra.mxu0 %v35_v19  ;;  %9069 = vst [vmem:[#allocation13_spill] sm:$0xff] %v3678_v42  ;;  %v3690_v44 = vld [vmem:[%s8384_s3 + $0x1f0] sm:$0xff]  ;;  %v3697_v45 = vld [vmem:[%s8384_s3 + $0x1b8] sm:$0xff]  ;;  %v3702_v46 = vld [vmem:[%s8384_s3 + $0x1c8] sm:$0xff] }
  0x11   :  { %766 = vmatprep.subr.mxu0 %v3543_v20  ;;  %9070 = vst [vmem:[#allocation14_spill] sm:$0xff] %v3690_v44  ;;  %9071 = vst [vmem:[#allocation15_spill] sm:$0xff] %v3702_v46  ;;  %v3709_v47 = vld [vmem:[%s8384_s3 + $0x1b0] sm:$0xff]  ;;  %v3714_v48 = vld [vmem:[%s8384_s3 + $0x1c0] sm:$0xff] }
  0x12   :  { %2808 = vmatmul.mubr.msk.f32.gmra.mxu0 %vm75_vm0, %v3550_v21  ;;  %2812 = vmatmul.mubr.msk.f32.gmra.mxu1 %vm75_vm0, %v3555_v22  ;;  %9072 = vst [vmem:[#allocation16_spill] sm:$0xff] %v3714_v48  ;;  %v3721_v49 = vld [vmem:[%s8384_s3 + $0x188] sm:$0xff]  ;;  %v3726_v50 = vld [vmem:[%s8384_s3 + $0x198] sm:$0xff]  ;;  %v3733_v51 = vld [vmem:[%s8384_s3 + $0x180] sm:$0xff] }
  0x13   :  { %277 = vmatprep.mubr.f32.mxu1 %v8389_v3  ;;  %390 = vmatprep.mubr.f32.mxu0 %v8389_v3  ;;  %9073 = vst [vmem:[#allocation17_spill] sm:$0xff] %v3726_v50  ;;  %v3738_v52 = vld [vmem:[%s8384_s3 + $0x190] sm:$0xff]  ;;  %v3745_v53 = vld [vmem:[%s8384_s3 + $0x158] sm:$0xff]  ;;  %v3750_v54 = vld [vmem:[%s8384_s3 + $0x168] sm:$0xff] }
  0x14   :  { %9074 = vst [vmem:[#allocation18_spill] sm:$0xff] %v3738_v52  ;;  %9075 = vst [vmem:[#allocation19_spill] sm:$0xff] %v3750_v54  ;;  %v3757_v55 = vld [vmem:[%s8384_s3 + $0x150] sm:$0xff]  ;;  %v3762_v56 = vld [vmem:[%s8384_s3 + $0x160] sm:$0xff] }
  0x15   :  { %9076 = vst [vmem:[#allocation20_spill] sm:$0xff] %v3762_v56  ;;  %v3769_v57 = vld [vmem:[%s8384_s3 + $0x128] sm:$0xff]  ;;  %v3774_v58 = vld [vmem:[%s8384_s3 + $0x138] sm:$0xff]  ;;  %v3781_v59 = vld [vmem:[%s8384_s3 + $0x120] sm:$0xff] }
  0x16   :  { %2813 = vmatmul.mubr.msk.f32.vlgmr.msra.gmra.mxu1 %vm75_vm0, %v23_v5  ;;  %2821 = vmatmul.mubr.msk.f32.vlgmr.msra.gmra.mxu0 %vm75_vm0, %v23_v5  ;;  %9077 = vst [vmem:[#allocation21_spill] sm:$0xff] %v3774_v58  ;;  %v3786_v60 = vld [vmem:[%s8384_s3 + $0x130] sm:$0xff]  ;;  %v3793_v61 = vld [vmem:[%s8384_s3 + $0xf8] sm:$0xff]  ;;  %v3798_v62 = vld [vmem:[%s8384_s3 + $0x108] sm:$0xff] }
  0x17   :  { %696 = vmatpush1.msra.mxu1 %v3567_v23  ;;  %767 = vmatpush1.msra.mxu0 %v3572_v24  ;;  %9078 = vst [vmem:[#allocation22_spill] sm:$0xff] %v3786_v60  ;;  %9079 = vst [vmem:[#allocation23_spill] sm:$0xff] %v3798_v62  ;;  %v3805_v63 = vld [vmem:[%s8384_s3 + $0xf0] sm:$0xff]  ;;  %v3810_v0 = vld [vmem:[%s8384_s3 + $0x100] sm:$0xff] }
  0x18   :  { %697 = vmatprep.subr.mxu1 %v3577_v25  ;;  %768 = vmatprep.subr.mxu0 %v3582_v26  ;;  %9080 = vst [vmem:[#allocation24_spill] sm:$0xff] %v3810_v0  ;;  %v3817_v1 = vld [vmem:[%s8384_s3 + $0xc8] sm:$0xff]  ;;  %v3822_v2 = vld [vmem:[%s8384_s3 + $0xd8] sm:$0xff]  ;;  %v3829_v4 = vld [vmem:[%s8384_s3 + $0xc0] sm:$0xff] }
  0x19   :  { %698 = vmatpush1.msra.mxu1 %v3589_v27  ;;  %769 = vmatpush1.msra.mxu0 %v3594_v28  ;;  %9081 = vst [vmem:[#allocation25_spill] sm:$0xff] %v3822_v2  ;;  %v3834_v5 = vld [vmem:[%s8384_s3 + $0xd0] sm:$0xff]  ;;  %v3841_v7 = vld [vmem:[%s8384_s3 + $0x98] sm:$0xff]  ;;  %v3846_v8 = vld [vmem:[%s8384_s3 + $0xa8] sm:$0xff] }
  0x1a   :  { %699 = vmatprep.subr.mxu1 %v3601_v29  ;;  %770 = vmatprep.subr.mxu0 %v3606_v30  ;;  %9082 = vst [vmem:[#allocation26_spill] sm:$0xff] %v3834_v5  ;;  %9083 = vst [vmem:[#allocation27_spill] sm:$0xff] %v3846_v8  ;;  %v3853_v9 = vld [vmem:[%s8384_s3 + $0x90] sm:$0xff]  ;;  %v3858_v10 = vld [vmem:[%s8384_s3 + $0xa0] sm:$0xff] }
  0x1b   :  { %700 = vmatpush1.msra.mxu1 %v3613_v31  ;;  %771 = vmatpush1.msra.mxu0 %v3618_v32  ;;  %9084 = vst [vmem:[#allocation28_spill] sm:$0xff] %v3858_v10  ;;  %v3865_v13 = vld [vmem:[%s8384_s3 + $0x68] sm:$0xff]  ;;  %v3870_v14 = vld [vmem:[%s8384_s3 + $0x78] sm:$0xff]  ;;  %v3877_v15 = vld [vmem:[%s8384_s3 + $0x60] sm:$0xff] }
  0x1c   :  { %701 = vmatprep.subr.mxu1 %v3625_v33  ;;  %772 = vmatprep.subr.mxu0 %v3630_v34  ;;  %9085 = vst [vmem:[#allocation29_spill] sm:$0xff] %v3870_v14  ;;  %v3882_v19 = vld [vmem:[%s8384_s3 + $0x70] sm:$0xff]  ;;  %v3889_v3 = vld [vmem:[%s8384_s3 + $0x38] sm:$0xff]  ;;  %v4168_v34 = vld [vmem:[%s8384_s3 + $0x460] sm:$0xff] }
  0x1d   :  { %702 = vmatpush1.msra.mxu1 %v3637_v35  ;;  %773 = vmatpush1.msra.mxu0 %v3642_v36  ;;  %9086 = vst [vmem:[#allocation30_spill] sm:$0xff] %v3882_v19  ;;  %v4142_v36 = vld [vmem:[%s8384_s3 + $0x490] sm:$0xff]  ;;  %9109 = vst [vmem:[#allocation52_spill] sm:$0xff] %v4168_v34  ;;  %v4182_v32 = vld [vmem:[%s8384_s3 + $0x438] sm:$0xff] }
  0x1e   :  { %703 = vmatprep.subr.mxu1 %v3649_v37  ;;  %774 = vmatprep.subr.mxu0 %v3654_v38  ;;  %v4128_v38 = vld [vmem:[%s8384_s3 + $0x498] sm:$0xff]  ;;  %9107 = vst [vmem:[#allocation50_spill] sm:$0xff] %v4142_v36  ;;  %9110 = vst [vmem:[#allocation53_spill] sm:$0xff] %v4182_v32  ;;  %v4196_v30 = vld [vmem:[%s8384_s3 + $0x430] sm:$0xff] }
  0x1f   :  { %704 = vmatpush1.msra.mxu1 %v3661_v39  ;;  %775 = vmatpush1.msra.mxu0 %v3666_v40  ;;  %v4114_v40 = vld [vmem:[%s8384_s3 + $0x4c0] sm:$0xff]  ;;  %9106 = vst [vmem:[#allocation49_spill] sm:$0xff] %v4128_v38  ;;  %9111 = vst [vmem:[#allocation54_spill] sm:$0xff] %v4196_v30  ;;  %v4236_v26 = vld [vmem:[%s8384_s3 + $0x3d8] sm:$0xff] }
  0x20   :  { %705 = vmatprep.subr.mxu1 %v3673_v41  ;;  %776 = vmatprep.subr.mxu0 %v3678_v42  ;;  %v4088_v42 = vld [vmem:[%s8384_s3 + $0x4f0] sm:$0xff]  ;;  %9105 = vst [vmem:[#allocation48_spill] sm:$0xff] %v4114_v40  ;;  %v4222_v28 = vld [vmem:[%s8384_s3 + $0x400] sm:$0xff]  ;;  %9115 = vst [vmem:[#allocation58_spill] sm:$0xff] %v4236_v26 }
  0x21   :  { %706 = vmatpush1.msra.mxu1 %v3685_v43  ;;  %777 = vmatpush1.msra.mxu0 %v3690_v44  ;;  %v4074_v44 = vld [vmem:[%s8384_s3 + $0x4f8] sm:$0xff]  ;;  %9103 = vst [vmem:[#allocation46_spill] sm:$0xff] %v4088_v42  ;;  %9113 = vst [vmem:[#allocation56_spill] sm:$0xff] %v4222_v28  ;;  %v4250_v24 = vld [vmem:[%s8384_s3 + $0x3d0] sm:$0xff] }
  0x22   :  { %707 = vmatprep.subr.mxu1 %v3697_v45  ;;  %778 = vmatprep.subr.mxu0 %v3702_v46  ;;  %v4060_v46 = vld [vmem:[%s8384_s3 + $0x520] sm:$0xff]  ;;  %9102 = vst [vmem:[#allocation45_spill] sm:$0xff] %v4074_v44  ;;  %9117 = vst [vmem:[#allocation60_spill] sm:$0xff] %v4250_v24 }
  0x23   :  { %708 = vmatpush1.msra.mxu1 %v3709_v47  ;;  %779 = vmatpush1.msra.mxu0 %v3714_v48  ;;  %v4034_v48 = vld [vmem:[%s8384_s3 + $0x550] sm:$0xff]  ;;  %9101 = vst [vmem:[#allocation44_spill] sm:$0xff] %v4060_v46  ;;  %v4276_v20 = vld [vmem:[%s8384_s3 + $0x3a0] sm:$0xff] }
  0x24   :  { %709 = vmatprep.subr.mxu1 %v3721_v49  ;;  %780 = vmatprep.subr.mxu0 %v3726_v50  ;;  %v4020_v50 = vld [vmem:[%s8384_s3 + $0x558] sm:$0xff]  ;;  %9099 = vst [vmem:[#allocation42_spill] sm:$0xff] %v4034_v48  ;;  %9119 = vst [vmem:[#allocation62_spill] sm:$0xff] %v4276_v20 }
  0x25   :  { %710 = vmatpush1.msra.mxu1 %v3733_v51  ;;  %781 = vmatpush1.msra.mxu0 %v3738_v52  ;;  %v4006_v52 = vld [vmem:[%s8384_s3 + $0x580] sm:$0xff]  ;;  %9098 = vst [vmem:[#allocation41_spill] sm:$0xff] %v4020_v50 }
  0x26   :  { %711 = vmatprep.subr.mxu1 %v3745_v53  ;;  %782 = vmatprep.subr.mxu0 %v3750_v54  ;;  %v9095_v54 = vmov 0.0   ;;  %9097 = vst [vmem:[#allocation40_spill] sm:$0xff] %v4006_v52 }
  0x27   :  { %712 = vmatpush1.msra.mxu1 %v3757_v55  ;;  %783 = vmatpush1.msra.mxu0 %v3762_v56  ;;  %v3980_v56 = vld [vmem:[%s8384_s3 + $0x5b0] sm:$0xff] }
  0x28   :  { %713 = vmatprep.subr.mxu1 %v3769_v57  ;;  %784 = vmatprep.subr.mxu0 %v3774_v58  ;;  %v3961_v58 = vld [vmem:[%s8384_s3 + $0x5a8] sm:$0xff]  ;;  %9094 = vst [vmem:[#allocation38_spill] sm:$0xff] %v3980_v56 }
  0x29   :  { %714 = vmatpush1.msra.mxu1 %v3781_v59  ;;  %785 = vmatpush1.msra.mxu0 %v3786_v60  ;;  %v3949_v60 = vld [vmem:[%s8384_s3 + $0x5d0] sm:$0xff] }
  0x2a   :  { %715 = vmatprep.subr.mxu1 %v3793_v61  ;;  %786 = vmatprep.subr.mxu0 %v3798_v62  ;;  %v3937_v62 = vld [vmem:[%s8384_s3 + $0x5d8] sm:$0xff] }
  0x2b   :  { %716 = vmatpush1.msra.mxu1 %v3805_v63  ;;  %787 = vmatpush1.msra.mxu0 %v3810_v0  ;;  %v3925_v0 = vld [vmem:[%s8384_s3] sm:$0xff] }
  0x2c   :  { %717 = vmatprep.subr.mxu1 %v3817_v1  ;;  %788 = vmatprep.subr.mxu0 %v3822_v2  ;;  %v3913_v2 = vld [vmem:[%s8384_s3 + $0x8] sm:$0xff] }
  0x2d   :  { %718 = vmatpush1.msra.mxu1 %v3829_v4  ;;  %789 = vmatpush1.msra.mxu0 %v3834_v5  ;;  %v3901_v5 = vld [vmem:[%s8384_s3 + $0x30] sm:$0xff] }
  0x2e   :  { %719 = vmatprep.subr.mxu1 %v3841_v7  ;;  %790 = vmatprep.subr.mxu0 %v3846_v8  ;;  %v3894_v8 = vld [vmem:[%s8384_s3 + $0x48] sm:$0xff] }
  0x2f   :  { %720 = vmatpush1.msra.mxu1 %v3853_v9  ;;  %791 = vmatpush1.msra.mxu0 %v3858_v10  ;;  %9087 = vst [vmem:[#allocation31_spill] sm:$0xff] %v3894_v8  ;;  %v3906_v10 = vld [vmem:[%s8384_s3 + $0x40] sm:$0xff] }
  0x30   :  { %721 = vmatprep.subr.mxu1 %v3865_v13  ;;  %792 = vmatprep.subr.mxu0 %v3870_v14  ;;  %9088 = vst [vmem:[#allocation32_spill] sm:$0xff] %v3906_v10  ;;  %v3918_v14 = vld [vmem:[%s8384_s3 + $0x18] sm:$0xff] }
  0x31   :  { %722 = vmatpush1.msra.mxu1 %v3877_v15  ;;  %793 = vmatpush1.msra.mxu0 %v3882_v19  ;;  %9089 = vst [vmem:[#allocation33_spill] sm:$0xff] %v3918_v14  ;;  %v3930_v19 = vld [vmem:[%s8384_s3 + $0x10] sm:$0xff] }
  0x32   :  { %723 = vmatprep.subr.mxu1 %v3889_v3  ;;  %794 = vmatprep.subr.mxu0 %v3894_v8  ;;  %9090 = vst [vmem:[#allocation34_spill] sm:$0xff] %v3930_v19  ;;  %v3942_v8 = vld [vmem:[%s8384_s3 + $0x5e8] sm:$0xff] }
  0x33   :  { %724 = vmatpush1.msra.mxu1 %v3901_v5  ;;  %795 = vmatpush1.msra.mxu0 %v3906_v10  ;;  %9091 = vst [vmem:[#allocation35_spill] sm:$0xff] %v3942_v8  ;;  %v3954_v10 = vld [vmem:[%s8384_s3 + $0x5e0] sm:$0xff] }
  0x34   :  { %725 = vmatprep.subr.mxu1 %v3913_v2  ;;  %796 = vmatprep.subr.mxu0 %v3918_v14  ;;  %9092 = vst [vmem:[#allocation36_spill] sm:$0xff] %v3954_v10  ;;  %v3966_v14 = vld [vmem:[%s8384_s3 + $0x5b8] sm:$0xff] }
  0x35   :  { %726 = vmatpush1.msra.mxu1 %v3925_v0  ;;  %797 = vmatpush1.msra.mxu0 %v3930_v19  ;;  %9093 = vst [vmem:[#allocation37_spill] sm:$0xff] %v3966_v14  ;;  %v3975_v19 = vld [vmem:[%s8384_s3 + $0x5a0] sm:$0xff] }
  0x36   :  { %727 = vmatprep.subr.mxu1 %v3937_v62  ;;  %798 = vmatprep.subr.mxu0 %v3942_v8  ;;  %v3994_v8 = vld [vmem:[%s8384_s3 + $0x588] sm:$0xff] }
  0x37   :  { %728 = vmatpush2.msra.mxu1 %v3949_v60  ;;  %799 = vmatpush2.msra.mxu0 %v3954_v10  ;;  %v3989_v10 = vld [vmem:[%s8384_s3 + $0x578] sm:$0xff]  ;;  %9096 = vst [vmem:[#allocation39_spill] sm:$0xff] %v3994_v8 }
  0x38   :  { %729 = vmatprep.subr.mxu1 %v3961_v58  ;;  %800 = vmatprep.subr.mxu0 %v3966_v14  ;;  %v4001_v14 = vld [vmem:[%s8384_s3 + $0x570] sm:$0xff] }
  0x39   :  { %283 = vmatprep.mubr.f32.mxu1 %v9095_v54  ;;  %396 = vmatprep.mubr.f32.mxu0 %v9095_v54 }
  0x3a   :  { %730 = vmatpush2.msra.mxu1 %v3975_v19  ;;  %801 = vmatpush2.msra.mxu0 %v3980_v56  ;;  %v4015_v56 = vld [vmem:[%s8384_s3 + $0x548] sm:$0xff] }
  0x3b   :  { %2814 = vmatmul.mubr.msk.f32.gmra.mxu1 %vm75_vm0, %v3494_v11  ;;  %2822 = vmatmul.mubr.msk.f32.gmra.mxu0 %vm75_vm0, %v3494_v11  ;;  %v4029_v11 = vld [vmem:[%s8384_s3 + $0x540] sm:$0xff] }
  0x3c   :  { %731 = vmatprep.subr.mxu1 %v3989_v10  ;;  %802 = vmatprep.subr.mxu0 %v3994_v8  ;;  %v4048_v8 = vld [vmem:[%s8384_s3 + $0x528] sm:$0xff] }
  0x3d   :  { %732 = vmatpush2.msra.mxu1 %v4001_v14  ;;  %803 = vmatpush2.msra.mxu0 %v4006_v52  ;;  %v4043_v52 = vld [vmem:[%s8384_s3 + $0x518] sm:$0xff]  ;;  %9100 = vst [vmem:[#allocation43_spill] sm:$0xff] %v4048_v8 }
  0x3e   :  { %733 = vmatprep.subr.mxu1 %v4015_v56  ;;  %804 = vmatprep.subr.mxu0 %v4020_v50  ;;  %v4055_v50 = vld [vmem:[%s8384_s3 + $0x510] sm:$0xff] }
  0x3f   :  { %289 = vmatprep.mubr.f32.mxu1 %v9095_v54  ;;  %402 = vmatprep.mubr.f32.mxu0 %v9095_v54 }
  0x40   :  { %734 = vmatpush2.msra.mxu1 %v4029_v11  ;;  %805 = vmatpush2.msra.mxu0 %v4034_v48  ;;  %v4069_v48 = vld [vmem:[%s8384_s3 + $0x4e8] sm:$0xff] }
  0x41   :  { %2815 = vmatmul.mubr.msk.f32.gmra.mxu1 %vm75_vm0, %v3525_v17  ;;  %2823 = vmatmul.mubr.msk.f32.gmra.mxu0 %vm75_vm0, %v3525_v17  ;;  %v4083_v17 = vld [vmem:[%s8384_s3 + $0x4e0] sm:$0xff] }
  0x42   :  { %735 = vmatprep.subr.mxu1 %v4043_v52  ;;  %806 = vmatprep.subr.mxu0 %v4048_v8  ;;  %v4102_v8 = vld [vmem:[%s8384_s3 + $0x4c8] sm:$0xff] }
  0x43   :  { %736 = vmatpush2.msra.mxu1 %v4055_v50  ;;  %807 = vmatpush2.msra.mxu0 %v4060_v46  ;;  %v4097_v46 = vld [vmem:[%s8384_s3 + $0x4b8] sm:$0xff]  ;;  %9104 = vst [vmem:[#allocation47_spill] sm:$0xff] %v4102_v8 }
  0x44   :  { %737 = vmatprep.subr.mxu1 %v4069_v48  ;;  %808 = vmatprep.subr.mxu0 %v4074_v44  ;;  %v4109_v44 = vld [vmem:[%s8384_s3 + $0x4b0] sm:$0xff] }
  0x45   :  { %295 = vmatprep.mubr.f32.mxu1 %v9095_v54  ;;  %408 = vmatprep.mubr.f32.mxu0 %v9095_v54 }
  0x46   :  { %738 = vmatpush2.msra.mxu1 %v4083_v17  ;;  %809 = vmatpush2.msra.mxu0 %v4088_v42  ;;  %v4123_v42 = vld [vmem:[%s8384_s3 + $0x488] sm:$0xff] }
  0x47   :  { %2816 = vmatmul.mubr.msk.f32.gmra.mxu1 %vm75_vm0, %v3550_v21  ;;  %2824 = vmatmul.mubr.msk.f32.gmra.mxu0 %vm75_vm0, %v3550_v21  ;;  %v4137_v21 = vld [vmem:[%s8384_s3 + $0x480] sm:$0xff] }
  0x48   :  { %739 = vmatprep.subr.mxu1 %v4097_v46  ;;  %810 = vmatprep.subr.mxu0 %v4102_v8  ;;  %v4156_v8 = vld [vmem:[%s8384_s3 + $0x468] sm:$0xff] }
  0x49   :  { %740 = vmatpush2.msra.mxu1 %v4109_v44  ;;  %811 = vmatpush2.msra.mxu0 %v4114_v40  ;;  %v4151_v40 = vld [vmem:[%s8384_s3 + $0x458] sm:$0xff]  ;;  %9108 = vst [vmem:[#allocation51_spill] sm:$0xff] %v4156_v8 }
  0x4a   :  { %741 = vmatprep.subr.mxu1 %v4123_v42  ;;  %812 = vmatprep.subr.mxu0 %v4128_v38  ;;  %v4163_v38 = vld [vmem:[%s8384_s3 + $0x450] sm:$0xff] }
  0x4b   :  { %301 = vmatprep.mubr.f32.mxu1 %v9095_v54  ;;  %414 = vmatprep.mubr.f32.mxu0 %v9095_v54 }
  0x4c   :  { %742 = vmatpush2.msra.mxu1 %v4137_v21  ;;  %813 = vmatpush2.msra.mxu0 %v4142_v36  ;;  %v4177_v36 = vld [vmem:[%s8384_s3 + $0x428] sm:$0xff] }
  0x4d   :  { %2817 = vmatmul.mubr.msk.f32.gmra.mxu1 %vm75_vm0, %v3473_v6  ;;  %2825 = vmatmul.mubr.msk.f32.gmra.mxu0 %vm75_vm0, %v3473_v6  ;;  %v4191_v6 = vld [vmem:[%s8384_s3 + $0x420] sm:$0xff] }
  0x4e   :  { %743 = vmatprep.subr.mxu1 %v4151_v40  ;;  %814 = vmatprep.subr.mxu0 %v4156_v8  ;;  %v4210_v8 = vld [vmem:[%s8384_s3 + $0x408] sm:$0xff] }
  0x4f   :  { %744 = vmatpush2.msra.mxu1 %v4163_v38  ;;  %815 = vmatpush2.msra.mxu0 %v4168_v34  ;;  %v4205_v34 = vld [vmem:[%s8384_s3 + $0x3f8] sm:$0xff]  ;;  %9112 = vst [vmem:[#allocation55_spill] sm:$0xff] %v4210_v8 }
  0x50   :  { %745 = vmatprep.subr.mxu1 %v4177_v36  ;;  %816 = vmatprep.subr.mxu0 %v4182_v32  ;;  %v4217_v32 = vld [vmem:[%s8384_s3 + $0x3f0] sm:$0xff] }
  0x51   :  { %307 = vmatprep.mubr.f32.mxu1 %v9095_v54  ;;  %420 = vmatprep.mubr.f32.mxu0 %v9095_v54 }
  0x52   :  { %746 = vmatpush2.msra.mxu1 %v4191_v6  ;;  %817 = vmatpush2.msra.mxu0 %v4196_v30  ;;  %v4231_v30 = vld [vmem:[%s8384_s3 + $0x3c8] sm:$0xff] }
  0x53   :  { %2818 = vmatmul.mubr.msk.f32.gmra.mxu1 %vm75_vm0, %v3499_v12  ;;  %2826 = vmatmul.mubr.msk.f32.gmra.mxu0 %vm75_vm0, %v3499_v12  ;;  %9114 = vst [vmem:[#allocation57_spill] sm:$0xff] %v4231_v30  ;;  %v4245_v12 = vld [vmem:[%s8384_s3 + $0x3c0] sm:$0xff] }
  0x54   :  { %747 = vmatprep.subr.mxu1 %v4205_v34  ;;  %818 = vmatprep.subr.mxu0 %v4210_v8  ;;  %9116 = vst [vmem:[#allocation59_spill] sm:$0xff] %v4245_v12  ;;  %v4264_v8 = vld [vmem:[%s8384_s3 + $0x3a8] sm:$0xff] }
  0x55   :  { %748 = vmatpush2.msra.mxu1 %v4217_v32  ;;  %819 = vmatpush2.msra.mxu0 %v4222_v28  ;;  %v4259_v28 = vld [vmem:[%s8384_s3 + $0x398] sm:$0xff]  ;;  %9118 = vst [vmem:[#allocation61_spill] sm:$0xff] %v4264_v8 }
  0x56   :  { %749 = vmatprep.subr.mxu1 %v4231_v30  ;;  %820 = vmatprep.subr.mxu0 %v4236_v26  ;;  %v4271_v26 = vld [vmem:[%s8384_s3 + $0x390] sm:$0xff] }
  0x57   :  { %313 = vmatprep.mubr.f32.mxu1 %v9095_v54  ;;  %426 = vmatprep.mubr.f32.mxu0 %v9095_v54  ;;  %v4304_v30 = vld [vmem:[%s8384_s3 + $0x370] sm:$0xff] }
  0x58   :  { %750 = vmatpush2.msra.mxu1 %v4245_v12  ;;  %821 = vmatpush2.msra.mxu0 %v4250_v24  ;;  %v4285_v24 = vld [vmem:[%s8384_s3 + $0x368] sm:$0xff]  ;;  %v4290_v12 = vld [vmem:[%s8384_s3 + $0x378] sm:$0xff]  ;;  %9123 = vst [vmem:[#allocation66_spill] sm:$0xff] %v4304_v30 }
  0x59   :  { %2819 = vmatmul.mubr.msk.f32.gmra.mxu1 %vm75_vm0, %v3530_v18  ;;  %2827 = vmatmul.mubr.msk.f32.gmra.mxu0 %vm75_vm0, %v3530_v18  ;;  %9120 = vst [vmem:[#allocation63_spill] sm:$0xff] %v4285_v24  ;;  %9121 = vst [vmem:[#allocation64_spill] sm:$0xff] %v4290_v12  ;;  %v4299_v18 = vld [vmem:[%s8384_s3 + $0x360] sm:$0xff] }
  0x5a   :  { %751 = vmatprep.subr.mxu1 %v4259_v28  ;;  %822 = vmatprep.subr.mxu0 %v4264_v8  ;;  %9122 = vst [vmem:[#allocation65_spill] sm:$0xff] %v4299_v18  ;;  %v4318_v8 = vld [vmem:[%s8384_s3 + $0x348] sm:$0xff] }
  0x5b   :  { %752 = vmatpush2.msra.mxu1 %v4271_v26  ;;  %823 = vmatpush2.msra.mxu0 %v4276_v20  ;;  %v4313_v20 = vld [vmem:[%s8384_s3 + $0x338] sm:$0xff]  ;;  %9125 = vst [vmem:[#allocation68_spill] sm:$0xff] %v4318_v8 }
  0x5c   :  { %753 = vmatprep.subr.mxu1 %v4285_v24  ;;  %824 = vmatprep.subr.mxu0 %v4290_v12  ;;  %9124 = vst [vmem:[#allocation67_spill] sm:$0xff] %v4313_v20  ;;  %v4325_v12 = vld [vmem:[%s8384_s3 + $0x330] sm:$0xff]  ;;  %v4351_v24 = vld [vmem:[%s8384_s3 + $0x300] sm:$0xff] }
  0x5d   :  { %319 = vmatprep.mubr.f32.mxu1 %v9095_v54  ;;  %432 = vmatprep.mubr.f32.mxu0 %v9095_v54  ;;  %v4330_v54 = vld [vmem:[%s8384_s3 + $0x340] sm:$0xff]  ;;  %9128 = vst [vmem:[#allocation71_spill] sm:$0xff] %v4351_v24 }
  0x5e   :  { %754 = vmatpush2.msra.mxu1 %v4299_v18  ;;  %825 = vmatpush2.msra.mxu0 %v4304_v30  ;;  %9126 = vst [vmem:[#allocation69_spill] sm:$0xff] %v4330_v54  ;;  %v4339_v30 = vld [vmem:[%s8384_s3 + $0x308] sm:$0xff]  ;;  %v4344_v18 = vld [vmem:[%s8384_s3 + $0x318] sm:$0xff] }
  0x5f   :  { %2820 = vmatmul.mubr.msk.f32.gmra.mxu1 %vm75_vm0, %v3555_v22  ;;  %2828 = vmatmul.mubr.msk.f32.gmra.mxu0 %vm75_vm0, %v3555_v22  ;;  %9127 = vst [vmem:[#allocation70_spill] sm:$0xff] %v4344_v18  ;;  %v4356_v22 = vld [vmem:[%s8385_s1 + $0x8] sm:$0xff] }
  0x60   :  { %755 = vmatprep.subr.mxu1 %v4313_v20  ;;  %826 = vmatprep.subr.mxu0 %v4318_v8  ;;  %v4363_v20 = vld [vmem:[%s8384_s3 + $0x310] sm:$0xff]  ;;  %v4370_v8 = vld [vmem:[%s8385_s1] sm:$0xff] }
  0x61   :  { %756 = vmatpush2.msra.mxu1 %v4325_v12  ;;  %827 = vmatpush2.msra.mxu0 %v4330_v54  ;;  %9129 = vst [vmem:[#allocation72_spill] sm:$0xff] %v4363_v20  ;;  %9130 = vst [vmem:[#allocation73_spill] sm:$0xff] %v4370_v8  ;;  %v4377_v54 = vld [vmem:[%s8384_s3 + $0x2f8] sm:$0xff] }
  0x62   :  { %757 = vmatprep.subr.mxu1 %v4339_v30  ;;  %828 = vmatprep.subr.mxu0 %v4344_v18  ;;  %9131 = vst [vmem:[#allocation74_spill] sm:$0xff] %v4377_v54  ;;  %v4384_v18 = vld [vmem:[%s8384_s3 + $0x2f0] sm:$0xff] }
  0x63   :  { %758 = vmatpush2.msra.mxu1 %v4351_v24  ;;  %759 = vmatprep.mubr.f32.mxu1 %v4356_v22  ;;  %9132 = vst [vmem:[#allocation75_spill] sm:$0xff] %v4384_v18  ;;  %v4391_v24 = vld [vmem:[%s8384_s3 + $0x2c8] sm:$0xff] }
  0x64   :  { %829 = vmatpush2.msra.mxu0 %v4363_v20  ;;  %830 = vmatprep.mubr.f32.mxu0 %v4356_v22  ;;  %v4397_v20 = vld [vmem:[%s8384_s3 + $0x2c0] sm:$0xff] }
  0x65   :  { %760 = vmatmul.mubr.f32.vlgmr.msra.gmra.mxu1 %v4370_v8  ;;  %831 = vmatmul.mubr.f32.vlgmr.msra.gmra.mxu0 %v4370_v8  ;;  %v4404_v8 = vld [vmem:[%s8384_s3 + $0x298] sm:$0xff] }
  0x66   :  { %837 = vmatprep.subr.mxu1 %v4377_v54  ;;  %901 = vmatprep.mubr.f32.mxu1 %v4356_v22  ;;  %v4411_v54 = vld [vmem:[%s8384_s3 + $0x290] sm:$0xff] }
  0x67   :  { %838 = vmatpush1.msra.mxu1 %v4384_v18  ;;  %958 = vmatprep.subr.mxu0 %v3518_v16  ;;  %v4418_v18 = vld [vmem:[%s8384_s3 + $0x268] sm:$0xff]  ;;  %v4425_v16 = vld [vmem:[%s8384_s3 + $0x260] sm:$0xff] }
  0x68   :  { %839 = vmatprep.subr.mxu1 %v4391_v24  ;;  %959 = vmatpush1.msra.mxu0 %v3567_v23  ;;  %v4432_v23 = vld [vmem:[%s8384_s3 + $0x238] sm:$0xff] }
  0x69   :  { %840 = vmatpush1.msra.mxu1 %v4397_v20  ;;  %960 = vmatprep.subr.mxu0 %v3577_v25  ;;  %v4439_v25 = vld [vmem:[%s8384_s3 + $0x230] sm:$0xff] }
  0x6a   :  { %841 = vmatprep.subr.mxu1 %v4404_v8  ;;  %961 = vmatpush1.msra.mxu0 %v3589_v27  ;;  %v4446_v27 = vld [vmem:[%s8384_s3 + $0x208] sm:$0xff] }
  0x6b   :  { %842 = vmatpush1.msra.mxu1 %v4411_v54  ;;  %962 = vmatprep.subr.mxu0 %v3601_v29  ;;  %v4453_v29 = vld [vmem:[%s8384_s3 + $0x200] sm:$0xff] }
  0x6c   :  { %843 = vmatprep.subr.mxu1 %v4418_v18  ;;  %963 = vmatpush1.msra.mxu0 %v3613_v31  ;;  %v4460_v31 = vld [vmem:[%s8384_s3 + $0x1d8] sm:$0xff] }
  0x6d   :  { %844 = vmatpush1.msra.mxu1 %v4425_v16  ;;  %964 = vmatprep.subr.mxu0 %v3625_v33  ;;  %v4467_v33 = vld [vmem:[%s8384_s3 + $0x1d0] sm:$0xff] }
  0x6e   :  { %845 = vmatprep.subr.mxu1 %v4432_v23  ;;  %965 = vmatpush1.msra.mxu0 %v3637_v35  ;;  %v4474_v35 = vld [vmem:[%s8384_s3 + $0x1a8] sm:$0xff] }
  0x6f   :  { %846 = vmatpush1.msra.mxu1 %v4439_v25  ;;  %966 = vmatprep.subr.mxu0 %v3649_v37  ;;  %v4481_v37 = vld [vmem:[%s8384_s3 + $0x1a0] sm:$0xff] }
  0x70   :  { %847 = vmatprep.subr.mxu1 %v4446_v27  ;;  %967 = vmatpush1.msra.mxu0 %v3661_v39  ;;  %v4488_v39 = vld [vmem:[%s8384_s3 + $0x178] sm:$0xff] }
  0x71   :  { %848 = vmatpush1.msra.mxu1 %v4453_v29  ;;  %968 = vmatprep.subr.mxu0 %v3673_v41  ;;  %v4495_v41 = vld [vmem:[%s8384_s3 + $0x170] sm:$0xff] }
  0x72   :  { %849 = vmatprep.subr.mxu1 %v4460_v31  ;;  %969 = vmatpush1.msra.mxu0 %v3685_v43  ;;  %v4502_v43 = vld [vmem:[%s8384_s3 + $0x148] sm:$0xff] }
  0x73   :  { %850 = vmatpush1.msra.mxu1 %v4467_v33  ;;  %970 = vmatprep.subr.mxu0 %v3697_v45  ;;  %v4509_v45 = vld [vmem:[%s8384_s3 + $0x140] sm:$0xff] }
  0x74   :  { %851 = vmatprep.subr.mxu1 %v4474_v35  ;;  %971 = vmatpush1.msra.mxu0 %v3709_v47  ;;  %v4516_v47 = vld [vmem:[%s8384_s3 + $0x118] sm:$0xff] }
  0x75   :  { %852 = vmatpush1.msra.mxu1 %v4481_v37  ;;  %972 = vmatprep.subr.mxu0 %v3721_v49  ;;  %v4523_v49 = vld [vmem:[%s8384_s3 + $0x110] sm:$0xff] }
  0x76   :  { %853 = vmatprep.subr.mxu1 %v4488_v39  ;;  %973 = vmatpush1.msra.mxu0 %v3733_v51  ;;  %v4530_v51 = vld [vmem:[%s8384_s3 + $0xe8] sm:$0xff] }
  0x77   :  { %854 = vmatpush1.msra.mxu1 %v4495_v41  ;;  %974 = vmatprep.subr.mxu0 %v3745_v53  ;;  %v4537_v53 = vld [vmem:[%s8384_s3 + $0xe0] sm:$0xff] }
  0x78   :  { %855 = vmatprep.subr.mxu1 %v4502_v43  ;;  %975 = vmatpush1.msra.mxu0 %v3757_v55  ;;  %v4544_v55 = vld [vmem:[%s8384_s3 + $0xb8] sm:$0xff] }
  0x79   :  { %856 = vmatpush1.msra.mxu1 %v4509_v45  ;;  %976 = vmatprep.subr.mxu0 %v3769_v57  ;;  %v4551_v57 = vld [vmem:[%s8384_s3 + $0xb0] sm:$0xff] }
  0x7a   :  { %857 = vmatprep.subr.mxu1 %v4516_v47  ;;  %977 = vmatpush1.msra.mxu0 %v3781_v59  ;;  %v4558_v59 = vld [vmem:[%s8384_s3 + $0x88] sm:$0xff] }
  0x7b   :  { %858 = vmatpush1.msra.mxu1 %v4523_v49  ;;  %978 = vmatprep.subr.mxu0 %v3793_v61  ;;  %v4565_v61 = vld [vmem:[%s8384_s3 + $0x80] sm:$0xff] }
  0x7c   :  { %859 = vmatprep.subr.mxu1 %v4530_v51  ;;  %979 = vmatpush1.msra.mxu0 %v3805_v63  ;;  %v4572_v63 = vld [vmem:[%s8384_s3 + $0x58] sm:$0xff] }
  0x7d   :  { %860 = vmatpush1.msra.mxu1 %v4537_v53  ;;  %980 = vmatprep.subr.mxu0 %v3817_v1  ;;  %v4579_v1 = vld [vmem:[%s8384_s3 + $0x50] sm:$0xff] }
  0x7e   :  { %861 = vmatprep.subr.mxu1 %v4544_v55  ;;  %981 = vmatpush1.msra.mxu0 %v3829_v4  ;;  %v4586_v4 = vld [vmem:[%s8384_s3 + $0x28] sm:$0xff] }
  0x7f   :  { %862 = vmatpush1.msra.mxu1 %v4551_v57  ;;  %982 = vmatprep.subr.mxu0 %v3841_v7  ;;  %v4593_v7 = vld [vmem:[%s8384_s3 + $0x20] sm:$0xff] }
  0x80   :  { %863 = vmatprep.subr.mxu1 %v4558_v59  ;;  %983 = vmatpush1.msra.mxu0 %v3853_v9  ;;  %v4600_v9 = vld [vmem:[%s8384_s3 + $0x5f8] sm:$0xff] }
  0x81   :  { %864 = vmatpush1.msra.mxu1 %v4565_v61  ;;  %984 = vmatprep.subr.mxu0 %v3865_v13  ;;  %v4607_v13 = vld [vmem:[%s8384_s3 + $0x5f0] sm:$0xff] }
  0x82   :  { %865 = vmatprep.subr.mxu1 %v4572_v63  ;;  %985 = vmatpush1.msra.mxu0 %v3877_v15  ;;  %v4614_v15 = vld [vmem:[%s8384_s3 + $0x5c8] sm:$0xff] }
  0x83   :  { %866 = vmatpush1.msra.mxu1 %v4579_v1  ;;  %986 = vmatprep.subr.mxu0 %v3889_v3  ;;  %v4621_v3 = vld [vmem:[%s8384_s3 + $0x5c0] sm:$0xff] }
  0x84   :  { %867 = vmatprep.subr.mxu1 %v4586_v4  ;;  %987 = vmatpush1.msra.mxu0 %v3901_v5  ;;  %v4628_v5 = vld [vmem:[%s8384_s3 + $0x598] sm:$0xff] }
  0x85   :  { %868 = vmatpush1.msra.mxu1 %v4593_v7  ;;  %988 = vmatprep.subr.mxu0 %v3913_v2  ;;  %v4635_v2 = vld [vmem:[%s8384_s3 + $0x590] sm:$0xff] }
  0x86   :  { %869 = vmatprep.subr.mxu1 %v4600_v9  ;;  %989 = vmatpush1.msra.mxu0 %v3925_v0  ;;  %v4642_v0 = vld [vmem:[%s8384_s3 + $0x568] sm:$0xff] }
  0x87   :  { %870 = vmatpush2.msra.mxu1 %v4607_v13  ;;  %990 = vmatprep.subr.mxu0 %v3937_v62  ;;  %v4649_v62 = vld [vmem:[%s8384_s3 + $0x560] sm:$0xff] }
  0x88   :  { %871 = vmatprep.subr.mxu1 %v4614_v15  ;;  %991 = vmatpush2.msra.mxu0 %v3949_v60  ;;  %9133 = vst [vmem:[#allocation76_spill] sm:$0xff] %v4649_v62  ;;  %v4656_v60 = vld [vmem:[%s8384_s3 + $0x538] sm:$0xff] }
  0x89   :  { %872 = vmatpush2.msra.mxu1 %v4621_v3  ;;  %992 = vmatprep.subr.mxu0 %v3961_v58  ;;  %9134 = vst [vmem:[#allocation77_spill] sm:$0xff] %v4656_v60  ;;  %v4663_v58 = vld [vmem:[%s8384_s3 + $0x530] sm:$0xff] }
  0x8a   :  { %873 = vmatprep.subr.mxu1 %v4628_v5  ;;  %993 = vmatpush2.msra.mxu0 %v3975_v19  ;;  %9135 = vst [vmem:[#allocation78_spill] sm:$0xff] %v4663_v58  ;;  %v4670_v19 = vld [vmem:[%s8384_s3 + $0x508] sm:$0xff] }
  0x8b   :  { %874 = vmatpush2.msra.mxu1 %v4635_v2  ;;  %994 = vmatprep.subr.mxu0 %v3989_v10  ;;  %9136 = vst [vmem:[#allocation79_spill] sm:$0xff] %v4670_v19  ;;  %v4677_v10 = vld [vmem:[%s8384_s3 + $0x500] sm:$0xff] }
  0x8c   :  { %875 = vmatprep.subr.mxu1 %v4642_v0  ;;  %995 = vmatpush2.msra.mxu0 %v4001_v14  ;;  %9137 = vst [vmem:[#allocation80_spill] sm:$0xff] %v4677_v10  ;;  %v4684_v14 = vld [vmem:[%s8384_s3 + $0x4d8] sm:$0xff] }
  0x8d   :  { %876 = vmatpush2.msra.mxu1 %v4649_v62  ;;  %996 = vmatprep.subr.mxu0 %v4015_v56  ;;  %9138 = vst [vmem:[#allocation81_spill] sm:$0xff] %v4684_v14  ;;  %v4691_v56 = vld [vmem:[%s8384_s3 + $0x4d0] sm:$0xff] }
  0x8e   :  { %877 = vmatprep.subr.mxu1 %v4656_v60  ;;  %997 = vmatpush2.msra.mxu0 %v4029_v11  ;;  %9139 = vst [vmem:[#allocation82_spill] sm:$0xff] %v4691_v56  ;;  %v4698_v11 = vld [vmem:[%s8384_s3 + $0x4a8] sm:$0xff] }
  0x8f   :  { %878 = vmatpush2.msra.mxu1 %v4663_v58  ;;  %998 = vmatprep.subr.mxu0 %v4043_v52  ;;  %9140 = vst [vmem:[#allocation83_spill] sm:$0xff] %v4698_v11  ;;  %v4705_v52 = vld [vmem:[%s8384_s3 + $0x4a0] sm:$0xff] }
  0x90   :  { %879 = vmatprep.subr.mxu1 %v4670_v19  ;;  %999 = vmatpush2.msra.mxu0 %v4055_v50  ;;  %9141 = vst [vmem:[#allocation84_spill] sm:$0xff] %v4705_v52  ;;  %v4712_v50 = vld [vmem:[%s8384_s3 + $0x478] sm:$0xff] }
  0x91   :  { %880 = vmatpush2.msra.mxu1 %v4677_v10  ;;  %1000 = vmatprep.subr.mxu0 %v4069_v48  ;;  %9142 = vst [vmem:[#allocation85_spill] sm:$0xff] %v4712_v50  ;;  %v4719_v48 = vld [vmem:[%s8384_s3 + $0x470] sm:$0xff] }
  0x92   :  { %881 = vmatprep.subr.mxu1 %v4684_v14  ;;  %1001 = vmatpush2.msra.mxu0 %v4083_v17  ;;  %9143 = vst [vmem:[#allocation86_spill] sm:$0xff] %v4719_v48  ;;  %v4726_v17 = vld [vmem:[%s8384_s3 + $0x448] sm:$0xff] }
  0x93   :  { %882 = vmatpush2.msra.mxu1 %v4691_v56  ;;  %1002 = vmatprep.subr.mxu0 %v4097_v46  ;;  %9144 = vst [vmem:[#allocation87_spill] sm:$0xff] %v4726_v17  ;;  %v4733_v46 = vld [vmem:[%s8384_s3 + $0x440] sm:$0xff] }
  0x94   :  { %883 = vmatprep.subr.mxu1 %v4698_v11  ;;  %1003 = vmatpush2.msra.mxu0 %v4109_v44  ;;  %9145 = vst [vmem:[#allocation88_spill] sm:$0xff] %v4733_v46  ;;  %v4740_v44 = vld [vmem:[%s8384_s3 + $0x418] sm:$0xff] }
  0x95   :  { %884 = vmatpush2.msra.mxu1 %v4705_v52  ;;  %1004 = vmatprep.subr.mxu0 %v4123_v42  ;;  %9146 = vst [vmem:[#allocation89_spill] sm:$0xff] %v4740_v44  ;;  %v4747_v42 = vld [vmem:[%s8384_s3 + $0x410] sm:$0xff]  ;;  %v9204_v52 = vld [vmem:[#allocation39_spill] sm:$0xff] }
  0x96   :  { %885 = vmatprep.subr.mxu1 %v4712_v50  ;;  %1005 = vmatpush2.msra.mxu0 %v4137_v21  ;;  %9147 = vst [vmem:[#allocation90_spill] sm:$0xff] %v4747_v42  ;;  %v4754_v21 = vld [vmem:[%s8384_s3 + $0x3e8] sm:$0xff] }
  0x97   :  { %886 = vmatpush2.msra.mxu1 %v4719_v48  ;;  %1006 = vmatprep.subr.mxu0 %v4151_v40  ;;  %9148 = vst [vmem:[#allocation91_spill] sm:$0xff] %v4754_v21  ;;  %v4761_v40 = vld [vmem:[%s8384_s3 + $0x3e0] sm:$0xff] }
  0x98   :  { %887 = vmatprep.subr.mxu1 %v4726_v17  ;;  %1007 = vmatpush2.msra.mxu0 %v4163_v38  ;;  %9149 = vst [vmem:[#allocation92_spill] sm:$0xff] %v4761_v40  ;;  %v4768_v38 = vld [vmem:[%s8384_s3 + $0x3b8] sm:$0xff]  ;;  %v9198_v17 = vld [vmem:[#allocation35_spill] sm:$0xff] }
  0x99   :  { %888 = vmatpush2.msra.mxu1 %v4733_v46  ;;  %1008 = vmatprep.subr.mxu0 %v4177_v36  ;;  %9150 = vst [vmem:[#allocation93_spill] sm:$0xff] %v4768_v38  ;;  %v4775_v36 = vld [vmem:[%s8384_s3 + $0x3b0] sm:$0xff] }
  0x9a   :  { %889 = vmatprep.subr.mxu1 %v4740_v44  ;;  %1009 = vmatpush2.msra.mxu0 %v4191_v6  ;;  %9151 = vst [vmem:[#allocation94_spill] sm:$0xff] %v4775_v36  ;;  %v4782_v6 = vld [vmem:[%s8384_s3 + $0x388] sm:$0xff] }
  0x9b   :  { %890 = vmatpush2.msra.mxu1 %v4747_v42  ;;  %1010 = vmatprep.subr.mxu0 %v4205_v34  ;;  %9152 = vst [vmem:[#allocation95_spill] sm:$0xff] %v4782_v6  ;;  %v9153_v42 = vld [vmem:[#allocation57_spill] sm:$0xff]  ;;  %v4789_v34 = vld [vmem:[%s8384_s3 + $0x380] sm:$0xff]  ;;  %v9191_v44 = vld [vmem:[#allocation28_spill] sm:$0xff] }
  0x9c   :  { %891 = vmatprep.subr.mxu1 %v4754_v21  ;;  %1011 = vmatpush2.msra.mxu0 %v4217_v32  ;;  %9154 = vst [vmem:[#allocation57_spill] sm:$0xff] %v4789_v34  ;;  %v9155_v21 = vld [vmem:[#allocation59_spill] sm:$0xff]  ;;  %v4796_v32 = vld [vmem:[%s8384_s3 + $0x358] sm:$0xff] }
  0x9d   :  { %892 = vmatpush2.msra.mxu1 %v4761_v40  ;;  %1012 = vmatprep.subr.mxu0 %v9153_v42  ;;  %9156 = vst [vmem:[#allocation59_spill] sm:$0xff] %v4796_v32  ;;  %v4803_v42 = vld [vmem:[%s8384_s3 + $0x350] sm:$0xff]  ;;  %v9174_v40 = vld [vmem:[#allocation11_spill] sm:$0xff] }
  0x9e   :  { %893 = vmatprep.subr.mxu1 %v4768_v38  ;;  %1013 = vmatpush2.msra.mxu0 %v9155_v21  ;;  %9157 = vst [vmem:[#allocation96_spill] sm:$0xff] %v4803_v42  ;;  %v4810_v21 = vld [vmem:[%s8384_s3 + $0x328] sm:$0xff]  ;;  %v9166_v38 = vld [vmem:[#allocation71_spill] sm:$0xff] }
  0x9f   :  { %894 = vmatpush2.msra.mxu1 %v4775_v36  ;;  %1014 = vmatprep.subr.mxu0 %v4259_v28  ;;  %9158 = vst [vmem:[#allocation97_spill] sm:$0xff] %v4810_v21  ;;  %v9159_v36 = vld [vmem:[#allocation63_spill] sm:$0xff] }
  0xa0   :  { %895 = vmatprep.subr.mxu1 %v4782_v6  ;;  %1015 = vmatpush2.msra.mxu0 %v4271_v26  ;;  %v4817_v28 = vld [vmem:[%s8384_s3 + $0x320] sm:$0xff]  ;;  %v9161_v6 = vld [vmem:[#allocation65_spill] sm:$0xff] }
  0xa1   :  { %896 = vmatpush2.msra.mxu1 %v4789_v34  ;;  %1016 = vmatprep.subr.mxu0 %v9159_v36  ;;  %9160 = vst [vmem:[#allocation63_spill] sm:$0xff] %v4817_v28  ;;  %v9162_v26 = vld [vmem:[#allocation67_spill] sm:$0xff]  ;;  %v9163_v36 = vld [vmem:[#allocation73_spill] sm:$0xff]  ;;  %v9165_v34 = vld [vmem:[#allocation4_spill] sm:$0xff] }
  0xa2   :  { %897 = vmatprep.subr.mxu1 %v4796_v32  ;;  %1017 = vmatpush2.msra.mxu0 %v9161_v6  ;;  %v9164_v32 = vld [vmem:[#allocation3_spill] sm:$0xff]  ;;  %v9167_v6 = vld [vmem:[#allocation5_spill] sm:$0xff] }
  0xa3   :  { %898 = vmatpush2.msra.mxu1 %v4803_v42  ;;  %1018 = vmatprep.subr.mxu0 %v9162_v26  ;;  %v9168_v42 = vld [vmem:[#allocation74_spill] sm:$0xff] }
  0xa4   :  { %899 = vmatprep.subr.mxu1 %v4810_v21  ;;  %1019 = vmatpush2.msra.mxu0 %v4325_v12  ;;  %v9169_v26 = vld [vmem:[#allocation6_spill] sm:$0xff]  ;;  %v9170_v21 = vld [vmem:[#allocation7_spill] sm:$0xff]  ;;  %v9171_v12 = vld [vmem:[#allocation8_spill] sm:$0xff] }
  0xa5   :  { %900 = vmatpush2.msra.mxu1 %v4817_v28  ;;  %1020 = vmatprep.subr.mxu0 %v4339_v30  ;;  %v9172_v28 = vld [vmem:[#allocation9_spill] sm:$0xff]  ;;  %v9173_v30 = vld [vmem:[#allocation10_spill] sm:$0xff] }
  0xa6   :  { %902 = vmatmul.mubr.f32.vlgmr.msra.gmra.mxu1 %v9163_v36  ;;  %1029 = vmatprep.subr.mxu1 %v9164_v32  ;;  %v9175_v32 = vld [vmem:[#allocation12_spill] sm:$0xff] }
  0xa7   :  { %1030 = vmatpush1.msra.mxu1 %v9165_v34  ;;  %1021 = vmatpush2.msra.mxu0 %v9166_v38  ;;  %v9176_v34 = vld [vmem:[#allocation13_spill] sm:$0xff]  ;;  %v9177_v38 = vld [vmem:[#allocation14_spill] sm:$0xff] }
  0xa8   :  { %1031 = vmatprep.subr.mxu1 %v9167_v6  ;;  %1100 = vmatprep.subr.mxu0 %v9168_v42  ;;  %v9178_v6 = vld [vmem:[#allocation15_spill] sm:$0xff]  ;;  %v9179_v42 = vld [vmem:[#allocation16_spill] sm:$0xff] }
  0xa9   :  { %1032 = vmatpush1.msra.mxu1 %v9169_v26  ;;  %v9180_v26 = vld [vmem:[#allocation17_spill] sm:$0xff] }
  0xaa   :  { %1033 = vmatprep.subr.mxu1 %v9170_v21  ;;  %v9181_v21 = vld [vmem:[#allocation18_spill] sm:$0xff] }
  0xab   :  { %1034 = vmatpush1.msra.mxu1 %v9171_v12  ;;  %v9182_v12 = vld [vmem:[#allocation19_spill] sm:$0xff] }
  0xac   :  { %1035 = vmatprep.subr.mxu1 %v9172_v28  ;;  %v45_v28 = vlaneseq }
  0xad   :  { %1036 = vmatpush1.msra.mxu1 %v9173_v30  ;;  %v9183_v30 = vld [vmem:[#allocation20_spill] sm:$0xff] }
  0xae   :  { %1037 = vmatprep.subr.mxu1 %v9174_v40  ;;  %v9184_v40 = vld [vmem:[#allocation21_spill] sm:$0xff] }
  0xaf   :  { %1038 = vmatpush1.msra.mxu1 %v9175_v32  ;;  %v9185_v32 = vld [vmem:[#allocation22_spill] sm:$0xff] }
  0xb0   :  { %1039 = vmatprep.subr.mxu1 %v9176_v34  ;;  %v9186_v34 = vld [vmem:[#allocation23_spill] sm:$0xff] }
  0xb1   :  { %1040 = vmatpush1.msra.mxu1 %v9177_v38  ;;  %v4850_v38 = vshrl.u32 %v45_v28, 7 }
  0xb2   :  { %1041 = vmatprep.subr.mxu1 %v9178_v6  ;;  %v9187_v6 = vld [vmem:[#allocation24_spill] sm:$0xff] }
  0xb3   :  { %1042 = vmatpush1.msra.mxu1 %v9179_v42  ;;  %v9188_v42 = vld [vmem:[#allocation25_spill] sm:$0xff]  ;;  %v51_v28 = vsub.s32 1, %v4850_v38 }
  0xb4   :  { %1043 = vmatprep.subr.mxu1 %v9180_v26  ;;  %v9189_v26 = vld [vmem:[#allocation26_spill] sm:$0xff] }
  0xb5   :  { %1044 = vmatpush1.msra.mxu1 %v9181_v21  ;;  %v9190_v21 = vld [vmem:[#allocation27_spill] sm:$0xff] }
  0xb6   :  { %1045 = vmatprep.subr.mxu1 %v9182_v12  ;;  %v47_v12 = vsub.s32 0, %v4850_v38 }
  0xb7   :  { %1046 = vmatpush1.msra.mxu1 %v9183_v30  ;;  %v4861_v30 = vld [vmem:[%s8386_s4] sm:$0x3f] }
  0xb8   :  { %1047 = vmatprep.subr.mxu1 %v9184_v40  ;;  %v9192_v40 = vld [vmem:[#allocation29_spill] sm:$0xff] }
  0xb9   :  { %1048 = vmatpush1.msra.mxu1 %v9185_v32  ;;  %v9193_v32 = vld [vmem:[#allocation30_spill] sm:$0xff] }
  0xba   :  { %1049 = vmatprep.subr.mxu1 %v9186_v34  ;;  %v9194_v34 = vld [vmem:[#allocation31_spill] sm:$0xff] }
  0xbb   :  { %1050 = vmatpush1.msra.mxu1 %v9187_v6  ;;  %v4868_v6 = vrot.slane %v4861_v30, %v47_v12 }
  0xbc   :  { %1051 = vmatprep.subr.mxu1 %v9188_v42  ;;  %v9195_v42 = vld [vmem:[#allocation32_spill] sm:$0xff] }
  0xbd   :  { %1052 = vmatpush1.msra.mxu1 %v9189_v26  ;;  %v9196_v26 = vld [vmem:[#allocation33_spill] sm:$0xff] }
  0xbe   :  { %1053 = vmatprep.subr.mxu1 %v9190_v21  ;;  %v9197_v21 = vld [vmem:[#allocation34_spill] sm:$0xff] }
  0xbf   :  { %1054 = vmatpush1.msra.mxu1 %v9191_v44  ;;  %v4873_v44 = vrot.slane %v4861_v30, %v51_v28 }
  0xc0   :  { %1055 = vmatprep.subr.mxu1 %v9192_v40 }
  0xc1   :  { %1056 = vmatpush1.msra.mxu1 %v9193_v32 }
  0xc2   :  { %1057 = vmatprep.subr.mxu1 %v9194_v34  ;;  %v9200_v34 = vld [vmem:[#allocation36_spill] sm:$0xff] }
  0xc3   :  { %1058 = vmatpush1.msra.mxu1 %v9195_v42  ;;  %v9201_v42 = vld [vmem:[#allocation37_spill] sm:$0xff] }
  0xc4   :  { %1059 = vmatprep.subr.mxu1 %v9196_v26  ;;  %v9203_v26 = vld [vmem:[#allocation38_spill] sm:$0xff] }
  0xc5   :  { %1060 = vmatpush1.msra.mxu1 %v9197_v21 }
  0xc6   :  { %v190_v46 = vpop.f32.mrf.mxu1  ;;  %v4876_v40 = vpop.f32.mrf.mxu0  ;;  %1061 = vmatprep.subr.mxu1 %v9198_v17 }
  0xc7   :  { %v4880_v32 = vadd.f32 %v190_v46, %v4868_v6  ;;  %1062 = vmatpush2.msra.mxu1 %v9200_v34  ;;  %v9207_v34 = vld [vmem:[#allocation40_spill] sm:$0xff] }
  0xc8   :  { %v192_v12 = vpop.f32.mrf.mxu1  ;;  %v4883_v48 = vpop.f32.mrf.mxu0  ;;  %1063 = vmatprep.subr.mxu1 %v9201_v42  ;;  %v9208_v42 = vld [vmem:[#allocation41_spill] sm:$0xff] }
  0xc9   :  { %9199 = vst [vmem:[#allocation65_spill] sm:$0xff] %v4880_v32  ;;  %v4887_v28 = vadd.f32 %v192_v12, %v4873_v44  ;;  %1064 = vmatpush2.msra.mxu1 %v9203_v26  ;;  %v169_v58 = vadd.f32 %v4883_v48, %v4873_v44 }
  0xca   :  { %v196_v21 = vpop.f32.mrf.mxu1  ;;  %v172_v50 = vpop.f32.mrf.mxu0  ;;  %1065 = vmatprep.subr.mxu1 %v9204_v52 }
  0xcb   :  { %9202 = vst [vmem:[#allocation67_spill] sm:$0xff] %v4887_v28  ;;  %v4892_v17 = vadd.f32 %v196_v21, %v4868_v6  ;;  %v4895_v46 = vadd.f32 %v172_v50, %v4868_v6  ;;  %1066 = vmatpush2.msra.mxu1 %v9207_v34  ;;  %v9211_v28 = vld [vmem:[#allocation42_spill] sm:$0xff] }
  0xcc   :  { %v198_v32 = vpop.f32.mrf.mxu1  ;;  %v174_v11 = vpop.f32.mrf.mxu0  ;;  %1067 = vmatprep.subr.mxu1 %v9208_v42 }
  0xcd   :  { %9205 = vst [vmem:[#allocation73_spill] sm:$0xff] %v4892_v17  ;;  %9206 = vst [vmem:[#allocation3_spill] sm:$0xff] %v4895_v46  ;;  %v4900_v12 = vadd.f32 %v198_v32, %v4873_v44  ;;  %v4903_v26 = vadd.f32 %v174_v11, %v4873_v44  ;;  %1068 = vmatpush2.msra.mxu1 %v9211_v28  ;;  %v9212_v17 = vld [vmem:[#allocation43_spill] sm:$0xff]  ;;  %v9215_v46 = vld [vmem:[#allocation44_spill] sm:$0xff] }
  0xce   :  { %v202_v52 = vpop.f32.mrf.mxu1  ;;  %v178_v21 = vpop.f32.mrf.mxu0  ;;  %1069 = vmatprep.subr.mxu1 %v9212_v17 }
  0xcf   :  { %9209 = vst [vmem:[#allocation4_spill] sm:$0xff] %v4900_v12  ;;  %9210 = vst [vmem:[#allocation71_spill] sm:$0xff] %v4903_v26  ;;  %v4908_v50 = vadd.f32 %v202_v52, %v4868_v6  ;;  %v4911_v34 = vadd.f32 %v178_v21, %v4868_v6  ;;  %1070 = vmatpush2.msra.mxu1 %v9215_v46  ;;  %v9216_v12 = vld [vmem:[#allocation45_spill] sm:$0xff]  ;;  %v9219_v26 = vld [vmem:[#allocation46_spill] sm:$0xff] }
  0xd0   :  { %v204_v42 = vpop.f32.mrf.mxu1  ;;  %v180_v32 = vpop.f32.mrf.mxu0  ;;  %1071 = vmatprep.subr.mxu1 %v9216_v12 }
  0xd1   :  { %9213 = vst [vmem:[#allocation5_spill] sm:$0xff] %v4908_v50  ;;  %9214 = vst [vmem:[#allocation74_spill] sm:$0xff] %v4911_v34  ;;  %v4916_v11 = vadd.f32 %v204_v42, %v4873_v44  ;;  %v4919_v28 = vadd.f32 %v180_v32, %v4873_v44  ;;  %1072 = vmatpush2.msra.mxu1 %v9219_v26  ;;  %v9220_v50 = vld [vmem:[#allocation47_spill] sm:$0xff]  ;;  %v9223_v34 = vld [vmem:[#allocation48_spill] sm:$0xff] }
  0xd2   :  { %v208_v17 = vpop.f32.mrf.mxu1  ;;  %v184_v52 = vpop.f32.mrf.mxu0  ;;  %1073 = vmatprep.subr.mxu1 %v9220_v50  ;;  %v9228_v50 = vld [vmem:[#allocation51_spill] sm:$0xff] }
  0xd3   :  { %9217 = vst [vmem:[#allocation6_spill] sm:$0xff] %v4916_v11  ;;  %9218 = vst [vmem:[#allocation7_spill] sm:$0xff] %v4919_v28  ;;  %v4924_v21 = vadd.f32 %v208_v17, %v4868_v6  ;;  %v4927_v46 = vadd.f32 %v184_v52, %v4868_v6  ;;  %1074 = vmatpush2.msra.mxu1 %v9223_v34  ;;  %v9224_v11 = vld [vmem:[#allocation49_spill] sm:$0xff]  ;;  %v9227_v28 = vld [vmem:[#allocation50_spill] sm:$0xff] }
  0xd4   :  { %v210_v12 = vpop.f32.mrf.mxu1  ;;  %v186_v42 = vpop.f32.mrf.mxu0  ;;  %1075 = vmatprep.subr.mxu1 %v9224_v11  ;;  %v9229_v17 = vld [vmem:[#allocation52_spill] sm:$0xff]  ;;  %v9230_v52 = vld [vmem:[#allocation53_spill] sm:$0xff]  ;;  %v9232_v34 = vld [vmem:[#allocation55_spill] sm:$0xff] }
  0xd5   :  { %9221 = vst [vmem:[#allocation8_spill] sm:$0xff] %v4924_v21  ;;  %9222 = vst [vmem:[#allocation9_spill] sm:$0xff] %v4927_v46  ;;  %v4932_v32 = vadd.f32 %v210_v12, %v4873_v44  ;;  %v4935_v26 = vadd.f32 %v186_v42, %v4873_v44  ;;  %1076 = vmatpush2.msra.mxu1 %v9227_v28  ;;  %v9231_v21 = vld [vmem:[#allocation54_spill] sm:$0xff]  ;;  %v9233_v46 = vld [vmem:[#allocation56_spill] sm:$0xff] }
  0xd6   :  { %1077 = vmatprep.subr.mxu1 %v9228_v50  ;;  %v9234_v11 = vld [vmem:[#allocation58_spill] sm:$0xff]  ;;  %v9235_v12 = vld [vmem:[#allocation60_spill] sm:$0xff]  ;;  %v9236_v42 = vld [vmem:[#allocation61_spill] sm:$0xff] }
  0xd7   :  { %9225 = vst [vmem:[#allocation10_spill] sm:$0xff] %v4932_v32  ;;  %9226 = vst [vmem:[#allocation11_spill] sm:$0xff] %v4935_v26  ;;  %1078 = vmatpush2.msra.mxu1 %v9229_v17  ;;  %v9237_v32 = vld [vmem:[#allocation62_spill] sm:$0xff]  ;;  %v9238_v28 = vld [vmem:[#allocation64_spill] sm:$0xff] }
  0xd8   :  { %1079 = vmatprep.subr.mxu1 %v9230_v52  ;;  %v9239_v50 = vld [vmem:[#allocation66_spill] sm:$0xff]  ;;  %v9240_v17 = vld [vmem:[#allocation68_spill] sm:$0xff]  ;;  %v9241_v52 = vld [vmem:[#allocation69_spill] sm:$0xff] }
  0xd9   :  { %1080 = vmatpush2.msra.mxu1 %v9231_v21  ;;  %v9242_v21 = vld [vmem:[#allocation70_spill] sm:$0xff] }
  0xda   :  { %1081 = vmatprep.subr.mxu1 %v9232_v34  ;;  %v9243_v34 = vld [vmem:[#allocation72_spill] sm:$0xff] }
  0xdb   :  { %1082 = vmatpush2.msra.mxu1 %v9233_v46  ;;  %v4957_v46 = vld [vmem:[%s8384_s3 + $0x2d8] sm:$0xff] }
  0xdc   :  { %1083 = vmatprep.subr.mxu1 %v9234_v11  ;;  %9244 = vst [vmem:[#allocation12_spill] sm:$0xff] %v4957_v46  ;;  %v4962_v11 = vpop.f32.mrf.mxu1 }
  0xdd   :  { %1084 = vmatpush2.msra.mxu1 %v9235_v12 }
  0xde   :  { %1085 = vmatprep.subr.mxu1 %v9236_v42  ;;  %v4966_v42 = vpop.f32.mrf.mxu1 }
  0xdf   :  { %1086 = vmatpush2.msra.mxu1 %v9237_v32  ;;  %v4960_v32 = vpop.f32.mrf.mxu0  ;;  %9247 = vst [vmem:[#allocation15_spill] sm:$0xff] %v4966_v42 }
  0xe0   :  { %1087 = vmatprep.subr.mxu1 %v9238_v28  ;;  %9245 = vst [vmem:[#allocation13_spill] sm:$0xff] %v4960_v32 }
  0xe1   :  { %1088 = vmatpush2.msra.mxu1 %v9239_v50  ;;  %v4964_v12 = vpop.f32.mrf.mxu0 }
  0xe2   :  { %1089 = vmatprep.subr.mxu1 %v9240_v17  ;;  %9246 = vst [vmem:[#allocation14_spill] sm:$0xff] %v4964_v12 }
  0xe3   :  { %1090 = vmatpush2.msra.mxu1 %v9241_v52 }
  0xe4   :  { %1091 = vmatprep.subr.mxu1 %v9242_v21 }
  0xe5   :  { %1092 = vmatpush2.msra.mxu1 %v9243_v34 }
  0xe6   :  { %1221 = vmatprep.subr.mxu1 %v4957_v46 }
  0xfb   :  { %v4968_v28 = vpop.f32.mrf.mxu1  ;;  %v4970_v50 = vpop.f32.mrf.mxu0 }
  0xfc   :  { %9248 = vst [vmem:[#allocation16_spill] sm:$0xff] %v4968_v28  ;;  %9249 = vst [vmem:[#allocation17_spill] sm:$0xff] %v4970_v50 }
  0xfd   :  { %v4972_v17 = vpop.f32.mrf.mxu1  ;;  %v4974_v52 = vpop.f32.mrf.mxu0 }
  0xfe   :  { %9250 = vst [vmem:[#allocation18_spill] sm:$0xff] %v4972_v17  ;;  %9251 = vst [vmem:[#allocation19_spill] sm:$0xff] %v4974_v52 }
 0x101   :  { %v4976_v21 = vpop.f32.mrf.mxu1  ;;  %v4978_v34 = vpop.f32.mrf.mxu0 }
 0x102   :  { %9252 = vst [vmem:[#allocation20_spill] sm:$0xff] %v4976_v21  ;;  %9253 = vst [vmem:[#allocation21_spill] sm:$0xff] %v4978_v34 }
 0x103   :  { %v4980_v26 = vpop.f32.mrf.mxu1  ;;  %v4982_v32 = vpop.f32.mrf.mxu0 }
 0x104   :  { %9254 = vst [vmem:[#allocation22_spill] sm:$0xff] %v4980_v26  ;;  %9255 = vst [vmem:[#allocation23_spill] sm:$0xff] %v4982_v32 }
 0x107   :  { %v4984_v46 = vpop.f32.mrf.mxu1  ;;  %v4986_v12 = vpop.f32.mrf.mxu0 }
 0x108   :  { %9256 = vst [vmem:[#allocation24_spill] sm:$0xff] %v4984_v46  ;;  %9257 = vst [vmem:[#allocation25_spill] sm:$0xff] %v4986_v12 }
 0x109   :  { %v4988_v42 = vpop.f32.mrf.mxu1  ;;  %v4990_v28 = vpop.f32.mrf.mxu0 }
 0x10a   :  { %9258 = vst [vmem:[#allocation26_spill] sm:$0xff] %v4988_v42  ;;  %9259 = vst [vmem:[#allocation27_spill] sm:$0xff] %v4990_v28 }
 0x10d   :  { %v4992_v50 = vpop.f32.mrf.mxu1  ;;  %v4994_v17 = vpop.f32.mrf.mxu0 }
 0x10e   :  { %9260 = vst [vmem:[#allocation28_spill] sm:$0xff] %v4992_v50  ;;  %9261 = vst [vmem:[#allocation29_spill] sm:$0xff] %v4994_v17 }
 0x10f   :  { %v4996_v52 = vpop.f32.mrf.mxu1  ;;  %v4998_v21 = vpop.f32.mrf.mxu0 }
 0x110   :  { %9262 = vst [vmem:[#allocation30_spill] sm:$0xff] %v4996_v52  ;;  %9263 = vst [vmem:[#allocation31_spill] sm:$0xff] %v4998_v21 }
 0x113   :  { %v5000_v34 = vpop.f32.mrf.mxu1  ;;  %v5002_v26 = vpop.f32.mrf.mxu0 }
 0x114   :  { %9264 = vst [vmem:[#allocation32_spill] sm:$0xff] %v5000_v34  ;;  %9265 = vst [vmem:[#allocation33_spill] sm:$0xff] %v5002_v26  ;;  %v59_v34 = vsub.s32 3, %v4850_v38 }
 0x115   :  { %v5004_v32 = vpop.f32.mrf.mxu1  ;;  %v5006_v46 = vpop.f32.mrf.mxu0 }
 0x116   :  { %9266 = vst [vmem:[#allocation34_spill] sm:$0xff] %v5004_v32  ;;  %9267 = vst [vmem:[#allocation35_spill] sm:$0xff] %v5006_v46  ;;  %v167_v32 = vadd.f32 %v4876_v40, %v4868_v6  ;;  %v63_v40 = vsub.s32 4, %v4850_v38 }
 0x119   :  { %v5008_v12 = vpop.f32.mrf.mxu1  ;;  %v5010_v42 = vpop.f32.mrf.mxu0 }
 0x11a   :  { %9268 = vst [vmem:[#allocation36_spill] sm:$0xff] %v5008_v12  ;;  %9269 = vst [vmem:[#allocation37_spill] sm:$0xff] %v5010_v42  ;;  %v5022_v12 = vrot.slane %v4861_v30, %v59_v34  ;;  %v5029_v34 = vrot.slane %v4861_v30, %v63_v40 }
 0x11b   :  { %v5012_v28 = vpop.f32.mrf.mxu1  ;;  %v5014_v50 = vpop.f32.mrf.mxu0 }
 0x11c   :  { %9270 = vst [vmem:[#allocation38_spill] sm:$0xff] %v5012_v28  ;;  %9271 = vst [vmem:[#allocation39_spill] sm:$0xff] %v5014_v50 }
 0x11d   :  { %9273 = vst [vmem:[#allocation41_spill] sm:$0xff] %v5029_v34 }
 0x11f   :  { %v5016_v17 = vpop.f32.mrf.mxu1  ;;  %v434_v52 = vpop.f32.mrf.mxu0 }
 0x120   :  { %9272 = vst [vmem:[#allocation40_spill] sm:$0xff] %v5016_v17 }
 0x121   :  { %v323_v21 = vpop.f32.mrf.mxu1  ;;  %v436_v56 = vpop.f32.mrf.mxu0 }
 0x122   :  { %v324_v28 = vadd.f32 %v323_v21, %v5022_v12  ;;  %v67_v21 = vsub.s32 5, %v4850_v38 }
 0x125   :  { %v761_v26 = vpop.f32.mrf.mxu1  ;;  %v832_v46 = vpop.f32.mrf.mxu0 }
 0x126   :  { %v914_v14 = vadd.f32 %v761_v26, %v167_v32 }
 0x127   :  { %v834_v42 = vpop.f32.mrf.mxu0  ;;  %v763_v19 = vpop.f32.mrf.mxu1 }
 0x128   :  { %v2831_v50 = vmul.f32 -1.442695, %v914_v14  ;;  %v936_v10 = vadd.f32 %v834_v42, %v324_v28  ;;  %v921_v62 = vadd.f32 %v763_v19, %v169_v58  ;;  %v5042_v19 = vld [vmem:[%s8387_s5 + $0x1] ss:$0 sm:$0xff] }
 0x129   :  { %9275 = vst [vmem:[#allocation43_spill] sm:$0xff] %v5042_v19 }
 0x12a   :  { %2868 = vpow2.f32 %v2831_v50  ;;  %v2833_v17 = vmul.f32 -1.442695, %v936_v10  ;;  %v2832_v32 = vmul.f32 -1.442695, %v921_v62  ;;  %v435_v10 = vadd.f32 %v434_v52, %v5029_v34 }
 0x12b   :  { %v55_v62 = vsub.s32 2, %v4850_v38 }
 0x12c   :  { %2870 = vpow2.f32 %v2833_v17 }
 0x12d   :  { %v5045_v17 = vrot.slane %v4861_v30, %v55_v62 }
 0x137   :  { %v2869_v60 = vpop.eup %2868 }
 0x138   :  { %v918_v6 = vadd.f32 1.0, %v2869_v60  ;;  %v5035_v60 = vld [vmem:[%s8387_s5] ss:$0 sm:$0xff] }
 0x139   :  { %v2871_v26 = vpop.eup %2870  ;;  %9274 = vst [vmem:[#allocation42_spill] sm:$0xff] %v5035_v60  ;;  %v928_v58 = vadd.f32 %v5035_v60, %v832_v46  ;;  %v280_v46 = vadd.f32 %v4962_v11, %v5045_v17 }
 0x13a   :  { %2872 = vrcp.f32 %v918_v6  ;;  %v940_v14 = vadd.f32 1.0, %v2871_v26 }
 0x13b   :  { %2874 = vpow2.f32 %v2832_v32 }
 0x13c   :  { %2876 = vrcp.f32 %v940_v14  ;;  %v5052_v14 = vrot.slane %v4861_v30, %v67_v21 }
 0x147   :  { %v2873_v44 = vpop.eup %2872 }
 0x148   :  { %v2875_v52 = vpop.eup %2874  ;;  %v929_v40 = vmul.f32 %v2873_v44, %v928_v58 }
 0x149   :  { %v2877_v26 = vpop.eup %2876  ;;  %v925_v32 = vadd.f32 1.0, %v2875_v52 }
 0x166   :  { %v903_v42 = vpop.f32.mrf.mxu1 }
 0x167   :  { %v943_v28 = vadd.f32 %v903_v42, %v435_v10  ;;  %v930_v42 = vadd.f32 %v929_v40, %v280_v46  ;;  %v9304_v46 = vld [vmem:[#allocation78_spill] sm:$0xff] }
 0x168   :  { %v905_v48 = vpop.f32.mrf.mxu1 }
 0x169   :  { %v2834_v50 = vmul.f32 -1.442695, %v943_v28  ;;  %v950_v6 = vadd.f32 %v5042_v19, %v905_v48  ;;  %v437_v28 = vadd.f32 %v436_v56, %v5052_v14 }
 0x16b   :  { %2878 = vpow2.f32 %v2834_v50  ;;  %v951_v10 = vmul.f32 %v2877_v26, %v950_v6  ;;  %v9302_v26 = vld [vmem:[#allocation77_spill] sm:$0xff] }
 0x16c   :  { %2880 = vrcp.f32 %v925_v32  ;;  %v5344_v32 = vld [vmem:[%s8384_s3 + $0x518] sm:$0xff] }
 0x16d   :  { %v952_v34 = vadd.f32 %v951_v10, %v437_v28  ;;  %2882 = vtanh.f32 %v930_v42  ;;  %9305 = vst [vmem:[#allocation77_spill] sm:$0xff] %v5344_v32  ;;  %v9306_v10 = vld [vmem:[#allocation79_spill] sm:$0xff]  ;;  %v5351_v42 = vld [vmem:[%s8384_s3 + $0x510] sm:$0xff]  ;;  %v9308_v28 = vld [vmem:[#allocation80_spill] sm:$0xff] }
 0x16e   :  { %9307 = vst [vmem:[#allocation78_spill] sm:$0xff] %v5351_v42 }
 0x178   :  { %v2879_v50 = vpop.eup %2878 }
 0x179   :  { %v947_v62 = vadd.f32 1.0, %v2879_v50  ;;  %v2881_v38 = vpop.eup %2880  ;;  %v5358_v50 = vld [vmem:[%s8384_s3 + $0x4e8] sm:$0xff] }
 0x17a   :  { %v2883_v58 = vpop.eup %2882  ;;  %v932_v44 = vsub.f32 1.0, %v2881_v38  ;;  %v934_v6 = vmul.f32 %v2881_v38, %v9163_v36  ;;  %v5078_v36 = vld [vmem:[%s8384_s3 + $0x2a8] sm:$0xff]  ;;  %9309 = vst [vmem:[#allocation79_spill] sm:$0xff] %v5358_v50  ;;  %v5365_v38 = vld [vmem:[%s8384_s3 + $0x4e0] sm:$0xff] }
 0x17b   :  { %2884 = vrcp.f32 %v947_v62  ;;  %v9310_v62 = vld [vmem:[#allocation81_spill] sm:$0xff]  ;;  %9311 = vst [vmem:[#allocation80_spill] sm:$0xff] %v5365_v38 }
 0x17c   :  { %2886 = vtanh.f32 %v952_v34  ;;  %v933_v19 = vmul.f32 %v2883_v58, %v932_v44  ;;  %v9276_v34 = vld [vmem:[#allocation75_spill] sm:$0xff]  ;;  %v9312_v58 = vld [vmem:[#allocation82_spill] sm:$0xff] }
 0x17d   :  { %v9314_v44 = vld [vmem:[#allocation83_spill] sm:$0xff] }
 0x17e   :  { %v5059_v40 = vadd.f32 %v934_v6, %v933_v19  ;;  %v9300_v19 = vld [vmem:[#allocation76_spill] sm:$0xff]  ;;  %v5393_v6 = vld [vmem:[%s8384_s3 + $0x480] sm:$0xff] }
 0x188   :  { %v2885_v48 = vpop.eup %2884 }
 0x189   :  { %v954_v11 = vsub.f32 1.0, %v2885_v48  ;;  %v2887_v52 = vpop.eup %2886  ;;  %v956_v21 = vmul.f32 %v2885_v48, %v4356_v22  ;;  %v5071_v22 = vld [vmem:[%s8384_s3 + $0x2d0] sm:$0xff]  ;;  %v5372_v48 = vld [vmem:[%s8384_s3 + $0x4b8] sm:$0xff] }
 0x18a   :  { %9313 = vst [vmem:[#allocation81_spill] sm:$0xff] %v5372_v48 }
 0x18b   :  { %v955_v30 = vmul.f32 %v2887_v52, %v954_v11  ;;  %v5379_v11 = vld [vmem:[%s8384_s3 + $0x4b0] sm:$0xff]  ;;  %v9316_v52 = vld [vmem:[#allocation84_spill] sm:$0xff] }
 0x18c   :  { %9315 = vst [vmem:[#allocation82_spill] sm:$0xff] %v5379_v11  ;;  %9319 = vst [vmem:[#allocation84_spill] sm:$0xff] %v5393_v6 }
 0x18d   :  { %v5057_v56 = vadd.f32 %v956_v21, %v955_v30  ;;  %v5386_v30 = vld [vmem:[%s8384_s3 + $0x488] sm:$0xff]  ;;  %v9318_v21 = vld [vmem:[#allocation85_spill] sm:$0xff] }
 0x18e   :  { %9317 = vst [vmem:[#allocation83_spill] sm:$0xff] %v5386_v30 }
 0x18f   :  { %1022 = vmatprep.mubr.f32.mxu0 %v5057_v56  ;;  %1093 = vmatprep.mubr.f32.mxu1 %v5057_v56 }
 0x190   :  { %1023 = vmatmul.mubr.f32.vlgmr.msra.gmra.mxu0 %v5059_v40  ;;  %1094 = vmatmul.mubr.f32.vlgmr.msra.gmra.mxu1 %v5059_v40 }
 0x191   :  { %1101 = vmatpush1.msra.mxu0 %v9276_v34  ;;  %1164 = vmatprep.mubr.f32.mxu0 %v5057_v56  ;;  %v9320_v34 = vld [vmem:[#allocation86_spill] sm:$0xff] }
 0x192   :  { %1102 = vmatprep.subr.mxu0 %v4391_v24  ;;  %1222 = vmatpush1.msra.mxu1 %v5071_v22  ;;  %v5085_v24 = vld [vmem:[%s8384_s3 + $0x2a0] sm:$0xff] }
 0x193   :  { %1103 = vmatpush1.msra.mxu0 %v4397_v20  ;;  %1223 = vmatprep.subr.mxu1 %v5078_v36  ;;  %v5092_v20 = vld [vmem:[%s8384_s3 + $0x278] sm:$0xff] }
 0x194   :  { %1104 = vmatprep.subr.mxu0 %v4404_v8  ;;  %1224 = vmatpush1.msra.mxu1 %v5085_v24  ;;  %v5099_v8 = vld [vmem:[%s8384_s3 + $0x270] sm:$0xff] }
 0x195   :  { %1105 = vmatpush1.msra.mxu0 %v4411_v54  ;;  %1225 = vmatprep.subr.mxu1 %v5092_v20  ;;  %v5106_v54 = vld [vmem:[%s8384_s3 + $0x248] sm:$0xff] }
 0x196   :  { %1106 = vmatprep.subr.mxu0 %v4418_v18  ;;  %1226 = vmatpush1.msra.mxu1 %v5099_v8  ;;  %v5113_v18 = vld [vmem:[%s8384_s3 + $0x240] sm:$0xff] }
 0x197   :  { %1107 = vmatpush1.msra.mxu0 %v4425_v16  ;;  %1227 = vmatprep.subr.mxu1 %v5106_v54  ;;  %v5120_v16 = vld [vmem:[%s8384_s3 + $0x218] sm:$0xff] }
 0x198   :  { %1108 = vmatprep.subr.mxu0 %v4432_v23  ;;  %1228 = vmatpush1.msra.mxu1 %v5113_v18  ;;  %v5127_v23 = vld [vmem:[%s8384_s3 + $0x210] sm:$0xff] }
 0x199   :  { %1109 = vmatpush1.msra.mxu0 %v4439_v25  ;;  %1229 = vmatprep.subr.mxu1 %v5120_v16  ;;  %v5134_v25 = vld [vmem:[%s8384_s3 + $0x1e8] sm:$0xff] }
 0x19a   :  { %1110 = vmatprep.subr.mxu0 %v4446_v27  ;;  %1230 = vmatpush1.msra.mxu1 %v5127_v23  ;;  %v5141_v27 = vld [vmem:[%s8384_s3 + $0x1e0] sm:$0xff] }
 0x19b   :  { %1111 = vmatpush1.msra.mxu0 %v4453_v29  ;;  %1231 = vmatprep.subr.mxu1 %v5134_v25  ;;  %v5148_v29 = vld [vmem:[%s8384_s3 + $0x1b8] sm:$0xff] }
 0x19c   :  { %1112 = vmatprep.subr.mxu0 %v4460_v31  ;;  %1232 = vmatpush1.msra.mxu1 %v5141_v27  ;;  %v5155_v31 = vld [vmem:[%s8384_s3 + $0x1b0] sm:$0xff] }
 0x19d   :  { %1113 = vmatpush1.msra.mxu0 %v4467_v33  ;;  %1233 = vmatprep.subr.mxu1 %v5148_v29  ;;  %v5162_v33 = vld [vmem:[%s8384_s3 + $0x188] sm:$0xff] }
 0x19e   :  { %1114 = vmatprep.subr.mxu0 %v4474_v35  ;;  %1234 = vmatpush1.msra.mxu1 %v5155_v31  ;;  %v5169_v35 = vld [vmem:[%s8384_s3 + $0x180] sm:$0xff] }
 0x19f   :  { %1115 = vmatpush1.msra.mxu0 %v4481_v37  ;;  %1235 = vmatprep.subr.mxu1 %v5162_v33  ;;  %9277 = vst [vmem:[#allocation44_spill] sm:$0xff] %v5169_v35  ;;  %v5176_v37 = vld [vmem:[%s8384_s3 + $0x158] sm:$0xff] }
 0x1a0   :  { %1116 = vmatprep.subr.mxu0 %v4488_v39  ;;  %1236 = vmatpush1.msra.mxu1 %v5169_v35  ;;  %9278 = vst [vmem:[#allocation45_spill] sm:$0xff] %v5176_v37  ;;  %v5183_v39 = vld [vmem:[%s8384_s3 + $0x150] sm:$0xff] }
 0x1a1   :  { %1117 = vmatpush1.msra.mxu0 %v4495_v41  ;;  %1237 = vmatprep.subr.mxu1 %v5176_v37  ;;  %9279 = vst [vmem:[#allocation46_spill] sm:$0xff] %v5183_v39  ;;  %v5190_v41 = vld [vmem:[%s8384_s3 + $0x128] sm:$0xff] }
 0x1a2   :  { %1118 = vmatprep.subr.mxu0 %v4502_v43  ;;  %1238 = vmatpush1.msra.mxu1 %v5183_v39  ;;  %9280 = vst [vmem:[#allocation47_spill] sm:$0xff] %v5190_v41  ;;  %v5197_v43 = vld [vmem:[%s8384_s3 + $0x120] sm:$0xff] }
 0x1a3   :  { %1119 = vmatpush1.msra.mxu0 %v4509_v45  ;;  %1239 = vmatprep.subr.mxu1 %v5190_v41  ;;  %9281 = vst [vmem:[#allocation48_spill] sm:$0xff] %v5197_v43  ;;  %v5204_v45 = vld [vmem:[%s8384_s3 + $0xf8] sm:$0xff] }
 0x1a4   :  { %1120 = vmatprep.subr.mxu0 %v4516_v47  ;;  %1240 = vmatpush1.msra.mxu1 %v5197_v43  ;;  %9282 = vst [vmem:[#allocation49_spill] sm:$0xff] %v5204_v45  ;;  %v5211_v47 = vld [vmem:[%s8384_s3 + $0xf0] sm:$0xff] }
 0x1a5   :  { %1121 = vmatpush1.msra.mxu0 %v4523_v49  ;;  %1241 = vmatprep.subr.mxu1 %v5204_v45  ;;  %9283 = vst [vmem:[#allocation50_spill] sm:$0xff] %v5211_v47  ;;  %v5218_v49 = vld [vmem:[%s8384_s3 + $0xc8] sm:$0xff] }
 0x1a6   :  { %1122 = vmatprep.subr.mxu0 %v4530_v51  ;;  %1242 = vmatpush1.msra.mxu1 %v5211_v47  ;;  %9284 = vst [vmem:[#allocation51_spill] sm:$0xff] %v5218_v49  ;;  %v5225_v51 = vld [vmem:[%s8384_s3 + $0xc0] sm:$0xff] }
 0x1a7   :  { %1123 = vmatpush1.msra.mxu0 %v4537_v53  ;;  %1243 = vmatprep.subr.mxu1 %v5218_v49  ;;  %9285 = vst [vmem:[#allocation52_spill] sm:$0xff] %v5225_v51  ;;  %v5232_v53 = vld [vmem:[%s8384_s3 + $0x98] sm:$0xff] }
 0x1a8   :  { %1124 = vmatprep.subr.mxu0 %v4544_v55  ;;  %1244 = vmatpush1.msra.mxu1 %v5225_v51  ;;  %9286 = vst [vmem:[#allocation53_spill] sm:$0xff] %v5232_v53  ;;  %v5239_v55 = vld [vmem:[%s8384_s3 + $0x90] sm:$0xff] }
 0x1a9   :  { %1125 = vmatpush1.msra.mxu0 %v4551_v57  ;;  %1245 = vmatprep.subr.mxu1 %v5232_v53  ;;  %9287 = vst [vmem:[#allocation54_spill] sm:$0xff] %v5239_v55  ;;  %v5246_v57 = vld [vmem:[%s8384_s3 + $0x68] sm:$0xff] }
 0x1aa   :  { %1126 = vmatprep.subr.mxu0 %v4558_v59  ;;  %1246 = vmatpush1.msra.mxu1 %v5239_v55  ;;  %9288 = vst [vmem:[#allocation55_spill] sm:$0xff] %v5246_v57  ;;  %v5253_v59 = vld [vmem:[%s8384_s3 + $0x60] sm:$0xff] }
 0x1ab   :  { %1127 = vmatpush1.msra.mxu0 %v4565_v61  ;;  %1247 = vmatprep.subr.mxu1 %v5246_v57  ;;  %9289 = vst [vmem:[#allocation56_spill] sm:$0xff] %v5253_v59  ;;  %v5260_v61 = vld [vmem:[%s8384_s3 + $0x38] sm:$0xff] }
 0x1ac   :  { %1128 = vmatprep.subr.mxu0 %v4572_v63  ;;  %1248 = vmatpush1.msra.mxu1 %v5253_v59  ;;  %9290 = vst [vmem:[#allocation58_spill] sm:$0xff] %v5260_v61  ;;  %v5267_v63 = vld [vmem:[%s8384_s3 + $0x30] sm:$0xff] }
 0x1ad   :  { %1129 = vmatpush1.msra.mxu0 %v4579_v1  ;;  %1249 = vmatprep.subr.mxu1 %v5260_v61  ;;  %9291 = vst [vmem:[#allocation60_spill] sm:$0xff] %v5267_v63  ;;  %v5274_v1 = vld [vmem:[%s8384_s3 + $0x8] sm:$0xff] }
 0x1ae   :  { %1130 = vmatprep.subr.mxu0 %v4586_v4  ;;  %1250 = vmatpush1.msra.mxu1 %v5267_v63  ;;  %9292 = vst [vmem:[#allocation61_spill] sm:$0xff] %v5274_v1  ;;  %v5281_v4 = vld [vmem:[%s8384_s3] sm:$0xff] }
 0x1af   :  { %1131 = vmatpush1.msra.mxu0 %v4593_v7  ;;  %1251 = vmatprep.subr.mxu1 %v5274_v1  ;;  %9293 = vst [vmem:[#allocation62_spill] sm:$0xff] %v5281_v4  ;;  %v5288_v7 = vld [vmem:[%s8384_s3 + $0x5d8] sm:$0xff] }
 0x1b0   :  { %1132 = vmatprep.subr.mxu0 %v4600_v9  ;;  %1252 = vmatpush1.msra.mxu1 %v5281_v4  ;;  %9294 = vst [vmem:[#allocation64_spill] sm:$0xff] %v5288_v7  ;;  %v5295_v9 = vld [vmem:[%s8384_s3 + $0x5d0] sm:$0xff] }
 0x1b1   :  { %1133 = vmatpush2.msra.mxu0 %v4607_v13  ;;  %1253 = vmatprep.subr.mxu1 %v5288_v7  ;;  %9295 = vst [vmem:[#allocation66_spill] sm:$0xff] %v5295_v9  ;;  %v5302_v13 = vld [vmem:[%s8384_s3 + $0x5a8] sm:$0xff] }
 0x1b2   :  { %1134 = vmatprep.subr.mxu0 %v4614_v15  ;;  %1254 = vmatpush2.msra.mxu1 %v5295_v9  ;;  %9296 = vst [vmem:[#allocation68_spill] sm:$0xff] %v5302_v13  ;;  %v5309_v15 = vld [vmem:[%s8384_s3 + $0x5a0] sm:$0xff] }
 0x1b3   :  { %1135 = vmatpush2.msra.mxu0 %v4621_v3  ;;  %1255 = vmatprep.subr.mxu1 %v5302_v13  ;;  %9297 = vst [vmem:[#allocation69_spill] sm:$0xff] %v5309_v15  ;;  %v5316_v3 = vld [vmem:[%s8384_s3 + $0x578] sm:$0xff] }
 0x1b4   :  { %1136 = vmatprep.subr.mxu0 %v4628_v5  ;;  %1256 = vmatpush2.msra.mxu1 %v5309_v15  ;;  %9298 = vst [vmem:[#allocation70_spill] sm:$0xff] %v5316_v3  ;;  %v5323_v5 = vld [vmem:[%s8384_s3 + $0x570] sm:$0xff] }
 0x1b5   :  { %1137 = vmatpush2.msra.mxu0 %v4635_v2  ;;  %1257 = vmatprep.subr.mxu1 %v5316_v3  ;;  %9299 = vst [vmem:[#allocation72_spill] sm:$0xff] %v5323_v5  ;;  %v5330_v2 = vld [vmem:[%s8384_s3 + $0x548] sm:$0xff] }
 0x1b6   :  { %1138 = vmatprep.subr.mxu0 %v4642_v0  ;;  %1258 = vmatpush2.msra.mxu1 %v5323_v5  ;;  %9301 = vst [vmem:[#allocation75_spill] sm:$0xff] %v5330_v2  ;;  %v5337_v0 = vld [vmem:[%s8384_s3 + $0x540] sm:$0xff] }
 0x1b7   :  { %1139 = vmatpush2.msra.mxu0 %v9300_v19  ;;  %1259 = vmatprep.subr.mxu1 %v5330_v2  ;;  %9303 = vst [vmem:[#allocation76_spill] sm:$0xff] %v5337_v0  ;;  %v5400_v19 = vld [vmem:[%s8384_s3 + $0x458] sm:$0xff] }
 0x1b8   :  { %1140 = vmatprep.subr.mxu0 %v9302_v26  ;;  %1260 = vmatpush2.msra.mxu1 %v5337_v0  ;;  %9321 = vst [vmem:[#allocation85_spill] sm:$0xff] %v5400_v19  ;;  %v9322_v26 = vld [vmem:[#allocation87_spill] sm:$0xff] }
 0x1b9   :  { %1141 = vmatpush2.msra.mxu0 %v9304_v46  ;;  %1261 = vmatprep.subr.mxu1 %v5344_v32  ;;  %v5407_v46 = vld [vmem:[%s8384_s3 + $0x450] sm:$0xff] }
 0x1ba   :  { %1142 = vmatprep.subr.mxu0 %v9306_v10  ;;  %1262 = vmatpush2.msra.mxu1 %v5351_v42  ;;  %9323 = vst [vmem:[#allocation86_spill] sm:$0xff] %v5407_v46  ;;  %v9324_v10 = vld [vmem:[#allocation88_spill] sm:$0xff] }
 0x1bb   :  { %1143 = vmatpush2.msra.mxu0 %v9308_v28  ;;  %1263 = vmatprep.subr.mxu1 %v5358_v50  ;;  %v5414_v28 = vld [vmem:[%s8384_s3 + $0x428] sm:$0xff] }
 0x1bc   :  { %1144 = vmatprep.subr.mxu0 %v9310_v62  ;;  %1264 = vmatpush2.msra.mxu1 %v5365_v38  ;;  %9325 = vst [vmem:[#allocation87_spill] sm:$0xff] %v5414_v28  ;;  %v9326_v62 = vld [vmem:[#allocation89_spill] sm:$0xff] }
 0x1bd   :  { %1145 = vmatpush2.msra.mxu0 %v9312_v58  ;;  %1265 = vmatprep.subr.mxu1 %v5372_v48  ;;  %v5421_v58 = vld [vmem:[%s8384_s3 + $0x420] sm:$0xff]  ;;  %v9419_v48 = vld [vmem:[#allocation38_spill] sm:$0xff] }
 0x1be   :  { %1146 = vmatprep.subr.mxu0 %v9314_v44  ;;  %1266 = vmatpush2.msra.mxu1 %v5379_v11  ;;  %9327 = vst [vmem:[#allocation88_spill] sm:$0xff] %v5421_v58  ;;  %v9328_v44 = vld [vmem:[#allocation90_spill] sm:$0xff] }
 0x1bf   :  { %1147 = vmatpush2.msra.mxu0 %v9316_v52  ;;  %1267 = vmatprep.subr.mxu1 %v5386_v30  ;;  %v5428_v52 = vld [vmem:[%s8384_s3 + $0x3f8] sm:$0xff] }
 0x1c0   :  { %1148 = vmatprep.subr.mxu0 %v9318_v21  ;;  %1268 = vmatpush2.msra.mxu1 %v5393_v6  ;;  %9329 = vst [vmem:[#allocation89_spill] sm:$0xff] %v5428_v52  ;;  %v9330_v21 = vld [vmem:[#allocation91_spill] sm:$0xff] }
 0x1c1   :  { %1149 = vmatpush2.msra.mxu0 %v9320_v34  ;;  %1269 = vmatprep.subr.mxu1 %v5400_v19  ;;  %v5435_v34 = vld [vmem:[%s8384_s3 + $0x3f0] sm:$0xff] }
 0x1c2   :  { %1150 = vmatprep.subr.mxu0 %v9322_v26  ;;  %1270 = vmatpush2.msra.mxu1 %v5407_v46  ;;  %9331 = vst [vmem:[#allocation90_spill] sm:$0xff] %v5435_v34  ;;  %v9332_v26 = vld [vmem:[#allocation92_spill] sm:$0xff] }
 0x1c3   :  { %1151 = vmatpush2.msra.mxu0 %v9324_v10  ;;  %1271 = vmatprep.subr.mxu1 %v5414_v28  ;;  %v5442_v10 = vld [vmem:[%s8384_s3 + $0x3c8] sm:$0xff]  ;;  %v9418_v28 = vld [vmem:[#allocation71_spill] sm:$0xff] }
 0x1c4   :  { %1152 = vmatprep.subr.mxu0 %v9326_v62  ;;  %1272 = vmatpush2.msra.mxu1 %v5421_v58  ;;  %9333 = vst [vmem:[#allocation91_spill] sm:$0xff] %v5442_v10  ;;  %v9334_v62 = vld [vmem:[#allocation93_spill] sm:$0xff] }
 0x1c5   :  { %1153 = vmatpush2.msra.mxu0 %v9328_v44  ;;  %1273 = vmatprep.subr.mxu1 %v5428_v52  ;;  %v5449_v44 = vld [vmem:[%s8384_s3 + $0x3c0] sm:$0xff] }
 0x1c6   :  { %1154 = vmatprep.subr.mxu0 %v9330_v21  ;;  %1274 = vmatpush2.msra.mxu1 %v5435_v34  ;;  %9335 = vst [vmem:[#allocation92_spill] sm:$0xff] %v5449_v44  ;;  %v9336_v21 = vld [vmem:[#allocation94_spill] sm:$0xff]  ;;  %v9338_v34 = vld [vmem:[#allocation95_spill] sm:$0xff] }
 0x1c7   :  { %1155 = vmatpush2.msra.mxu0 %v9332_v26  ;;  %1275 = vmatprep.subr.mxu1 %v5442_v10  ;;  %v5456_v26 = vld [vmem:[%s8384_s3 + $0x398] sm:$0xff]  ;;  %v9340_v10 = vld [vmem:[#allocation57_spill] sm:$0xff] }
 0x1c8   :  { %1156 = vmatprep.subr.mxu0 %v9334_v62  ;;  %1276 = vmatpush2.msra.mxu1 %v5449_v44  ;;  %9337 = vst [vmem:[#allocation93_spill] sm:$0xff] %v5456_v26  ;;  %v5463_v62 = vld [vmem:[%s8384_s3 + $0x390] sm:$0xff]  ;;  %v9342_v44 = vld [vmem:[#allocation59_spill] sm:$0xff] }
 0x1c9   :  { %1157 = vmatpush2.msra.mxu0 %v9336_v21  ;;  %1277 = vmatprep.subr.mxu1 %v5456_v26  ;;  %9339 = vst [vmem:[#allocation94_spill] sm:$0xff] %v5463_v62  ;;  %v5470_v21 = vld [vmem:[%s8384_s3 + $0x368] sm:$0xff] }
 0x1ca   :  { %1158 = vmatprep.subr.mxu0 %v9338_v34  ;;  %1278 = vmatpush2.msra.mxu1 %v5463_v62  ;;  %9341 = vst [vmem:[#allocation95_spill] sm:$0xff] %v5470_v21  ;;  %v5477_v34 = vld [vmem:[%s8384_s3 + $0x360] sm:$0xff]  ;;  %v9344_v26 = vld [vmem:[#allocation96_spill] sm:$0xff]  ;;  %v9346_v62 = vld [vmem:[#allocation97_spill] sm:$0xff] }
 0x1cb   :  { %1159 = vmatpush2.msra.mxu0 %v9340_v10  ;;  %1279 = vmatprep.subr.mxu1 %v5470_v21  ;;  %9343 = vst [vmem:[#allocation57_spill] sm:$0xff] %v5477_v34  ;;  %v5484_v10 = vld [vmem:[%s8384_s3 + $0x338] sm:$0xff]  ;;  %v9348_v21 = vld [vmem:[#allocation63_spill] sm:$0xff] }
 0x1cc   :  { %1160 = vmatprep.subr.mxu0 %v9342_v44  ;;  %1280 = vmatpush2.msra.mxu1 %v5477_v34  ;;  %9345 = vst [vmem:[#allocation59_spill] sm:$0xff] %v5484_v10  ;;  %v5491_v44 = vld [vmem:[%s8384_s3 + $0x330] sm:$0xff]  ;;  %v9417_v34 = vld [vmem:[#allocation3_spill] sm:$0xff] }
 0x1cd   :  { %1161 = vmatpush2.msra.mxu0 %v9344_v26  ;;  %1281 = vmatprep.subr.mxu1 %v5484_v10  ;;  %9347 = vst [vmem:[#allocation96_spill] sm:$0xff] %v5491_v44  ;;  %v5498_v26 = vld [vmem:[%s8384_s3 + $0x308] sm:$0xff] }
 0x1ce   :  { %1162 = vmatprep.subr.mxu0 %v9346_v62  ;;  %1282 = vmatpush2.msra.mxu1 %v5491_v44  ;;  %9349 = vst [vmem:[#allocation97_spill] sm:$0xff] %v5498_v26  ;;  %v5505_v62 = vld [vmem:[%s8384_s3 + $0x2e8] sm:$0xff]  ;;  %v5523_v44 = vld [vmem:[%s8384_s3 + $0x2b8] sm:$0xff] }
 0x1cf   :  { %1163 = vmatpush2.msra.mxu0 %v9348_v21  ;;  %1283 = vmatprep.subr.mxu1 %v5498_v26  ;;  %9350 = vst [vmem:[#allocation63_spill] sm:$0xff] %v5505_v62  ;;  %v5511_v21 = vld [vmem:[%s8384_s3 + $0x2e0] sm:$0xff]  ;;  %9353 = vst [vmem:[#allocation100_spill] sm:$0xff] %v5523_v44 }
 0x1d0   :  { %1165 = vmatmul.mubr.f32.vlgmr.msra.gmra.mxu0 %v5059_v40  ;;  %1292 = vmatprep.subr.mxu0 %v5505_v62  ;;  %9351 = vst [vmem:[#allocation98_spill] sm:$0xff] %v5511_v21  ;;  %v5517_v26 = vld [vmem:[%s8384_s3 + $0x300] sm:$0xff]  ;;  %v5529_v62 = vld [vmem:[%s8384_s3 + $0x2f8] sm:$0xff] }
 0x1d1   :  { %1293 = vmatpush1.msra.mxu0 %v5511_v21  ;;  %9352 = vst [vmem:[#allocation99_spill] sm:$0xff] %v5517_v26  ;;  %1284 = vmatpush2.msra.mxu1 %v5517_v26  ;;  %9354 = vst [vmem:[#allocation101_spill] sm:$0xff] %v5529_v62  ;;  %v5535_v21 = vld [vmem:[%s8384_s3 + $0x2b0] sm:$0xff]  ;;  %v5541_v26 = vld [vmem:[%s8384_s3 + $0x288] sm:$0xff] }
 0x1d2   :  { %1294 = vmatprep.subr.mxu0 %v5523_v44  ;;  %1363 = vmatprep.subr.mxu1 %v5529_v62  ;;  %9355 = vst [vmem:[#allocation102_spill] sm:$0xff] %v5535_v21  ;;  %9356 = vst [vmem:[#allocation103_spill] sm:$0xff] %v5541_v26  ;;  %v5547_v44 = vld [vmem:[%s8384_s3 + $0x280] sm:$0xff]  ;;  %v5553_v62 = vld [vmem:[%s8384_s3 + $0x258] sm:$0xff] }
 0x1d3   :  { %1295 = vmatpush1.msra.mxu0 %v5535_v21  ;;  %9357 = vst [vmem:[#allocation104_spill] sm:$0xff] %v5547_v44  ;;  %9358 = vst [vmem:[#allocation105_spill] sm:$0xff] %v5553_v62  ;;  %v5559_v21 = vld [vmem:[%s8384_s3 + $0x250] sm:$0xff] }
 0x1d4   :  { %1296 = vmatprep.subr.mxu0 %v5541_v26  ;;  %9359 = vst [vmem:[#allocation106_spill] sm:$0xff] %v5559_v21  ;;  %v5565_v26 = vld [vmem:[%s8384_s3 + $0x228] sm:$0xff] }
 0x1d5   :  { %1297 = vmatpush1.msra.mxu0 %v5547_v44  ;;  %9360 = vst [vmem:[#allocation107_spill] sm:$0xff] %v5565_v26  ;;  %v5571_v44 = vld [vmem:[%s8384_s3 + $0x220] sm:$0xff] }
 0x1d6   :  { %1298 = vmatprep.subr.mxu0 %v5553_v62  ;;  %9361 = vst [vmem:[#allocation108_spill] sm:$0xff] %v5571_v44  ;;  %v5577_v62 = vld [vmem:[%s8384_s3 + $0x1f8] sm:$0xff] }
 0x1d7   :  { %1299 = vmatpush1.msra.mxu0 %v5559_v21  ;;  %9362 = vst [vmem:[#allocation109_spill] sm:$0xff] %v5577_v62  ;;  %v5583_v21 = vld [vmem:[%s8384_s3 + $0x1f0] sm:$0xff] }
 0x1d8   :  { %1300 = vmatprep.subr.mxu0 %v5565_v26  ;;  %9363 = vst [vmem:[#allocation110_spill] sm:$0xff] %v5583_v21  ;;  %v5589_v26 = vld [vmem:[%s8384_s3 + $0x1c8] sm:$0xff] }
 0x1d9   :  { %1301 = vmatpush1.msra.mxu0 %v5571_v44  ;;  %9364 = vst [vmem:[#allocation111_spill] sm:$0xff] %v5589_v26  ;;  %v5595_v44 = vld [vmem:[%s8384_s3 + $0x1c0] sm:$0xff] }
 0x1da   :  { %1302 = vmatprep.subr.mxu0 %v5577_v62  ;;  %9365 = vst [vmem:[#allocation112_spill] sm:$0xff] %v5595_v44  ;;  %v5601_v62 = vld [vmem:[%s8384_s3 + $0x198] sm:$0xff] }
 0x1db   :  { %1303 = vmatpush1.msra.mxu0 %v5583_v21  ;;  %9366 = vst [vmem:[#allocation113_spill] sm:$0xff] %v5601_v62  ;;  %v5607_v21 = vld [vmem:[%s8384_s3 + $0x190] sm:$0xff] }
 0x1dc   :  { %1304 = vmatprep.subr.mxu0 %v5589_v26  ;;  %9367 = vst [vmem:[#allocation114_spill] sm:$0xff] %v5607_v21  ;;  %v5613_v26 = vld [vmem:[%s8384_s3 + $0x168] sm:$0xff] }
 0x1dd   :  { %1305 = vmatpush1.msra.mxu0 %v5595_v44  ;;  %9368 = vst [vmem:[#allocation115_spill] sm:$0xff] %v5613_v26  ;;  %v5619_v44 = vld [vmem:[%s8384_s3 + $0x160] sm:$0xff] }
 0x1de   :  { %1306 = vmatprep.subr.mxu0 %v5601_v62  ;;  %9369 = vst [vmem:[#allocation116_spill] sm:$0xff] %v5619_v44  ;;  %v5625_v62 = vld [vmem:[%s8384_s3 + $0x138] sm:$0xff] }
 0x1df   :  { %1307 = vmatpush1.msra.mxu0 %v5607_v21  ;;  %9370 = vst [vmem:[#allocation117_spill] sm:$0xff] %v5625_v62  ;;  %v5631_v21 = vld [vmem:[%s8384_s3 + $0x130] sm:$0xff] }
 0x1e0   :  { %1308 = vmatprep.subr.mxu0 %v5613_v26  ;;  %9371 = vst [vmem:[#allocation118_spill] sm:$0xff] %v5631_v21  ;;  %v5637_v26 = vld [vmem:[%s8384_s3 + $0x108] sm:$0xff] }
 0x1e1   :  { %1309 = vmatpush1.msra.mxu0 %v5619_v44  ;;  %9372 = vst [vmem:[#allocation119_spill] sm:$0xff] %v5637_v26  ;;  %v5643_v44 = vld [vmem:[%s8384_s3 + $0x100] sm:$0xff] }
 0x1e2   :  { %1310 = vmatprep.subr.mxu0 %v5625_v62  ;;  %9373 = vst [vmem:[#allocation120_spill] sm:$0xff] %v5643_v44  ;;  %v5649_v62 = vld [vmem:[%s8384_s3 + $0xd8] sm:$0xff] }
 0x1e3   :  { %1311 = vmatpush1.msra.mxu0 %v5631_v21  ;;  %9374 = vst [vmem:[#allocation121_spill] sm:$0xff] %v5649_v62  ;;  %v5655_v21 = vld [vmem:[%s8384_s3 + $0xd0] sm:$0xff] }
 0x1e4   :  { %1312 = vmatprep.subr.mxu0 %v5637_v26  ;;  %9375 = vst [vmem:[#allocation122_spill] sm:$0xff] %v5655_v21  ;;  %v5661_v26 = vld [vmem:[%s8384_s3 + $0xa8] sm:$0xff] }
 0x1e5   :  { %1313 = vmatpush1.msra.mxu0 %v5643_v44  ;;  %9376 = vst [vmem:[#allocation123_spill] sm:$0xff] %v5661_v26  ;;  %v5667_v44 = vld [vmem:[%s8384_s3 + $0xa0] sm:$0xff] }
 0x1e6   :  { %1314 = vmatprep.subr.mxu0 %v5649_v62  ;;  %9377 = vst [vmem:[#allocation124_spill] sm:$0xff] %v5667_v44  ;;  %v5673_v62 = vld [vmem:[%s8384_s3 + $0x78] sm:$0xff] }
 0x1e7   :  { %1315 = vmatpush1.msra.mxu0 %v5655_v21  ;;  %9378 = vst [vmem:[#allocation125_spill] sm:$0xff] %v5673_v62  ;;  %v5679_v21 = vld [vmem:[%s8384_s3 + $0x70] sm:$0xff] }
 0x1e8   :  { %1316 = vmatprep.subr.mxu0 %v5661_v26  ;;  %9379 = vst [vmem:[#allocation126_spill] sm:$0xff] %v5679_v21  ;;  %v5685_v26 = vld [vmem:[%s8384_s3 + $0x48] sm:$0xff] }
 0x1e9   :  { %1317 = vmatpush1.msra.mxu0 %v5667_v44  ;;  %9380 = vst [vmem:[#allocation127_spill] sm:$0xff] %v5685_v26  ;;  %v5691_v44 = vld [vmem:[%s8384_s3 + $0x40] sm:$0xff] }
 0x1ea   :  { %1318 = vmatprep.subr.mxu0 %v5673_v62  ;;  %9381 = vst [vmem:[#allocation128_spill] sm:$0xff] %v5691_v44  ;;  %v5697_v62 = vld [vmem:[%s8384_s3 + $0x18] sm:$0xff] }
 0x1eb   :  { %1319 = vmatpush1.msra.mxu0 %v5679_v21  ;;  %9382 = vst [vmem:[#allocation129_spill] sm:$0xff] %v5697_v62  ;;  %v5703_v21 = vld [vmem:[%s8384_s3 + $0x10] sm:$0xff] }
 0x1ec   :  { %1320 = vmatprep.subr.mxu0 %v5685_v26  ;;  %9383 = vst [vmem:[#allocation130_spill] sm:$0xff] %v5703_v21  ;;  %v5709_v26 = vld [vmem:[%s8384_s3 + $0x5e8] sm:$0xff] }
 0x1ed   :  { %1321 = vmatpush1.msra.mxu0 %v5691_v44  ;;  %9384 = vst [vmem:[#allocation131_spill] sm:$0xff] %v5709_v26  ;;  %v5715_v44 = vld [vmem:[%s8384_s3 + $0x5e0] sm:$0xff] }
 0x1ee   :  { %1322 = vmatprep.subr.mxu0 %v5697_v62  ;;  %9385 = vst [vmem:[#allocation132_spill] sm:$0xff] %v5715_v44  ;;  %v5721_v62 = vld [vmem:[%s8384_s3 + $0x5b8] sm:$0xff] }
 0x1ef   :  { %1323 = vmatpush1.msra.mxu0 %v5703_v21  ;;  %9386 = vst [vmem:[#allocation133_spill] sm:$0xff] %v5721_v62  ;;  %v5727_v21 = vld [vmem:[%s8384_s3 + $0x5b0] sm:$0xff] }
 0x1f0   :  { %1324 = vmatprep.subr.mxu0 %v5709_v26  ;;  %9387 = vst [vmem:[#allocation134_spill] sm:$0xff] %v5727_v21  ;;  %v5733_v26 = vld [vmem:[%s8384_s3 + $0x588] sm:$0xff] }
 0x1f1   :  { %1325 = vmatpush2.msra.mxu0 %v5715_v44  ;;  %9388 = vst [vmem:[#allocation135_spill] sm:$0xff] %v5733_v26  ;;  %v5739_v44 = vld [vmem:[%s8384_s3 + $0x580] sm:$0xff] }
 0x1f2   :  { %1326 = vmatprep.subr.mxu0 %v5721_v62  ;;  %9389 = vst [vmem:[#allocation136_spill] sm:$0xff] %v5739_v44  ;;  %v5745_v62 = vld [vmem:[%s8384_s3 + $0x558] sm:$0xff] }
 0x1f3   :  { %1327 = vmatpush2.msra.mxu0 %v5727_v21  ;;  %9390 = vst [vmem:[#allocation137_spill] sm:$0xff] %v5745_v62  ;;  %v5751_v21 = vld [vmem:[%s8384_s3 + $0x550] sm:$0xff] }
 0x1f4   :  { %1328 = vmatprep.subr.mxu0 %v5733_v26  ;;  %9391 = vst [vmem:[#allocation138_spill] sm:$0xff] %v5751_v21  ;;  %v5757_v26 = vld [vmem:[%s8384_s3 + $0x528] sm:$0xff] }
 0x1f5   :  { %1329 = vmatpush2.msra.mxu0 %v5739_v44  ;;  %9392 = vst [vmem:[#allocation139_spill] sm:$0xff] %v5757_v26  ;;  %v5763_v44 = vld [vmem:[%s8384_s3 + $0x520] sm:$0xff] }
 0x1f6   :  { %1330 = vmatprep.subr.mxu0 %v5745_v62  ;;  %9393 = vst [vmem:[#allocation140_spill] sm:$0xff] %v5763_v44  ;;  %v5769_v62 = vld [vmem:[%s8384_s3 + $0x4f8] sm:$0xff] }
 0x1f7   :  { %1331 = vmatpush2.msra.mxu0 %v5751_v21  ;;  %9394 = vst [vmem:[#allocation141_spill] sm:$0xff] %v5769_v62  ;;  %v5775_v21 = vld [vmem:[%s8384_s3 + $0x4f0] sm:$0xff] }
 0x1f8   :  { %1332 = vmatprep.subr.mxu0 %v5757_v26  ;;  %9395 = vst [vmem:[#allocation142_spill] sm:$0xff] %v5775_v21  ;;  %v5781_v26 = vld [vmem:[%s8384_s3 + $0x4c8] sm:$0xff] }
 0x1f9   :  { %1333 = vmatpush2.msra.mxu0 %v5763_v44  ;;  %9396 = vst [vmem:[#allocation143_spill] sm:$0xff] %v5781_v26  ;;  %v5787_v44 = vld [vmem:[%s8384_s3 + $0x4c0] sm:$0xff] }
 0x1fa   :  { %1334 = vmatprep.subr.mxu0 %v5769_v62  ;;  %9397 = vst [vmem:[#allocation144_spill] sm:$0xff] %v5787_v44  ;;  %v5793_v62 = vld [vmem:[%s8384_s3 + $0x498] sm:$0xff] }
 0x1fb   :  { %1335 = vmatpush2.msra.mxu0 %v5775_v21  ;;  %9398 = vst [vmem:[#allocation145_spill] sm:$0xff] %v5793_v62  ;;  %v5799_v21 = vld [vmem:[%s8384_s3 + $0x490] sm:$0xff] }
 0x1fc   :  { %1336 = vmatprep.subr.mxu0 %v5781_v26  ;;  %9399 = vst [vmem:[#allocation146_spill] sm:$0xff] %v5799_v21  ;;  %v5805_v26 = vld [vmem:[%s8384_s3 + $0x468] sm:$0xff] }
 0x1fd   :  { %1337 = vmatpush2.msra.mxu0 %v5787_v44  ;;  %9400 = vst [vmem:[#allocation147_spill] sm:$0xff] %v5805_v26  ;;  %v5811_v44 = vld [vmem:[%s8384_s3 + $0x460] sm:$0xff] }
 0x1fe   :  { %1338 = vmatprep.subr.mxu0 %v5793_v62  ;;  %9401 = vst [vmem:[#allocation148_spill] sm:$0xff] %v5811_v44  ;;  %v5817_v62 = vld [vmem:[%s8384_s3 + $0x438] sm:$0xff] }
 0x1ff   :  { %1339 = vmatpush2.msra.mxu0 %v5799_v21  ;;  %9402 = vst [vmem:[#allocation149_spill] sm:$0xff] %v5817_v62  ;;  %v5823_v21 = vld [vmem:[%s8384_s3 + $0x430] sm:$0xff] }
 0x200   :  { %1340 = vmatprep.subr.mxu0 %v5805_v26  ;;  %9403 = vst [vmem:[#allocation150_spill] sm:$0xff] %v5823_v21  ;;  %v5829_v26 = vld [vmem:[%s8384_s3 + $0x408] sm:$0xff] }
 0x201   :  { %1341 = vmatpush2.msra.mxu0 %v5811_v44  ;;  %9404 = vst [vmem:[#allocation151_spill] sm:$0xff] %v5829_v26  ;;  %v5835_v44 = vld [vmem:[%s8384_s3 + $0x400] sm:$0xff] }
 0x202   :  { %1342 = vmatprep.subr.mxu0 %v5817_v62  ;;  %9405 = vst [vmem:[#allocation152_spill] sm:$0xff] %v5835_v44  ;;  %v5841_v62 = vld [vmem:[%s8384_s3 + $0x3d8] sm:$0xff] }
 0x203   :  { %1343 = vmatpush2.msra.mxu0 %v5823_v21  ;;  %9406 = vst [vmem:[#allocation153_spill] sm:$0xff] %v5841_v62  ;;  %v5847_v21 = vld [vmem:[%s8384_s3 + $0x3d0] sm:$0xff] }
 0x204   :  { %1344 = vmatprep.subr.mxu0 %v5829_v26  ;;  %9407 = vst [vmem:[#allocation154_spill] sm:$0xff] %v5847_v21  ;;  %v5853_v26 = vld [vmem:[%s8384_s3 + $0x3a8] sm:$0xff] }
 0x205   :  { %1345 = vmatpush2.msra.mxu0 %v5835_v44  ;;  %9408 = vst [vmem:[#allocation155_spill] sm:$0xff] %v5853_v26  ;;  %v5859_v44 = vld [vmem:[%s8384_s3 + $0x3a0] sm:$0xff] }
 0x206   :  { %1346 = vmatprep.subr.mxu0 %v5841_v62  ;;  %9409 = vst [vmem:[#allocation156_spill] sm:$0xff] %v5859_v44  ;;  %v5865_v62 = vld [vmem:[%s8384_s3 + $0x378] sm:$0xff] }
 0x207   :  { %1347 = vmatpush2.msra.mxu0 %v5847_v21  ;;  %9410 = vst [vmem:[#allocation157_spill] sm:$0xff] %v5865_v62  ;;  %v5871_v21 = vld [vmem:[%s8384_s3 + $0x370] sm:$0xff] }
 0x208   :  { %1348 = vmatprep.subr.mxu0 %v5853_v26  ;;  %9411 = vst [vmem:[#allocation158_spill] sm:$0xff] %v5871_v21  ;;  %v5877_v26 = vld [vmem:[%s8384_s3 + $0x348] sm:$0xff] }
 0x209   :  { %1349 = vmatpush2.msra.mxu0 %v5859_v44  ;;  %9412 = vst [vmem:[#allocation159_spill] sm:$0xff] %v5877_v26  ;;  %v5883_v44 = vld [vmem:[%s8384_s3 + $0x340] sm:$0xff] }
 0x20a   :  { %1350 = vmatprep.subr.mxu0 %v5865_v62  ;;  %9413 = vst [vmem:[#allocation160_spill] sm:$0xff] %v5883_v44  ;;  %v5889_v62 = vld [vmem:[%s8384_s3 + $0x318] sm:$0xff] }
 0x20b   :  { %1351 = vmatpush2.msra.mxu0 %v5871_v21  ;;  %9414 = vst [vmem:[#allocation161_spill] sm:$0xff] %v5889_v62  ;;  %v5895_v21 = vld [vmem:[%s8384_s3 + $0x310] sm:$0xff] }
 0x20c   :  { %1352 = vmatprep.subr.mxu0 %v5877_v26  ;;  %9415 = vst [vmem:[#allocation162_spill] sm:$0xff] %v5895_v21  ;;  %v9416_v26 = vld [vmem:[#allocation12_spill] sm:$0xff] }
 0x20d   :  { %1353 = vmatpush2.msra.mxu0 %v5883_v44 }
 0x20e   :  { %1354 = vmatprep.subr.mxu0 %v5889_v62 }
 0x20f   :  { %1355 = vmatpush2.msra.mxu0 %v5895_v21  ;;  %v318_v21 = vadd.f32 %v9419_v48, %v5022_v12 }
 0x210   :  { %1484 = vmatprep.subr.mxu0 %v9416_v26 }
 0x250   :  { %v1024_v10 = vpop.f32.mrf.mxu0  ;;  %v1095_v30 = vpop.f32.mrf.mxu1 }
 0x251   :  { %v1177_v52 = vadd.f32 %v1024_v10, %v9417_v34 }
 0x252   :  { %v1026_v58 = vpop.f32.mrf.mxu0  ;;  %v1097_v11 = vpop.f32.mrf.mxu1 }
 0x253   :  { %v2835_v44 = vmul.f32 -1.442695, %v1177_v52  ;;  %v1184_v46 = vadd.f32 %v1026_v58, %v9418_v28  ;;  %v1199_v38 = vadd.f32 %v1097_v11, %v318_v21  ;;  %v1191_v52 = vadd.f32 %v5035_v60, %v1095_v30  ;;  %v9420_v28 = vld [vmem:[#allocation16_spill] sm:$0xff]  ;;  %v9421_v30 = vld [vmem:[#allocation41_spill] sm:$0xff] }
 0x255   :  { %2888 = vpow2.f32 %v2835_v44  ;;  %v2836_v19 = vmul.f32 -1.442695, %v1184_v46  ;;  %v2837_v50 = vmul.f32 -1.442695, %v1199_v38  ;;  %v286_v46 = vadd.f32 %v9420_v28, %v5045_v17 }
 0x257   :  { %2890 = vpow2.f32 %v2836_v19 }
 0x262   :  { %v2889_v62 = vpop.eup %2888 }
 0x263   :  { %v1181_v6 = vadd.f32 1.0, %v2889_v62 }
 0x264   :  { %v2891_v26 = vpop.eup %2890 }
 0x265   :  { %2892 = vrcp.f32 %v1181_v6  ;;  %v1188_v42 = vadd.f32 1.0, %v2891_v26 }
 0x266   :  { %2894 = vpow2.f32 %v2837_v50  ;;  %v9422_v50 = vld [vmem:[#allocation37_spill] sm:$0xff] }
 0x267   :  { %2896 = vrcp.f32 %v1188_v42  ;;  %v429_v26 = vadd.f32 %v9422_v50, %v9421_v30 }
 0x272   :  { %v2893_v34 = vpop.eup %2892 }
 0x273   :  { %v1192_v19 = vmul.f32 %v2893_v34, %v1191_v52  ;;  %v2895_v6 = vpop.eup %2894  ;;  %v9423_v34 = vld [vmem:[#allocation43_spill] sm:$0xff] }
 0x274   :  { %v2897_v10 = vpop.eup %2896  ;;  %v1203_v44 = vadd.f32 1.0, %v2895_v6 }
 0x275   :  { %v1193_v58 = vadd.f32 %v1192_v19, %v286_v46  ;;  %v1195_v62 = vsub.f32 1.0, %v2897_v10  ;;  %v1197_v38 = vmul.f32 %v2897_v10, %v5059_v40 }
 0x277   :  { %2898 = vtanh.f32 %v1193_v58  ;;  %v9424_v58 = vld [vmem:[#allocation39_spill] sm:$0xff] }
 0x278   :  { %2900 = vrcp.f32 %v1203_v44  ;;  %v431_v6 = vadd.f32 %v9424_v58, %v5052_v14  ;;  %v5973_v58 = vld [vmem:[%s8384_s3 + $0x238] sm:$0xff] }
 0x284   :  { %v2899_v48 = vpop.eup %2898 }
 0x285   :  { %v1196_v11 = vmul.f32 %v2899_v48, %v1195_v62  ;;  %v2901_v19 = vpop.eup %2900 }
 0x287   :  { %v5907_v21 = vadd.f32 %v1197_v38, %v1196_v11 }
 0x290   :  { %v1166_v60 = vpop.f32.mrf.mxu0 }
 0x291   :  { %v1206_v28 = vadd.f32 %v1166_v60, %v429_v26 }
 0x292   :  { %v1168_v52 = vpop.f32.mrf.mxu0 }
 0x293   :  { %v2838_v42 = vmul.f32 -1.442695, %v1206_v28  ;;  %v1213_v46 = vadd.f32 %v9423_v34, %v1168_v52  ;;  %v5924_v28 = vld [vmem:[%s8384_s3 + $0x2f0] sm:$0xff]  ;;  %v5938_v52 = vld [vmem:[%s8384_s3 + $0x2c0] sm:$0xff] }
 0x294   :  { %v5952_v34 = vld [vmem:[%s8384_s3 + $0x290] sm:$0xff] }
 0x295   :  { %2902 = vpow2.f32 %v2838_v42  ;;  %v1214_v62 = vmul.f32 %v2901_v19, %v1213_v46  ;;  %v5945_v42 = vld [vmem:[%s8384_s3 + $0x298] sm:$0xff]  ;;  %v5959_v46 = vld [vmem:[%s8384_s3 + $0x268] sm:$0xff]  ;;  %v5966_v19 = vld [vmem:[%s8384_s3 + $0x260] sm:$0xff] }
 0x297   :  { %v1215_v48 = vadd.f32 %v1214_v62, %v431_v6  ;;  %v5980_v6 = vld [vmem:[%s8384_s3 + $0x230] sm:$0xff]  ;;  %v5987_v62 = vld [vmem:[%s8384_s3 + $0x208] sm:$0xff] }
 0x2a2   :  { %v2903_v40 = vpop.eup %2902 }
 0x2a3   :  { %v1210_v10 = vadd.f32 1.0, %v2903_v40  ;;  %v6001_v40 = vld [vmem:[%s8384_s3 + $0x1d8] sm:$0xff] }
 0x2a5   :  { %2904 = vrcp.f32 %v1210_v10  ;;  %v6008_v10 = vld [vmem:[%s8384_s3 + $0x1d0] sm:$0xff] }
 0x2a6   :  { %2906 = vtanh.f32 %v1215_v48  ;;  %v5994_v48 = vld [vmem:[%s8384_s3 + $0x200] sm:$0xff] }
 0x2b2   :  { %v2905_v44 = vpop.eup %2904 }
 0x2b3   :  { %v1217_v11 = vsub.f32 1.0, %v2905_v44  ;;  %v2907_v38 = vpop.eup %2906  ;;  %v1219_v60 = vmul.f32 %v2905_v44, %v5057_v56  ;;  %v5931_v56 = vld [vmem:[%s8384_s3 + $0x2c8] sm:$0xff] }
 0x2b4   :  { %v6015_v44 = vld [vmem:[%s8384_s3 + $0x1a8] sm:$0xff] }
 0x2b5   :  { %v1218_v50 = vmul.f32 %v2907_v38, %v1217_v11  ;;  %v6022_v11 = vld [vmem:[%s8384_s3 + $0x1a0] sm:$0xff]  ;;  %v6029_v38 = vld [vmem:[%s8384_s3 + $0x178] sm:$0xff] }
 0x2b7   :  { %v5915_v26 = vadd.f32 %v1219_v60, %v1218_v50  ;;  %v6036_v50 = vld [vmem:[%s8384_s3 + $0x170] sm:$0xff]  ;;  %v6043_v60 = vld [vmem:[%s8384_s3 + $0x148] sm:$0xff] }
 0x2b9   :  { %1285 = vmatprep.mubr.f32.mxu1 %v5915_v26  ;;  %1356 = vmatprep.mubr.f32.mxu0 %v5915_v26 }
 0x2ba   :  { %1286 = vmatmul.mubr.f32.vlgmr.msra.gmra.mxu1 %v5907_v21  ;;  %1357 = vmatmul.mubr.f32.vlgmr.msra.gmra.mxu0 %v5907_v21 }
 0x2bb   :  { %1364 = vmatpush1.msra.mxu1 %v5924_v28  ;;  %1427 = vmatprep.mubr.f32.mxu1 %v5915_v26 }
 0x2bc   :  { %1365 = vmatprep.subr.mxu1 %v5931_v56  ;;  %1485 = vmatpush1.msra.mxu0 %v5071_v22 }
 0x2bd   :  { %1366 = vmatpush1.msra.mxu1 %v5938_v52  ;;  %1486 = vmatprep.subr.mxu0 %v5078_v36 }
 0x2be   :  { %1367 = vmatprep.subr.mxu1 %v5945_v42  ;;  %1487 = vmatpush1.msra.mxu0 %v5085_v24 }
 0x2bf   :  { %1368 = vmatpush1.msra.mxu1 %v5952_v34  ;;  %1488 = vmatprep.subr.mxu0 %v5092_v20 }
 0x2c0   :  { %1369 = vmatprep.subr.mxu1 %v5959_v46  ;;  %1489 = vmatpush1.msra.mxu0 %v5099_v8 }
 0x2c1   :  { %1370 = vmatpush1.msra.mxu1 %v5966_v19  ;;  %1490 = vmatprep.subr.mxu0 %v5106_v54 }
 0x2c2   :  { %1371 = vmatprep.subr.mxu1 %v5973_v58  ;;  %1491 = vmatpush1.msra.mxu0 %v5113_v18 }
 0x2c3   :  { %1372 = vmatpush1.msra.mxu1 %v5980_v6  ;;  %1492 = vmatprep.subr.mxu0 %v5120_v16 }
 0x2c4   :  { %1373 = vmatprep.subr.mxu1 %v5987_v62  ;;  %1493 = vmatpush1.msra.mxu0 %v5127_v23 }
 0x2c5   :  { %1374 = vmatpush1.msra.mxu1 %v5994_v48  ;;  %1494 = vmatprep.subr.mxu0 %v5134_v25 }
 0x2c6   :  { %1375 = vmatprep.subr.mxu1 %v6001_v40  ;;  %1495 = vmatpush1.msra.mxu0 %v5141_v27 }
 0x2c7   :  { %1376 = vmatpush1.msra.mxu1 %v6008_v10  ;;  %1496 = vmatprep.subr.mxu0 %v5148_v29 }
 0x2c8   :  { %1377 = vmatprep.subr.mxu1 %v6015_v44  ;;  %1497 = vmatpush1.msra.mxu0 %v5155_v31 }
 0x2c9   :  { %1378 = vmatpush1.msra.mxu1 %v6022_v11  ;;  %1498 = vmatprep.subr.mxu0 %v5162_v33 }
 0x2ca   :  { %1379 = vmatprep.subr.mxu1 %v6029_v38  ;;  %1499 = vmatpush1.msra.mxu0 %v5169_v35  ;;  %v6050_v35 = vld [vmem:[%s8384_s3 + $0x140] sm:$0xff] }
 0x2cb   :  { %1380 = vmatpush1.msra.mxu1 %v6036_v50  ;;  %1500 = vmatprep.subr.mxu0 %v5176_v37  ;;  %v6057_v37 = vld [vmem:[%s8384_s3 + $0x118] sm:$0xff] }
 0x2cc   :  { %1381 = vmatprep.subr.mxu1 %v6043_v60  ;;  %1501 = vmatpush1.msra.mxu0 %v5183_v39  ;;  %v6064_v39 = vld [vmem:[%s8384_s3 + $0x110] sm:$0xff] }
 0x2cd   :  { %1382 = vmatpush1.msra.mxu1 %v6050_v35  ;;  %1502 = vmatprep.subr.mxu0 %v5190_v41  ;;  %v6071_v41 = vld [vmem:[%s8384_s3 + $0xe8] sm:$0xff] }
 0x2ce   :  { %1383 = vmatprep.subr.mxu1 %v6057_v37  ;;  %1503 = vmatpush1.msra.mxu0 %v5197_v43  ;;  %v6078_v43 = vld [vmem:[%s8384_s3 + $0xe0] sm:$0xff] }
 0x2cf   :  { %1384 = vmatpush1.msra.mxu1 %v6064_v39  ;;  %1504 = vmatprep.subr.mxu0 %v5204_v45  ;;  %v6085_v45 = vld [vmem:[%s8384_s3 + $0xb8] sm:$0xff] }
 0x2d0   :  { %1385 = vmatprep.subr.mxu1 %v6071_v41  ;;  %1505 = vmatpush1.msra.mxu0 %v5211_v47  ;;  %v6092_v47 = vld [vmem:[%s8384_s3 + $0xb0] sm:$0xff] }
 0x2d1   :  { %1386 = vmatpush1.msra.mxu1 %v6078_v43  ;;  %1506 = vmatprep.subr.mxu0 %v5218_v49  ;;  %v6099_v49 = vld [vmem:[%s8384_s3 + $0x88] sm:$0xff] }
 0x2d2   :  { %1387 = vmatprep.subr.mxu1 %v6085_v45  ;;  %1507 = vmatpush1.msra.mxu0 %v5225_v51  ;;  %9425 = vst [vmem:[#allocation12_spill] sm:$0xff] %v6099_v49  ;;  %v6106_v51 = vld [vmem:[%s8384_s3 + $0x80] sm:$0xff] }
 0x2d3   :  { %1388 = vmatpush1.msra.mxu1 %v6092_v47  ;;  %1508 = vmatprep.subr.mxu0 %v5232_v53  ;;  %9426 = vst [vmem:[#allocation3_spill] sm:$0xff] %v6106_v51  ;;  %v6113_v53 = vld [vmem:[%s8384_s3 + $0x58] sm:$0xff] }
 0x2d4   :  { %1389 = vmatprep.subr.mxu1 %v6099_v49  ;;  %1509 = vmatpush1.msra.mxu0 %v5239_v55  ;;  %9427 = vst [vmem:[#allocation71_spill] sm:$0xff] %v6113_v53  ;;  %v6120_v55 = vld [vmem:[%s8384_s3 + $0x50] sm:$0xff] }
 0x2d5   :  { %1390 = vmatpush1.msra.mxu1 %v6106_v51  ;;  %1510 = vmatprep.subr.mxu0 %v5246_v57  ;;  %9428 = vst [vmem:[#allocation38_spill] sm:$0xff] %v6120_v55  ;;  %v6127_v57 = vld [vmem:[%s8384_s3 + $0x28] sm:$0xff] }
 0x2d6   :  { %1391 = vmatprep.subr.mxu1 %v6113_v53  ;;  %1511 = vmatpush1.msra.mxu0 %v5253_v59  ;;  %9429 = vst [vmem:[#allocation16_spill] sm:$0xff] %v6127_v57  ;;  %v6134_v59 = vld [vmem:[%s8384_s3 + $0x20] sm:$0xff] }
 0x2d7   :  { %1392 = vmatpush1.msra.mxu1 %v6120_v55  ;;  %1512 = vmatprep.subr.mxu0 %v5260_v61  ;;  %9430 = vst [vmem:[#allocation41_spill] sm:$0xff] %v6134_v59  ;;  %v6141_v61 = vld [vmem:[%s8384_s3 + $0x5f8] sm:$0xff] }
 0x2d8   :  { %1393 = vmatprep.subr.mxu1 %v6127_v57  ;;  %1513 = vmatpush1.msra.mxu0 %v5267_v63  ;;  %9431 = vst [vmem:[#allocation37_spill] sm:$0xff] %v6141_v61  ;;  %v6148_v63 = vld [vmem:[%s8384_s3 + $0x5f0] sm:$0xff] }
 0x2d9   :  { %1394 = vmatpush1.msra.mxu1 %v6134_v59  ;;  %1514 = vmatprep.subr.mxu0 %v5274_v1  ;;  %9432 = vst [vmem:[#allocation43_spill] sm:$0xff] %v6148_v63  ;;  %v6155_v1 = vld [vmem:[%s8384_s3 + $0x5c8] sm:$0xff]  ;;  %v9554_v59 = vld [vmem:[#allocation34_spill] sm:$0xff] }
 0x2da   :  { %1395 = vmatprep.subr.mxu1 %v6141_v61  ;;  %1515 = vmatpush1.msra.mxu0 %v5281_v4  ;;  %9433 = vst [vmem:[#allocation39_spill] sm:$0xff] %v6155_v1  ;;  %v6162_v4 = vld [vmem:[%s8384_s3 + $0x5c0] sm:$0xff]  ;;  %v312_v57 = vadd.f32 %v9554_v59, %v5022_v12 }
 0x2db   :  { %1396 = vmatpush2.msra.mxu1 %v6148_v63  ;;  %1516 = vmatprep.subr.mxu0 %v5288_v7  ;;  %9434 = vst [vmem:[#allocation163_spill] sm:$0xff] %v6162_v4  ;;  %v6169_v7 = vld [vmem:[%s8384_s3 + $0x598] sm:$0xff] }
 0x2dc   :  { %1397 = vmatprep.subr.mxu1 %v6155_v1  ;;  %1517 = vmatpush2.msra.mxu0 %v5295_v9  ;;  %9435 = vst [vmem:[#allocation164_spill] sm:$0xff] %v6169_v7  ;;  %v6176_v9 = vld [vmem:[%s8384_s3 + $0x590] sm:$0xff]  ;;  %v9495_v1 = vld [vmem:[#allocation107_spill] sm:$0xff] }
 0x2dd   :  { %1398 = vmatpush2.msra.mxu1 %v6162_v4  ;;  %1518 = vmatprep.subr.mxu0 %v5302_v13  ;;  %9436 = vst [vmem:[#allocation165_spill] sm:$0xff] %v6176_v9  ;;  %v6183_v13 = vld [vmem:[%s8384_s3 + $0x568] sm:$0xff] }
 0x2de   :  { %1399 = vmatprep.subr.mxu1 %v6169_v7  ;;  %1519 = vmatpush2.msra.mxu0 %v5309_v15  ;;  %9437 = vst [vmem:[#allocation166_spill] sm:$0xff] %v6183_v13  ;;  %v6190_v15 = vld [vmem:[%s8384_s3 + $0x560] sm:$0xff]  ;;  %v9492_v4 = vld [vmem:[#allocation104_spill] sm:$0xff] }
 0x2df   :  { %1400 = vmatpush2.msra.mxu1 %v6176_v9  ;;  %1520 = vmatprep.subr.mxu0 %v5316_v3  ;;  %9438 = vst [vmem:[#allocation167_spill] sm:$0xff] %v6190_v15  ;;  %v6197_v3 = vld [vmem:[%s8384_s3 + $0x538] sm:$0xff]  ;;  %v9491_v7 = vld [vmem:[#allocation103_spill] sm:$0xff] }
 0x2e0   :  { %1401 = vmatprep.subr.mxu1 %v6183_v13  ;;  %1521 = vmatpush2.msra.mxu0 %v5323_v5  ;;  %9439 = vst [vmem:[#allocation168_spill] sm:$0xff] %v6197_v3  ;;  %v6204_v5 = vld [vmem:[%s8384_s3 + $0x530] sm:$0xff]  ;;  %v9487_v13 = vld [vmem:[#allocation99_spill] sm:$0xff]  ;;  %v9490_v9 = vld [vmem:[#allocation102_spill] sm:$0xff] }
 0x2e1   :  { %1402 = vmatpush2.msra.mxu1 %v6190_v15  ;;  %1522 = vmatprep.subr.mxu0 %v5330_v2  ;;  %9440 = vst [vmem:[#allocation169_spill] sm:$0xff] %v6204_v5  ;;  %v6211_v2 = vld [vmem:[%s8384_s3 + $0x508] sm:$0xff]  ;;  %v9442_v15 = vld [vmem:[#allocation78_spill] sm:$0xff] }
 0x2e2   :  { %1403 = vmatprep.subr.mxu1 %v6197_v3  ;;  %1523 = vmatpush2.msra.mxu0 %v5337_v0  ;;  %9441 = vst [vmem:[#allocation170_spill] sm:$0xff] %v6211_v2  ;;  %v6218_v0 = vld [vmem:[%s8384_s3 + $0x500] sm:$0xff] }
 0x2e3   :  { %1404 = vmatpush2.msra.mxu1 %v6204_v5  ;;  %1524 = vmatprep.subr.mxu0 %v5344_v32  ;;  %9443 = vst [vmem:[#allocation171_spill] sm:$0xff] %v6218_v0  ;;  %v9444_v3 = vld [vmem:[#allocation79_spill] sm:$0xff]  ;;  %v6225_v32 = vld [vmem:[%s8384_s3 + $0x4d8] sm:$0xff]  ;;  %v9446_v5 = vld [vmem:[#allocation80_spill] sm:$0xff] }
 0x2e4   :  { %1405 = vmatprep.subr.mxu1 %v6211_v2  ;;  %1525 = vmatpush2.msra.mxu0 %v9442_v15  ;;  %9445 = vst [vmem:[#allocation172_spill] sm:$0xff] %v6225_v32  ;;  %v6232_v15 = vld [vmem:[%s8384_s3 + $0x4d0] sm:$0xff] }
 0x2e5   :  { %1406 = vmatpush2.msra.mxu1 %v6218_v0  ;;  %1526 = vmatprep.subr.mxu0 %v9444_v3  ;;  %9447 = vst [vmem:[#allocation173_spill] sm:$0xff] %v6232_v15  ;;  %v9448_v2 = vld [vmem:[#allocation81_spill] sm:$0xff]  ;;  %v6239_v3 = vld [vmem:[%s8384_s3 + $0x4a8] sm:$0xff]  ;;  %v9450_v0 = vld [vmem:[#allocation82_spill] sm:$0xff] }
 0x2e6   :  { %1407 = vmatprep.subr.mxu1 %v6225_v32  ;;  %1527 = vmatpush2.msra.mxu0 %v9446_v5  ;;  %9449 = vst [vmem:[#allocation174_spill] sm:$0xff] %v6239_v3  ;;  %v6246_v5 = vld [vmem:[%s8384_s3 + $0x4a0] sm:$0xff] }
 0x2e7   :  { %1408 = vmatpush2.msra.mxu1 %v6232_v15  ;;  %1528 = vmatprep.subr.mxu0 %v9448_v2  ;;  %9451 = vst [vmem:[#allocation175_spill] sm:$0xff] %v6246_v5  ;;  %v9452_v32 = vld [vmem:[#allocation83_spill] sm:$0xff]  ;;  %v6253_v2 = vld [vmem:[%s8384_s3 + $0x478] sm:$0xff]  ;;  %v9454_v15 = vld [vmem:[#allocation84_spill] sm:$0xff] }
 0x2e8   :  { %1409 = vmatprep.subr.mxu1 %v6239_v3  ;;  %1529 = vmatpush2.msra.mxu0 %v9450_v0  ;;  %9453 = vst [vmem:[#allocation176_spill] sm:$0xff] %v6253_v2  ;;  %v6260_v0 = vld [vmem:[%s8384_s3 + $0x470] sm:$0xff] }
 0x2e9   :  { %1410 = vmatpush2.msra.mxu1 %v6246_v5  ;;  %1530 = vmatprep.subr.mxu0 %v9452_v32  ;;  %9455 = vst [vmem:[#allocation177_spill] sm:$0xff] %v6260_v0  ;;  %v9456_v3 = vld [vmem:[#allocation85_spill] sm:$0xff]  ;;  %v6267_v32 = vld [vmem:[%s8384_s3 + $0x448] sm:$0xff]  ;;  %v9458_v5 = vld [vmem:[#allocation86_spill] sm:$0xff] }
 0x2ea   :  { %1411 = vmatprep.subr.mxu1 %v6253_v2  ;;  %1531 = vmatpush2.msra.mxu0 %v9454_v15  ;;  %9457 = vst [vmem:[#allocation178_spill] sm:$0xff] %v6267_v32  ;;  %v6274_v15 = vld [vmem:[%s8384_s3 + $0x440] sm:$0xff] }
 0x2eb   :  { %1412 = vmatpush2.msra.mxu1 %v6260_v0  ;;  %1532 = vmatprep.subr.mxu0 %v9456_v3  ;;  %9459 = vst [vmem:[#allocation179_spill] sm:$0xff] %v6274_v15  ;;  %v9460_v2 = vld [vmem:[#allocation87_spill] sm:$0xff]  ;;  %v6281_v3 = vld [vmem:[%s8384_s3 + $0x418] sm:$0xff]  ;;  %v9462_v0 = vld [vmem:[#allocation88_spill] sm:$0xff] }
 0x2ec   :  { %1413 = vmatprep.subr.mxu1 %v6267_v32  ;;  %1533 = vmatpush2.msra.mxu0 %v9458_v5  ;;  %9461 = vst [vmem:[#allocation180_spill] sm:$0xff] %v6281_v3  ;;  %v6288_v5 = vld [vmem:[%s8384_s3 + $0x410] sm:$0xff] }
 0x2ed   :  { %1414 = vmatpush2.msra.mxu1 %v6274_v15  ;;  %1534 = vmatprep.subr.mxu0 %v9460_v2  ;;  %9463 = vst [vmem:[#allocation181_spill] sm:$0xff] %v6288_v5  ;;  %v9464_v32 = vld [vmem:[#allocation89_spill] sm:$0xff]  ;;  %v6295_v2 = vld [vmem:[%s8384_s3 + $0x3e8] sm:$0xff]  ;;  %v9466_v15 = vld [vmem:[#allocation90_spill] sm:$0xff] }
 0x2ee   :  { %1415 = vmatprep.subr.mxu1 %v6281_v3  ;;  %1535 = vmatpush2.msra.mxu0 %v9462_v0  ;;  %9465 = vst [vmem:[#allocation182_spill] sm:$0xff] %v6295_v2  ;;  %v6302_v0 = vld [vmem:[%s8384_s3 + $0x3e0] sm:$0xff] }
 0x2ef   :  { %1416 = vmatpush2.msra.mxu1 %v6288_v5  ;;  %1536 = vmatprep.subr.mxu0 %v9464_v32  ;;  %9467 = vst [vmem:[#allocation183_spill] sm:$0xff] %v6302_v0  ;;  %v9468_v3 = vld [vmem:[#allocation91_spill] sm:$0xff]  ;;  %v6309_v32 = vld [vmem:[%s8384_s3 + $0x3b8] sm:$0xff]  ;;  %v9470_v5 = vld [vmem:[#allocation92_spill] sm:$0xff] }
 0x2f0   :  { %1417 = vmatprep.subr.mxu1 %v6295_v2  ;;  %1537 = vmatpush2.msra.mxu0 %v9466_v15  ;;  %9469 = vst [vmem:[#allocation184_spill] sm:$0xff] %v6309_v32  ;;  %v6316_v15 = vld [vmem:[%s8384_s3 + $0x3b0] sm:$0xff] }
 0x2f1   :  { %1418 = vmatpush2.msra.mxu1 %v6302_v0  ;;  %1538 = vmatprep.subr.mxu0 %v9468_v3  ;;  %9471 = vst [vmem:[#allocation185_spill] sm:$0xff] %v6316_v15  ;;  %v9472_v2 = vld [vmem:[#allocation93_spill] sm:$0xff]  ;;  %v6323_v3 = vld [vmem:[%s8384_s3 + $0x388] sm:$0xff]  ;;  %v9474_v0 = vld [vmem:[#allocation94_spill] sm:$0xff] }
 0x2f2   :  { %1419 = vmatprep.subr.mxu1 %v6309_v32  ;;  %1539 = vmatpush2.msra.mxu0 %v9470_v5  ;;  %9473 = vst [vmem:[#allocation186_spill] sm:$0xff] %v6323_v3  ;;  %v6330_v5 = vld [vmem:[%s8384_s3 + $0x380] sm:$0xff] }
 0x2f3   :  { %1420 = vmatpush2.msra.mxu1 %v6316_v15  ;;  %1540 = vmatprep.subr.mxu0 %v9472_v2  ;;  %9475 = vst [vmem:[#allocation187_spill] sm:$0xff] %v6330_v5  ;;  %v9476_v32 = vld [vmem:[#allocation95_spill] sm:$0xff]  ;;  %v6337_v2 = vld [vmem:[%s8384_s3 + $0x358] sm:$0xff]  ;;  %v9478_v15 = vld [vmem:[#allocation57_spill] sm:$0xff] }
 0x2f4   :  { %1421 = vmatprep.subr.mxu1 %v6323_v3  ;;  %1541 = vmatpush2.msra.mxu0 %v9474_v0  ;;  %9477 = vst [vmem:[#allocation188_spill] sm:$0xff] %v6337_v2  ;;  %v6344_v0 = vld [vmem:[%s8384_s3 + $0x350] sm:$0xff]  ;;  %v9480_v3 = vld [vmem:[#allocation59_spill] sm:$0xff] }
 0x2f5   :  { %1422 = vmatpush2.msra.mxu1 %v6330_v5  ;;  %1542 = vmatprep.subr.mxu0 %v9476_v32  ;;  %9479 = vst [vmem:[#allocation189_spill] sm:$0xff] %v6344_v0  ;;  %v6351_v32 = vld [vmem:[%s8384_s3 + $0x328] sm:$0xff] }
 0x2f6   :  { %1423 = vmatprep.subr.mxu1 %v6337_v2  ;;  %1543 = vmatpush2.msra.mxu0 %v9478_v15  ;;  %9481 = vst [vmem:[#allocation190_spill] sm:$0xff] %v6351_v32  ;;  %v9482_v5 = vld [vmem:[#allocation96_spill] sm:$0xff]  ;;  %v6358_v15 = vld [vmem:[%s8384_s3 + $0x320] sm:$0xff]  ;;  %v9484_v2 = vld [vmem:[#allocation97_spill] sm:$0xff] }
 0x2f7   :  { %1424 = vmatpush2.msra.mxu1 %v6344_v0  ;;  %1544 = vmatprep.subr.mxu0 %v9480_v3  ;;  %9483 = vst [vmem:[#allocation191_spill] sm:$0xff] %v6358_v15  ;;  %v9485_v3 = vld [vmem:[#allocation63_spill] sm:$0xff]  ;;  %v9486_v0 = vld [vmem:[#allocation98_spill] sm:$0xff] }
 0x2f8   :  { %1425 = vmatprep.subr.mxu1 %v6351_v32  ;;  %1545 = vmatpush2.msra.mxu0 %v9482_v5  ;;  %v9488_v32 = vld [vmem:[#allocation100_spill] sm:$0xff]  ;;  %v9489_v5 = vld [vmem:[#allocation101_spill] sm:$0xff] }
 0x2f9   :  { %1426 = vmatpush2.msra.mxu1 %v6358_v15  ;;  %1546 = vmatprep.subr.mxu0 %v9484_v2  ;;  %v9493_v15 = vld [vmem:[#allocation105_spill] sm:$0xff]  ;;  %v9494_v2 = vld [vmem:[#allocation106_spill] sm:$0xff] }
 0x2fa   :  { %1428 = vmatmul.mubr.f32.vlgmr.msra.gmra.mxu1 %v5907_v21  ;;  %1555 = vmatprep.subr.mxu1 %v9485_v3  ;;  %v9496_v3 = vld [vmem:[#allocation108_spill] sm:$0xff] }
 0x2fb   :  { %1556 = vmatpush1.msra.mxu1 %v9486_v0  ;;  %1547 = vmatpush2.msra.mxu0 %v9487_v13  ;;  %v9497_v0 = vld [vmem:[#allocation109_spill] sm:$0xff]  ;;  %v9498_v13 = vld [vmem:[#allocation110_spill] sm:$0xff] }
 0x2fc   :  { %1557 = vmatprep.subr.mxu1 %v9488_v32  ;;  %1626 = vmatprep.subr.mxu0 %v9489_v5  ;;  %v9499_v32 = vld [vmem:[#allocation111_spill] sm:$0xff]  ;;  %v9500_v5 = vld [vmem:[#allocation112_spill] sm:$0xff] }
 0x2fd   :  { %1558 = vmatpush1.msra.mxu1 %v9490_v9  ;;  %v9501_v9 = vld [vmem:[#allocation113_spill] sm:$0xff] }
 0x2fe   :  { %1559 = vmatprep.subr.mxu1 %v9491_v7  ;;  %v9502_v7 = vld [vmem:[#allocation114_spill] sm:$0xff] }
 0x2ff   :  { %1560 = vmatpush1.msra.mxu1 %v9492_v4  ;;  %v9503_v4 = vld [vmem:[#allocation115_spill] sm:$0xff] }
 0x300   :  { %1561 = vmatprep.subr.mxu1 %v9493_v15  ;;  %v9504_v15 = vld [vmem:[#allocation116_spill] sm:$0xff] }
 0x301   :  { %1562 = vmatpush1.msra.mxu1 %v9494_v2  ;;  %v9505_v2 = vld [vmem:[#allocation117_spill] sm:$0xff] }
 0x302   :  { %1563 = vmatprep.subr.mxu1 %v9495_v1  ;;  %v9506_v1 = vld [vmem:[#allocation118_spill] sm:$0xff] }
 0x303   :  { %1564 = vmatpush1.msra.mxu1 %v9496_v3  ;;  %v9507_v3 = vld [vmem:[#allocation119_spill] sm:$0xff] }
 0x304   :  { %1565 = vmatprep.subr.mxu1 %v9497_v0  ;;  %v9508_v0 = vld [vmem:[#allocation120_spill] sm:$0xff] }
 0x305   :  { %1566 = vmatpush1.msra.mxu1 %v9498_v13  ;;  %v9509_v13 = vld [vmem:[#allocation121_spill] sm:$0xff] }
 0x306   :  { %1567 = vmatprep.subr.mxu1 %v9499_v32  ;;  %v9510_v32 = vld [vmem:[#allocation122_spill] sm:$0xff] }
 0x307   :  { %1568 = vmatpush1.msra.mxu1 %v9500_v5  ;;  %v9511_v5 = vld [vmem:[#allocation123_spill] sm:$0xff] }
 0x308   :  { %1569 = vmatprep.subr.mxu1 %v9501_v9  ;;  %v9512_v9 = vld [vmem:[#allocation124_spill] sm:$0xff] }
 0x309   :  { %1570 = vmatpush1.msra.mxu1 %v9502_v7  ;;  %v9513_v7 = vld [vmem:[#allocation125_spill] sm:$0xff] }
 0x30a   :  { %1571 = vmatprep.subr.mxu1 %v9503_v4  ;;  %v9514_v4 = vld [vmem:[#allocation126_spill] sm:$0xff] }
 0x30b   :  { %1572 = vmatpush1.msra.mxu1 %v9504_v15  ;;  %v9515_v15 = vld [vmem:[#allocation127_spill] sm:$0xff] }
 0x30c   :  { %1573 = vmatprep.subr.mxu1 %v9505_v2  ;;  %v9516_v2 = vld [vmem:[#allocation128_spill] sm:$0xff] }
 0x30d   :  { %1574 = vmatpush1.msra.mxu1 %v9506_v1  ;;  %v9517_v1 = vld [vmem:[#allocation129_spill] sm:$0xff] }
 0x30e   :  { %1575 = vmatprep.subr.mxu1 %v9507_v3  ;;  %v9518_v3 = vld [vmem:[#allocation130_spill] sm:$0xff] }
 0x30f   :  { %1576 = vmatpush1.msra.mxu1 %v9508_v0  ;;  %v9519_v0 = vld [vmem:[#allocation131_spill] sm:$0xff] }
 0x310   :  { %1577 = vmatprep.subr.mxu1 %v9509_v13  ;;  %v9520_v13 = vld [vmem:[#allocation132_spill] sm:$0xff] }
 0x311   :  { %1578 = vmatpush1.msra.mxu1 %v9510_v32  ;;  %v9521_v32 = vld [vmem:[#allocation133_spill] sm:$0xff] }
 0x312   :  { %1579 = vmatprep.subr.mxu1 %v9511_v5  ;;  %v9522_v5 = vld [vmem:[#allocation134_spill] sm:$0xff] }
 0x313   :  { %1580 = vmatpush1.msra.mxu1 %v9512_v9  ;;  %v9523_v9 = vld [vmem:[#allocation135_spill] sm:$0xff] }
 0x314   :  { %1581 = vmatprep.subr.mxu1 %v9513_v7  ;;  %v9524_v7 = vld [vmem:[#allocation136_spill] sm:$0xff] }
 0x315   :  { %1582 = vmatpush1.msra.mxu1 %v9514_v4  ;;  %v9525_v4 = vld [vmem:[#allocation137_spill] sm:$0xff] }
 0x316   :  { %1583 = vmatprep.subr.mxu1 %v9515_v15  ;;  %v9526_v15 = vld [vmem:[#allocation138_spill] sm:$0xff] }
 0x317   :  { %1584 = vmatpush1.msra.mxu1 %v9516_v2  ;;  %v9527_v2 = vld [vmem:[#allocation139_spill] sm:$0xff] }
 0x318   :  { %1585 = vmatprep.subr.mxu1 %v9517_v1  ;;  %v9528_v1 = vld [vmem:[#allocation140_spill] sm:$0xff] }
 0x319   :  { %1586 = vmatpush1.msra.mxu1 %v9518_v3  ;;  %v9529_v3 = vld [vmem:[#allocation141_spill] sm:$0xff] }
 0x31a   :  { %1587 = vmatprep.subr.mxu1 %v9519_v0  ;;  %v9530_v0 = vld [vmem:[#allocation142_spill] sm:$0xff] }
 0x31b   :  { %1588 = vmatpush2.msra.mxu1 %v9520_v13  ;;  %v9531_v13 = vld [vmem:[#allocation143_spill] sm:$0xff] }
 0x31c   :  { %1589 = vmatprep.subr.mxu1 %v9521_v32  ;;  %v9532_v32 = vld [vmem:[#allocation144_spill] sm:$0xff] }
 0x31d   :  { %1590 = vmatpush2.msra.mxu1 %v9522_v5  ;;  %v9533_v5 = vld [vmem:[#allocation145_spill] sm:$0xff] }
 0x31e   :  { %1591 = vmatprep.subr.mxu1 %v9523_v9  ;;  %v9534_v9 = vld [vmem:[#allocation146_spill] sm:$0xff] }
 0x31f   :  { %1592 = vmatpush2.msra.mxu1 %v9524_v7  ;;  %v9535_v7 = vld [vmem:[#allocation147_spill] sm:$0xff] }
 0x320   :  { %1593 = vmatprep.subr.mxu1 %v9525_v4  ;;  %v9536_v4 = vld [vmem:[#allocation148_spill] sm:$0xff] }
 0x321   :  { %1594 = vmatpush2.msra.mxu1 %v9526_v15  ;;  %v9537_v15 = vld [vmem:[#allocation149_spill] sm:$0xff] }
 0x322   :  { %1595 = vmatprep.subr.mxu1 %v9527_v2  ;;  %v9538_v2 = vld [vmem:[#allocation150_spill] sm:$0xff] }
 0x323   :  { %1596 = vmatpush2.msra.mxu1 %v9528_v1  ;;  %v9539_v1 = vld [vmem:[#allocation151_spill] sm:$0xff] }
 0x324   :  { %1597 = vmatprep.subr.mxu1 %v9529_v3  ;;  %v9540_v3 = vld [vmem:[#allocation152_spill] sm:$0xff] }
 0x325   :  { %1598 = vmatpush2.msra.mxu1 %v9530_v0  ;;  %v9541_v0 = vld [vmem:[#allocation153_spill] sm:$0xff] }
 0x326   :  { %1599 = vmatprep.subr.mxu1 %v9531_v13  ;;  %v9542_v13 = vld [vmem:[#allocation154_spill] sm:$0xff] }
 0x327   :  { %1600 = vmatpush2.msra.mxu1 %v9532_v32  ;;  %v9543_v32 = vld [vmem:[#allocation155_spill] sm:$0xff] }
 0x328   :  { %1601 = vmatprep.subr.mxu1 %v9533_v5  ;;  %v9544_v5 = vld [vmem:[#allocation156_spill] sm:$0xff] }
 0x329   :  { %1602 = vmatpush2.msra.mxu1 %v9534_v9  ;;  %v9545_v9 = vld [vmem:[#allocation157_spill] sm:$0xff] }
 0x32a   :  { %1603 = vmatprep.subr.mxu1 %v9535_v7  ;;  %v9546_v7 = vld [vmem:[#allocation158_spill] sm:$0xff] }
 0x32b   :  { %1604 = vmatpush2.msra.mxu1 %v9536_v4  ;;  %v9547_v4 = vld [vmem:[#allocation159_spill] sm:$0xff] }
 0x32c   :  { %1605 = vmatprep.subr.mxu1 %v9537_v15  ;;  %v9548_v15 = vld [vmem:[#allocation160_spill] sm:$0xff] }
 0x32d   :  { %1606 = vmatpush2.msra.mxu1 %v9538_v2  ;;  %v9549_v2 = vld [vmem:[#allocation161_spill] sm:$0xff] }
 0x32e   :  { %1607 = vmatprep.subr.mxu1 %v9539_v1  ;;  %v9550_v1 = vld [vmem:[#allocation162_spill] sm:$0xff] }
 0x32f   :  { %1608 = vmatpush2.msra.mxu1 %v9540_v3 }
 0x330   :  { %1609 = vmatprep.subr.mxu1 %v9541_v0 }
 0x331   :  { %1610 = vmatpush2.msra.mxu1 %v9542_v13  ;;  %v6432_v13 = vld [vmem:[%s8384_s3 + $0x2d8] sm:$0xff] }
 0x332   :  { %1611 = vmatprep.subr.mxu1 %v9543_v32  ;;  %9551 = vst [vmem:[#allocation192_spill] sm:$0xff] %v6432_v13  ;;  %v9552_v32 = vld [vmem:[#allocation74_spill] sm:$0xff] }
 0x333   :  { %1612 = vmatpush2.msra.mxu1 %v9544_v5 }
 0x334   :  { %1613 = vmatprep.subr.mxu1 %v9545_v9 }
 0x335   :  { %1614 = vmatpush2.msra.mxu1 %v9546_v7 }
 0x336   :  { %1615 = vmatprep.subr.mxu1 %v9547_v4  ;;  %v9553_v4 = vld [vmem:[#allocation7_spill] sm:$0xff] }
 0x337   :  { %1616 = vmatpush2.msra.mxu1 %v9548_v15 }
 0x338   :  { %1617 = vmatprep.subr.mxu1 %v9549_v2 }
 0x339   :  { %1618 = vmatpush2.msra.mxu1 %v9550_v1 }
 0x33a   :  { %1747 = vmatprep.subr.mxu1 %v6432_v13 }
 0x37a   :  { %v1287_v5 = vpop.f32.mrf.mxu1  ;;  %v1358_v1 = vpop.f32.mrf.mxu0 }
 0x37b   :  { %v1440_v9 = vadd.f32 %v1287_v5, %v9552_v32  ;;  %v9555_v5 = vld [vmem:[#allocation42_spill] sm:$0xff] }
 0x37c   :  { %v1289_v7 = vpop.f32.mrf.mxu1  ;;  %v1360_v61 = vpop.f32.mrf.mxu0 }
 0x37d   :  { %v2839_v0 = vmul.f32 -1.442695, %v1440_v9  ;;  %v1447_v3 = vadd.f32 %v1289_v7, %v9553_v4  ;;  %v1462_v55 = vadd.f32 %v1360_v61, %v312_v57  ;;  %v1454_v9 = vadd.f32 %v9555_v5, %v1358_v1  ;;  %v9556_v4 = vld [vmem:[#allocation20_spill] sm:$0xff] }
 0x37e   :  { %v292_v7 = vadd.f32 %v9556_v4, %v5045_v17 }
 0x37f   :  { %2908 = vpow2.f32 %v2839_v0  ;;  %v2840_v15 = vmul.f32 -1.442695, %v1447_v3  ;;  %v2841_v53 = vmul.f32 -1.442695, %v1462_v55 }
 0x381   :  { %2910 = vpow2.f32 %v2840_v15 }
 0x38c   :  { %v2909_v2 = vpop.eup %2908 }
 0x38d   :  { %v1444_v63 = vadd.f32 1.0, %v2909_v2 }
 0x38e   :  { %v2911_v13 = vpop.eup %2910 }
 0x38f   :  { %2912 = vrcp.f32 %v1444_v63  ;;  %v1451_v51 = vadd.f32 1.0, %v2911_v13 }
 0x390   :  { %2914 = vpow2.f32 %v2841_v53  ;;  %v9557_v53 = vld [vmem:[#allocation33_spill] sm:$0xff] }
 0x391   :  { %2916 = vrcp.f32 %v1451_v51  ;;  %v423_v1 = vadd.f32 %v9557_v53, %v9421_v30 }
 0x39c   :  { %v2913_v32 = vpop.eup %2912 }
 0x39d   :  { %v1455_v15 = vmul.f32 %v2913_v32, %v1454_v9  ;;  %v2915_v63 = vpop.eup %2914  ;;  %v6450_v32 = vld [vmem:[%s8387_s5 + $0x1] ss:$0 sm:$0xff] }
 0x39e   :  { %v2917_v2 = vpop.eup %2916  ;;  %v1466_v0 = vadd.f32 1.0, %v2915_v63 }
 0x39f   :  { %v1456_v3 = vadd.f32 %v1455_v15, %v292_v7  ;;  %v1458_v49 = vsub.f32 1.0, %v2917_v2  ;;  %v1460_v55 = vmul.f32 %v2917_v2, %v5907_v21  ;;  %v9558_v21 = vld [vmem:[#allocation35_spill] sm:$0xff] }
 0x3a0   :  { %v425_v7 = vadd.f32 %v9558_v21, %v5052_v14  ;;  %v9580_v21 = vld [vmem:[#allocation61_spill] sm:$0xff] }
 0x3a1   :  { %2918 = vtanh.f32 %v1456_v3 }
 0x3a2   :  { %2920 = vrcp.f32 %v1466_v0 }
 0x3ae   :  { %v2919_v59 = vpop.eup %2918 }
 0x3af   :  { %v1459_v57 = vmul.f32 %v2919_v59, %v1458_v49  ;;  %v2921_v49 = vpop.eup %2920 }
 0x3b1   :  { %v6443_v61 = vadd.f32 %v1460_v55, %v1459_v57 }
 0x3ba   :  { %v1429_v13 = vpop.f32.mrf.mxu1 }
 0x3bb   :  { %v1469_v5 = vadd.f32 %v1429_v13, %v423_v1  ;;  %v9574_v13 = vld [vmem:[#allocation56_spill] sm:$0xff] }
 0x3bc   :  { %v1431_v9 = vpop.f32.mrf.mxu1 }
 0x3bd   :  { %v2842_v51 = vmul.f32 -1.442695, %v1469_v5  ;;  %v1476_v4 = vadd.f32 %v6450_v32, %v1431_v9  ;;  %v9575_v5 = vld [vmem:[#allocation38_spill] sm:$0xff] }
 0x3be   :  { %v9576_v9 = vld [vmem:[#allocation58_spill] sm:$0xff] }
 0x3bf   :  { %2922 = vpow2.f32 %v2842_v51  ;;  %v1477_v15 = vmul.f32 %v2921_v49, %v1476_v4  ;;  %v9577_v51 = vld [vmem:[#allocation16_spill] sm:$0xff]  ;;  %v9579_v49 = vld [vmem:[#allocation41_spill] sm:$0xff] }
 0x3c0   :  { %v9578_v4 = vld [vmem:[#allocation60_spill] sm:$0xff] }
 0x3c1   :  { %v1478_v3 = vadd.f32 %v1477_v15, %v425_v7  ;;  %v9581_v7 = vld [vmem:[#allocation37_spill] sm:$0xff]  ;;  %v9582_v15 = vld [vmem:[#allocation62_spill] sm:$0xff] }
 0x3cc   :  { %v2923_v63 = vpop.eup %2922 }
 0x3cd   :  { %v1473_v2 = vadd.f32 1.0, %v2923_v63  ;;  %v9584_v63 = vld [vmem:[#allocation64_spill] sm:$0xff] }
 0x3cf   :  { %2924 = vrcp.f32 %v1473_v2  ;;  %v9585_v2 = vld [vmem:[#allocation39_spill] sm:$0xff] }
 0x3d0   :  { %2926 = vtanh.f32 %v1478_v3  ;;  %v9583_v3 = vld [vmem:[#allocation43_spill] sm:$0xff] }
 0x3dc   :  { %v2925_v0 = vpop.eup %2924 }
 0x3dd   :  { %v1480_v59 = vsub.f32 1.0, %v2925_v0  ;;  %v2927_v57 = vpop.eup %2926  ;;  %v1482_v53 = vmul.f32 %v2925_v0, %v5915_v26  ;;  %v9573_v26 = vld [vmem:[#allocation71_spill] sm:$0xff]  ;;  %v9586_v0 = vld [vmem:[#allocation66_spill] sm:$0xff] }
 0x3df   :  { %v1481_v55 = vmul.f32 %v2927_v57, %v1480_v59  ;;  %v9587_v59 = vld [vmem:[#allocation163_spill] sm:$0xff]  ;;  %v9588_v57 = vld [vmem:[#allocation68_spill] sm:$0xff] }
 0x3e1   :  { %v6456_v1 = vadd.f32 %v1482_v53, %v1481_v55  ;;  %v9589_v55 = vld [vmem:[#allocation164_spill] sm:$0xff]  ;;  %v9590_v53 = vld [vmem:[#allocation69_spill] sm:$0xff] }
 0x3e3   :  { %1548 = vmatprep.mubr.f32.mxu0 %v6456_v1  ;;  %1619 = vmatprep.mubr.f32.mxu1 %v6456_v1 }
 0x3e4   :  { %1549 = vmatmul.mubr.f32.vlgmr.msra.gmra.mxu0 %v6443_v61  ;;  %1620 = vmatmul.mubr.f32.vlgmr.msra.gmra.mxu1 %v6443_v61 }
 0x3e5   :  { %1627 = vmatpush1.msra.mxu0 %v5924_v28  ;;  %1690 = vmatprep.mubr.f32.mxu0 %v6456_v1 }
 0x3e6   :  { %1628 = vmatprep.subr.mxu0 %v5931_v56  ;;  %1748 = vmatpush1.msra.mxu1 %v5071_v22  ;;  %v9559_v22 = vld [vmem:[#allocation44_spill] sm:$0xff] }
 0x3e7   :  { %1629 = vmatpush1.msra.mxu0 %v5938_v52  ;;  %1749 = vmatprep.subr.mxu1 %v5078_v36  ;;  %v9560_v36 = vld [vmem:[#allocation45_spill] sm:$0xff] }
 0x3e8   :  { %1630 = vmatprep.subr.mxu0 %v5945_v42  ;;  %1750 = vmatpush1.msra.mxu1 %v5085_v24  ;;  %v9561_v24 = vld [vmem:[#allocation46_spill] sm:$0xff] }
 0x3e9   :  { %1631 = vmatpush1.msra.mxu0 %v5952_v34  ;;  %1751 = vmatprep.subr.mxu1 %v5092_v20  ;;  %v9562_v20 = vld [vmem:[#allocation47_spill] sm:$0xff] }
 0x3ea   :  { %1632 = vmatprep.subr.mxu0 %v5959_v46  ;;  %1752 = vmatpush1.msra.mxu1 %v5099_v8  ;;  %v9563_v8 = vld [vmem:[#allocation48_spill] sm:$0xff] }
 0x3eb   :  { %1633 = vmatpush1.msra.mxu0 %v5966_v19  ;;  %1753 = vmatprep.subr.mxu1 %v5106_v54  ;;  %v9564_v54 = vld [vmem:[#allocation49_spill] sm:$0xff] }
 0x3ec   :  { %1634 = vmatprep.subr.mxu0 %v5973_v58  ;;  %1754 = vmatpush1.msra.mxu1 %v5113_v18  ;;  %v9565_v18 = vld [vmem:[#allocation50_spill] sm:$0xff] }
 0x3ed   :  { %1635 = vmatpush1.msra.mxu0 %v5980_v6  ;;  %1755 = vmatprep.subr.mxu1 %v5120_v16  ;;  %v9566_v16 = vld [vmem:[#allocation51_spill] sm:$0xff] }
 0x3ee   :  { %1636 = vmatprep.subr.mxu0 %v5987_v62  ;;  %1756 = vmatpush1.msra.mxu1 %v5127_v23  ;;  %v9567_v23 = vld [vmem:[#allocation52_spill] sm:$0xff] }
 0x3ef   :  { %1637 = vmatpush1.msra.mxu0 %v5994_v48  ;;  %1757 = vmatprep.subr.mxu1 %v5134_v25  ;;  %v9568_v25 = vld [vmem:[#allocation53_spill] sm:$0xff] }
 0x3f0   :  { %1638 = vmatprep.subr.mxu0 %v6001_v40  ;;  %1758 = vmatpush1.msra.mxu1 %v5141_v27  ;;  %v9569_v27 = vld [vmem:[#allocation12_spill] sm:$0xff] }
 0x3f1   :  { %1639 = vmatpush1.msra.mxu0 %v6008_v10  ;;  %1759 = vmatprep.subr.mxu1 %v5148_v29  ;;  %v9570_v29 = vld [vmem:[#allocation54_spill] sm:$0xff] }
 0x3f2   :  { %1640 = vmatprep.subr.mxu0 %v6015_v44  ;;  %1760 = vmatpush1.msra.mxu1 %v5155_v31  ;;  %v9571_v31 = vld [vmem:[#allocation3_spill] sm:$0xff] }
 0x3f3   :  { %1641 = vmatpush1.msra.mxu0 %v6022_v11  ;;  %1761 = vmatprep.subr.mxu1 %v5162_v33  ;;  %v9572_v33 = vld [vmem:[#allocation55_spill] sm:$0xff] }
 0x3f4   :  { %1642 = vmatprep.subr.mxu0 %v6029_v38  ;;  %1762 = vmatpush1.msra.mxu1 %v9559_v22  ;;  %v9591_v22 = vld [vmem:[#allocation165_spill] sm:$0xff] }
 0x3f5   :  { %1643 = vmatpush1.msra.mxu0 %v6036_v50  ;;  %1763 = vmatprep.subr.mxu1 %v9560_v36  ;;  %v9592_v36 = vld [vmem:[#allocation70_spill] sm:$0xff] }
 0x3f6   :  { %1644 = vmatprep.subr.mxu0 %v6043_v60  ;;  %1764 = vmatpush1.msra.mxu1 %v9561_v24  ;;  %v9593_v24 = vld [vmem:[#allocation166_spill] sm:$0xff] }
 0x3f7   :  { %1645 = vmatpush1.msra.mxu0 %v6050_v35  ;;  %1765 = vmatprep.subr.mxu1 %v9562_v20  ;;  %v9594_v20 = vld [vmem:[#allocation72_spill] sm:$0xff] }
 0x3f8   :  { %1646 = vmatprep.subr.mxu0 %v6057_v37  ;;  %1766 = vmatpush1.msra.mxu1 %v9563_v8  ;;  %v9595_v8 = vld [vmem:[#allocation167_spill] sm:$0xff] }
 0x3f9   :  { %1647 = vmatpush1.msra.mxu0 %v6064_v39  ;;  %1767 = vmatprep.subr.mxu1 %v9564_v54  ;;  %v9596_v54 = vld [vmem:[#allocation75_spill] sm:$0xff] }
 0x3fa   :  { %1648 = vmatprep.subr.mxu0 %v6071_v41  ;;  %1768 = vmatpush1.msra.mxu1 %v9565_v18  ;;  %v9597_v18 = vld [vmem:[#allocation168_spill] sm:$0xff] }
 0x3fb   :  { %1649 = vmatpush1.msra.mxu0 %v6078_v43  ;;  %1769 = vmatprep.subr.mxu1 %v9566_v16  ;;  %v9598_v16 = vld [vmem:[#allocation76_spill] sm:$0xff] }
 0x3fc   :  { %1650 = vmatprep.subr.mxu0 %v6085_v45  ;;  %1770 = vmatpush1.msra.mxu1 %v9567_v23  ;;  %v9599_v23 = vld [vmem:[#allocation169_spill] sm:$0xff] }
 0x3fd   :  { %1651 = vmatpush1.msra.mxu0 %v6092_v47  ;;  %1771 = vmatprep.subr.mxu1 %v9568_v25  ;;  %v9600_v25 = vld [vmem:[#allocation77_spill] sm:$0xff] }
 0x3fe   :  { %1652 = vmatprep.subr.mxu0 %v9569_v27  ;;  %1772 = vmatpush1.msra.mxu1 %v9570_v29  ;;  %v9601_v29 = vld [vmem:[#allocation170_spill] sm:$0xff] }
 0x3ff   :  { %1653 = vmatpush1.msra.mxu0 %v9571_v31  ;;  %1773 = vmatprep.subr.mxu1 %v9572_v33  ;;  %v9602_v33 = vld [vmem:[#allocation78_spill] sm:$0xff] }
 0x400   :  { %1654 = vmatprep.subr.mxu0 %v9573_v26  ;;  %1774 = vmatpush1.msra.mxu1 %v9574_v13  ;;  %v9603_v13 = vld [vmem:[#allocation171_spill] sm:$0xff] }
 0x401   :  { %1655 = vmatpush1.msra.mxu0 %v9575_v5  ;;  %1775 = vmatprep.subr.mxu1 %v9576_v9  ;;  %v9604_v9 = vld [vmem:[#allocation79_spill] sm:$0xff] }
 0x402   :  { %1656 = vmatprep.subr.mxu0 %v9577_v51  ;;  %1776 = vmatpush1.msra.mxu1 %v9578_v4  ;;  %v9605_v4 = vld [vmem:[#allocation172_spill] sm:$0xff] }
 0x403   :  { %1657 = vmatpush1.msra.mxu0 %v9579_v49  ;;  %1777 = vmatprep.subr.mxu1 %v9580_v21  ;;  %v9606_v21 = vld [vmem:[#allocation80_spill] sm:$0xff] }
 0x404   :  { %1658 = vmatprep.subr.mxu0 %v9581_v7  ;;  %1778 = vmatpush1.msra.mxu1 %v9582_v15  ;;  %v9607_v15 = vld [vmem:[#allocation173_spill] sm:$0xff] }
 0x405   :  { %1659 = vmatpush2.msra.mxu0 %v9583_v3  ;;  %1779 = vmatprep.subr.mxu1 %v9584_v63  ;;  %v9608_v63 = vld [vmem:[#allocation81_spill] sm:$0xff] }
 0x406   :  { %1660 = vmatprep.subr.mxu0 %v9585_v2  ;;  %1780 = vmatpush2.msra.mxu1 %v9586_v0  ;;  %v9609_v0 = vld [vmem:[#allocation174_spill] sm:$0xff] }
 0x407   :  { %1661 = vmatpush2.msra.mxu0 %v9587_v59  ;;  %1781 = vmatprep.subr.mxu1 %v9588_v57  ;;  %v9610_v57 = vld [vmem:[#allocation82_spill] sm:$0xff] }
 0x408   :  { %1662 = vmatprep.subr.mxu0 %v9589_v55  ;;  %1782 = vmatpush2.msra.mxu1 %v9590_v53  ;;  %v9611_v53 = vld [vmem:[#allocation175_spill] sm:$0xff] }
 0x409   :  { %1663 = vmatpush2.msra.mxu0 %v9591_v22  ;;  %1783 = vmatprep.subr.mxu1 %v9592_v36  ;;  %v9612_v36 = vld [vmem:[#allocation83_spill] sm:$0xff] }
 0x40a   :  { %1664 = vmatprep.subr.mxu0 %v9593_v24  ;;  %1784 = vmatpush2.msra.mxu1 %v9594_v20  ;;  %v9613_v20 = vld [vmem:[#allocation176_spill] sm:$0xff] }
 0x40b   :  { %1665 = vmatpush2.msra.mxu0 %v9595_v8  ;;  %1785 = vmatprep.subr.mxu1 %v9596_v54  ;;  %v9614_v54 = vld [vmem:[#allocation84_spill] sm:$0xff] }
 0x40c   :  { %1666 = vmatprep.subr.mxu0 %v9597_v18  ;;  %1786 = vmatpush2.msra.mxu1 %v9598_v16  ;;  %v9615_v16 = vld [vmem:[#allocation177_spill] sm:$0xff] }
 0x40d   :  { %1667 = vmatpush2.msra.mxu0 %v9599_v23  ;;  %1787 = vmatprep.subr.mxu1 %v9600_v25  ;;  %v9616_v25 = vld [vmem:[#allocation85_spill] sm:$0xff] }
 0x40e   :  { %1668 = vmatprep.subr.mxu0 %v9601_v29  ;;  %1788 = vmatpush2.msra.mxu1 %v9602_v33  ;;  %v9617_v33 = vld [vmem:[#allocation178_spill] sm:$0xff] }
 0x40f   :  { %1669 = vmatpush2.msra.mxu0 %v9603_v13  ;;  %1789 = vmatprep.subr.mxu1 %v9604_v9  ;;  %v9618_v9 = vld [vmem:[#allocation86_spill] sm:$0xff] }
 0x410   :  { %1670 = vmatprep.subr.mxu0 %v9605_v4  ;;  %1790 = vmatpush2.msra.mxu1 %v9606_v21  ;;  %v9619_v21 = vld [vmem:[#allocation179_spill] sm:$0xff] }
 0x411   :  { %1671 = vmatpush2.msra.mxu0 %v9607_v15  ;;  %1791 = vmatprep.subr.mxu1 %v9608_v63  ;;  %v9620_v63 = vld [vmem:[#allocation87_spill] sm:$0xff] }
 0x412   :  { %1672 = vmatprep.subr.mxu0 %v9609_v0  ;;  %1792 = vmatpush2.msra.mxu1 %v9610_v57  ;;  %v9621_v57 = vld [vmem:[#allocation180_spill] sm:$0xff] }
 0x413   :  { %1673 = vmatpush2.msra.mxu0 %v9611_v53  ;;  %1793 = vmatprep.subr.mxu1 %v9612_v36  ;;  %v9622_v53 = vld [vmem:[#allocation88_spill] sm:$0xff]  ;;  %v9623_v36 = vld [vmem:[#allocation181_spill] sm:$0xff] }
 0x414   :  { %1674 = vmatprep.subr.mxu0 %v9613_v20  ;;  %1794 = vmatpush2.msra.mxu1 %v9614_v54  ;;  %v9624_v20 = vld [vmem:[#allocation89_spill] sm:$0xff]  ;;  %v9625_v54 = vld [vmem:[#allocation182_spill] sm:$0xff] }
 0x415   :  { %1675 = vmatpush2.msra.mxu0 %v9615_v16  ;;  %1795 = vmatprep.subr.mxu1 %v9616_v25  ;;  %v9626_v16 = vld [vmem:[#allocation90_spill] sm:$0xff]  ;;  %v9627_v25 = vld [vmem:[#allocation183_spill] sm:$0xff] }
 0x416   :  { %1676 = vmatprep.subr.mxu0 %v9617_v33  ;;  %1796 = vmatpush2.msra.mxu1 %v9618_v9  ;;  %v9628_v33 = vld [vmem:[#allocation91_spill] sm:$0xff]  ;;  %v9629_v9 = vld [vmem:[#allocation184_spill] sm:$0xff] }
 0x417   :  { %1677 = vmatpush2.msra.mxu0 %v9619_v21  ;;  %1797 = vmatprep.subr.mxu1 %v9620_v63  ;;  %v9630_v21 = vld [vmem:[#allocation92_spill] sm:$0xff]  ;;  %v9631_v63 = vld [vmem:[#allocation185_spill] sm:$0xff] }
 0x418   :  { %1678 = vmatprep.subr.mxu0 %v9621_v57  ;;  %1798 = vmatpush2.msra.mxu1 %v9622_v53  ;;  %v9632_v57 = vld [vmem:[#allocation93_spill] sm:$0xff]  ;;  %v9633_v53 = vld [vmem:[#allocation186_spill] sm:$0xff] }
 0x419   :  { %1679 = vmatpush2.msra.mxu0 %v9623_v36  ;;  %1799 = vmatprep.subr.mxu1 %v9624_v20  ;;  %v9634_v36 = vld [vmem:[#allocation94_spill] sm:$0xff]  ;;  %v9635_v20 = vld [vmem:[#allocation187_spill] sm:$0xff] }
 0x41a   :  { %1680 = vmatprep.subr.mxu0 %v9625_v54  ;;  %1800 = vmatpush2.msra.mxu1 %v9626_v16  ;;  %v9636_v54 = vld [vmem:[#allocation95_spill] sm:$0xff]  ;;  %v9637_v16 = vld [vmem:[#allocation188_spill] sm:$0xff] }
 0x41b   :  { %1681 = vmatpush2.msra.mxu0 %v9627_v25  ;;  %1801 = vmatprep.subr.mxu1 %v9628_v33  ;;  %v9638_v25 = vld [vmem:[#allocation57_spill] sm:$0xff] }
 0x41c   :  { %1682 = vmatprep.subr.mxu0 %v9629_v9  ;;  %1802 = vmatpush2.msra.mxu1 %v9630_v21  ;;  %v9639_v33 = vld [vmem:[#allocation189_spill] sm:$0xff]  ;;  %v9640_v9 = vld [vmem:[#allocation59_spill] sm:$0xff]  ;;  %v9641_v21 = vld [vmem:[#allocation190_spill] sm:$0xff] }
 0x41d   :  { %1683 = vmatpush2.msra.mxu0 %v9631_v63  ;;  %1803 = vmatprep.subr.mxu1 %v9632_v57  ;;  %v9642_v63 = vld [vmem:[#allocation96_spill] sm:$0xff]  ;;  %v9643_v57 = vld [vmem:[#allocation191_spill] sm:$0xff] }
 0x41e   :  { %1684 = vmatprep.subr.mxu0 %v9633_v53  ;;  %1804 = vmatpush2.msra.mxu1 %v9634_v36  ;;  %v9644_v53 = vld [vmem:[#allocation97_spill] sm:$0xff]  ;;  %v9645_v36 = vld [vmem:[#allocation63_spill] sm:$0xff] }
 0x41f   :  { %1685 = vmatpush2.msra.mxu0 %v9635_v20  ;;  %1805 = vmatprep.subr.mxu1 %v9636_v54  ;;  %v9646_v54 = vld [vmem:[#allocation98_spill] sm:$0xff]  ;;  %v9655_v20 = vld [vmem:[#allocation107_spill] sm:$0xff] }
 0x420   :  { %1686 = vmatprep.subr.mxu0 %v9637_v16  ;;  %1806 = vmatpush2.msra.mxu1 %v9638_v25  ;;  %v9647_v16 = vld [vmem:[#allocation99_spill] sm:$0xff]  ;;  %v9648_v25 = vld [vmem:[#allocation100_spill] sm:$0xff] }
 0x421   :  { %1687 = vmatpush2.msra.mxu0 %v9639_v33  ;;  %1807 = vmatprep.subr.mxu1 %v9640_v9  ;;  %v9649_v33 = vld [vmem:[#allocation101_spill] sm:$0xff]  ;;  %v9650_v9 = vld [vmem:[#allocation102_spill] sm:$0xff] }
 0x422   :  { %1688 = vmatprep.subr.mxu0 %v9641_v21  ;;  %1808 = vmatpush2.msra.mxu1 %v9642_v63  ;;  %v9651_v21 = vld [vmem:[#allocation103_spill] sm:$0xff]  ;;  %v9652_v63 = vld [vmem:[#allocation104_spill] sm:$0xff] }
 0x423   :  { %1689 = vmatpush2.msra.mxu0 %v9643_v57  ;;  %1809 = vmatprep.subr.mxu1 %v9644_v53  ;;  %v9653_v57 = vld [vmem:[#allocation105_spill] sm:$0xff]  ;;  %v9654_v53 = vld [vmem:[#allocation106_spill] sm:$0xff] }
 0x424   :  { %1691 = vmatmul.mubr.f32.vlgmr.msra.gmra.mxu0 %v6443_v61  ;;  %1818 = vmatprep.subr.mxu0 %v9645_v36  ;;  %v9656_v36 = vld [vmem:[#allocation108_spill] sm:$0xff] }
 0x425   :  { %1819 = vmatpush1.msra.mxu0 %v9646_v54  ;;  %1810 = vmatpush2.msra.mxu1 %v9647_v16  ;;  %v9657_v54 = vld [vmem:[#allocation109_spill] sm:$0xff]  ;;  %v9658_v16 = vld [vmem:[#allocation110_spill] sm:$0xff] }
 0x426   :  { %1820 = vmatprep.subr.mxu0 %v9648_v25  ;;  %1889 = vmatprep.subr.mxu1 %v9649_v33  ;;  %v9659_v25 = vld [vmem:[#allocation111_spill] sm:$0xff]  ;;  %v9660_v33 = vld [vmem:[#allocation112_spill] sm:$0xff] }
 0x427   :  { %1821 = vmatpush1.msra.mxu0 %v9650_v9  ;;  %v9661_v9 = vld [vmem:[#allocation113_spill] sm:$0xff] }
 0x428   :  { %1822 = vmatprep.subr.mxu0 %v9651_v21  ;;  %v9662_v21 = vld [vmem:[#allocation114_spill] sm:$0xff] }
 0x429   :  { %1823 = vmatpush1.msra.mxu0 %v9652_v63  ;;  %v9663_v63 = vld [vmem:[#allocation115_spill] sm:$0xff] }
 0x42a   :  { %1824 = vmatprep.subr.mxu0 %v9653_v57  ;;  %v9664_v57 = vld [vmem:[#allocation116_spill] sm:$0xff] }
 0x42b   :  { %1825 = vmatpush1.msra.mxu0 %v9654_v53  ;;  %v9665_v53 = vld [vmem:[#allocation117_spill] sm:$0xff] }
 0x42c   :  { %1826 = vmatprep.subr.mxu0 %v9655_v20  ;;  %v9666_v20 = vld [vmem:[#allocation118_spill] sm:$0xff] }
 0x42d   :  { %1827 = vmatpush1.msra.mxu0 %v9656_v36  ;;  %v9667_v36 = vld [vmem:[#allocation119_spill] sm:$0xff] }
 0x42e   :  { %1828 = vmatprep.subr.mxu0 %v9657_v54  ;;  %v9668_v54 = vld [vmem:[#allocation120_spill] sm:$0xff] }
 0x42f   :  { %1829 = vmatpush1.msra.mxu0 %v9658_v16  ;;  %v9669_v16 = vld [vmem:[#allocation121_spill] sm:$0xff] }
 0x430   :  { %1830 = vmatprep.subr.mxu0 %v9659_v25  ;;  %v9670_v25 = vld [vmem:[#allocation122_spill] sm:$0xff] }
 0x431   :  { %1831 = vmatpush1.msra.mxu0 %v9660_v33  ;;  %v9671_v33 = vld [vmem:[#allocation123_spill] sm:$0xff] }
 0x432   :  { %1832 = vmatprep.subr.mxu0 %v9661_v9  ;;  %v9672_v9 = vld [vmem:[#allocation124_spill] sm:$0xff] }
 0x433   :  { %1833 = vmatpush1.msra.mxu0 %v9662_v21  ;;  %v9673_v21 = vld [vmem:[#allocation125_spill] sm:$0xff] }
 0x434   :  { %1834 = vmatprep.subr.mxu0 %v9663_v63  ;;  %v9674_v63 = vld [vmem:[#allocation126_spill] sm:$0xff] }
 0x435   :  { %1835 = vmatpush1.msra.mxu0 %v9664_v57  ;;  %v9675_v57 = vld [vmem:[#allocation127_spill] sm:$0xff] }
 0x436   :  { %1836 = vmatprep.subr.mxu0 %v9665_v53  ;;  %v9676_v53 = vld [vmem:[#allocation128_spill] sm:$0xff] }
 0x437   :  { %1837 = vmatpush1.msra.mxu0 %v9666_v20  ;;  %v9677_v20 = vld [vmem:[#allocation129_spill] sm:$0xff] }
 0x438   :  { %1838 = vmatprep.subr.mxu0 %v9667_v36  ;;  %v9678_v36 = vld [vmem:[#allocation130_spill] sm:$0xff] }
 0x439   :  { %1839 = vmatpush1.msra.mxu0 %v9668_v54  ;;  %v9679_v54 = vld [vmem:[#allocation131_spill] sm:$0xff] }
 0x43a   :  { %1840 = vmatprep.subr.mxu0 %v9669_v16  ;;  %v9680_v16 = vld [vmem:[#allocation132_spill] sm:$0xff] }
 0x43b   :  { %1841 = vmatpush1.msra.mxu0 %v9670_v25  ;;  %v9681_v25 = vld [vmem:[#allocation133_spill] sm:$0xff] }
 0x43c   :  { %1842 = vmatprep.subr.mxu0 %v9671_v33  ;;  %v9682_v33 = vld [vmem:[#allocation134_spill] sm:$0xff] }
 0x43d   :  { %1843 = vmatpush1.msra.mxu0 %v9672_v9  ;;  %v9683_v9 = vld [vmem:[#allocation135_spill] sm:$0xff] }
 0x43e   :  { %1844 = vmatprep.subr.mxu0 %v9673_v21  ;;  %v9684_v21 = vld [vmem:[#allocation136_spill] sm:$0xff] }
 0x43f   :  { %1845 = vmatpush1.msra.mxu0 %v9674_v63  ;;  %v9685_v63 = vld [vmem:[#allocation137_spill] sm:$0xff] }
 0x440   :  { %1846 = vmatprep.subr.mxu0 %v9675_v57  ;;  %v9686_v57 = vld [vmem:[#allocation138_spill] sm:$0xff] }
 0x441   :  { %1847 = vmatpush1.msra.mxu0 %v9676_v53  ;;  %v9687_v53 = vld [vmem:[#allocation139_spill] sm:$0xff] }
 0x442   :  { %1848 = vmatprep.subr.mxu0 %v9677_v20  ;;  %v9688_v20 = vld [vmem:[#allocation140_spill] sm:$0xff] }
 0x443   :  { %1849 = vmatpush1.msra.mxu0 %v9678_v36  ;;  %v9689_v36 = vld [vmem:[#allocation141_spill] sm:$0xff] }
 0x444   :  { %1850 = vmatprep.subr.mxu0 %v9679_v54  ;;  %v9690_v54 = vld [vmem:[#allocation142_spill] sm:$0xff] }
 0x445   :  { %1851 = vmatpush2.msra.mxu0 %v9680_v16  ;;  %v9691_v16 = vld [vmem:[#allocation143_spill] sm:$0xff] }
 0x446   :  { %1852 = vmatprep.subr.mxu0 %v9681_v25  ;;  %v9692_v25 = vld [vmem:[#allocation144_spill] sm:$0xff] }
 0x447   :  { %1853 = vmatpush2.msra.mxu0 %v9682_v33  ;;  %v9693_v33 = vld [vmem:[#allocation145_spill] sm:$0xff] }
 0x448   :  { %1854 = vmatprep.subr.mxu0 %v9683_v9  ;;  %v9694_v9 = vld [vmem:[#allocation146_spill] sm:$0xff] }
 0x449   :  { %1855 = vmatpush2.msra.mxu0 %v9684_v21  ;;  %v9695_v21 = vld [vmem:[#allocation147_spill] sm:$0xff] }
 0x44a   :  { %1856 = vmatprep.subr.mxu0 %v9685_v63  ;;  %v9696_v63 = vld [vmem:[#allocation148_spill] sm:$0xff] }
 0x44b   :  { %1857 = vmatpush2.msra.mxu0 %v9686_v57  ;;  %v9697_v57 = vld [vmem:[#allocation149_spill] sm:$0xff] }
 0x44c   :  { %1858 = vmatprep.subr.mxu0 %v9687_v53  ;;  %v9698_v53 = vld [vmem:[#allocation150_spill] sm:$0xff] }
 0x44d   :  { %1859 = vmatpush2.msra.mxu0 %v9688_v20  ;;  %v9699_v20 = vld [vmem:[#allocation151_spill] sm:$0xff] }
 0x44e   :  { %1860 = vmatprep.subr.mxu0 %v9689_v36  ;;  %v9700_v36 = vld [vmem:[#allocation152_spill] sm:$0xff] }
 0x44f   :  { %1861 = vmatpush2.msra.mxu0 %v9690_v54  ;;  %v9701_v54 = vld [vmem:[#allocation153_spill] sm:$0xff] }
 0x450   :  { %1862 = vmatprep.subr.mxu0 %v9691_v16  ;;  %v9702_v16 = vld [vmem:[#allocation154_spill] sm:$0xff] }
 0x451   :  { %1863 = vmatpush2.msra.mxu0 %v9692_v25  ;;  %v9703_v25 = vld [vmem:[#allocation155_spill] sm:$0xff] }
 0x452   :  { %1864 = vmatprep.subr.mxu0 %v9693_v33  ;;  %v9704_v33 = vld [vmem:[#allocation156_spill] sm:$0xff] }
 0x453   :  { %1865 = vmatpush2.msra.mxu0 %v9694_v9  ;;  %v9705_v9 = vld [vmem:[#allocation157_spill] sm:$0xff] }
 0x454   :  { %1866 = vmatprep.subr.mxu0 %v9695_v21  ;;  %v9706_v21 = vld [vmem:[#allocation158_spill] sm:$0xff] }
 0x455   :  { %1867 = vmatpush2.msra.mxu0 %v9696_v63  ;;  %v9707_v63 = vld [vmem:[#allocation159_spill] sm:$0xff] }
 0x456   :  { %1868 = vmatprep.subr.mxu0 %v9697_v57  ;;  %v9708_v57 = vld [vmem:[#allocation160_spill] sm:$0xff] }
 0x457   :  { %1869 = vmatpush2.msra.mxu0 %v9698_v53  ;;  %v9709_v53 = vld [vmem:[#allocation161_spill] sm:$0xff] }
 0x458   :  { %1870 = vmatprep.subr.mxu0 %v9699_v20  ;;  %v9710_v20 = vld [vmem:[#allocation162_spill] sm:$0xff] }
 0x459   :  { %1871 = vmatpush2.msra.mxu0 %v9700_v36  ;;  %v9711_v36 = vld [vmem:[#allocation192_spill] sm:$0xff] }
 0x45a   :  { %1872 = vmatprep.subr.mxu0 %v9701_v54 }
 0x45b   :  { %1873 = vmatpush2.msra.mxu0 %v9702_v16  ;;  %v9712_v16 = vld [vmem:[#allocation9_spill] sm:$0xff] }
 0x45c   :  { %1874 = vmatprep.subr.mxu0 %v9703_v25 }
 0x45d   :  { %1875 = vmatpush2.msra.mxu0 %v9704_v33  ;;  %v9713_v33 = vld [vmem:[#allocation11_spill] sm:$0xff] }
 0x45e   :  { %1876 = vmatprep.subr.mxu0 %v9705_v9 }
 0x45f   :  { %1877 = vmatpush2.msra.mxu0 %v9706_v21 }
 0x460   :  { %1878 = vmatprep.subr.mxu0 %v9707_v63 }
 0x461   :  { %1879 = vmatpush2.msra.mxu0 %v9708_v57 }
 0x462   :  { %1880 = vmatprep.subr.mxu0 %v9709_v53  ;;  %v9714_v53 = vld [vmem:[#allocation30_spill] sm:$0xff] }
 0x463   :  { %1881 = vmatpush2.msra.mxu0 %v9710_v20  ;;  %v306_v20 = vadd.f32 %v9714_v53, %v5022_v12 }
 0x464   :  { %2010 = vmatprep.subr.mxu0 %v9711_v36 }
 0x4a4   :  { %v1550_v54 = vpop.f32.mrf.mxu0  ;;  %v1621_v13 = vpop.f32.mrf.mxu1 }
 0x4a5   :  { %v1703_v0 = vadd.f32 %v1550_v54, %v9712_v16  ;;  %v9716_v54 = vld [vmem:[#allocation24_spill] sm:$0xff] }
 0x4a6   :  { %v1552_v15 = vpop.f32.mrf.mxu0  ;;  %v1623_v57 = vpop.f32.mrf.mxu1  ;;  %v298_v16 = vadd.f32 %v9716_v54, %v5045_v17 }
 0x4a7   :  { %v2843_v25 = vmul.f32 -1.442695, %v1703_v0  ;;  %v1710_v9 = vadd.f32 %v1552_v15, %v9713_v33  ;;  %v1725_v29 = vadd.f32 %v1623_v57, %v306_v20  ;;  %v6663_v0 = vld [vmem:[%s8387_s5] ss:$0 sm:$0xff] }
 0x4a8   :  { %9715 = vst [vmem:[#allocation74_spill] sm:$0xff] %v6663_v0  ;;  %v1717_v15 = vadd.f32 %v6663_v0, %v1621_v13 }
 0x4a9   :  { %2928 = vpow2.f32 %v2843_v25  ;;  %v2844_v4 = vmul.f32 -1.442695, %v1710_v9  ;;  %v2845_v23 = vmul.f32 -1.442695, %v1725_v29 }
 0x4ab   :  { %2930 = vpow2.f32 %v2844_v4 }
 0x4b6   :  { %v2929_v21 = vpop.eup %2928 }
 0x4b7   :  { %v1707_v63 = vadd.f32 1.0, %v2929_v21 }
 0x4b8   :  { %v2931_v36 = vpop.eup %2930 }
 0x4b9   :  { %2932 = vrcp.f32 %v1707_v63  ;;  %v1714_v18 = vadd.f32 1.0, %v2931_v36 }
 0x4ba   :  { %2934 = vpow2.f32 %v2845_v23  ;;  %v9717_v23 = vld [vmem:[#allocation29_spill] sm:$0xff] }
 0x4bb   :  { %2936 = vrcp.f32 %v1714_v18  ;;  %v417_v13 = vadd.f32 %v9717_v23, %v9421_v30 }
 0x4c6   :  { %v2933_v4 = vpop.eup %2932 }
 0x4c7   :  { %v1718_v25 = vmul.f32 %v2933_v4, %v1717_v15  ;;  %v2935_v9 = vpop.eup %2934 }
 0x4c8   :  { %v2937_v21 = vpop.eup %2936  ;;  %v1729_v29 = vadd.f32 1.0, %v2935_v9 }
 0x4c9   :  { %v1719_v33 = vadd.f32 %v1718_v25, %v298_v16  ;;  %v1721_v36 = vsub.f32 1.0, %v2937_v21  ;;  %v1723_v53 = vmul.f32 %v2937_v21, %v6443_v61  ;;  %v9718_v25 = vld [vmem:[#allocation31_spill] sm:$0xff] }
 0x4cb   :  { %2938 = vtanh.f32 %v1719_v33  ;;  %v419_v33 = vadd.f32 %v9718_v25, %v5052_v14  ;;  %v9750_v25 = vld [vmem:[#allocation172_spill] sm:$0xff] }
 0x4cc   :  { %2940 = vrcp.f32 %v1729_v29 }
 0x4d8   :  { %v2939_v63 = vpop.eup %2938 }
 0x4d9   :  { %v1722_v57 = vmul.f32 %v2939_v63, %v1721_v36  ;;  %v2941_v16 = vpop.eup %2940 }
 0x4db   :  { %v6669_v20 = vadd.f32 %v1723_v53, %v1722_v57 }
 0x4e4   :  { %v1692_v0 = vpop.f32.mrf.mxu0 }
 0x4e5   :  { %v1732_v54 = vadd.f32 %v1692_v0, %v417_v13  ;;  %v6696_v13 = vld [vmem:[%s8384_s3 + $0x2a8] sm:$0xff] }
 0x4e6   :  { %v1694_v15 = vpop.f32.mrf.mxu0 }
 0x4e7   :  { %v2846_v18 = vmul.f32 -1.442695, %v1732_v54  ;;  %v1739_v4 = vadd.f32 %v6450_v32, %v1694_v15  ;;  %v9744_v54 = vld [vmem:[#allocation169_spill] sm:$0xff]  ;;  %v9746_v15 = vld [vmem:[#allocation170_spill] sm:$0xff] }
 0x4e9   :  { %2942 = vpow2.f32 %v2846_v18  ;;  %v1740_v9 = vmul.f32 %v2941_v16, %v1739_v4  ;;  %v6969_v18 = vld [vmem:[%s8384_s3 + $0x510] sm:$0xff]  ;;  %v9748_v4 = vld [vmem:[#allocation171_spill] sm:$0xff]  ;;  %v6976_v16 = vld [vmem:[%s8384_s3 + $0x4e8] sm:$0xff] }
 0x4ea   :  { %9747 = vst [vmem:[#allocation60_spill] sm:$0xff] %v6969_v18  ;;  %9749 = vst [vmem:[#allocation41_spill] sm:$0xff] %v6976_v16 }
 0x4eb   :  { %v1741_v36 = vadd.f32 %v1740_v9, %v419_v33  ;;  %v6983_v33 = vld [vmem:[%s8384_s3 + $0x4e0] sm:$0xff]  ;;  %v9752_v9 = vld [vmem:[#allocation173_spill] sm:$0xff] }
 0x4ec   :  { %9751 = vst [vmem:[#allocation61_spill] sm:$0xff] %v6983_v33 }
 0x4f6   :  { %v2943_v61 = vpop.eup %2942 }
 0x4f7   :  { %v1736_v21 = vadd.f32 1.0, %v2943_v61  ;;  %v9754_v61 = vld [vmem:[#allocation174_spill] sm:$0xff] }
 0x4f9   :  { %2944 = vrcp.f32 %v1736_v21  ;;  %v6997_v21 = vld [vmem:[%s8384_s3 + $0x4b0] sm:$0xff] }
 0x4fa   :  { %2946 = vtanh.f32 %v1741_v36  ;;  %v6990_v36 = vld [vmem:[%s8384_s3 + $0x4b8] sm:$0xff]  ;;  %9755 = vst [vmem:[#allocation62_spill] sm:$0xff] %v6997_v21 }
 0x4fb   :  { %9753 = vst [vmem:[#allocation37_spill] sm:$0xff] %v6990_v36 }
 0x506   :  { %v2945_v29 = vpop.eup %2944 }
 0x507   :  { %v1743_v63 = vsub.f32 1.0, %v2945_v29  ;;  %v2947_v57 = vpop.eup %2946  ;;  %v1745_v0 = vmul.f32 %v2945_v29, %v6456_v1  ;;  %v6689_v1 = vld [vmem:[%s8384_s3 + $0x2d0] sm:$0xff]  ;;  %v9756_v29 = vld [vmem:[#allocation175_spill] sm:$0xff] }
 0x509   :  { %v1744_v53 = vmul.f32 %v2947_v57, %v1743_v63  ;;  %v7004_v63 = vld [vmem:[%s8384_s3 + $0x488] sm:$0xff] }
 0x50a   :  { %9757 = vst [vmem:[#allocation43_spill] sm:$0xff] %v7004_v63  ;;  %v9758_v57 = vld [vmem:[#allocation176_spill] sm:$0xff] }
 0x50b   :  { %v6677_v23 = vadd.f32 %v1745_v0, %v1744_v53  ;;  %v7011_v53 = vld [vmem:[%s8384_s3 + $0x480] sm:$0xff]  ;;  %v9760_v0 = vld [vmem:[#allocation177_spill] sm:$0xff] }
 0x50c   :  { %9759 = vst [vmem:[#allocation64_spill] sm:$0xff] %v7011_v53 }
 0x50d   :  { %1811 = vmatprep.mubr.f32.mxu1 %v6677_v23  ;;  %1882 = vmatprep.mubr.f32.mxu0 %v6677_v23 }
 0x50e   :  { %1812 = vmatmul.mubr.f32.vlgmr.msra.gmra.mxu1 %v6669_v20  ;;  %1883 = vmatmul.mubr.f32.vlgmr.msra.gmra.mxu0 %v6669_v20 }
 0x50f   :  { %1890 = vmatpush1.msra.mxu1 %v5924_v28  ;;  %1953 = vmatprep.mubr.f32.mxu1 %v6677_v23  ;;  %v6703_v28 = vld [vmem:[%s8384_s3 + $0x2a0] sm:$0xff] }
 0x510   :  { %1891 = vmatprep.subr.mxu1 %v5931_v56  ;;  %2011 = vmatpush1.msra.mxu0 %v6689_v1  ;;  %v6710_v56 = vld [vmem:[%s8384_s3 + $0x278] sm:$0xff] }
 0x511   :  { %1892 = vmatpush1.msra.mxu1 %v5938_v52  ;;  %2012 = vmatprep.subr.mxu0 %v6696_v13  ;;  %v6717_v52 = vld [vmem:[%s8384_s3 + $0x270] sm:$0xff] }
 0x512   :  { %1893 = vmatprep.subr.mxu1 %v5945_v42  ;;  %2013 = vmatpush1.msra.mxu0 %v6703_v28  ;;  %v6724_v42 = vld [vmem:[%s8384_s3 + $0x248] sm:$0xff] }
 0x513   :  { %1894 = vmatpush1.msra.mxu1 %v5952_v34  ;;  %2014 = vmatprep.subr.mxu0 %v6710_v56  ;;  %v6731_v34 = vld [vmem:[%s8384_s3 + $0x240] sm:$0xff] }
 0x514   :  { %1895 = vmatprep.subr.mxu1 %v5959_v46  ;;  %2015 = vmatpush1.msra.mxu0 %v6717_v52  ;;  %v6738_v46 = vld [vmem:[%s8384_s3 + $0x218] sm:$0xff] }
 0x515   :  { %1896 = vmatpush1.msra.mxu1 %v5966_v19  ;;  %2016 = vmatprep.subr.mxu0 %v6724_v42  ;;  %v6745_v19 = vld [vmem:[%s8384_s3 + $0x210] sm:$0xff] }
 0x516   :  { %1897 = vmatprep.subr.mxu1 %v5973_v58  ;;  %2017 = vmatpush1.msra.mxu0 %v6731_v34  ;;  %v6752_v58 = vld [vmem:[%s8384_s3 + $0x1e8] sm:$0xff] }
 0x517   :  { %1898 = vmatpush1.msra.mxu1 %v5980_v6  ;;  %2018 = vmatprep.subr.mxu0 %v6738_v46  ;;  %v6759_v6 = vld [vmem:[%s8384_s3 + $0x1e0] sm:$0xff] }
 0x518   :  { %1899 = vmatprep.subr.mxu1 %v5987_v62  ;;  %2019 = vmatpush1.msra.mxu0 %v6745_v19  ;;  %v6766_v62 = vld [vmem:[%s8384_s3 + $0x1b8] sm:$0xff] }
 0x519   :  { %1900 = vmatpush1.msra.mxu1 %v5994_v48  ;;  %2020 = vmatprep.subr.mxu0 %v6752_v58  ;;  %v6773_v48 = vld [vmem:[%s8384_s3 + $0x1b0] sm:$0xff] }
 0x51a   :  { %1901 = vmatprep.subr.mxu1 %v6001_v40  ;;  %2021 = vmatpush1.msra.mxu0 %v6759_v6  ;;  %v6780_v40 = vld [vmem:[%s8384_s3 + $0x188] sm:$0xff] }
 0x51b   :  { %1902 = vmatpush1.msra.mxu1 %v6008_v10  ;;  %2022 = vmatprep.subr.mxu0 %v6766_v62  ;;  %v6787_v10 = vld [vmem:[%s8384_s3 + $0x180] sm:$0xff] }
 0x51c   :  { %1903 = vmatprep.subr.mxu1 %v6015_v44  ;;  %2023 = vmatpush1.msra.mxu0 %v6773_v48  ;;  %v6794_v44 = vld [vmem:[%s8384_s3 + $0x158] sm:$0xff] }
 0x51d   :  { %1904 = vmatpush1.msra.mxu1 %v6022_v11  ;;  %2024 = vmatprep.subr.mxu0 %v6780_v40  ;;  %9719 = vst [vmem:[#allocation7_spill] sm:$0xff] %v6794_v44  ;;  %v6801_v11 = vld [vmem:[%s8384_s3 + $0x150] sm:$0xff] }
 0x51e   :  { %1905 = vmatprep.subr.mxu1 %v6029_v38  ;;  %2025 = vmatpush1.msra.mxu0 %v6787_v10  ;;  %9720 = vst [vmem:[#allocation34_spill] sm:$0xff] %v6801_v11  ;;  %v6808_v38 = vld [vmem:[%s8384_s3 + $0x128] sm:$0xff] }
 0x51f   :  { %1906 = vmatpush1.msra.mxu1 %v6036_v50  ;;  %2026 = vmatprep.subr.mxu0 %v6794_v44  ;;  %9721 = vst [vmem:[#allocation42_spill] sm:$0xff] %v6808_v38  ;;  %v6815_v50 = vld [vmem:[%s8384_s3 + $0x120] sm:$0xff] }
 0x520   :  { %1907 = vmatprep.subr.mxu1 %v6043_v60  ;;  %2027 = vmatpush1.msra.mxu0 %v6801_v11  ;;  %9722 = vst [vmem:[#allocation20_spill] sm:$0xff] %v6815_v50  ;;  %v6871_v60 = vld [vmem:[%s8384_s3 + $0x60] sm:$0xff] }
 0x521   :  { %1908 = vmatpush1.msra.mxu1 %v6050_v35  ;;  %2028 = vmatprep.subr.mxu0 %v6808_v38  ;;  %v6822_v35 = vld [vmem:[%s8384_s3 + $0xf8] sm:$0xff]  ;;  %9730 = vst [vmem:[#allocation49_spill] sm:$0xff] %v6871_v60 }
 0x522   :  { %1909 = vmatprep.subr.mxu1 %v6057_v37  ;;  %2029 = vmatpush1.msra.mxu0 %v6815_v50  ;;  %9723 = vst [vmem:[#allocation33_spill] sm:$0xff] %v6822_v35  ;;  %v6829_v37 = vld [vmem:[%s8384_s3 + $0xf0] sm:$0xff] }
 0x523   :  { %1910 = vmatpush1.msra.mxu1 %v6064_v39  ;;  %2030 = vmatprep.subr.mxu0 %v6822_v35  ;;  %9724 = vst [vmem:[#allocation35_spill] sm:$0xff] %v6829_v37  ;;  %v6836_v39 = vld [vmem:[%s8384_s3 + $0xc8] sm:$0xff] }
 0x524   :  { %1911 = vmatprep.subr.mxu1 %v6071_v41  ;;  %2031 = vmatpush1.msra.mxu0 %v6829_v37  ;;  %9725 = vst [vmem:[#allocation44_spill] sm:$0xff] %v6836_v39  ;;  %v6843_v41 = vld [vmem:[%s8384_s3 + $0xc0] sm:$0xff] }
 0x525   :  { %1912 = vmatpush1.msra.mxu1 %v6078_v43  ;;  %2032 = vmatprep.subr.mxu0 %v6836_v39  ;;  %9726 = vst [vmem:[#allocation45_spill] sm:$0xff] %v6843_v41  ;;  %v6850_v43 = vld [vmem:[%s8384_s3 + $0x98] sm:$0xff] }
 0x526   :  { %1913 = vmatprep.subr.mxu1 %v6085_v45  ;;  %2033 = vmatpush1.msra.mxu0 %v6843_v41  ;;  %9727 = vst [vmem:[#allocation46_spill] sm:$0xff] %v6850_v43  ;;  %v6857_v45 = vld [vmem:[%s8384_s3 + $0x90] sm:$0xff] }
 0x527   :  { %1914 = vmatpush1.msra.mxu1 %v6092_v47  ;;  %2034 = vmatprep.subr.mxu0 %v6850_v43  ;;  %9728 = vst [vmem:[#allocation47_spill] sm:$0xff] %v6857_v45  ;;  %v6864_v47 = vld [vmem:[%s8384_s3 + $0x68] sm:$0xff] }
 0x528   :  { %1915 = vmatprep.subr.mxu1 %v9569_v27  ;;  %2035 = vmatpush1.msra.mxu0 %v6857_v45  ;;  %9729 = vst [vmem:[#allocation48_spill] sm:$0xff] %v6864_v47  ;;  %v6878_v27 = vld [vmem:[%s8384_s3 + $0x38] sm:$0xff] }
 0x529   :  { %1916 = vmatpush1.msra.mxu1 %v9571_v31  ;;  %2036 = vmatprep.subr.mxu0 %v6864_v47  ;;  %9731 = vst [vmem:[#allocation50_spill] sm:$0xff] %v6878_v27  ;;  %v6885_v31 = vld [vmem:[%s8384_s3 + $0x30] sm:$0xff] }
 0x52a   :  { %1917 = vmatprep.subr.mxu1 %v9573_v26  ;;  %2037 = vmatpush1.msra.mxu0 %v6871_v60  ;;  %9732 = vst [vmem:[#allocation51_spill] sm:$0xff] %v6885_v31  ;;  %v6892_v26 = vld [vmem:[%s8384_s3 + $0x8] sm:$0xff] }
 0x52b   :  { %1918 = vmatpush1.msra.mxu1 %v9575_v5  ;;  %2038 = vmatprep.subr.mxu0 %v6878_v27  ;;  %9733 = vst [vmem:[#allocation52_spill] sm:$0xff] %v6892_v26  ;;  %v6899_v5 = vld [vmem:[%s8384_s3] sm:$0xff] }
 0x52c   :  { %1919 = vmatprep.subr.mxu1 %v9577_v51  ;;  %2039 = vmatpush1.msra.mxu0 %v6885_v31  ;;  %9734 = vst [vmem:[#allocation53_spill] sm:$0xff] %v6899_v5  ;;  %v6906_v51 = vld [vmem:[%s8384_s3 + $0x5d8] sm:$0xff] }
 0x52d   :  { %1920 = vmatpush1.msra.mxu1 %v9579_v49  ;;  %2040 = vmatprep.subr.mxu0 %v6892_v26  ;;  %9735 = vst [vmem:[#allocation12_spill] sm:$0xff] %v6906_v51  ;;  %v6913_v49 = vld [vmem:[%s8384_s3 + $0x5d0] sm:$0xff] }
 0x52e   :  { %1921 = vmatprep.subr.mxu1 %v9581_v7  ;;  %2041 = vmatpush1.msra.mxu0 %v6899_v5  ;;  %9736 = vst [vmem:[#allocation54_spill] sm:$0xff] %v6913_v49  ;;  %v6920_v7 = vld [vmem:[%s8384_s3 + $0x5a8] sm:$0xff] }
 0x52f   :  { %1922 = vmatpush2.msra.mxu1 %v9583_v3  ;;  %2042 = vmatprep.subr.mxu0 %v6906_v51  ;;  %9737 = vst [vmem:[#allocation3_spill] sm:$0xff] %v6920_v7  ;;  %v6927_v3 = vld [vmem:[%s8384_s3 + $0x5a0] sm:$0xff] }
 0x530   :  { %1923 = vmatprep.subr.mxu1 %v9585_v2  ;;  %2043 = vmatpush2.msra.mxu0 %v6913_v49  ;;  %9738 = vst [vmem:[#allocation55_spill] sm:$0xff] %v6927_v3  ;;  %v6934_v2 = vld [vmem:[%s8384_s3 + $0x578] sm:$0xff] }
 0x531   :  { %1924 = vmatpush2.msra.mxu1 %v9587_v59  ;;  %2044 = vmatprep.subr.mxu0 %v6920_v7  ;;  %9739 = vst [vmem:[#allocation71_spill] sm:$0xff] %v6934_v2  ;;  %v6941_v59 = vld [vmem:[%s8384_s3 + $0x570] sm:$0xff] }
 0x532   :  { %1925 = vmatprep.subr.mxu1 %v9589_v55  ;;  %2045 = vmatpush2.msra.mxu0 %v6927_v3  ;;  %9740 = vst [vmem:[#allocation56_spill] sm:$0xff] %v6941_v59  ;;  %v6948_v55 = vld [vmem:[%s8384_s3 + $0x548] sm:$0xff] }
 0x533   :  { %1926 = vmatpush2.msra.mxu1 %v9591_v22  ;;  %2046 = vmatprep.subr.mxu0 %v6934_v2  ;;  %9741 = vst [vmem:[#allocation38_spill] sm:$0xff] %v6948_v55  ;;  %v9742_v22 = vld [vmem:[#allocation168_spill] sm:$0xff] }
 0x534   :  { %1927 = vmatprep.subr.mxu1 %v9593_v24  ;;  %2047 = vmatpush2.msra.mxu0 %v6941_v59  ;;  %v6955_v24 = vld [vmem:[%s8384_s3 + $0x540] sm:$0xff] }
 0x535   :  { %1928 = vmatpush2.msra.mxu1 %v9595_v8  ;;  %2048 = vmatprep.subr.mxu0 %v6948_v55  ;;  %9743 = vst [vmem:[#allocation58_spill] sm:$0xff] %v6955_v24  ;;  %v6962_v8 = vld [vmem:[%s8384_s3 + $0x518] sm:$0xff] }
 0x536   :  { %1929 = vmatprep.subr.mxu1 %v9742_v22  ;;  %2049 = vmatpush2.msra.mxu0 %v6955_v24  ;;  %9745 = vst [vmem:[#allocation16_spill] sm:$0xff] %v6962_v8  ;;  %v7018_v22 = vld [vmem:[%s8384_s3 + $0x458] sm:$0xff] }
 0x537   :  { %1930 = vmatpush2.msra.mxu1 %v9744_v54  ;;  %2050 = vmatprep.subr.mxu0 %v6962_v8  ;;  %9761 = vst [vmem:[#allocation39_spill] sm:$0xff] %v7018_v22  ;;  %v9762_v54 = vld [vmem:[#allocation178_spill] sm:$0xff] }
 0x538   :  { %1931 = vmatprep.subr.mxu1 %v9746_v15  ;;  %2051 = vmatpush2.msra.mxu0 %v6969_v18  ;;  %v7025_v15 = vld [vmem:[%s8384_s3 + $0x450] sm:$0xff] }
 0x539   :  { %1932 = vmatpush2.msra.mxu1 %v9748_v4  ;;  %2052 = vmatprep.subr.mxu0 %v6976_v16  ;;  %9763 = vst [vmem:[#allocation66_spill] sm:$0xff] %v7025_v15  ;;  %v9764_v4 = vld [vmem:[#allocation179_spill] sm:$0xff] }
 0x53a   :  { %1933 = vmatprep.subr.mxu1 %v9750_v25  ;;  %2053 = vmatpush2.msra.mxu0 %v6983_v33  ;;  %v7032_v25 = vld [vmem:[%s8384_s3 + $0x428] sm:$0xff]  ;;  %v9859_v33 = vld [vmem:[#allocation26_spill] sm:$0xff] }
 0x53b   :  { %1934 = vmatpush2.msra.mxu1 %v9752_v9  ;;  %2054 = vmatprep.subr.mxu0 %v6990_v36  ;;  %9765 = vst [vmem:[#allocation163_spill] sm:$0xff] %v7032_v25  ;;  %v9766_v9 = vld [vmem:[#allocation180_spill] sm:$0xff] }
 0x53c   :  { %1935 = vmatprep.subr.mxu1 %v9754_v61  ;;  %2055 = vmatpush2.msra.mxu0 %v6997_v21  ;;  %v7039_v61 = vld [vmem:[%s8384_s3 + $0x420] sm:$0xff] }
 0x53d   :  { %1936 = vmatpush2.msra.mxu1 %v9756_v29  ;;  %2056 = vmatprep.subr.mxu0 %v7004_v63  ;;  %9767 = vst [vmem:[#allocation68_spill] sm:$0xff] %v7039_v61  ;;  %v9768_v29 = vld [vmem:[#allocation181_spill] sm:$0xff] }
 0x53e   :  { %1937 = vmatprep.subr.mxu1 %v9758_v57  ;;  %2057 = vmatpush2.msra.mxu0 %v7011_v53  ;;  %v7046_v57 = vld [vmem:[%s8384_s3 + $0x3f8] sm:$0xff] }
 0x53f   :  { %1938 = vmatpush2.msra.mxu1 %v9760_v0  ;;  %2058 = vmatprep.subr.mxu0 %v7018_v22  ;;  %9769 = vst [vmem:[#allocation164_spill] sm:$0xff] %v7046_v57  ;;  %v9770_v0 = vld [vmem:[#allocation182_spill] sm:$0xff] }
 0x540   :  { %1939 = vmatprep.subr.mxu1 %v9762_v54  ;;  %2059 = vmatpush2.msra.mxu0 %v7025_v15  ;;  %v7053_v54 = vld [vmem:[%s8384_s3 + $0x3f0] sm:$0xff]  ;;  %v9858_v15 = vld [vmem:[#allocation67_spill] sm:$0xff] }
 0x541   :  { %1940 = vmatpush2.msra.mxu1 %v9764_v4  ;;  %2060 = vmatprep.subr.mxu0 %v7032_v25  ;;  %9771 = vst [vmem:[#allocation69_spill] sm:$0xff] %v7053_v54  ;;  %v9772_v4 = vld [vmem:[#allocation183_spill] sm:$0xff] }
 0x542   :  { %1941 = vmatprep.subr.mxu1 %v9766_v9  ;;  %2061 = vmatpush2.msra.mxu0 %v7039_v61  ;;  %v7060_v9 = vld [vmem:[%s8384_s3 + $0x3c8] sm:$0xff] }
 0x543   :  { %1942 = vmatpush2.msra.mxu1 %v9768_v29  ;;  %2062 = vmatprep.subr.mxu0 %v7046_v57  ;;  %9773 = vst [vmem:[#allocation165_spill] sm:$0xff] %v7060_v9  ;;  %v9774_v29 = vld [vmem:[#allocation184_spill] sm:$0xff]  ;;  %v9776_v57 = vld [vmem:[#allocation185_spill] sm:$0xff] }
 0x544   :  { %1943 = vmatprep.subr.mxu1 %v9770_v0  ;;  %2063 = vmatpush2.msra.mxu0 %v7053_v54  ;;  %v7067_v0 = vld [vmem:[%s8384_s3 + $0x3c0] sm:$0xff]  ;;  %v9778_v54 = vld [vmem:[#allocation186_spill] sm:$0xff] }
 0x545   :  { %1944 = vmatpush2.msra.mxu1 %v9772_v4  ;;  %2064 = vmatprep.subr.mxu0 %v7060_v9  ;;  %9775 = vst [vmem:[#allocation70_spill] sm:$0xff] %v7067_v0  ;;  %v7074_v4 = vld [vmem:[%s8384_s3 + $0x398] sm:$0xff]  ;;  %v9780_v9 = vld [vmem:[#allocation187_spill] sm:$0xff] }
 0x546   :  { %1945 = vmatprep.subr.mxu1 %v9774_v29  ;;  %2065 = vmatpush2.msra.mxu0 %v7067_v0  ;;  %9777 = vst [vmem:[#allocation166_spill] sm:$0xff] %v7074_v4  ;;  %v7081_v29 = vld [vmem:[%s8384_s3 + $0x390] sm:$0xff]  ;;  %v9782_v0 = vld [vmem:[#allocation188_spill] sm:$0xff] }
 0x547   :  { %1946 = vmatpush2.msra.mxu1 %v9776_v57  ;;  %2066 = vmatprep.subr.mxu0 %v7074_v4  ;;  %9779 = vst [vmem:[#allocation72_spill] sm:$0xff] %v7081_v29  ;;  %v7088_v57 = vld [vmem:[%s8384_s3 + $0x368] sm:$0xff]  ;;  %v9784_v4 = vld [vmem:[#allocation189_spill] sm:$0xff] }
 0x548   :  { %1947 = vmatprep.subr.mxu1 %v9778_v54  ;;  %2067 = vmatpush2.msra.mxu0 %v7081_v29  ;;  %9781 = vst [vmem:[#allocation167_spill] sm:$0xff] %v7088_v57  ;;  %v7095_v54 = vld [vmem:[%s8384_s3 + $0x360] sm:$0xff]  ;;  %v9786_v29 = vld [vmem:[#allocation190_spill] sm:$0xff] }
 0x549   :  { %1948 = vmatpush2.msra.mxu1 %v9780_v9  ;;  %2068 = vmatprep.subr.mxu0 %v7088_v57  ;;  %9783 = vst [vmem:[#allocation75_spill] sm:$0xff] %v7095_v54  ;;  %v7102_v9 = vld [vmem:[%s8384_s3 + $0x338] sm:$0xff]  ;;  %v9788_v57 = vld [vmem:[#allocation191_spill] sm:$0xff] }
 0x54a   :  { %1949 = vmatprep.subr.mxu1 %v9782_v0  ;;  %2069 = vmatpush2.msra.mxu0 %v7095_v54  ;;  %9785 = vst [vmem:[#allocation76_spill] sm:$0xff] %v7102_v9  ;;  %v7109_v0 = vld [vmem:[%s8384_s3 + $0x330] sm:$0xff] }
 0x54b   :  { %1950 = vmatpush2.msra.mxu1 %v9784_v4  ;;  %2070 = vmatprep.subr.mxu0 %v7102_v9  ;;  %9787 = vst [vmem:[#allocation77_spill] sm:$0xff] %v7109_v0  ;;  %v7116_v4 = vld [vmem:[%s8384_s3 + $0x308] sm:$0xff]  ;;  %v9857_v54 = vld [vmem:[#allocation65_spill] sm:$0xff] }
 0x54c   :  { %1951 = vmatprep.subr.mxu1 %v9786_v29  ;;  %2071 = vmatpush2.msra.mxu0 %v7109_v0  ;;  %9789 = vst [vmem:[#allocation78_spill] sm:$0xff] %v7116_v4  ;;  %v7123_v29 = vld [vmem:[%s8384_s3 + $0x2e8] sm:$0xff]  ;;  %v7141_v0 = vld [vmem:[%s8384_s3 + $0x2b8] sm:$0xff] }
 0x54d   :  { %1952 = vmatpush2.msra.mxu1 %v9788_v57  ;;  %2072 = vmatprep.subr.mxu0 %v7116_v4  ;;  %9790 = vst [vmem:[#allocation79_spill] sm:$0xff] %v7123_v29  ;;  %v7129_v57 = vld [vmem:[%s8384_s3 + $0x2e0] sm:$0xff]  ;;  %9793 = vst [vmem:[#allocation82_spill] sm:$0xff] %v7141_v0 }
 0x54e   :  { %1954 = vmatmul.mubr.f32.vlgmr.msra.gmra.mxu1 %v6669_v20  ;;  %2081 = vmatprep.subr.mxu1 %v7123_v29  ;;  %9791 = vst [vmem:[#allocation80_spill] sm:$0xff] %v7129_v57  ;;  %v7135_v4 = vld [vmem:[%s8384_s3 + $0x300] sm:$0xff]  ;;  %v7147_v29 = vld [vmem:[%s8384_s3 + $0x2f8] sm:$0xff] }
 0x54f   :  { %2082 = vmatpush1.msra.mxu1 %v7129_v57  ;;  %9792 = vst [vmem:[#allocation81_spill] sm:$0xff] %v7135_v4  ;;  %2073 = vmatpush2.msra.mxu0 %v7135_v4  ;;  %9794 = vst [vmem:[#allocation83_spill] sm:$0xff] %v7147_v29  ;;  %v7153_v57 = vld [vmem:[%s8384_s3 + $0x2b0] sm:$0xff]  ;;  %v7159_v4 = vld [vmem:[%s8384_s3 + $0x288] sm:$0xff] }
 0x550   :  { %2083 = vmatprep.subr.mxu1 %v7141_v0  ;;  %2152 = vmatprep.subr.mxu0 %v7147_v29  ;;  %9795 = vst [vmem:[#allocation84_spill] sm:$0xff] %v7153_v57  ;;  %9796 = vst [vmem:[#allocation85_spill] sm:$0xff] %v7159_v4  ;;  %v7165_v0 = vld [vmem:[%s8384_s3 + $0x280] sm:$0xff]  ;;  %v7171_v29 = vld [vmem:[%s8384_s3 + $0x258] sm:$0xff] }
 0x551   :  { %2084 = vmatpush1.msra.mxu1 %v7153_v57  ;;  %9797 = vst [vmem:[#allocation86_spill] sm:$0xff] %v7165_v0  ;;  %9798 = vst [vmem:[#allocation87_spill] sm:$0xff] %v7171_v29  ;;  %v7177_v57 = vld [vmem:[%s8384_s3 + $0x250] sm:$0xff] }
 0x552   :  { %2085 = vmatprep.subr.mxu1 %v7159_v4  ;;  %9799 = vst [vmem:[#allocation88_spill] sm:$0xff] %v7177_v57  ;;  %v7183_v4 = vld [vmem:[%s8384_s3 + $0x228] sm:$0xff] }
 0x553   :  { %2086 = vmatpush1.msra.mxu1 %v7165_v0  ;;  %9800 = vst [vmem:[#allocation89_spill] sm:$0xff] %v7183_v4  ;;  %v7189_v0 = vld [vmem:[%s8384_s3 + $0x220] sm:$0xff] }
 0x554   :  { %2087 = vmatprep.subr.mxu1 %v7171_v29  ;;  %9801 = vst [vmem:[#allocation90_spill] sm:$0xff] %v7189_v0  ;;  %v7195_v29 = vld [vmem:[%s8384_s3 + $0x1f8] sm:$0xff] }
 0x555   :  { %2088 = vmatpush1.msra.mxu1 %v7177_v57  ;;  %9802 = vst [vmem:[#allocation91_spill] sm:$0xff] %v7195_v29  ;;  %v7201_v57 = vld [vmem:[%s8384_s3 + $0x1f0] sm:$0xff] }
 0x556   :  { %2089 = vmatprep.subr.mxu1 %v7183_v4  ;;  %9803 = vst [vmem:[#allocation92_spill] sm:$0xff] %v7201_v57  ;;  %v7207_v4 = vld [vmem:[%s8384_s3 + $0x1c8] sm:$0xff] }
 0x557   :  { %2090 = vmatpush1.msra.mxu1 %v7189_v0  ;;  %9804 = vst [vmem:[#allocation93_spill] sm:$0xff] %v7207_v4  ;;  %v7213_v0 = vld [vmem:[%s8384_s3 + $0x1c0] sm:$0xff] }
 0x558   :  { %2091 = vmatprep.subr.mxu1 %v7195_v29  ;;  %9805 = vst [vmem:[#allocation94_spill] sm:$0xff] %v7213_v0  ;;  %v7219_v29 = vld [vmem:[%s8384_s3 + $0x198] sm:$0xff] }
 0x559   :  { %2092 = vmatpush1.msra.mxu1 %v7201_v57  ;;  %9806 = vst [vmem:[#allocation95_spill] sm:$0xff] %v7219_v29  ;;  %v7225_v57 = vld [vmem:[%s8384_s3 + $0x190] sm:$0xff] }
 0x55a   :  { %2093 = vmatprep.subr.mxu1 %v7207_v4  ;;  %9807 = vst [vmem:[#allocation57_spill] sm:$0xff] %v7225_v57  ;;  %v7231_v4 = vld [vmem:[%s8384_s3 + $0x168] sm:$0xff] }
 0x55b   :  { %2094 = vmatpush1.msra.mxu1 %v7213_v0  ;;  %9808 = vst [vmem:[#allocation59_spill] sm:$0xff] %v7231_v4  ;;  %v7237_v0 = vld [vmem:[%s8384_s3 + $0x160] sm:$0xff] }
 0x55c   :  { %2095 = vmatprep.subr.mxu1 %v7219_v29  ;;  %9809 = vst [vmem:[#allocation96_spill] sm:$0xff] %v7237_v0  ;;  %v7243_v29 = vld [vmem:[%s8384_s3 + $0x138] sm:$0xff] }
 0x55d   :  { %2096 = vmatpush1.msra.mxu1 %v7225_v57  ;;  %9810 = vst [vmem:[#allocation97_spill] sm:$0xff] %v7243_v29  ;;  %v7249_v57 = vld [vmem:[%s8384_s3 + $0x130] sm:$0xff] }
 0x55e   :  { %2097 = vmatprep.subr.mxu1 %v7231_v4  ;;  %9811 = vst [vmem:[#allocation63_spill] sm:$0xff] %v7249_v57  ;;  %v7255_v4 = vld [vmem:[%s8384_s3 + $0x108] sm:$0xff] }
 0x55f   :  { %2098 = vmatpush1.msra.mxu1 %v7237_v0  ;;  %9812 = vst [vmem:[#allocation98_spill] sm:$0xff] %v7255_v4  ;;  %v7261_v0 = vld [vmem:[%s8384_s3 + $0x100] sm:$0xff] }
 0x560   :  { %2099 = vmatprep.subr.mxu1 %v7243_v29  ;;  %9813 = vst [vmem:[#allocation99_spill] sm:$0xff] %v7261_v0  ;;  %v7267_v29 = vld [vmem:[%s8384_s3 + $0xd8] sm:$0xff] }
 0x561   :  { %2100 = vmatpush1.msra.mxu1 %v7249_v57  ;;  %9814 = vst [vmem:[#allocation100_spill] sm:$0xff] %v7267_v29  ;;  %v7273_v57 = vld [vmem:[%s8384_s3 + $0xd0] sm:$0xff] }
 0x562   :  { %2101 = vmatprep.subr.mxu1 %v7255_v4  ;;  %9815 = vst [vmem:[#allocation101_spill] sm:$0xff] %v7273_v57  ;;  %v7279_v4 = vld [vmem:[%s8384_s3 + $0xa8] sm:$0xff] }
 0x563   :  { %2102 = vmatpush1.msra.mxu1 %v7261_v0  ;;  %9816 = vst [vmem:[#allocation102_spill] sm:$0xff] %v7279_v4  ;;  %v7285_v0 = vld [vmem:[%s8384_s3 + $0xa0] sm:$0xff] }
 0x564   :  { %2103 = vmatprep.subr.mxu1 %v7267_v29  ;;  %9817 = vst [vmem:[#allocation103_spill] sm:$0xff] %v7285_v0  ;;  %v7291_v29 = vld [vmem:[%s8384_s3 + $0x78] sm:$0xff] }
 0x565   :  { %2104 = vmatpush1.msra.mxu1 %v7273_v57  ;;  %9818 = vst [vmem:[#allocation104_spill] sm:$0xff] %v7291_v29  ;;  %v7297_v57 = vld [vmem:[%s8384_s3 + $0x70] sm:$0xff] }
 0x566   :  { %2105 = vmatprep.subr.mxu1 %v7279_v4  ;;  %9819 = vst [vmem:[#allocation105_spill] sm:$0xff] %v7297_v57  ;;  %v7303_v4 = vld [vmem:[%s8384_s3 + $0x48] sm:$0xff] }
 0x567   :  { %2106 = vmatpush1.msra.mxu1 %v7285_v0  ;;  %9820 = vst [vmem:[#allocation106_spill] sm:$0xff] %v7303_v4  ;;  %v7309_v0 = vld [vmem:[%s8384_s3 + $0x40] sm:$0xff] }
 0x568   :  { %2107 = vmatprep.subr.mxu1 %v7291_v29  ;;  %9821 = vst [vmem:[#allocation107_spill] sm:$0xff] %v7309_v0  ;;  %v7315_v29 = vld [vmem:[%s8384_s3 + $0x18] sm:$0xff] }
 0x569   :  { %2108 = vmatpush1.msra.mxu1 %v7297_v57  ;;  %9822 = vst [vmem:[#allocation108_spill] sm:$0xff] %v7315_v29  ;;  %v7321_v57 = vld [vmem:[%s8384_s3 + $0x10] sm:$0xff] }
 0x56a   :  { %2109 = vmatprep.subr.mxu1 %v7303_v4  ;;  %9823 = vst [vmem:[#allocation109_spill] sm:$0xff] %v7321_v57  ;;  %v7327_v4 = vld [vmem:[%s8384_s3 + $0x5e8] sm:$0xff] }
 0x56b   :  { %2110 = vmatpush1.msra.mxu1 %v7309_v0  ;;  %9824 = vst [vmem:[#allocation110_spill] sm:$0xff] %v7327_v4  ;;  %v7333_v0 = vld [vmem:[%s8384_s3 + $0x5e0] sm:$0xff] }
 0x56c   :  { %2111 = vmatprep.subr.mxu1 %v7315_v29  ;;  %9825 = vst [vmem:[#allocation111_spill] sm:$0xff] %v7333_v0  ;;  %v7339_v29 = vld [vmem:[%s8384_s3 + $0x5b8] sm:$0xff] }
 0x56d   :  { %2112 = vmatpush1.msra.mxu1 %v7321_v57  ;;  %9826 = vst [vmem:[#allocation112_spill] sm:$0xff] %v7339_v29  ;;  %v7345_v57 = vld [vmem:[%s8384_s3 + $0x5b0] sm:$0xff] }
 0x56e   :  { %2113 = vmatprep.subr.mxu1 %v7327_v4  ;;  %9827 = vst [vmem:[#allocation113_spill] sm:$0xff] %v7345_v57  ;;  %v7351_v4 = vld [vmem:[%s8384_s3 + $0x588] sm:$0xff] }
 0x56f   :  { %2114 = vmatpush2.msra.mxu1 %v7333_v0  ;;  %9828 = vst [vmem:[#allocation114_spill] sm:$0xff] %v7351_v4  ;;  %v7357_v0 = vld [vmem:[%s8384_s3 + $0x580] sm:$0xff] }
 0x570   :  { %2115 = vmatprep.subr.mxu1 %v7339_v29  ;;  %9829 = vst [vmem:[#allocation115_spill] sm:$0xff] %v7357_v0  ;;  %v7363_v29 = vld [vmem:[%s8384_s3 + $0x558] sm:$0xff] }
 0x571   :  { %2116 = vmatpush2.msra.mxu1 %v7345_v57  ;;  %9830 = vst [vmem:[#allocation116_spill] sm:$0xff] %v7363_v29  ;;  %v7369_v57 = vld [vmem:[%s8384_s3 + $0x550] sm:$0xff] }
 0x572   :  { %2117 = vmatprep.subr.mxu1 %v7351_v4  ;;  %9831 = vst [vmem:[#allocation117_spill] sm:$0xff] %v7369_v57  ;;  %v7375_v4 = vld [vmem:[%s8384_s3 + $0x528] sm:$0xff] }
 0x573   :  { %2118 = vmatpush2.msra.mxu1 %v7357_v0  ;;  %9832 = vst [vmem:[#allocation118_spill] sm:$0xff] %v7375_v4  ;;  %v7381_v0 = vld [vmem:[%s8384_s3 + $0x520] sm:$0xff] }
 0x574   :  { %2119 = vmatprep.subr.mxu1 %v7363_v29  ;;  %9833 = vst [vmem:[#allocation119_spill] sm:$0xff] %v7381_v0  ;;  %v7387_v29 = vld [vmem:[%s8384_s3 + $0x4f8] sm:$0xff] }
 0x575   :  { %2120 = vmatpush2.msra.mxu1 %v7369_v57  ;;  %9834 = vst [vmem:[#allocation120_spill] sm:$0xff] %v7387_v29  ;;  %v7393_v57 = vld [vmem:[%s8384_s3 + $0x4f0] sm:$0xff] }
 0x576   :  { %2121 = vmatprep.subr.mxu1 %v7375_v4  ;;  %9835 = vst [vmem:[#allocation121_spill] sm:$0xff] %v7393_v57  ;;  %v7399_v4 = vld [vmem:[%s8384_s3 + $0x4c8] sm:$0xff] }
 0x577   :  { %2122 = vmatpush2.msra.mxu1 %v7381_v0  ;;  %9836 = vst [vmem:[#allocation122_spill] sm:$0xff] %v7399_v4  ;;  %v7405_v0 = vld [vmem:[%s8384_s3 + $0x4c0] sm:$0xff] }
 0x578   :  { %2123 = vmatprep.subr.mxu1 %v7387_v29  ;;  %9837 = vst [vmem:[#allocation123_spill] sm:$0xff] %v7405_v0  ;;  %v7411_v29 = vld [vmem:[%s8384_s3 + $0x498] sm:$0xff] }
 0x579   :  { %2124 = vmatpush2.msra.mxu1 %v7393_v57  ;;  %9838 = vst [vmem:[#allocation124_spill] sm:$0xff] %v7411_v29  ;;  %v7417_v57 = vld [vmem:[%s8384_s3 + $0x490] sm:$0xff] }
 0x57a   :  { %2125 = vmatprep.subr.mxu1 %v7399_v4  ;;  %9839 = vst [vmem:[#allocation125_spill] sm:$0xff] %v7417_v57  ;;  %v7423_v4 = vld [vmem:[%s8384_s3 + $0x468] sm:$0xff] }
 0x57b   :  { %2126 = vmatpush2.msra.mxu1 %v7405_v0  ;;  %9840 = vst [vmem:[#allocation126_spill] sm:$0xff] %v7423_v4  ;;  %v7429_v0 = vld [vmem:[%s8384_s3 + $0x460] sm:$0xff] }
 0x57c   :  { %2127 = vmatprep.subr.mxu1 %v7411_v29  ;;  %9841 = vst [vmem:[#allocation127_spill] sm:$0xff] %v7429_v0  ;;  %v7435_v29 = vld [vmem:[%s8384_s3 + $0x438] sm:$0xff] }
 0x57d   :  { %2128 = vmatpush2.msra.mxu1 %v7417_v57  ;;  %9842 = vst [vmem:[#allocation128_spill] sm:$0xff] %v7435_v29  ;;  %v7441_v57 = vld [vmem:[%s8384_s3 + $0x430] sm:$0xff] }
 0x57e   :  { %2129 = vmatprep.subr.mxu1 %v7423_v4  ;;  %9843 = vst [vmem:[#allocation129_spill] sm:$0xff] %v7441_v57  ;;  %v7447_v4 = vld [vmem:[%s8384_s3 + $0x408] sm:$0xff] }
 0x57f   :  { %2130 = vmatpush2.msra.mxu1 %v7429_v0  ;;  %9844 = vst [vmem:[#allocation130_spill] sm:$0xff] %v7447_v4  ;;  %v7453_v0 = vld [vmem:[%s8384_s3 + $0x400] sm:$0xff] }
 0x580   :  { %2131 = vmatprep.subr.mxu1 %v7435_v29  ;;  %9845 = vst [vmem:[#allocation131_spill] sm:$0xff] %v7453_v0  ;;  %v7459_v29 = vld [vmem:[%s8384_s3 + $0x3d8] sm:$0xff] }
 0x581   :  { %2132 = vmatpush2.msra.mxu1 %v7441_v57  ;;  %9846 = vst [vmem:[#allocation132_spill] sm:$0xff] %v7459_v29  ;;  %v7465_v57 = vld [vmem:[%s8384_s3 + $0x3d0] sm:$0xff] }
 0x582   :  { %2133 = vmatprep.subr.mxu1 %v7447_v4  ;;  %9847 = vst [vmem:[#allocation133_spill] sm:$0xff] %v7465_v57  ;;  %v7471_v4 = vld [vmem:[%s8384_s3 + $0x3a8] sm:$0xff] }
 0x583   :  { %2134 = vmatpush2.msra.mxu1 %v7453_v0  ;;  %9848 = vst [vmem:[#allocation134_spill] sm:$0xff] %v7471_v4  ;;  %v7477_v0 = vld [vmem:[%s8384_s3 + $0x3a0] sm:$0xff] }
 0x584   :  { %2135 = vmatprep.subr.mxu1 %v7459_v29  ;;  %9849 = vst [vmem:[#allocation135_spill] sm:$0xff] %v7477_v0  ;;  %v7483_v29 = vld [vmem:[%s8384_s3 + $0x378] sm:$0xff] }
 0x585   :  { %2136 = vmatpush2.msra.mxu1 %v7465_v57  ;;  %9850 = vst [vmem:[#allocation136_spill] sm:$0xff] %v7483_v29  ;;  %v7489_v57 = vld [vmem:[%s8384_s3 + $0x370] sm:$0xff] }
 0x586   :  { %2137 = vmatprep.subr.mxu1 %v7471_v4  ;;  %9851 = vst [vmem:[#allocation137_spill] sm:$0xff] %v7489_v57  ;;  %v7495_v4 = vld [vmem:[%s8384_s3 + $0x348] sm:$0xff] }
 0x587   :  { %2138 = vmatpush2.msra.mxu1 %v7477_v0  ;;  %9852 = vst [vmem:[#allocation138_spill] sm:$0xff] %v7495_v4  ;;  %v7501_v0 = vld [vmem:[%s8384_s3 + $0x340] sm:$0xff] }
 0x588   :  { %2139 = vmatprep.subr.mxu1 %v7483_v29  ;;  %9853 = vst [vmem:[#allocation139_spill] sm:$0xff] %v7501_v0  ;;  %v7507_v29 = vld [vmem:[%s8384_s3 + $0x318] sm:$0xff] }
 0x589   :  { %2140 = vmatpush2.msra.mxu1 %v7489_v57  ;;  %9854 = vst [vmem:[#allocation140_spill] sm:$0xff] %v7507_v29  ;;  %v7513_v57 = vld [vmem:[%s8384_s3 + $0x310] sm:$0xff] }
 0x58a   :  { %2141 = vmatprep.subr.mxu1 %v7495_v4  ;;  %9855 = vst [vmem:[#allocation141_spill] sm:$0xff] %v7513_v57  ;;  %v9856_v4 = vld [vmem:[#allocation192_spill] sm:$0xff] }
 0x58b   :  { %2142 = vmatpush2.msra.mxu1 %v7501_v0 }
 0x58c   :  { %2143 = vmatprep.subr.mxu1 %v7507_v29 }
 0x58d   :  { %2144 = vmatpush2.msra.mxu1 %v7513_v57  ;;  %v300_v57 = vadd.f32 %v9859_v33, %v5022_v12 }
 0x58e   :  { %2273 = vmatprep.subr.mxu1 %v9856_v4 }
 0x5ce   :  { %v1813_v9 = vpop.f32.mrf.mxu1  ;;  %v1884_v21 = vpop.f32.mrf.mxu0 }
 0x5cf   :  { %v1966_v61 = vadd.f32 %v1813_v9, %v9857_v54  ;;  %v9860_v54 = vld [vmem:[#allocation74_spill] sm:$0xff] }
 0x5d0   :  { %v1815_v25 = vpop.f32.mrf.mxu1  ;;  %v1886_v36 = vpop.f32.mrf.mxu0 }
 0x5d1   :  { %v2847_v0 = vmul.f32 -1.442695, %v1966_v61  ;;  %v1973_v22 = vadd.f32 %v1815_v25, %v9858_v15  ;;  %v1988_v16 = vadd.f32 %v1886_v36, %v300_v57  ;;  %v1980_v61 = vadd.f32 %v9860_v54, %v1884_v21  ;;  %v9861_v15 = vld [vmem:[#allocation28_spill] sm:$0xff] }
 0x5d3   :  { %2948 = vpow2.f32 %v2847_v0  ;;  %v2848_v53 = vmul.f32 -1.442695, %v1973_v22  ;;  %v2849_v18 = vmul.f32 -1.442695, %v1988_v16  ;;  %v304_v22 = vadd.f32 %v9861_v15, %v5045_v17 }
 0x5d5   :  { %2950 = vpow2.f32 %v2848_v53 }
 0x5e0   :  { %v2949_v29 = vpop.eup %2948 }
 0x5e1   :  { %v1970_v63 = vadd.f32 1.0, %v2949_v29 }
 0x5e2   :  { %v2951_v4 = vpop.eup %2950 }
 0x5e3   :  { %2952 = vrcp.f32 %v1970_v63  ;;  %v1977_v8 = vadd.f32 1.0, %v2951_v4 }
 0x5e4   :  { %2954 = vpow2.f32 %v2849_v18  ;;  %v9862_v18 = vld [vmem:[#allocation25_spill] sm:$0xff] }
 0x5e5   :  { %2956 = vrcp.f32 %v1977_v8  ;;  %v411_v21 = vadd.f32 %v9862_v18, %v9421_v30 }
 0x5f0   :  { %v2953_v9 = vpop.eup %2952 }
 0x5f1   :  { %v1981_v53 = vmul.f32 %v2953_v9, %v1980_v61  ;;  %v2955_v63 = vpop.eup %2954 }
 0x5f2   :  { %v2957_v0 = vpop.eup %2956  ;;  %v1992_v29 = vadd.f32 1.0, %v2955_v63 }
 0x5f3   :  { %v1982_v25 = vadd.f32 %v1981_v53, %v304_v22  ;;  %v1984_v24 = vsub.f32 1.0, %v2957_v0  ;;  %v1986_v16 = vmul.f32 %v2957_v0, %v6669_v20  ;;  %v9863_v53 = vld [vmem:[#allocation27_spill] sm:$0xff] }
 0x5f5   :  { %2958 = vtanh.f32 %v1982_v25  ;;  %v413_v25 = vadd.f32 %v9863_v53, %v5052_v14  ;;  %v7598_v53 = vld [vmem:[%s8384_s3 + $0x230] sm:$0xff] }
 0x5f6   :  { %2960 = vrcp.f32 %v1992_v29 }
 0x602   :  { %v2959_v33 = vpop.eup %2958 }
 0x603   :  { %v1985_v36 = vmul.f32 %v2959_v33, %v1984_v24  ;;  %v2961_v22 = vpop.eup %2960 }
 0x605   :  { %v7525_v57 = vadd.f32 %v1986_v16, %v1985_v36 }
 0x60e   :  { %v1955_v4 = vpop.f32.mrf.mxu1 }
 0x60f   :  { %v1995_v15 = vadd.f32 %v1955_v4, %v411_v21  ;;  %v7556_v4 = vld [vmem:[%s8384_s3 + $0x2c0] sm:$0xff] }
 0x610   :  { %v1957_v61 = vpop.f32.mrf.mxu1 }
 0x611   :  { %v2850_v8 = vmul.f32 -1.442695, %v1995_v15  ;;  %v2002_v9 = vadd.f32 %v6450_v32, %v1957_v61  ;;  %v7542_v32 = vld [vmem:[%s8384_s3 + $0x2f0] sm:$0xff]  ;;  %v7563_v15 = vld [vmem:[%s8384_s3 + $0x298] sm:$0xff] }
 0x612   :  { %v7570_v61 = vld [vmem:[%s8384_s3 + $0x290] sm:$0xff] }
 0x613   :  { %2962 = vpow2.f32 %v2850_v8  ;;  %v2003_v24 = vmul.f32 %v2961_v22, %v2002_v9  ;;  %v7577_v8 = vld [vmem:[%s8384_s3 + $0x268] sm:$0xff]  ;;  %v7584_v9 = vld [vmem:[%s8384_s3 + $0x260] sm:$0xff]  ;;  %v7591_v22 = vld [vmem:[%s8384_s3 + $0x238] sm:$0xff] }
 0x615   :  { %v2004_v63 = vadd.f32 %v2003_v24, %v413_v25  ;;  %v7605_v25 = vld [vmem:[%s8384_s3 + $0x208] sm:$0xff]  ;;  %v7612_v24 = vld [vmem:[%s8384_s3 + $0x200] sm:$0xff] }
 0x620   :  { %v2963_v20 = vpop.eup %2962 }
 0x621   :  { %v1999_v0 = vadd.f32 1.0, %v2963_v20  ;;  %v7626_v20 = vld [vmem:[%s8384_s3 + $0x1d0] sm:$0xff] }
 0x623   :  { %2964 = vrcp.f32 %v1999_v0  ;;  %v7633_v0 = vld [vmem:[%s8384_s3 + $0x1a8] sm:$0xff] }
 0x624   :  { %2966 = vtanh.f32 %v2004_v63  ;;  %v7619_v63 = vld [vmem:[%s8384_s3 + $0x1d8] sm:$0xff] }
 0x630   :  { %v2965_v29 = vpop.eup %2964 }
 0x631   :  { %v2006_v33 = vsub.f32 1.0, %v2965_v29  ;;  %v2967_v36 = vpop.eup %2966  ;;  %v2008_v18 = vmul.f32 %v2965_v29, %v6677_v23  ;;  %v7549_v23 = vld [vmem:[%s8384_s3 + $0x2c8] sm:$0xff]  ;;  %v7640_v29 = vld [vmem:[%s8384_s3 + $0x1a0] sm:$0xff] }
 0x633   :  { %v2007_v16 = vmul.f32 %v2967_v36, %v2006_v33  ;;  %v7647_v33 = vld [vmem:[%s8384_s3 + $0x178] sm:$0xff]  ;;  %v7654_v36 = vld [vmem:[%s8384_s3 + $0x170] sm:$0xff] }
 0x635   :  { %v7533_v21 = vadd.f32 %v2008_v18, %v2007_v16  ;;  %v7661_v16 = vld [vmem:[%s8384_s3 + $0x148] sm:$0xff]  ;;  %v7668_v18 = vld [vmem:[%s8384_s3 + $0x140] sm:$0xff] }
 0x637   :  { %2074 = vmatprep.mubr.f32.mxu0 %v7533_v21  ;;  %2145 = vmatprep.mubr.f32.mxu1 %v7533_v21 }
 0x638   :  { %2075 = vmatmul.mubr.f32.vlgmr.msra.gmra.mxu0 %v7525_v57  ;;  %2146 = vmatmul.mubr.f32.vlgmr.msra.gmra.mxu1 %v7525_v57 }
 0x639   :  { %2153 = vmatpush1.msra.mxu0 %v7542_v32  ;;  %2216 = vmatprep.mubr.f32.mxu0 %v7533_v21 }
 0x63a   :  { %2154 = vmatprep.subr.mxu0 %v7549_v23  ;;  %2274 = vmatpush1.msra.mxu1 %v6689_v1 }
 0x63b   :  { %2155 = vmatpush1.msra.mxu0 %v7556_v4  ;;  %2275 = vmatprep.subr.mxu1 %v6696_v13 }
 0x63c   :  { %2156 = vmatprep.subr.mxu0 %v7563_v15  ;;  %2276 = vmatpush1.msra.mxu1 %v6703_v28 }
 0x63d   :  { %2157 = vmatpush1.msra.mxu0 %v7570_v61  ;;  %2277 = vmatprep.subr.mxu1 %v6710_v56 }
 0x63e   :  { %2158 = vmatprep.subr.mxu0 %v7577_v8  ;;  %2278 = vmatpush1.msra.mxu1 %v6717_v52 }
 0x63f   :  { %2159 = vmatpush1.msra.mxu0 %v7584_v9  ;;  %2279 = vmatprep.subr.mxu1 %v6724_v42 }
 0x640   :  { %2160 = vmatprep.subr.mxu0 %v7591_v22  ;;  %2280 = vmatpush1.msra.mxu1 %v6731_v34 }
 0x641   :  { %2161 = vmatpush1.msra.mxu0 %v7598_v53  ;;  %2281 = vmatprep.subr.mxu1 %v6738_v46 }
 0x642   :  { %2162 = vmatprep.subr.mxu0 %v7605_v25  ;;  %2282 = vmatpush1.msra.mxu1 %v6745_v19 }
 0x643   :  { %2163 = vmatpush1.msra.mxu0 %v7612_v24  ;;  %2283 = vmatprep.subr.mxu1 %v6752_v58 }
 0x644   :  { %2164 = vmatprep.subr.mxu0 %v7619_v63  ;;  %2284 = vmatpush1.msra.mxu1 %v6759_v6 }
 0x645   :  { %2165 = vmatpush1.msra.mxu0 %v7626_v20  ;;  %2285 = vmatprep.subr.mxu1 %v6766_v62 }
 0x646   :  { %2166 = vmatprep.subr.mxu0 %v7633_v0  ;;  %2286 = vmatpush1.msra.mxu1 %v6773_v48 }
 0x647   :  { %2167 = vmatpush1.msra.mxu0 %v7640_v29  ;;  %2287 = vmatprep.subr.mxu1 %v6780_v40 }
 0x648   :  { %2168 = vmatprep.subr.mxu0 %v7647_v33  ;;  %2288 = vmatpush1.msra.mxu1 %v6787_v10 }
 0x649   :  { %2169 = vmatpush1.msra.mxu0 %v7654_v36  ;;  %2289 = vmatprep.subr.mxu1 %v6794_v44  ;;  %v7675_v44 = vld [vmem:[%s8384_s3 + $0x118] sm:$0xff] }
 0x64a   :  { %2170 = vmatprep.subr.mxu0 %v7661_v16  ;;  %2290 = vmatpush1.msra.mxu1 %v6801_v11  ;;  %v7682_v11 = vld [vmem:[%s8384_s3 + $0x110] sm:$0xff] }
 0x64b   :  { %2171 = vmatpush1.msra.mxu0 %v7668_v18  ;;  %2291 = vmatprep.subr.mxu1 %v6808_v38  ;;  %v7689_v38 = vld [vmem:[%s8384_s3 + $0xe8] sm:$0xff] }
 0x64c   :  { %2172 = vmatprep.subr.mxu0 %v7675_v44  ;;  %2292 = vmatpush1.msra.mxu1 %v6815_v50  ;;  %v7696_v50 = vld [vmem:[%s8384_s3 + $0xe0] sm:$0xff] }
 0x64d   :  { %2173 = vmatpush1.msra.mxu0 %v7682_v11  ;;  %2293 = vmatprep.subr.mxu1 %v6822_v35  ;;  %v7703_v35 = vld [vmem:[%s8384_s3 + $0xb8] sm:$0xff] }
 0x64e   :  { %2174 = vmatprep.subr.mxu0 %v7689_v38  ;;  %2294 = vmatpush1.msra.mxu1 %v6829_v37  ;;  %v7710_v37 = vld [vmem:[%s8384_s3 + $0xb0] sm:$0xff] }
 0x64f   :  { %2175 = vmatpush1.msra.mxu0 %v7696_v50  ;;  %2295 = vmatprep.subr.mxu1 %v6836_v39  ;;  %9864 = vst [vmem:[#allocation142_spill] sm:$0xff] %v7710_v37  ;;  %v7717_v39 = vld [vmem:[%s8384_s3 + $0x88] sm:$0xff] }
 0x650   :  { %2176 = vmatprep.subr.mxu0 %v7703_v35  ;;  %2296 = vmatpush1.msra.mxu1 %v6843_v41  ;;  %9865 = vst [vmem:[#allocation143_spill] sm:$0xff] %v7717_v39  ;;  %v7724_v41 = vld [vmem:[%s8384_s3 + $0x80] sm:$0xff] }
 0x651   :  { %2177 = vmatpush1.msra.mxu0 %v7710_v37  ;;  %2297 = vmatprep.subr.mxu1 %v6850_v43  ;;  %9866 = vst [vmem:[#allocation144_spill] sm:$0xff] %v7724_v41  ;;  %v7731_v43 = vld [vmem:[%s8384_s3 + $0x58] sm:$0xff] }
 0x652   :  { %2178 = vmatprep.subr.mxu0 %v7717_v39  ;;  %2298 = vmatpush1.msra.mxu1 %v6857_v45  ;;  %9867 = vst [vmem:[#allocation145_spill] sm:$0xff] %v7731_v43  ;;  %v7738_v45 = vld [vmem:[%s8384_s3 + $0x50] sm:$0xff] }
 0x653   :  { %2179 = vmatpush1.msra.mxu0 %v7724_v41  ;;  %2299 = vmatprep.subr.mxu1 %v6864_v47  ;;  %9868 = vst [vmem:[#allocation146_spill] sm:$0xff] %v7738_v45  ;;  %v7745_v47 = vld [vmem:[%s8384_s3 + $0x28] sm:$0xff] }
 0x654   :  { %2180 = vmatprep.subr.mxu0 %v7731_v43  ;;  %2300 = vmatpush1.msra.mxu1 %v6871_v60  ;;  %9869 = vst [vmem:[#allocation147_spill] sm:$0xff] %v7745_v47  ;;  %v7752_v60 = vld [vmem:[%s8384_s3 + $0x20] sm:$0xff] }
 0x655   :  { %2181 = vmatpush1.msra.mxu0 %v7738_v45  ;;  %2301 = vmatprep.subr.mxu1 %v6878_v27  ;;  %9870 = vst [vmem:[#allocation148_spill] sm:$0xff] %v7752_v60  ;;  %v7759_v27 = vld [vmem:[%s8384_s3 + $0x5f8] sm:$0xff] }
 0x656   :  { %2182 = vmatprep.subr.mxu0 %v7745_v47  ;;  %2302 = vmatpush1.msra.mxu1 %v6885_v31  ;;  %9871 = vst [vmem:[#allocation149_spill] sm:$0xff] %v7759_v27  ;;  %v7766_v31 = vld [vmem:[%s8384_s3 + $0x5f0] sm:$0xff]  ;;  %v9995_v45 = vld [vmem:[#allocation22_spill] sm:$0xff] }
 0x657   :  { %2183 = vmatpush1.msra.mxu0 %v7752_v60  ;;  %2303 = vmatprep.subr.mxu1 %v6892_v26  ;;  %9872 = vst [vmem:[#allocation150_spill] sm:$0xff] %v7766_v31  ;;  %v7773_v26 = vld [vmem:[%s8384_s3 + $0x5c8] sm:$0xff]  ;;  %v294_v43 = vadd.f32 %v9995_v45, %v5022_v12 }
 0x658   :  { %2184 = vmatprep.subr.mxu0 %v7759_v27  ;;  %2304 = vmatpush1.msra.mxu1 %v6899_v5  ;;  %9873 = vst [vmem:[#allocation151_spill] sm:$0xff] %v7773_v26  ;;  %v7780_v5 = vld [vmem:[%s8384_s3 + $0x5c0] sm:$0xff]  ;;  %v9937_v27 = vld [vmem:[#allocation89_spill] sm:$0xff] }
 0x659   :  { %2185 = vmatpush2.msra.mxu0 %v7766_v31  ;;  %2305 = vmatprep.subr.mxu1 %v6906_v51  ;;  %9874 = vst [vmem:[#allocation152_spill] sm:$0xff] %v7780_v5  ;;  %v7787_v51 = vld [vmem:[%s8384_s3 + $0x598] sm:$0xff] }
 0x65a   :  { %2186 = vmatprep.subr.mxu0 %v7773_v26  ;;  %2306 = vmatpush2.msra.mxu1 %v6913_v49  ;;  %9875 = vst [vmem:[#allocation153_spill] sm:$0xff] %v7787_v51  ;;  %v7794_v49 = vld [vmem:[%s8384_s3 + $0x590] sm:$0xff]  ;;  %v9934_v31 = vld [vmem:[#allocation86_spill] sm:$0xff] }
 0x65b   :  { %2187 = vmatpush2.msra.mxu0 %v7780_v5  ;;  %2307 = vmatprep.subr.mxu1 %v6920_v7  ;;  %9876 = vst [vmem:[#allocation154_spill] sm:$0xff] %v7794_v49  ;;  %v7801_v7 = vld [vmem:[%s8384_s3 + $0x568] sm:$0xff]  ;;  %v9933_v26 = vld [vmem:[#allocation85_spill] sm:$0xff] }
 0x65c   :  { %2188 = vmatprep.subr.mxu0 %v7787_v51  ;;  %2308 = vmatpush2.msra.mxu1 %v6927_v3  ;;  %9877 = vst [vmem:[#allocation155_spill] sm:$0xff] %v7801_v7  ;;  %v7808_v3 = vld [vmem:[%s8384_s3 + $0x560] sm:$0xff]  ;;  %v9929_v51 = vld [vmem:[#allocation81_spill] sm:$0xff]  ;;  %v9932_v5 = vld [vmem:[#allocation84_spill] sm:$0xff] }
 0x65d   :  { %2189 = vmatpush2.msra.mxu0 %v7794_v49  ;;  %2309 = vmatprep.subr.mxu1 %v6934_v2  ;;  %9878 = vst [vmem:[#allocation156_spill] sm:$0xff] %v7808_v3  ;;  %v7815_v2 = vld [vmem:[%s8384_s3 + $0x538] sm:$0xff] }
 0x65e   :  { %2190 = vmatprep.subr.mxu0 %v7801_v7  ;;  %2310 = vmatpush2.msra.mxu1 %v6941_v59  ;;  %9879 = vst [vmem:[#allocation157_spill] sm:$0xff] %v7815_v2  ;;  %v9880_v49 = vld [vmem:[#allocation58_spill] sm:$0xff]  ;;  %v7822_v59 = vld [vmem:[%s8384_s3 + $0x530] sm:$0xff]  ;;  %v9882_v7 = vld [vmem:[#allocation16_spill] sm:$0xff] }
 0x65f   :  { %2191 = vmatpush2.msra.mxu0 %v7808_v3  ;;  %2311 = vmatprep.subr.mxu1 %v6948_v55  ;;  %9881 = vst [vmem:[#allocation158_spill] sm:$0xff] %v7822_v59  ;;  %v7829_v55 = vld [vmem:[%s8384_s3 + $0x508] sm:$0xff] }
 0x660   :  { %2192 = vmatprep.subr.mxu0 %v7815_v2  ;;  %2312 = vmatpush2.msra.mxu1 %v9880_v49  ;;  %9883 = vst [vmem:[#allocation159_spill] sm:$0xff] %v7829_v55  ;;  %v9884_v3 = vld [vmem:[#allocation60_spill] sm:$0xff]  ;;  %v7836_v49 = vld [vmem:[%s8384_s3 + $0x500] sm:$0xff]  ;;  %v9886_v2 = vld [vmem:[#allocation41_spill] sm:$0xff] }
 0x661   :  { %2193 = vmatpush2.msra.mxu0 %v7822_v59  ;;  %2313 = vmatprep.subr.mxu1 %v9882_v7  ;;  %9885 = vst [vmem:[#allocation160_spill] sm:$0xff] %v7836_v49  ;;  %v7843_v7 = vld [vmem:[%s8384_s3 + $0x4d8] sm:$0xff]  ;;  %v9888_v59 = vld [vmem:[#allocation61_spill] sm:$0xff] }
 0x662   :  { %2194 = vmatprep.subr.mxu0 %v7829_v55  ;;  %2314 = vmatpush2.msra.mxu1 %v9884_v3  ;;  %9887 = vst [vmem:[#allocation161_spill] sm:$0xff] %v7843_v7  ;;  %v7850_v3 = vld [vmem:[%s8384_s3 + $0x4d0] sm:$0xff] }
 0x663   :  { %2195 = vmatpush2.msra.mxu0 %v7836_v49  ;;  %2315 = vmatprep.subr.mxu1 %v9886_v2  ;;  %9889 = vst [vmem:[#allocation162_spill] sm:$0xff] %v7850_v3  ;;  %v9890_v55 = vld [vmem:[#allocation37_spill] sm:$0xff]  ;;  %v7857_v2 = vld [vmem:[%s8384_s3 + $0x4a8] sm:$0xff]  ;;  %v9892_v49 = vld [vmem:[#allocation62_spill] sm:$0xff] }
 0x664   :  { %2196 = vmatprep.subr.mxu0 %v7843_v7  ;;  %2316 = vmatpush2.msra.mxu1 %v9888_v59  ;;  %9891 = vst [vmem:[#allocation9_spill] sm:$0xff] %v7857_v2  ;;  %v7864_v59 = vld [vmem:[%s8384_s3 + $0x4a0] sm:$0xff] }
 0x665   :  { %2197 = vmatpush2.msra.mxu0 %v7850_v3  ;;  %2317 = vmatprep.subr.mxu1 %v9890_v55  ;;  %9893 = vst [vmem:[#allocation11_spill] sm:$0xff] %v7864_v59  ;;  %v9894_v7 = vld [vmem:[#allocation43_spill] sm:$0xff]  ;;  %v7871_v55 = vld [vmem:[%s8384_s3 + $0x478] sm:$0xff]  ;;  %v9896_v3 = vld [vmem:[#allocation64_spill] sm:$0xff] }
 0x666   :  { %2198 = vmatprep.subr.mxu0 %v7857_v2  ;;  %2318 = vmatpush2.msra.mxu1 %v9892_v49  ;;  %9895 = vst [vmem:[#allocation30_spill] sm:$0xff] %v7871_v55  ;;  %v7878_v49 = vld [vmem:[%s8384_s3 + $0x470] sm:$0xff]  ;;  %v9898_v2 = vld [vmem:[#allocation39_spill] sm:$0xff] }
 0x667   :  { %2199 = vmatpush2.msra.mxu0 %v7864_v59  ;;  %2319 = vmatprep.subr.mxu1 %v9894_v7  ;;  %9897 = vst [vmem:[#allocation24_spill] sm:$0xff] %v7878_v49  ;;  %v7885_v7 = vld [vmem:[%s8384_s3 + $0x448] sm:$0xff]  ;;  %v9900_v59 = vld [vmem:[#allocation66_spill] sm:$0xff] }
 0x668   :  { %2200 = vmatprep.subr.mxu0 %v7871_v55  ;;  %2320 = vmatpush2.msra.mxu1 %v9896_v3  ;;  %9899 = vst [vmem:[#allocation29_spill] sm:$0xff] %v7885_v7  ;;  %v7892_v3 = vld [vmem:[%s8384_s3 + $0x440] sm:$0xff] }
 0x669   :  { %2201 = vmatpush2.msra.mxu0 %v7878_v49  ;;  %2321 = vmatprep.subr.mxu1 %v9898_v2  ;;  %9901 = vst [vmem:[#allocation31_spill] sm:$0xff] %v7892_v3  ;;  %v9902_v55 = vld [vmem:[#allocation163_spill] sm:$0xff]  ;;  %v7899_v2 = vld [vmem:[%s8384_s3 + $0x418] sm:$0xff]  ;;  %v9904_v49 = vld [vmem:[#allocation68_spill] sm:$0xff] }
 0x66a   :  { %2202 = vmatprep.subr.mxu0 %v7885_v7  ;;  %2322 = vmatpush2.msra.mxu1 %v9900_v59  ;;  %9903 = vst [vmem:[#allocation168_spill] sm:$0xff] %v7899_v2  ;;  %v7906_v59 = vld [vmem:[%s8384_s3 + $0x410] sm:$0xff]  ;;  %v9906_v7 = vld [vmem:[#allocation164_spill] sm:$0xff] }
 0x66b   :  { %2203 = vmatpush2.msra.mxu0 %v7892_v3  ;;  %2323 = vmatprep.subr.mxu1 %v9902_v55  ;;  %9905 = vst [vmem:[#allocation169_spill] sm:$0xff] %v7906_v59  ;;  %v7913_v55 = vld [vmem:[%s8384_s3 + $0x3e8] sm:$0xff]  ;;  %v9908_v3 = vld [vmem:[#allocation69_spill] sm:$0xff] }
 0x66c   :  { %2204 = vmatprep.subr.mxu0 %v7899_v2  ;;  %2324 = vmatpush2.msra.mxu1 %v9904_v49  ;;  %9907 = vst [vmem:[#allocation170_spill] sm:$0xff] %v7913_v55  ;;  %v7920_v49 = vld [vmem:[%s8384_s3 + $0x3e0] sm:$0xff]  ;;  %v9910_v2 = vld [vmem:[#allocation165_spill] sm:$0xff] }
 0x66d   :  { %2205 = vmatpush2.msra.mxu0 %v7906_v59  ;;  %2325 = vmatprep.subr.mxu1 %v9906_v7  ;;  %9909 = vst [vmem:[#allocation171_spill] sm:$0xff] %v7920_v49  ;;  %v7927_v7 = vld [vmem:[%s8384_s3 + $0x3b8] sm:$0xff] }
 0x66e   :  { %2206 = vmatprep.subr.mxu0 %v7913_v55  ;;  %2326 = vmatpush2.msra.mxu1 %v9908_v3  ;;  %9911 = vst [vmem:[#allocation172_spill] sm:$0xff] %v7927_v7  ;;  %v9912_v59 = vld [vmem:[#allocation70_spill] sm:$0xff]  ;;  %v7934_v3 = vld [vmem:[%s8384_s3 + $0x3b0] sm:$0xff] }
 0x66f   :  { %2207 = vmatpush2.msra.mxu0 %v7920_v49  ;;  %2327 = vmatprep.subr.mxu1 %v9910_v2  ;;  %9913 = vst [vmem:[#allocation173_spill] sm:$0xff] %v7934_v3  ;;  %v9914_v55 = vld [vmem:[#allocation166_spill] sm:$0xff]  ;;  %v7941_v2 = vld [vmem:[%s8384_s3 + $0x388] sm:$0xff] }
 0x670   :  { %2208 = vmatprep.subr.mxu0 %v7927_v7  ;;  %2328 = vmatpush2.msra.mxu1 %v9912_v59  ;;  %9915 = vst [vmem:[#allocation174_spill] sm:$0xff] %v7941_v2  ;;  %v9916_v49 = vld [vmem:[#allocation72_spill] sm:$0xff]  ;;  %v7948_v59 = vld [vmem:[%s8384_s3 + $0x380] sm:$0xff] }
 0x671   :  { %2209 = vmatpush2.msra.mxu0 %v7934_v3  ;;  %2329 = vmatprep.subr.mxu1 %v9914_v55  ;;  %9917 = vst [vmem:[#allocation175_spill] sm:$0xff] %v7948_v59  ;;  %v9918_v7 = vld [vmem:[#allocation167_spill] sm:$0xff]  ;;  %v7955_v55 = vld [vmem:[%s8384_s3 + $0x358] sm:$0xff] }
 0x672   :  { %2210 = vmatprep.subr.mxu0 %v7941_v2  ;;  %2330 = vmatpush2.msra.mxu1 %v9916_v49  ;;  %9919 = vst [vmem:[#allocation176_spill] sm:$0xff] %v7955_v55  ;;  %v9920_v3 = vld [vmem:[#allocation75_spill] sm:$0xff]  ;;  %v7962_v49 = vld [vmem:[%s8384_s3 + $0x350] sm:$0xff]  ;;  %v9922_v2 = vld [vmem:[#allocation76_spill] sm:$0xff] }
 0x673   :  { %2211 = vmatpush2.msra.mxu0 %v7948_v59  ;;  %2331 = vmatprep.subr.mxu1 %v9918_v7  ;;  %9921 = vst [vmem:[#allocation177_spill] sm:$0xff] %v7962_v49  ;;  %v7969_v7 = vld [vmem:[%s8384_s3 + $0x328] sm:$0xff]  ;;  %v9924_v59 = vld [vmem:[#allocation77_spill] sm:$0xff] }
 0x674   :  { %2212 = vmatprep.subr.mxu0 %v7955_v55  ;;  %2332 = vmatpush2.msra.mxu1 %v9920_v3  ;;  %9923 = vst [vmem:[#allocation178_spill] sm:$0xff] %v7969_v7  ;;  %v7976_v3 = vld [vmem:[%s8384_s3 + $0x320] sm:$0xff]  ;;  %v9926_v55 = vld [vmem:[#allocation78_spill] sm:$0xff] }
 0x675   :  { %2213 = vmatpush2.msra.mxu0 %v7962_v49  ;;  %2333 = vmatprep.subr.mxu1 %v9922_v2  ;;  %9925 = vst [vmem:[#allocation179_spill] sm:$0xff] %v7976_v3  ;;  %v9927_v2 = vld [vmem:[#allocation79_spill] sm:$0xff]  ;;  %v9928_v49 = vld [vmem:[#allocation80_spill] sm:$0xff] }
 0x676   :  { %2214 = vmatprep.subr.mxu0 %v7969_v7  ;;  %2334 = vmatpush2.msra.mxu1 %v9924_v59  ;;  %v9930_v7 = vld [vmem:[#allocation82_spill] sm:$0xff]  ;;  %v9931_v59 = vld [vmem:[#allocation83_spill] sm:$0xff] }
 0x677   :  { %2215 = vmatpush2.msra.mxu0 %v7976_v3  ;;  %2335 = vmatprep.subr.mxu1 %v9926_v55  ;;  %v9935_v3 = vld [vmem:[#allocation87_spill] sm:$0xff]  ;;  %v9936_v55 = vld [vmem:[#allocation88_spill] sm:$0xff] }
 0x678   :  { %2217 = vmatmul.mubr.f32.vlgmr.msra.gmra.mxu0 %v7525_v57  ;;  %2344 = vmatprep.subr.mxu0 %v9927_v2  ;;  %v9938_v2 = vld [vmem:[#allocation90_spill] sm:$0xff] }
 0x679   :  { %2345 = vmatpush1.msra.mxu0 %v9928_v49  ;;  %2336 = vmatpush2.msra.mxu1 %v9929_v51  ;;  %v9939_v49 = vld [vmem:[#allocation91_spill] sm:$0xff]  ;;  %v9940_v51 = vld [vmem:[#allocation92_spill] sm:$0xff] }
 0x67a   :  { %2346 = vmatprep.subr.mxu0 %v9930_v7  ;;  %2415 = vmatprep.subr.mxu1 %v9931_v59  ;;  %v9941_v7 = vld [vmem:[#allocation93_spill] sm:$0xff]  ;;  %v9942_v59 = vld [vmem:[#allocation94_spill] sm:$0xff] }
 0x67b   :  { %2347 = vmatpush1.msra.mxu0 %v9932_v5  ;;  %v9943_v5 = vld [vmem:[#allocation95_spill] sm:$0xff] }
 0x67c   :  { %2348 = vmatprep.subr.mxu0 %v9933_v26  ;;  %v9944_v26 = vld [vmem:[#allocation57_spill] sm:$0xff] }
 0x67d   :  { %2349 = vmatpush1.msra.mxu0 %v9934_v31  ;;  %v9945_v31 = vld [vmem:[#allocation59_spill] sm:$0xff] }
 0x67e   :  { %2350 = vmatprep.subr.mxu0 %v9935_v3  ;;  %v9946_v3 = vld [vmem:[#allocation96_spill] sm:$0xff] }
 0x67f   :  { %2351 = vmatpush1.msra.mxu0 %v9936_v55  ;;  %v9947_v55 = vld [vmem:[#allocation97_spill] sm:$0xff] }
 0x680   :  { %2352 = vmatprep.subr.mxu0 %v9937_v27  ;;  %v9948_v27 = vld [vmem:[#allocation63_spill] sm:$0xff] }
 0x681   :  { %2353 = vmatpush1.msra.mxu0 %v9938_v2  ;;  %v9949_v2 = vld [vmem:[#allocation98_spill] sm:$0xff] }
 0x682   :  { %2354 = vmatprep.subr.mxu0 %v9939_v49  ;;  %v9950_v49 = vld [vmem:[#allocation99_spill] sm:$0xff] }
 0x683   :  { %2355 = vmatpush1.msra.mxu0 %v9940_v51  ;;  %v9951_v51 = vld [vmem:[#allocation100_spill] sm:$0xff] }
 0x684   :  { %2356 = vmatprep.subr.mxu0 %v9941_v7  ;;  %v9952_v7 = vld [vmem:[#allocation101_spill] sm:$0xff] }
 0x685   :  { %2357 = vmatpush1.msra.mxu0 %v9942_v59  ;;  %v9953_v59 = vld [vmem:[#allocation102_spill] sm:$0xff] }
 0x686   :  { %2358 = vmatprep.subr.mxu0 %v9943_v5  ;;  %v9954_v5 = vld [vmem:[#allocation103_spill] sm:$0xff] }
 0x687   :  { %2359 = vmatpush1.msra.mxu0 %v9944_v26  ;;  %v9955_v26 = vld [vmem:[#allocation104_spill] sm:$0xff] }
 0x688   :  { %2360 = vmatprep.subr.mxu0 %v9945_v31  ;;  %v9956_v31 = vld [vmem:[#allocation105_spill] sm:$0xff] }
 0x689   :  { %2361 = vmatpush1.msra.mxu0 %v9946_v3  ;;  %v9957_v3 = vld [vmem:[#allocation106_spill] sm:$0xff] }
 0x68a   :  { %2362 = vmatprep.subr.mxu0 %v9947_v55  ;;  %v9958_v55 = vld [vmem:[#allocation107_spill] sm:$0xff] }
 0x68b   :  { %2363 = vmatpush1.msra.mxu0 %v9948_v27  ;;  %v9959_v27 = vld [vmem:[#allocation108_spill] sm:$0xff] }
 0x68c   :  { %2364 = vmatprep.subr.mxu0 %v9949_v2  ;;  %v9960_v2 = vld [vmem:[#allocation109_spill] sm:$0xff] }
 0x68d   :  { %2365 = vmatpush1.msra.mxu0 %v9950_v49  ;;  %v9961_v49 = vld [vmem:[#allocation110_spill] sm:$0xff] }
 0x68e   :  { %2366 = vmatprep.subr.mxu0 %v9951_v51  ;;  %v9962_v51 = vld [vmem:[#allocation111_spill] sm:$0xff] }
 0x68f   :  { %2367 = vmatpush1.msra.mxu0 %v9952_v7  ;;  %v9963_v7 = vld [vmem:[#allocation112_spill] sm:$0xff] }
 0x690   :  { %2368 = vmatprep.subr.mxu0 %v9953_v59  ;;  %v9964_v59 = vld [vmem:[#allocation113_spill] sm:$0xff] }
 0x691   :  { %2369 = vmatpush1.msra.mxu0 %v9954_v5  ;;  %v9965_v5 = vld [vmem:[#allocation114_spill] sm:$0xff] }
 0x692   :  { %2370 = vmatprep.subr.mxu0 %v9955_v26  ;;  %v9966_v26 = vld [vmem:[#allocation115_spill] sm:$0xff] }
 0x693   :  { %2371 = vmatpush1.msra.mxu0 %v9956_v31  ;;  %v9967_v31 = vld [vmem:[#allocation116_spill] sm:$0xff] }
 0x694   :  { %2372 = vmatprep.subr.mxu0 %v9957_v3  ;;  %v9968_v3 = vld [vmem:[#allocation117_spill] sm:$0xff] }
 0x695   :  { %2373 = vmatpush1.msra.mxu0 %v9958_v55  ;;  %v9969_v55 = vld [vmem:[#allocation118_spill] sm:$0xff] }
 0x696   :  { %2374 = vmatprep.subr.mxu0 %v9959_v27  ;;  %v9970_v27 = vld [vmem:[#allocation119_spill] sm:$0xff] }
 0x697   :  { %2375 = vmatpush1.msra.mxu0 %v9960_v2  ;;  %v9971_v2 = vld [vmem:[#allocation120_spill] sm:$0xff] }
 0x698   :  { %2376 = vmatprep.subr.mxu0 %v9961_v49  ;;  %v9972_v49 = vld [vmem:[#allocation121_spill] sm:$0xff] }
 0x699   :  { %2377 = vmatpush2.msra.mxu0 %v9962_v51  ;;  %v9973_v51 = vld [vmem:[#allocation122_spill] sm:$0xff] }
 0x69a   :  { %2378 = vmatprep.subr.mxu0 %v9963_v7  ;;  %v9974_v7 = vld [vmem:[#allocation123_spill] sm:$0xff] }
 0x69b   :  { %2379 = vmatpush2.msra.mxu0 %v9964_v59  ;;  %v9975_v59 = vld [vmem:[#allocation124_spill] sm:$0xff] }
 0x69c   :  { %2380 = vmatprep.subr.mxu0 %v9965_v5  ;;  %v9976_v5 = vld [vmem:[#allocation125_spill] sm:$0xff] }
 0x69d   :  { %2381 = vmatpush2.msra.mxu0 %v9966_v26  ;;  %v9977_v26 = vld [vmem:[#allocation126_spill] sm:$0xff] }
 0x69e   :  { %2382 = vmatprep.subr.mxu0 %v9967_v31  ;;  %v9978_v31 = vld [vmem:[#allocation127_spill] sm:$0xff] }
 0x69f   :  { %2383 = vmatpush2.msra.mxu0 %v9968_v3  ;;  %v9979_v3 = vld [vmem:[#allocation128_spill] sm:$0xff] }
 0x6a0   :  { %2384 = vmatprep.subr.mxu0 %v9969_v55  ;;  %v9980_v55 = vld [vmem:[#allocation129_spill] sm:$0xff] }
 0x6a1   :  { %2385 = vmatpush2.msra.mxu0 %v9970_v27  ;;  %v9981_v27 = vld [vmem:[#allocation130_spill] sm:$0xff] }
 0x6a2   :  { %2386 = vmatprep.subr.mxu0 %v9971_v2  ;;  %v9982_v2 = vld [vmem:[#allocation131_spill] sm:$0xff] }
 0x6a3   :  { %2387 = vmatpush2.msra.mxu0 %v9972_v49  ;;  %v9983_v49 = vld [vmem:[#allocation132_spill] sm:$0xff] }
 0x6a4   :  { %2388 = vmatprep.subr.mxu0 %v9973_v51  ;;  %v9984_v51 = vld [vmem:[#allocation133_spill] sm:$0xff] }
 0x6a5   :  { %2389 = vmatpush2.msra.mxu0 %v9974_v7  ;;  %v9985_v7 = vld [vmem:[#allocation134_spill] sm:$0xff] }
 0x6a6   :  { %2390 = vmatprep.subr.mxu0 %v9975_v59  ;;  %v9986_v59 = vld [vmem:[#allocation135_spill] sm:$0xff] }
 0x6a7   :  { %2391 = vmatpush2.msra.mxu0 %v9976_v5  ;;  %v9987_v5 = vld [vmem:[#allocation136_spill] sm:$0xff] }
 0x6a8   :  { %2392 = vmatprep.subr.mxu0 %v9977_v26  ;;  %v9988_v26 = vld [vmem:[#allocation137_spill] sm:$0xff] }
 0x6a9   :  { %2393 = vmatpush2.msra.mxu0 %v9978_v31  ;;  %v9989_v31 = vld [vmem:[#allocation138_spill] sm:$0xff] }
 0x6aa   :  { %2394 = vmatprep.subr.mxu0 %v9979_v3  ;;  %v9990_v3 = vld [vmem:[#allocation139_spill] sm:$0xff] }
 0x6ab   :  { %2395 = vmatpush2.msra.mxu0 %v9980_v55  ;;  %v9991_v55 = vld [vmem:[#allocation140_spill] sm:$0xff] }
 0x6ac   :  { %2396 = vmatprep.subr.mxu0 %v9981_v27  ;;  %v9992_v27 = vld [vmem:[#allocation141_spill] sm:$0xff] }
 0x6ad   :  { %2397 = vmatpush2.msra.mxu0 %v9982_v2 }
 0x6ae   :  { %2398 = vmatprep.subr.mxu0 %v9983_v49  ;;  %v9993_v49 = vld [vmem:[#allocation73_spill] sm:$0xff] }
 0x6af   :  { %2399 = vmatpush2.msra.mxu0 %v9984_v51  ;;  %v3414_v51 = vld [vmem:[%s8384_s3 + $0x2d8] sm:$0xff] }
 0x6b0   :  { %2400 = vmatprep.subr.mxu0 %v9985_v7 }
 0x6b1   :  { %2401 = vmatpush2.msra.mxu0 %v9986_v59 }
 0x6b2   :  { %2402 = vmatprep.subr.mxu0 %v9987_v5 }
 0x6b3   :  { %2403 = vmatpush2.msra.mxu0 %v9988_v26  ;;  %v9994_v26 = vld [vmem:[#allocation4_spill] sm:$0xff] }
 0x6b4   :  { %2404 = vmatprep.subr.mxu0 %v9989_v31 }
 0x6b5   :  { %2405 = vmatpush2.msra.mxu0 %v9990_v3 }
 0x6b6   :  { %2406 = vmatprep.subr.mxu0 %v9991_v55 }
 0x6b7   :  { %2407 = vmatpush2.msra.mxu0 %v9992_v27 }
 0x6b8   :  { %2536 = vmatprep.subr.mxu0 %v3414_v51 }
 0x6f8   :  { %v2076_v7 = vpop.f32.mrf.mxu0  ;;  %v2147_v55 = vpop.f32.mrf.mxu1 }
 0x6f9   :  { %v2229_v59 = vadd.f32 %v2076_v7, %v9993_v49  ;;  %v2243_v49 = vadd.f32 %v9860_v54, %v2147_v55 }
 0x6fa   :  { %v2078_v5 = vpop.f32.mrf.mxu0  ;;  %v2149_v27 = vpop.f32.mrf.mxu1 }
 0x6fb   :  { %v2851_v2 = vmul.f32 -1.442695, %v2229_v59  ;;  %v2236_v60 = vadd.f32 %v2078_v5, %v9994_v26  ;;  %v2251_v41 = vadd.f32 %v2149_v27, %v294_v43  ;;  %v9996_v26 = vld [vmem:[#allocation32_spill] sm:$0xff] }
 0x6fd   :  { %2968 = vpow2.f32 %v2851_v2  ;;  %v2852_v31 = vmul.f32 -1.442695, %v2236_v60  ;;  %v2853_v39 = vmul.f32 -1.442695, %v2251_v41  ;;  %v310_v60 = vadd.f32 %v9996_v26, %v5045_v17 }
 0x6ff   :  { %2970 = vpow2.f32 %v2852_v31 }
 0x70a   :  { %v2969_v3 = vpop.eup %2968 }
 0x70b   :  { %v2233_v47 = vadd.f32 1.0, %v2969_v3 }
 0x70c   :  { %v2971_v51 = vpop.eup %2970 }
 0x70d   :  { %2972 = vrcp.f32 %v2233_v47  ;;  %v2240_v37 = vadd.f32 1.0, %v2971_v51 }
 0x70e   :  { %2974 = vpow2.f32 %v2853_v39  ;;  %v9997_v39 = vld [vmem:[#allocation21_spill] sm:$0xff] }
 0x70f   :  { %2976 = vrcp.f32 %v2240_v37  ;;  %v405_v55 = vadd.f32 %v9997_v39, %v9421_v30 }
 0x71a   :  { %v2973_v7 = vpop.eup %2972 }
 0x71b   :  { %v2244_v31 = vmul.f32 %v2973_v7, %v2243_v49  ;;  %v2975_v47 = vpop.eup %2974  ;;  %v8065_v7 = vld [vmem:[%s8387_s5 + $0x1] ss:$0 sm:$0xff] }
 0x71c   :  { %v2977_v3 = vpop.eup %2976  ;;  %v2255_v2 = vadd.f32 1.0, %v2975_v47 }
 0x71d   :  { %v2245_v5 = vadd.f32 %v2244_v31, %v310_v60  ;;  %v2247_v59 = vsub.f32 1.0, %v2977_v3  ;;  %v2249_v41 = vmul.f32 %v2977_v3, %v7525_v57  ;;  %v9998_v57 = vld [vmem:[#allocation23_spill] sm:$0xff] }
 0x71e   :  { %v407_v31 = vadd.f32 %v9998_v57, %v5052_v14  ;;  %v10021_v57 = vld [vmem:[#allocation149_spill] sm:$0xff] }
 0x71f   :  { %2978 = vtanh.f32 %v2245_v5 }
 0x720   :  { %2980 = vrcp.f32 %v2255_v2 }
 0x72c   :  { %v2979_v45 = vpop.eup %2978 }
 0x72d   :  { %v2248_v43 = vmul.f32 %v2979_v45, %v2247_v59  ;;  %v2981_v60 = vpop.eup %2980 }
 0x72f   :  { %v8058_v27 = vadd.f32 %v2249_v41, %v2248_v43 }
 0x738   :  { %v2218_v54 = vpop.f32.mrf.mxu0 }
 0x739   :  { %v2258_v51 = vadd.f32 %v2218_v54, %v405_v55  ;;  %v10015_v54 = vld [vmem:[#allocation146_spill] sm:$0xff] }
 0x73a   :  { %v2220_v49 = vpop.f32.mrf.mxu0 }
 0x73b   :  { %v2854_v37 = vmul.f32 -1.442695, %v2258_v51  ;;  %v2265_v26 = vadd.f32 %v8065_v7, %v2220_v49  ;;  %v10016_v51 = vld [vmem:[#allocation50_spill] sm:$0xff]  ;;  %v10017_v49 = vld [vmem:[#allocation147_spill] sm:$0xff] }
 0x73d   :  { %2982 = vpow2.f32 %v2854_v37  ;;  %v2266_v5 = vmul.f32 %v2981_v60, %v2265_v26  ;;  %v10018_v37 = vld [vmem:[#allocation51_spill] sm:$0xff]  ;;  %v10019_v26 = vld [vmem:[#allocation148_spill] sm:$0xff] }
 0x73e   :  { %v10020_v60 = vld [vmem:[#allocation52_spill] sm:$0xff] }
 0x73f   :  { %v2267_v47 = vadd.f32 %v2266_v5, %v407_v31  ;;  %v10022_v31 = vld [vmem:[#allocation53_spill] sm:$0xff]  ;;  %v10023_v5 = vld [vmem:[#allocation150_spill] sm:$0xff] }
 0x74a   :  { %v2983_v3 = vpop.eup %2982 }
 0x74b   :  { %v2262_v2 = vadd.f32 1.0, %v2983_v3  ;;  %v10025_v3 = vld [vmem:[#allocation151_spill] sm:$0xff] }
 0x74d   :  { %2984 = vrcp.f32 %v2262_v2  ;;  %v10026_v2 = vld [vmem:[#allocation54_spill] sm:$0xff] }
 0x74e   :  { %2986 = vtanh.f32 %v2267_v47  ;;  %v10024_v47 = vld [vmem:[#allocation12_spill] sm:$0xff] }
 0x75a   :  { %v2985_v59 = vpop.eup %2984 }
 0x75b   :  { %v2269_v45 = vsub.f32 1.0, %v2985_v59  ;;  %v2987_v43 = vpop.eup %2986  ;;  %v2271_v39 = vmul.f32 %v2985_v59, %v7533_v21  ;;  %v10014_v21 = vld [vmem:[#allocation49_spill] sm:$0xff]  ;;  %v10027_v59 = vld [vmem:[#allocation152_spill] sm:$0xff] }
 0x75d   :  { %v2270_v41 = vmul.f32 %v2987_v43, %v2269_v45  ;;  %v10028_v45 = vld [vmem:[#allocation3_spill] sm:$0xff]  ;;  %v10029_v43 = vld [vmem:[#allocation153_spill] sm:$0xff] }
 0x75f   :  { %v8071_v55 = vadd.f32 %v2271_v39, %v2270_v41  ;;  %v10030_v41 = vld [vmem:[#allocation55_spill] sm:$0xff]  ;;  %v10031_v39 = vld [vmem:[#allocation154_spill] sm:$0xff] }
 0x761   :  { %2337 = vmatprep.mubr.f32.mxu1 %v8071_v55  ;;  %2408 = vmatprep.mubr.f32.mxu0 %v8071_v55 }
 0x762   :  { %2338 = vmatmul.mubr.f32.vlgmr.msra.gmra.mxu1 %v8058_v27  ;;  %2409 = vmatmul.mubr.f32.vlgmr.msra.gmra.mxu0 %v8058_v27 }
 0x763   :  { %2416 = vmatpush1.msra.mxu1 %v7542_v32  ;;  %2479 = vmatprep.mubr.f32.mxu1 %v8071_v55 }
 0x764   :  { %2417 = vmatprep.subr.mxu1 %v7549_v23  ;;  %2537 = vmatpush1.msra.mxu0 %v6689_v1  ;;  %v9999_v1 = vld [vmem:[#allocation7_spill] sm:$0xff] }
 0x765   :  { %2418 = vmatpush1.msra.mxu1 %v7556_v4  ;;  %2538 = vmatprep.subr.mxu0 %v6696_v13  ;;  %v10000_v13 = vld [vmem:[#allocation34_spill] sm:$0xff] }
 0x766   :  { %2419 = vmatprep.subr.mxu1 %v7563_v15  ;;  %2539 = vmatpush1.msra.mxu0 %v6703_v28  ;;  %v10001_v28 = vld [vmem:[#allocation42_spill] sm:$0xff] }
 0x767   :  { %2420 = vmatpush1.msra.mxu1 %v7570_v61  ;;  %2540 = vmatprep.subr.mxu0 %v6710_v56  ;;  %v10002_v56 = vld [vmem:[#allocation20_spill] sm:$0xff] }
 0x768   :  { %2421 = vmatprep.subr.mxu1 %v7577_v8  ;;  %2541 = vmatpush1.msra.mxu0 %v6717_v52  ;;  %v10003_v52 = vld [vmem:[#allocation33_spill] sm:$0xff] }
 0x769   :  { %2422 = vmatpush1.msra.mxu1 %v7584_v9  ;;  %2542 = vmatprep.subr.mxu0 %v6724_v42  ;;  %v10004_v42 = vld [vmem:[#allocation35_spill] sm:$0xff] }
 0x76a   :  { %2423 = vmatprep.subr.mxu1 %v7591_v22  ;;  %2543 = vmatpush1.msra.mxu0 %v6731_v34  ;;  %v10005_v34 = vld [vmem:[#allocation44_spill] sm:$0xff] }
 0x76b   :  { %2424 = vmatpush1.msra.mxu1 %v7598_v53  ;;  %2544 = vmatprep.subr.mxu0 %v6738_v46  ;;  %v10006_v46 = vld [vmem:[#allocation45_spill] sm:$0xff] }
 0x76c   :  { %2425 = vmatprep.subr.mxu1 %v7605_v25  ;;  %2545 = vmatpush1.msra.mxu0 %v6745_v19  ;;  %v10007_v19 = vld [vmem:[#allocation142_spill] sm:$0xff] }
 0x76d   :  { %2426 = vmatpush1.msra.mxu1 %v7612_v24  ;;  %2546 = vmatprep.subr.mxu0 %v6752_v58  ;;  %v10008_v58 = vld [vmem:[#allocation46_spill] sm:$0xff] }
 0x76e   :  { %2427 = vmatprep.subr.mxu1 %v7619_v63  ;;  %2547 = vmatpush1.msra.mxu0 %v6759_v6  ;;  %v10009_v6 = vld [vmem:[#allocation143_spill] sm:$0xff] }
 0x76f   :  { %2428 = vmatpush1.msra.mxu1 %v7626_v20  ;;  %2548 = vmatprep.subr.mxu0 %v6766_v62  ;;  %v10010_v62 = vld [vmem:[#allocation47_spill] sm:$0xff] }
 0x770   :  { %2429 = vmatprep.subr.mxu1 %v7633_v0  ;;  %2549 = vmatpush1.msra.mxu0 %v6773_v48  ;;  %v10011_v48 = vld [vmem:[#allocation144_spill] sm:$0xff] }
 0x771   :  { %2430 = vmatpush1.msra.mxu1 %v7640_v29  ;;  %2550 = vmatprep.subr.mxu0 %v6780_v40  ;;  %v10012_v40 = vld [vmem:[#allocation48_spill] sm:$0xff] }
 0x772   :  { %2431 = vmatprep.subr.mxu1 %v7647_v33  ;;  %2551 = vmatpush1.msra.mxu0 %v6787_v10  ;;  %v10013_v10 = vld [vmem:[#allocation145_spill] sm:$0xff] }
 0x773   :  { %2432 = vmatpush1.msra.mxu1 %v7654_v36  ;;  %2552 = vmatprep.subr.mxu0 %v9999_v1  ;;  %v10032_v1 = vld [vmem:[#allocation71_spill] sm:$0xff] }
 0x774   :  { %2433 = vmatprep.subr.mxu1 %v7661_v16  ;;  %2553 = vmatpush1.msra.mxu0 %v10000_v13  ;;  %v10033_v13 = vld [vmem:[#allocation155_spill] sm:$0xff] }
 0x775   :  { %2434 = vmatpush1.msra.mxu1 %v7668_v18  ;;  %2554 = vmatprep.subr.mxu0 %v10001_v28  ;;  %v10034_v28 = vld [vmem:[#allocation56_spill] sm:$0xff] }
 0x776   :  { %2435 = vmatprep.subr.mxu1 %v7675_v44  ;;  %2555 = vmatpush1.msra.mxu0 %v10002_v56  ;;  %v10035_v56 = vld [vmem:[#allocation156_spill] sm:$0xff] }
 0x777   :  { %2436 = vmatpush1.msra.mxu1 %v7682_v11  ;;  %2556 = vmatprep.subr.mxu0 %v10003_v52  ;;  %v10036_v52 = vld [vmem:[#allocation38_spill] sm:$0xff] }
 0x778   :  { %2437 = vmatprep.subr.mxu1 %v7689_v38  ;;  %2557 = vmatpush1.msra.mxu0 %v10004_v42  ;;  %v10037_v42 = vld [vmem:[#allocation157_spill] sm:$0xff] }
 0x779   :  { %2438 = vmatpush1.msra.mxu1 %v7696_v50  ;;  %2558 = vmatprep.subr.mxu0 %v10005_v34  ;;  %v10038_v34 = vld [vmem:[#allocation58_spill] sm:$0xff] }
 0x77a   :  { %2439 = vmatprep.subr.mxu1 %v7703_v35  ;;  %2559 = vmatpush1.msra.mxu0 %v10006_v46  ;;  %v10039_v46 = vld [vmem:[#allocation158_spill] sm:$0xff] }
 0x77b   :  { %2440 = vmatpush1.msra.mxu1 %v10007_v19  ;;  %2560 = vmatprep.subr.mxu0 %v10008_v58  ;;  %v10040_v58 = vld [vmem:[#allocation16_spill] sm:$0xff] }
 0x77c   :  { %2441 = vmatprep.subr.mxu1 %v10009_v6  ;;  %2561 = vmatpush1.msra.mxu0 %v10010_v62  ;;  %v10041_v62 = vld [vmem:[#allocation159_spill] sm:$0xff] }
 0x77d   :  { %2442 = vmatpush1.msra.mxu1 %v10011_v48  ;;  %2562 = vmatprep.subr.mxu0 %v10012_v40  ;;  %v10042_v40 = vld [vmem:[#allocation60_spill] sm:$0xff] }
 0x77e   :  { %2443 = vmatprep.subr.mxu1 %v10013_v10  ;;  %2563 = vmatpush1.msra.mxu0 %v10014_v21  ;;  %v10043_v21 = vld [vmem:[#allocation160_spill] sm:$0xff] }
 0x77f   :  { %2444 = vmatpush1.msra.mxu1 %v10015_v54  ;;  %2564 = vmatprep.subr.mxu0 %v10016_v51  ;;  %v10044_v51 = vld [vmem:[#allocation41_spill] sm:$0xff] }
 0x780   :  { %2445 = vmatprep.subr.mxu1 %v10017_v49  ;;  %2565 = vmatpush1.msra.mxu0 %v10018_v37  ;;  %v10045_v37 = vld [vmem:[#allocation161_spill] sm:$0xff] }
 0x781   :  { %2446 = vmatpush1.msra.mxu1 %v10019_v26  ;;  %2566 = vmatprep.subr.mxu0 %v10020_v60  ;;  %v10046_v60 = vld [vmem:[#allocation61_spill] sm:$0xff] }
 0x782   :  { %2447 = vmatprep.subr.mxu1 %v10021_v57  ;;  %2567 = vmatpush1.msra.mxu0 %v10022_v31  ;;  %v10047_v31 = vld [vmem:[#allocation162_spill] sm:$0xff] }
 0x783   :  { %2448 = vmatpush2.msra.mxu1 %v10023_v5  ;;  %2568 = vmatprep.subr.mxu0 %v10024_v47  ;;  %v10048_v47 = vld [vmem:[#allocation37_spill] sm:$0xff] }
 0x784   :  { %2449 = vmatprep.subr.mxu1 %v10025_v3  ;;  %2569 = vmatpush2.msra.mxu0 %v10026_v2  ;;  %v10049_v2 = vld [vmem:[#allocation9_spill] sm:$0xff] }
 0x785   :  { %2450 = vmatpush2.msra.mxu1 %v10027_v59  ;;  %2570 = vmatprep.subr.mxu0 %v10028_v45  ;;  %v10050_v45 = vld [vmem:[#allocation62_spill] sm:$0xff] }
 0x786   :  { %2451 = vmatprep.subr.mxu1 %v10029_v43  ;;  %2571 = vmatpush2.msra.mxu0 %v10030_v41  ;;  %v10051_v41 = vld [vmem:[#allocation11_spill] sm:$0xff] }
 0x787   :  { %2452 = vmatpush2.msra.mxu1 %v10031_v39  ;;  %2572 = vmatprep.subr.mxu0 %v10032_v1  ;;  %v10052_v1 = vld [vmem:[#allocation43_spill] sm:$0xff] }
 0x788   :  { %2453 = vmatprep.subr.mxu1 %v10033_v13  ;;  %2573 = vmatpush2.msra.mxu0 %v10034_v28  ;;  %v10053_v28 = vld [vmem:[#allocation30_spill] sm:$0xff] }
 0x789   :  { %2454 = vmatpush2.msra.mxu1 %v10035_v56  ;;  %2574 = vmatprep.subr.mxu0 %v10036_v52  ;;  %v10054_v52 = vld [vmem:[#allocation64_spill] sm:$0xff] }
 0x78a   :  { %2455 = vmatprep.subr.mxu1 %v10037_v42  ;;  %2575 = vmatpush2.msra.mxu0 %v10038_v34  ;;  %v10055_v34 = vld [vmem:[#allocation24_spill] sm:$0xff] }
 0x78b   :  { %2456 = vmatpush2.msra.mxu1 %v10039_v46  ;;  %2576 = vmatprep.subr.mxu0 %v10040_v58  ;;  %v10056_v58 = vld [vmem:[#allocation39_spill] sm:$0xff] }
 0x78c   :  { %2457 = vmatprep.subr.mxu1 %v10041_v62  ;;  %2577 = vmatpush2.msra.mxu0 %v10042_v40  ;;  %v10057_v40 = vld [vmem:[#allocation29_spill] sm:$0xff] }
 0x78d   :  { %2458 = vmatpush2.msra.mxu1 %v10043_v21  ;;  %2578 = vmatprep.subr.mxu0 %v10044_v51  ;;  %v10058_v51 = vld [vmem:[#allocation66_spill] sm:$0xff] }
 0x78e   :  { %2459 = vmatprep.subr.mxu1 %v10045_v37  ;;  %2579 = vmatpush2.msra.mxu0 %v10046_v60  ;;  %v10059_v60 = vld [vmem:[#allocation31_spill] sm:$0xff] }
 0x78f   :  { %2460 = vmatpush2.msra.mxu1 %v10047_v31  ;;  %2580 = vmatprep.subr.mxu0 %v10048_v47  ;;  %v10060_v47 = vld [vmem:[#allocation163_spill] sm:$0xff] }
 0x790   :  { %2461 = vmatprep.subr.mxu1 %v10049_v2  ;;  %2581 = vmatpush2.msra.mxu0 %v10050_v45  ;;  %v10061_v45 = vld [vmem:[#allocation168_spill] sm:$0xff] }
 0x791   :  { %2462 = vmatpush2.msra.mxu1 %v10051_v41  ;;  %2582 = vmatprep.subr.mxu0 %v10052_v1  ;;  %v10062_v41 = vld [vmem:[#allocation68_spill] sm:$0xff]  ;;  %v10063_v1 = vld [vmem:[#allocation169_spill] sm:$0xff] }
 0x792   :  { %2463 = vmatprep.subr.mxu1 %v10053_v28  ;;  %2583 = vmatpush2.msra.mxu0 %v10054_v52  ;;  %v10064_v28 = vld [vmem:[#allocation164_spill] sm:$0xff]  ;;  %v10065_v52 = vld [vmem:[#allocation170_spill] sm:$0xff] }
 0x793   :  { %2464 = vmatpush2.msra.mxu1 %v10055_v34  ;;  %2584 = vmatprep.subr.mxu0 %v10056_v58  ;;  %v10066_v34 = vld [vmem:[#allocation69_spill] sm:$0xff]  ;;  %v10067_v58 = vld [vmem:[#allocation171_spill] sm:$0xff] }
 0x794   :  { %2465 = vmatprep.subr.mxu1 %v10057_v40  ;;  %2585 = vmatpush2.msra.mxu0 %v10058_v51  ;;  %v10068_v40 = vld [vmem:[#allocation165_spill] sm:$0xff]  ;;  %v10069_v51 = vld [vmem:[#allocation172_spill] sm:$0xff] }
 0x795   :  { %2466 = vmatpush2.msra.mxu1 %v10059_v60  ;;  %2586 = vmatprep.subr.mxu0 %v10060_v47  ;;  %v10070_v60 = vld [vmem:[#allocation70_spill] sm:$0xff]  ;;  %v10071_v47 = vld [vmem:[#allocation173_spill] sm:$0xff] }
 0x796   :  { %2467 = vmatprep.subr.mxu1 %v10061_v45  ;;  %2587 = vmatpush2.msra.mxu0 %v10062_v41  ;;  %v10072_v45 = vld [vmem:[#allocation166_spill] sm:$0xff] }
 0x797   :  { %2468 = vmatpush2.msra.mxu1 %v10063_v1  ;;  %2588 = vmatprep.subr.mxu0 %v10064_v28  ;;  %v10073_v41 = vld [vmem:[#allocation174_spill] sm:$0xff]  ;;  %v10074_v1 = vld [vmem:[#allocation72_spill] sm:$0xff]  ;;  %v10075_v28 = vld [vmem:[#allocation175_spill] sm:$0xff] }
 0x798   :  { %2469 = vmatprep.subr.mxu1 %v10065_v52  ;;  %2589 = vmatpush2.msra.mxu0 %v10066_v34  ;;  %v10076_v52 = vld [vmem:[#allocation167_spill] sm:$0xff]  ;;  %v10077_v34 = vld [vmem:[#allocation176_spill] sm:$0xff] }
 0x799   :  { %2470 = vmatpush2.msra.mxu1 %v10067_v58  ;;  %2590 = vmatprep.subr.mxu0 %v10068_v40  ;;  %v10078_v58 = vld [vmem:[#allocation75_spill] sm:$0xff]  ;;  %v10079_v40 = vld [vmem:[#allocation177_spill] sm:$0xff] }
 0x79a   :  { %2471 = vmatprep.subr.mxu1 %v10069_v51  ;;  %2591 = vmatpush2.msra.mxu0 %v10070_v60  ;;  %v10080_v51 = vld [vmem:[#allocation76_spill] sm:$0xff]  ;;  %v10081_v60 = vld [vmem:[#allocation178_spill] sm:$0xff] }
 0x79b   :  { %2472 = vmatpush2.msra.mxu1 %v10071_v47  ;;  %2592 = vmatprep.subr.mxu0 %v10072_v45  ;;  %v10082_v47 = vld [vmem:[#allocation77_spill] sm:$0xff]  ;;  %v10083_v45 = vld [vmem:[#allocation179_spill] sm:$0xff] }
 0x79c   :  { %2473 = vmatprep.subr.mxu1 %v10073_v41  ;;  %2593 = vmatpush2.msra.mxu0 %v10074_v1  ;;  %v10084_v41 = vld [vmem:[#allocation78_spill] sm:$0xff]  ;;  %v10085_v1 = vld [vmem:[#allocation79_spill] sm:$0xff] }
 0x79d   :  { %2474 = vmatpush2.msra.mxu1 %v10075_v28  ;;  %2594 = vmatprep.subr.mxu0 %v10076_v52  ;;  %v10086_v52 = vld [vmem:[#allocation80_spill] sm:$0xff]  ;;  %v10095_v28 = vld [vmem:[#allocation89_spill] sm:$0xff] }
 0x79e   :  { %2475 = vmatprep.subr.mxu1 %v10077_v34  ;;  %2595 = vmatpush2.msra.mxu0 %v10078_v58  ;;  %v10087_v34 = vld [vmem:[#allocation81_spill] sm:$0xff]  ;;  %v10088_v58 = vld [vmem:[#allocation82_spill] sm:$0xff] }
 0x79f   :  { %2476 = vmatpush2.msra.mxu1 %v10079_v40  ;;  %2596 = vmatprep.subr.mxu0 %v10080_v51  ;;  %v10089_v40 = vld [vmem:[#allocation83_spill] sm:$0xff]  ;;  %v10090_v51 = vld [vmem:[#allocation84_spill] sm:$0xff] }
 0x7a0   :  { %2477 = vmatprep.subr.mxu1 %v10081_v60  ;;  %2597 = vmatpush2.msra.mxu0 %v10082_v47  ;;  %v10091_v60 = vld [vmem:[#allocation85_spill] sm:$0xff]  ;;  %v10092_v47 = vld [vmem:[#allocation86_spill] sm:$0xff] }
 0x7a1   :  { %2478 = vmatpush2.msra.mxu1 %v10083_v45  ;;  %2598 = vmatprep.subr.mxu0 %v10084_v41  ;;  %v10093_v45 = vld [vmem:[#allocation87_spill] sm:$0xff]  ;;  %v10094_v41 = vld [vmem:[#allocation88_spill] sm:$0xff] }
 0x7a2   :  { %2480 = vmatmul.mubr.f32.vlgmr.msra.gmra.mxu1 %v8058_v27  ;;  %2607 = vmatprep.subr.mxu1 %v10085_v1  ;;  %v10096_v1 = vld [vmem:[#allocation90_spill] sm:$0xff] }
 0x7a3   :  { %2608 = vmatpush1.msra.mxu1 %v10086_v52  ;;  %2599 = vmatpush2.msra.mxu0 %v10087_v34  ;;  %v10097_v52 = vld [vmem:[#allocation91_spill] sm:$0xff]  ;;  %v10098_v34 = vld [vmem:[#allocation92_spill] sm:$0xff] }
 0x7a4   :  { %2609 = vmatprep.subr.mxu1 %v10088_v58  ;;  %2678 = vmatprep.subr.mxu0 %v10089_v40  ;;  %v10099_v58 = vld [vmem:[#allocation93_spill] sm:$0xff]  ;;  %v10100_v40 = vld [vmem:[#allocation94_spill] sm:$0xff] }
 0x7a5   :  { %2610 = vmatpush1.msra.mxu1 %v10090_v51  ;;  %v10101_v51 = vld [vmem:[#allocation95_spill] sm:$0xff] }
 0x7a6   :  { %2611 = vmatprep.subr.mxu1 %v10091_v60  ;;  %v10102_v60 = vld [vmem:[#allocation57_spill] sm:$0xff] }
 0x7a7   :  { %2612 = vmatpush1.msra.mxu1 %v10092_v47  ;;  %v10103_v47 = vld [vmem:[#allocation59_spill] sm:$0xff] }
 0x7a8   :  { %2613 = vmatprep.subr.mxu1 %v10093_v45  ;;  %v10104_v45 = vld [vmem:[#allocation96_spill] sm:$0xff] }
 0x7a9   :  { %2614 = vmatpush1.msra.mxu1 %v10094_v41  ;;  %v10105_v41 = vld [vmem:[#allocation97_spill] sm:$0xff] }
 0x7aa   :  { %2615 = vmatprep.subr.mxu1 %v10095_v28  ;;  %v10106_v28 = vld [vmem:[#allocation63_spill] sm:$0xff] }
 0x7ab   :  { %2616 = vmatpush1.msra.mxu1 %v10096_v1  ;;  %v10107_v1 = vld [vmem:[#allocation98_spill] sm:$0xff] }
 0x7ac   :  { %2617 = vmatprep.subr.mxu1 %v10097_v52  ;;  %v10108_v52 = vld [vmem:[#allocation99_spill] sm:$0xff] }
 0x7ad   :  { %2618 = vmatpush1.msra.mxu1 %v10098_v34  ;;  %v10109_v34 = vld [vmem:[#allocation100_spill] sm:$0xff] }
 0x7ae   :  { %2619 = vmatprep.subr.mxu1 %v10099_v58  ;;  %v10110_v58 = vld [vmem:[#allocation101_spill] sm:$0xff] }
 0x7af   :  { %2620 = vmatpush1.msra.mxu1 %v10100_v40  ;;  %v10111_v40 = vld [vmem:[#allocation102_spill] sm:$0xff] }
 0x7b0   :  { %2621 = vmatprep.subr.mxu1 %v10101_v51  ;;  %v10112_v51 = vld [vmem:[#allocation103_spill] sm:$0xff] }
 0x7b1   :  { %2622 = vmatpush1.msra.mxu1 %v10102_v60  ;;  %v10113_v60 = vld [vmem:[#allocation104_spill] sm:$0xff] }
 0x7b2   :  { %2623 = vmatprep.subr.mxu1 %v10103_v47  ;;  %v10114_v47 = vld [vmem:[#allocation105_spill] sm:$0xff] }
 0x7b3   :  { %2624 = vmatpush1.msra.mxu1 %v10104_v45  ;;  %v10115_v45 = vld [vmem:[#allocation106_spill] sm:$0xff] }
 0x7b4   :  { %2625 = vmatprep.subr.mxu1 %v10105_v41  ;;  %v10116_v41 = vld [vmem:[#allocation107_spill] sm:$0xff] }
 0x7b5   :  { %2626 = vmatpush1.msra.mxu1 %v10106_v28  ;;  %v10117_v28 = vld [vmem:[#allocation108_spill] sm:$0xff] }
 0x7b6   :  { %2627 = vmatprep.subr.mxu1 %v10107_v1  ;;  %v10118_v1 = vld [vmem:[#allocation109_spill] sm:$0xff] }
 0x7b7   :  { %2628 = vmatpush1.msra.mxu1 %v10108_v52  ;;  %v10119_v52 = vld [vmem:[#allocation110_spill] sm:$0xff] }
 0x7b8   :  { %2629 = vmatprep.subr.mxu1 %v10109_v34  ;;  %v10120_v34 = vld [vmem:[#allocation111_spill] sm:$0xff] }
 0x7b9   :  { %2630 = vmatpush1.msra.mxu1 %v10110_v58  ;;  %v10121_v58 = vld [vmem:[#allocation112_spill] sm:$0xff] }
 0x7ba   :  { %2631 = vmatprep.subr.mxu1 %v10111_v40  ;;  %v10122_v40 = vld [vmem:[#allocation113_spill] sm:$0xff] }
 0x7bb   :  { %2632 = vmatpush1.msra.mxu1 %v10112_v51  ;;  %v10123_v51 = vld [vmem:[#allocation114_spill] sm:$0xff] }
 0x7bc   :  { %2633 = vmatprep.subr.mxu1 %v10113_v60  ;;  %v10124_v60 = vld [vmem:[#allocation115_spill] sm:$0xff] }
 0x7bd   :  { %2634 = vmatpush1.msra.mxu1 %v10114_v47  ;;  %v10125_v47 = vld [vmem:[#allocation116_spill] sm:$0xff] }
 0x7be   :  { %2635 = vmatprep.subr.mxu1 %v10115_v45  ;;  %v10126_v45 = vld [vmem:[#allocation117_spill] sm:$0xff] }
 0x7bf   :  { %2636 = vmatpush1.msra.mxu1 %v10116_v41  ;;  %v10127_v41 = vld [vmem:[#allocation118_spill] sm:$0xff] }
 0x7c0   :  { %2637 = vmatprep.subr.mxu1 %v10117_v28  ;;  %v10128_v28 = vld [vmem:[#allocation119_spill] sm:$0xff] }
 0x7c1   :  { %2638 = vmatpush1.msra.mxu1 %v10118_v1  ;;  %v10129_v1 = vld [vmem:[#allocation120_spill] sm:$0xff] }
 0x7c2   :  { %2639 = vmatprep.subr.mxu1 %v10119_v52  ;;  %v10130_v52 = vld [vmem:[#allocation121_spill] sm:$0xff] }
 0x7c3   :  { %2640 = vmatpush2.msra.mxu1 %v10120_v34  ;;  %v10131_v34 = vld [vmem:[#allocation122_spill] sm:$0xff] }
 0x7c4   :  { %2641 = vmatprep.subr.mxu1 %v10121_v58  ;;  %v10132_v58 = vld [vmem:[#allocation123_spill] sm:$0xff] }
 0x7c5   :  { %2642 = vmatpush2.msra.mxu1 %v10122_v40  ;;  %v10133_v40 = vld [vmem:[#allocation124_spill] sm:$0xff] }
 0x7c6   :  { %2643 = vmatprep.subr.mxu1 %v10123_v51  ;;  %v10134_v51 = vld [vmem:[#allocation125_spill] sm:$0xff] }
 0x7c7   :  { %2644 = vmatpush2.msra.mxu1 %v10124_v60  ;;  %v10135_v60 = vld [vmem:[#allocation126_spill] sm:$0xff] }
 0x7c8   :  { %2645 = vmatprep.subr.mxu1 %v10125_v47  ;;  %v10136_v47 = vld [vmem:[#allocation127_spill] sm:$0xff] }
 0x7c9   :  { %2646 = vmatpush2.msra.mxu1 %v10126_v45  ;;  %v10137_v45 = vld [vmem:[#allocation128_spill] sm:$0xff] }
 0x7ca   :  { %2647 = vmatprep.subr.mxu1 %v10127_v41  ;;  %v10138_v41 = vld [vmem:[#allocation129_spill] sm:$0xff] }
 0x7cb   :  { %2648 = vmatpush2.msra.mxu1 %v10128_v28  ;;  %v10139_v28 = vld [vmem:[#allocation130_spill] sm:$0xff] }
 0x7cc   :  { %2649 = vmatprep.subr.mxu1 %v10129_v1  ;;  %v10140_v1 = vld [vmem:[#allocation131_spill] sm:$0xff] }
 0x7cd   :  { %2650 = vmatpush2.msra.mxu1 %v10130_v52  ;;  %v10141_v52 = vld [vmem:[#allocation132_spill] sm:$0xff] }
 0x7ce   :  { %2651 = vmatprep.subr.mxu1 %v10131_v34  ;;  %v10142_v34 = vld [vmem:[#allocation133_spill] sm:$0xff] }
 0x7cf   :  { %2652 = vmatpush2.msra.mxu1 %v10132_v58  ;;  %v10143_v58 = vld [vmem:[#allocation134_spill] sm:$0xff] }
 0x7d0   :  { %2653 = vmatprep.subr.mxu1 %v10133_v40  ;;  %v10144_v40 = vld [vmem:[#allocation135_spill] sm:$0xff] }
 0x7d1   :  { %2654 = vmatpush2.msra.mxu1 %v10134_v51  ;;  %v10145_v51 = vld [vmem:[#allocation136_spill] sm:$0xff] }
 0x7d2   :  { %2655 = vmatprep.subr.mxu1 %v10135_v60  ;;  %v10146_v60 = vld [vmem:[#allocation137_spill] sm:$0xff] }
 0x7d3   :  { %2656 = vmatpush2.msra.mxu1 %v10136_v47  ;;  %v10147_v47 = vld [vmem:[#allocation138_spill] sm:$0xff] }
 0x7d4   :  { %2657 = vmatprep.subr.mxu1 %v10137_v45  ;;  %v10148_v45 = vld [vmem:[#allocation139_spill] sm:$0xff] }
 0x7d5   :  { %2658 = vmatpush2.msra.mxu1 %v10138_v41  ;;  %v10149_v41 = vld [vmem:[#allocation140_spill] sm:$0xff] }
 0x7d6   :  { %2659 = vmatprep.subr.mxu1 %v10139_v28  ;;  %v10150_v28 = vld [vmem:[#allocation141_spill] sm:$0xff] }
 0x7d7   :  { %2660 = vmatpush2.msra.mxu1 %v10140_v1 }
 0x7d8   :  { %2661 = vmatprep.subr.mxu1 %v10141_v52  ;;  %v10151_v52 = vld [vmem:[#allocation5_spill] sm:$0xff] }
 0x7d9   :  { %2662 = vmatpush2.msra.mxu1 %v10142_v34 }
 0x7da   :  { %2663 = vmatprep.subr.mxu1 %v10143_v58  ;;  %v10152_v58 = vld [vmem:[#allocation6_spill] sm:$0xff] }
 0x7db   :  { %2664 = vmatpush2.msra.mxu1 %v10144_v40 }
 0x7dc   :  { %2665 = vmatprep.subr.mxu1 %v10145_v51 }
 0x7dd   :  { %2666 = vmatpush2.msra.mxu1 %v10146_v60 }
 0x7de   :  { %2667 = vmatprep.subr.mxu1 %v10147_v47 }
 0x7df   :  { %2668 = vmatpush2.msra.mxu1 %v10148_v45  ;;  %v10153_v45 = vld [vmem:[#allocation18_spill] sm:$0xff] }
 0x7e0   :  { %2669 = vmatprep.subr.mxu1 %v10149_v41  ;;  %v288_v41 = vadd.f32 %v10153_v45, %v5022_v12 }
 0x7e1   :  { %2670 = vmatpush2.msra.mxu1 %v10150_v28 }
 0x822   :  { %v2339_v1 = vpop.f32.mrf.mxu1  ;;  %v2410_v21 = vpop.f32.mrf.mxu0 }
 0x823   :  { %v2492_v2 = vadd.f32 %v2339_v1, %v10151_v52  ;;  %v10155_v1 = vld [vmem:[#allocation36_spill] sm:$0xff] }
 0x824   :  { %v2341_v31 = vpop.f32.mrf.mxu1  ;;  %v2412_v47 = vpop.f32.mrf.mxu0  ;;  %v316_v52 = vadd.f32 %v10155_v1, %v5045_v17 }
 0x825   :  { %v2855_v34 = vmul.f32 -1.442695, %v2492_v2  ;;  %v2499_v40 = vadd.f32 %v2341_v31, %v10152_v58  ;;  %v2514_v62 = vadd.f32 %v2412_v47, %v288_v41  ;;  %v8277_v2 = vld [vmem:[%s8387_s5] ss:$0 sm:$0xff] }
 0x826   :  { %10154 = vst [vmem:[#allocation180_spill] sm:$0xff] %v8277_v2  ;;  %v2506_v31 = vadd.f32 %v8277_v2, %v2410_v21 }
 0x827   :  { %2988 = vpow2.f32 %v2855_v34  ;;  %v2856_v37 = vmul.f32 -1.442695, %v2499_v40  ;;  %v2857_v46 = vmul.f32 -1.442695, %v2514_v62 }
 0x829   :  { %2990 = vpow2.f32 %v2856_v37 }
 0x834   :  { %v2989_v51 = vpop.eup %2988 }
 0x835   :  { %v2496_v60 = vadd.f32 1.0, %v2989_v51 }
 0x836   :  { %v2991_v28 = vpop.eup %2990 }
 0x837   :  { %2992 = vrcp.f32 %v2496_v60  ;;  %v2503_v42 = vadd.f32 1.0, %v2991_v28 }
 0x838   :  { %2994 = vpow2.f32 %v2857_v46  ;;  %v10156_v46 = vld [vmem:[#allocation17_spill] sm:$0xff] }
 0x839   :  { %2996 = vrcp.f32 %v2503_v42  ;;  %v399_v21 = vadd.f32 %v10156_v46, %v9421_v30 }
 0x844   :  { %v2993_v37 = vpop.eup %2992 }
 0x845   :  { %v2507_v34 = vmul.f32 %v2993_v37, %v2506_v31  ;;  %v2995_v40 = vpop.eup %2994 }
 0x846   :  { %v2997_v51 = vpop.eup %2996  ;;  %v2518_v62 = vadd.f32 1.0, %v2995_v40 }
 0x847   :  { %v2508_v58 = vadd.f32 %v2507_v34, %v316_v52  ;;  %v2510_v60 = vsub.f32 1.0, %v2997_v51  ;;  %v2512_v41 = vmul.f32 %v2997_v51, %v8058_v27  ;;  %v10157_v34 = vld [vmem:[#allocation19_spill] sm:$0xff] }
 0x849   :  { %2998 = vtanh.f32 %v2508_v58  ;;  %v401_v58 = vadd.f32 %v10157_v34, %v5052_v14 }
 0x84a   :  { %3000 = vrcp.f32 %v2518_v62 }
 0x856   :  { %v2999_v47 = vpop.eup %2998 }
 0x857   :  { %v2511_v45 = vmul.f32 %v2999_v47, %v2510_v60  ;;  %v3001_v52 = vpop.eup %3000 }
 0x859   :  { %v8283_v28 = vadd.f32 %v2512_v41, %v2511_v45 }
 0x862   :  { %v2481_v2 = vpop.f32.mrf.mxu1 }
 0x863   :  { %v2521_v1 = vadd.f32 %v2481_v2, %v399_v21 }
 0x864   :  { %v2483_v31 = vpop.f32.mrf.mxu1 }
 0x865   :  { %v2858_v42 = vmul.f32 -1.442695, %v2521_v1  ;;  %v2528_v37 = vadd.f32 %v8065_v7, %v2483_v31  ;;  %v10185_v31 = vld [vmem:[#allocation180_spill] sm:$0xff] }
 0x867   :  { %3002 = vpow2.f32 %v2858_v42  ;;  %v2529_v40 = vmul.f32 %v3001_v52, %v2528_v37  ;;  %v10186_v52 = vld [vmem:[#allocation40_spill] sm:$0xff] }
 0x868   :  { %v322_v34 = vadd.f32 %v10186_v52, %v5045_v17  ;;  %v10187_v17 = vld [vmem:[#allocation13_spill] sm:$0xff] }
 0x869   :  { %v2530_v60 = vadd.f32 %v2529_v40, %v401_v58 }
 0x874   :  { %v3003_v27 = vpop.eup %3002 }
 0x875   :  { %v2525_v51 = vadd.f32 1.0, %v3003_v27 }
 0x877   :  { %3004 = vrcp.f32 %v2525_v51 }
 0x878   :  { %3006 = vtanh.f32 %v2530_v60 }
 0x884   :  { %v3005_v62 = vpop.eup %3004 }
 0x885   :  { %v2532_v47 = vsub.f32 1.0, %v3005_v62  ;;  %v3007_v45 = vpop.eup %3006  ;;  %v2534_v2 = vmul.f32 %v3005_v62, %v8071_v55 }
 0x887   :  { %v2533_v41 = vmul.f32 %v3007_v45, %v2532_v47 }
 0x889   :  { %v8291_v46 = vadd.f32 %v2534_v2, %v2533_v41  ;;  %v393_v2 = vadd.f32 %v10187_v17, %v9421_v30 }
 0x88b   :  { %2600 = vmatprep.mubr.f32.mxu0 %v8291_v46  ;;  %2671 = vmatprep.mubr.f32.mxu1 %v8291_v46 }
 0x88c   :  { %2601 = vmatmul.mubr.f32.vlgmr.msra.gmra.mxu0 %v8283_v28  ;;  %2672 = vmatmul.mubr.f32.vlgmr.msra.gmra.mxu1 %v8283_v28 }
 0x88d   :  { %2679 = vmatpush1.msra.mxu0 %v7542_v32  ;;  %2742 = vmatprep.mubr.f32.mxu0 %v8291_v46  ;;  %v10163_v32 = vld [vmem:[#allocation162_spill] sm:$0xff] }
 0x88e   :  { %2680 = vmatprep.subr.mxu0 %v7549_v23  ;;  %v10164_v23 = vld [vmem:[#allocation9_spill] sm:$0xff] }
 0x88f   :  { %2681 = vmatpush1.msra.mxu0 %v7556_v4  ;;  %v10165_v4 = vld [vmem:[#allocation11_spill] sm:$0xff] }
 0x890   :  { %2682 = vmatprep.subr.mxu0 %v7563_v15  ;;  %v10166_v15 = vld [vmem:[#allocation30_spill] sm:$0xff] }
 0x891   :  { %2683 = vmatpush1.msra.mxu0 %v7570_v61  ;;  %v10167_v61 = vld [vmem:[#allocation24_spill] sm:$0xff] }
 0x892   :  { %2684 = vmatprep.subr.mxu0 %v7577_v8  ;;  %v10168_v8 = vld [vmem:[#allocation29_spill] sm:$0xff] }
 0x893   :  { %2685 = vmatpush1.msra.mxu0 %v7584_v9  ;;  %v10169_v9 = vld [vmem:[#allocation31_spill] sm:$0xff] }
 0x894   :  { %2686 = vmatprep.subr.mxu0 %v7591_v22  ;;  %v10170_v22 = vld [vmem:[#allocation168_spill] sm:$0xff] }
 0x895   :  { %2687 = vmatpush1.msra.mxu0 %v7598_v53  ;;  %v10171_v53 = vld [vmem:[#allocation169_spill] sm:$0xff] }
 0x896   :  { %2688 = vmatprep.subr.mxu0 %v7605_v25  ;;  %v10172_v25 = vld [vmem:[#allocation170_spill] sm:$0xff] }
 0x897   :  { %2689 = vmatpush1.msra.mxu0 %v7612_v24  ;;  %v10173_v24 = vld [vmem:[#allocation171_spill] sm:$0xff] }
 0x898   :  { %2690 = vmatprep.subr.mxu0 %v7619_v63  ;;  %v10174_v63 = vld [vmem:[#allocation172_spill] sm:$0xff] }
 0x899   :  { %2691 = vmatpush1.msra.mxu0 %v7626_v20  ;;  %v10175_v20 = vld [vmem:[#allocation173_spill] sm:$0xff] }
 0x89a   :  { %2692 = vmatprep.subr.mxu0 %v7633_v0  ;;  %v10176_v0 = vld [vmem:[#allocation174_spill] sm:$0xff] }
 0x89b   :  { %2693 = vmatpush1.msra.mxu0 %v7640_v29  ;;  %v10177_v29 = vld [vmem:[#allocation175_spill] sm:$0xff] }
 0x89c   :  { %2694 = vmatprep.subr.mxu0 %v7647_v33  ;;  %v10178_v33 = vld [vmem:[#allocation176_spill] sm:$0xff] }
 0x89d   :  { %2695 = vmatpush1.msra.mxu0 %v7654_v36  ;;  %v10179_v36 = vld [vmem:[#allocation177_spill] sm:$0xff] }
 0x89e   :  { %2696 = vmatprep.subr.mxu0 %v7661_v16  ;;  %v10180_v16 = vld [vmem:[#allocation178_spill] sm:$0xff] }
 0x89f   :  { %2697 = vmatpush1.msra.mxu0 %v7668_v18  ;;  %v10181_v18 = vld [vmem:[#allocation179_spill] sm:$0xff] }
 0x8a0   :  { %2698 = vmatprep.subr.mxu0 %v7675_v44  ;;  %v10158_v44 = vld [vmem:[#allocation157_spill] sm:$0xff] }
 0x8a1   :  { %2699 = vmatpush1.msra.mxu0 %v7682_v11  ;;  %v10159_v11 = vld [vmem:[#allocation158_spill] sm:$0xff] }
 0x8a2   :  { %2700 = vmatprep.subr.mxu0 %v7689_v38  ;;  %v10160_v38 = vld [vmem:[#allocation159_spill] sm:$0xff] }
 0x8a3   :  { %2701 = vmatpush1.msra.mxu0 %v7696_v50  ;;  %v10161_v50 = vld [vmem:[#allocation160_spill] sm:$0xff] }
 0x8a4   :  { %2702 = vmatprep.subr.mxu0 %v7703_v35  ;;  %v10162_v35 = vld [vmem:[#allocation161_spill] sm:$0xff] }
 0x8a5   :  { %2703 = vmatpush1.msra.mxu0 %v10007_v19  ;;  %v10182_v19 = vld [vmem:[#allocation8_spill] sm:$0xff] }
 0x8a6   :  { %2704 = vmatprep.subr.mxu0 %v10009_v6 }
 0x8a7   :  { %2705 = vmatpush1.msra.mxu0 %v10011_v48 }
 0x8a8   :  { %2706 = vmatprep.subr.mxu0 %v10013_v10 }
 0x8a9   :  { %2707 = vmatpush1.msra.mxu0 %v10015_v54  ;;  %v10183_v54 = vld [vmem:[#allocation10_spill] sm:$0xff] }
 0x8aa   :  { %2708 = vmatprep.subr.mxu0 %v10017_v49 }
 0x8ab   :  { %2709 = vmatpush1.msra.mxu0 %v10019_v26 }
 0x8ac   :  { %2710 = vmatprep.subr.mxu0 %v10021_v57 }
 0x8ad   :  { %2711 = vmatpush2.msra.mxu0 %v10023_v5 }
 0x8ae   :  { %2712 = vmatprep.subr.mxu0 %v10025_v3 }
 0x8af   :  { %2713 = vmatpush2.msra.mxu0 %v10027_v59 }
 0x8b0   :  { %2714 = vmatprep.subr.mxu0 %v10029_v43  ;;  %v10184_v43 = vld [vmem:[#allocation15_spill] sm:$0xff] }
 0x8b1   :  { %2715 = vmatpush2.msra.mxu0 %v10031_v39  ;;  %v282_v39 = vadd.f32 %v10184_v43, %v5022_v12 }
 0x8b2   :  { %2716 = vmatprep.subr.mxu0 %v10033_v13 }
 0x8b3   :  { %2717 = vmatpush2.msra.mxu0 %v10035_v56 }
 0x8b4   :  { %2718 = vmatprep.subr.mxu0 %v10158_v44 }
 0x8b5   :  { %2719 = vmatpush2.msra.mxu0 %v10159_v11 }
 0x8b6   :  { %2720 = vmatprep.subr.mxu0 %v10160_v38 }
 0x8b7   :  { %2721 = vmatpush2.msra.mxu0 %v10161_v50 }
 0x8b8   :  { %2722 = vmatprep.subr.mxu0 %v10162_v35 }
 0x8b9   :  { %2723 = vmatpush2.msra.mxu0 %v10163_v32 }
 0x8ba   :  { %2724 = vmatprep.subr.mxu0 %v10164_v23  ;;  %v10188_v23 = vld [vmem:[#allocation14_spill] sm:$0xff] }
 0x8bb   :  { %2725 = vmatpush2.msra.mxu0 %v10165_v4  ;;  %v395_v4 = vadd.f32 %v10188_v23, %v5052_v14 }
 0x8bc   :  { %2726 = vmatprep.subr.mxu0 %v10166_v15 }
 0x8bd   :  { %2727 = vmatpush2.msra.mxu0 %v10167_v61 }
 0x8be   :  { %2728 = vmatprep.subr.mxu0 %v10168_v8 }
 0x8bf   :  { %2729 = vmatpush2.msra.mxu0 %v10169_v9 }
 0x8c0   :  { %2730 = vmatprep.subr.mxu0 %v10170_v22 }
 0x8c1   :  { %2731 = vmatpush2.msra.mxu0 %v10171_v53 }
 0x8c2   :  { %2732 = vmatprep.subr.mxu0 %v10172_v25 }
 0x8c3   :  { %2733 = vmatpush2.msra.mxu0 %v10173_v24 }
 0x8c4   :  { %2734 = vmatprep.subr.mxu0 %v10174_v63 }
 0x8c5   :  { %2735 = vmatpush2.msra.mxu0 %v10175_v20 }
 0x8c6   :  { %2736 = vmatprep.subr.mxu0 %v10176_v0 }
 0x8c7   :  { %2737 = vmatpush2.msra.mxu0 %v10177_v29 }
 0x8c8   :  { %2738 = vmatprep.subr.mxu0 %v10178_v33 }
 0x8c9   :  { %2739 = vmatpush2.msra.mxu0 %v10179_v36 }
 0x8ca   :  { %2740 = vmatprep.subr.mxu0 %v10180_v16 }
 0x8cb   :  { %2741 = vmatpush2.msra.mxu0 %v10181_v18 }
 0x8cc   :  { %2743 = vmatmul.mubr.f32.vlgmr.msra.gmra.mxu0 %v8283_v28 }
 0x94c   :  { %v2602_v55 = vpop.f32.mrf.mxu0  ;;  %v2673_v3 = vpop.f32.mrf.mxu1 }
 0x94d   :  { %v2755_v6 = vadd.f32 %v2602_v55, %v10182_v19  ;;  %v2769_v42 = vadd.f32 %v10185_v31, %v2673_v3 }
 0x94e   :  { %v2604_v10 = vpop.f32.mrf.mxu0  ;;  %v2675_v59 = vpop.f32.mrf.mxu1 }
 0x94f   :  { %v2859_v48 = vmul.f32 -1.442695, %v2755_v6  ;;  %v2762_v49 = vadd.f32 %v2604_v10, %v10183_v54  ;;  %v2777_v13 = vadd.f32 %v2675_v59, %v282_v39 }
 0x951   :  { %3008 = vpow2.f32 %v2859_v48  ;;  %v2860_v26 = vmul.f32 -1.442695, %v2762_v49  ;;  %v2861_v21 = vmul.f32 -1.442695, %v2777_v13 }
 0x953   :  { %3010 = vpow2.f32 %v2860_v26 }
 0x95e   :  { %v3009_v57 = vpop.eup %3008 }
 0x95f   :  { %v2759_v5 = vadd.f32 1.0, %v3009_v57 }
 0x960   :  { %v3011_v56 = vpop.eup %3010 }
 0x961   :  { %3012 = vrcp.f32 %v2759_v5  ;;  %v2766_v1 = vadd.f32 1.0, %v3011_v56 }
 0x962   :  { %3014 = vpow2.f32 %v2861_v21 }
 0x963   :  { %3016 = vrcp.f32 %v2766_v1 }
 0x96e   :  { %v3013_v37 = vpop.eup %3012 }
 0x96f   :  { %v2770_v58 = vmul.f32 %v3013_v37, %v2769_v42  ;;  %v3015_v60 = vpop.eup %3014 }
 0x970   :  { %v3017_v27 = vpop.eup %3016  ;;  %v2781_v62 = vadd.f32 1.0, %v3015_v60 }
 0x971   :  { %v2771_v40 = vadd.f32 %v2770_v58, %v322_v34  ;;  %v2773_v51 = vsub.f32 1.0, %v3017_v27  ;;  %v2775_v45 = vmul.f32 %v3017_v27, %v8283_v28 }
 0x973   :  { %3018 = vtanh.f32 %v2771_v40 }
 0x974   :  { %3020 = vrcp.f32 %v2781_v62 }
 0x980   :  { %v3019_v12 = vpop.eup %3018 }
 0x981   :  { %v2774_v47 = vmul.f32 %v3019_v12, %v2773_v51  ;;  %v3021_v32 = vpop.eup %3020 }
 0x983   :  { %v2776_v41 = vadd.f32 %v2775_v45, %v2774_v47 }
 0x985   :  { %2799 = vst [vmem:[%s8388_s6] sm:$0xff] %v2776_v41 }
 0x98c   :  { %v2744_v44 = vpop.f32.mrf.mxu0 }
 0x98d   :  { %v2784_v11 = vadd.f32 %v2744_v44, %v393_v2 }
 0x98e   :  { %v2746_v38 = vpop.f32.mrf.mxu0 }
 0x98f   :  { %v2862_v50 = vmul.f32 -1.442695, %v2784_v11  ;;  %v2791_v35 = vadd.f32 %v8065_v7, %v2746_v38 }
 0x991   :  { %3022 = vpow2.f32 %v2862_v50  ;;  %v2792_v28 = vmul.f32 %v3021_v32, %v2791_v35 }
 0x993   :  { %v2793_v15 = vadd.f32 %v2792_v28, %v395_v4 }
 0x99e   :  { %v3023_v61 = vpop.eup %3022 }
 0x99f   :  { %v2788_v8 = vadd.f32 1.0, %v3023_v61 }
 0x9a1   :  { %3024 = vrcp.f32 %v2788_v8 }
 0x9a2   :  { %3026 = vtanh.f32 %v2793_v15 }
 0x9ae   :  { %v3025_v9 = vpop.eup %3024 }
 0x9af   :  { %v2795_v22 = vsub.f32 1.0, %v3025_v9  ;;  %v3027_v30 = vpop.eup %3026  ;;  %v2797_v53 = vmul.f32 %v3025_v9, %v8291_v46 }
 0x9b1   :  { %v2796_v25 = vmul.f32 %v3027_v30, %v2795_v22 }
 0x9b3   :  { %v2798_v24 = vadd.f32 %v2797_v53, %v2796_v25 }
 0x9b5   :  { %2800 = vst [vmem:[%s8388_s6 + $0x8] sm:$0xff] %v2798_v24 }

</bundles_post_ra>
